<compile_context>
chip_gen: v7x
topology: tpu7x:2x2x1
jax: 0.10.0
libtpu: 0.0.40
codegen_flags: <defaults>
</compile_context>

<pallas_src>
import functools
import math

import jax
import jax.numpy as jnp
from jax.experimental import pallas as pl
from jax.experimental.pallas import tpu as pltpu

BN_EPS = 1e-5
# (kernel_size, maxpool3) per conv block — fixed by the module definition.
CONV_LAYOUT = ((7, True), (7, True), (3, False), (3, False), (3, False), (3, True))

ARG_ORDER = tuple(
    [f"conv{i}_{s}" for i in range(1, 7) for s in ("w", "b")]
    + [f"fc{i}_{s}" for i in range(1, 4) for s in ("w", "b")]
)

# Scoped-VMEM budget.  The small test config (TB=16) needs only a few MB.
# Per-generation batch-tile guidance (perf review): v7x (64 MiB physical):
# TB ~ 32-64 and keep this limit <= ~48 MiB; v6e/v5e (128 MiB physical):
# TB ~ 128-256 (bf16 operands) and raise this toward 96-128 MiB.
VMEM_LIMIT_BYTES = 48 * 1024 * 1024


# ------------------------------ fused kernel ------------------------------- #

def _fused_forward_kernel(x_ref, *refs):
    """TB examples per grid step; all 9 layers fused, data stays in VMEM."""
    o_ref = refs[-1]
    conv_refs = refs[0:12]    # w1,b1,...,w6,b6   w:(K, C_in, C_out) bf16, b:(1, C_out) f32
    fc_refs = refs[12:18]     # fw1,fb1,fw2,fb2,fw3,fb3

    L, TB, C_in = x_ref.shape
    # Position-major rows: row p*TB + t = (example t, position p); lanes = channels.
    x = x_ref[...].reshape(L * TB, C_in)          # bf16, layout-preserving merge

    for i, (K, pool) in enumerate(CONV_LAYOUT):
        w_ref = conv_refs[2 * i]                  # (K, C_in_i, C_out) bf16
        b = conv_refs[2 * i + 1][...]             # (1, C_out) f32
        C_out = w_ref.shape[2]
        L_out = L - K + 1
        # K-tap accumulation: each tap is an aligned unit-stride sublane slice
        # feeding a 2-D MXU matmul with M = TB*L_out (no im2col lane concat).
        acc = jnp.dot(x[0:L_out * TB, :], w_ref[0],
                      preferred_element_type=jnp.float32)
        for k in range(1, K):
            acc = acc + jnp.dot(x[k * TB:(k + L_out) * TB, :], w_ref[k],
                                preferred_element_type=jnp.float32)
        y = jnp.maximum(acc + b, 0.0)             # bias + ReLU in f32
        L = L_out
        if pool:                                  # MaxPool1d(3), floor semantics
            lp = L // 3
            # Leading-dim reshape keeps the (sublane, lane) tiling intact;
            # the three window taps are TB-aligned slices -> pure VPU maxes.
            z = y[: 3 * lp * TB, :].reshape(lp, 3 * TB, C_out)
            y = jnp.maximum(jnp.maximum(z[:, 0:TB, :], z[:, TB:2 * TB, :]),
                            z[:, 2 * TB:3 * TB, :]).reshape(lp * TB, C_out)
            L = lp
        x = y.astype(jnp.bfloat16)                # one cast per layer for the MXU

    # --- classifier head: M = TB matmuls -------------------------------------
    fw1 = fc_refs[0]                              # (l6, C, n_fc) bf16, pre-permuted
    l6 = fw1.shape[0]
    assert l6 == L, (l6, L)                       # trace-time sanity check
    h = jnp.dot(x[0:TB, :], fw1[0], preferred_element_type=jnp.float32)
    for p in range(1, l6):
        h = h + jnp.dot(x[p * TB:(p + 1) * TB, :], fw1[p],
                        preferred_element_type=jnp.float32)
    h = jnp.maximum(h + fc_refs[1][...], 0.0)     # (TB, n_fc) f32
    # TODO(synk): nn.Dropout(0.5) is train-time randomness; identity at inference.
    h = jnp.maximum(
        jnp.dot(h.astype(jnp.bfloat16), fc_refs[2][...],
                preferred_element_type=jnp.float32) + fc_refs[3][...], 0.0)
    out = jnp.dot(h.astype(jnp.bfloat16), fc_refs[4][...],
                  preferred_element_type=jnp.float32) + fc_refs[5][...]
    o_ref[...] = out                              # lane-dense (TB, 128) store


# ------------------------- parameters & preparation ------------------------ #

def _uniform(key, shape, bound):
    return jax.random.uniform(key, shape, jnp.float32, -bound, bound)


def init_params(key, input_dim, n_filters, n_fc, n_classes, flat_dim):
    """Deterministic PyTorch-style (uniform fan-in) init, PyTorch weight layouts."""
    keys = jax.random.split(key, 18)
    p = {}
    conv_defs = [
        ("conv1", input_dim, n_filters, 7),
        ("conv2", n_filters, n_filters, 7),
        ("conv3", n_filters, n_filters, 3),
        ("conv4", n_filters, n_filters, 3),
        ("conv5", n_filters, n_filters, 3),
        ("conv6", n_filters, n_filters, 3),
    ]
    i = 0
    for name, c_in, c_out, k in conv_defs:
        bound = 1.0 / math.sqrt(c_in * k)
        p[name + "_w"] = _uniform(keys[i], (c_out, c_in, k), bound); i += 1
        p[name + "_b"] = _uniform(keys[i], (c_out,), bound); i += 1
    fc_defs = [("fc1", flat_dim, n_fc), ("fc2", n_fc, n_fc), ("fc3", n_fc, n_classes)]
    for name, f_in, f_out in fc_defs:
        bound = 1.0 / math.sqrt(f_in)
        p[name + "_w"] = _uniform(keys[i], (f_out, f_in), bound); i += 1
        p[name + "_b"] = _uniform(keys[i], (f_out,), bound); i += 1
    # BatchNorm1d(n_filters): fresh-module params / running stats (eval mode).
    p["bn_gamma"] = jnp.ones((n_filters,), jnp.float32)
    p["bn_beta"] = jnp.zeros((n_filters,), jnp.float32)
    p["bn_mean"] = jnp.zeros((n_filters,), jnp.float32)
    p["bn_var"] = jnp.ones((n_filters,), jnp.float32)
    return p


def prepare_params(p):
    """One-time layout / dtype prep (NOT in the per-call forward path)."""
    # Fold eval-mode BatchNorm1d into conv6 (per-out-channel affine).
    scale = p["bn_gamma"] / jnp.sqrt(p["bn_var"] + BN_EPS)
    conv_w = [p["conv1_w"], p["conv2_w"], p["conv3_w"], p["conv4_w"], p["conv5_w"],
              p["conv6_w"] * scale[:, None, None]]
    conv_b = [p["conv1_b"], p["conv2_b"], p["conv3_b"], p["conv4_b"], p["conv5_b"],
              (p["conv6_b"] - p["bn_mean"]) * scale + p["bn_beta"]]
    prep = {}
    for i, (w, b) in enumerate(zip(conv_w, conv_b), start=1):
        # (C_out, C_in, K) -> (K, C_in, C_out): tap-k weight = prep[k]  (bf16 MXU operand)
        prep[f"conv{i}_w"] = jnp.transpose(w, (2, 1, 0)).astype(jnp.bfloat16)
        prep[f"conv{i}_b"] = b.reshape(1, -1).astype(jnp.float32)

    # fc1: PyTorch flattens (B, C, L6) channel-major (flat idx = c*L6 + p); the
    # kernel sums per-position matmuls, so split/permute the weight once:
    # (n_fc, C*L6) -> (L6, C, n_fc) with fw1[p, c, j] = W[j, c*L6 + p].
    n_fc, flat_dim = p["fc1_w"].shape
    n_filters = p["conv6_w"].shape[0]
    l6 = flat_dim // n_filters
    fw1 = p["fc1_w"].reshape(n_fc, n_filters, l6)
    prep["fc1_w"] = jnp.transpose(fw1, (2, 1, 0)).astype(jnp.bfloat16)
    prep["fc1_b"] = p["fc1_b"].reshape(1, -1).astype(jnp.float32)
    prep["fc2_w"] = p["fc2_w"].T.astype(jnp.bfloat16)
    prep["fc2_b"] = p["fc2_b"].reshape(1, -1).astype(jnp.float32)
    # fc3: zero-pad the output columns to a multiple of 128 lanes so the kernel's
    # output store is lane-dense; the wrapper slices back to n_classes.
    n_classes = p["fc3_w"].shape[0]
    npad = ((n_classes + 127) // 128) * 128
    w3 = jnp.pad(p["fc3_w"].T, ((0, 0), (0, npad - n_classes)))
    prep["fc3_w"] = w3.astype(jnp.bfloat16)
    prep["fc3_b"] = jnp.pad(p["fc3_b"], (0, npad - n_classes)).reshape(1, -1).astype(jnp.float32)
    return prep


# --------------------------------- forward --------------------------------- #

@functools.partial(jax.jit, static_argnames=("n_classes", "tb"))
def char_cnn_forward(prep, x_ncw, *, n_classes, tb=16):
    """x_ncw: (B, input_dim, input_length) — NCW layout like PyTorch."""
    assert tb % 16 == 0, "batch tile must be a multiple of 16 (bf16 sublane packing)"
    B, C_in, L0 = x_ncw.shape
    # One fused XLA transpose+cast: NCW -> position-major (L0, B, C_in), bf16.
    x = jnp.transpose(x_ncw, (2, 0, 1)).astype(jnp.bfloat16)
    Bp = ((B + tb - 1) // tb) * tb
    if Bp != B:                                   # pad batch to a tile multiple
        x = jnp.pad(x, ((0, 0), (0, Bp - B), (0, 0)))

    weights = [prep[k] for k in ARG_ORDER]
    npad = prep["fc3_w"].shape[1]

    in_specs = [pl.BlockSpec((L0, tb, C_in), lambda b: (0, b, 0))]
    for w in weights:  # whole-array, VMEM-resident, constant block index (no re-fetch)
        in_specs.append(pl.BlockSpec(w.shape, lambda b, nd=w.ndim: (0,) * nd))

    out = pl.pallas_call(
        _fused_forward_kernel,
        grid=(Bp // tb,),
        out_shape=jax.ShapeDtypeStruct((Bp, npad), jnp.float32),
        in_specs=in_specs,
        out_specs=pl.BlockSpec((tb, npad), lambda b: (b, 0)),
        compiler_params=pltpu.CompilerParams(
            dimension_semantics=("parallel",),    # megacore sharding on v7x
            vmem_limit_bytes=VMEM_LIMIT_BYTES),
    )(x, *weights)
    return out[:B, :n_classes]


# ----------------------------- pure-JAX reference -------------------------- #

def _ref_conv1d(x, w, b):  # x: (B, C_in, L), w: (C_out, C_in, K)
    y = jax.lax.conv_general_dilated(
        x, w, (1,), "VALID", dimension_numbers=("NCH", "OIH", "NCH"))
    return y + b[None, :, None]


def _ref_maxpool3(x):
    return jax.lax.reduce_window(
        x, -jnp.inf, jax.lax.max, (1, 1, 3), (1, 1, 3), "VALID")


def ref_forward(params, x):
    y = _ref_maxpool3(jnp.maximum(_ref_conv1d(x, params["conv1_w"], params["conv1_b"]), 0.0))
    y = _ref_maxpool3(jnp.maximum(_ref_conv1d(y, params["conv2_w"], params["conv2_b"]), 0.0))
    y = jnp.maximum(_ref_conv1d(y, params["conv3_w"], params["conv3_b"]), 0.0)
    y = jnp.maximum(_ref_conv1d(y, params["conv4_w"], params["conv4_b"]), 0.0)
    y = jnp.maximum(_ref_conv1d(y, params["conv5_w"], params["conv5_b"]), 0.0)
    y = _ref_conv1d(y, params["conv6_w"], params["conv6_b"])
    y = (y - params["bn_mean"][None, :, None]) / jnp.sqrt(params["bn_var"][None, :, None] + BN_EPS)
    y = y * params["bn_gamma"][None, :, None] + params["bn_beta"][None, :, None]
    y = _ref_maxpool3(jnp.maximum(y, 0.0))
    y = y.reshape(y.shape[0], -1)
    y = jnp.maximum(y @ params["fc1_w"].T + params["fc1_b"], 0.0)
    y = jnp.maximum(y @ params["fc2_w"].T + params["fc2_b"], 0.0)
    return y @ params["fc3_w"].T + params["fc3_b"]


# ----------------------------------- main ----------------------------------- #

if __name__ == "__main__":
    # Small config consistent with the module's size arithmetic:
    # dimension = (input_length - 96) / 27 * n_conv_filters, and the conv stack's
    # final length here is 2, so the flattened dim is 2 * n_conv_filters.
    B = 32
    input_length = 150
    input_dim = 16
    n_conv_filters = 64
    n_fc_neurons = 128
    n_classes = 3
    flat_dim = int((input_length - 96) / 27 * n_conv_filters)  # 128

    key = jax.random.PRNGKey(0)
    kx, kp = jax.random.split(key)
    x = jax.random.normal(kx, (B, input_dim, input_length), jnp.float32)  # NCW like PyTorch
    params = init_params(kp, input_dim, n_conv_filters, n_fc_neurons, n_classes, flat_dim)

    prep = prepare_params(params)                 # one-time layout / bf16 prep
    out = jax.block_until_ready(char_cnn_forward(prep, x, n_classes=n_classes, tb=16))
    ref = jax.block_until_ready(ref_forward(params, x))

    assert out.shape == (B, n_classes), out.shape
    max_err = float(jnp.max(jnp.abs(out - ref)))
    # bf16 MXU operands (f32 accumulation) => relaxed tolerance vs. the f32 reference.
    if max_err > 2.5e-2:
        raise AssertionError(f"mismatch vs reference: max_abs_err={max_err}")
    print("KERNEL_OK")
</pallas_src>

<mosaic_0001>
module attributes {stable_mosaic.version = 11 : i64} {
  func.func @_fused_forward_kernel(%arg0: i32, %arg1: memref<150x16x16xbf16, #tpu.memory_space<vmem>>, %arg2: memref<7x16x64xbf16, #tpu.memory_space<vmem>>, %arg3: memref<1x64xf32, #tpu.memory_space<vmem>>, %arg4: memref<7x64x64xbf16, #tpu.memory_space<vmem>>, %arg5: memref<1x64xf32, #tpu.memory_space<vmem>>, %arg6: memref<3x64x64xbf16, #tpu.memory_space<vmem>>, %arg7: memref<1x64xf32, #tpu.memory_space<vmem>>, %arg8: memref<3x64x64xbf16, #tpu.memory_space<vmem>>, %arg9: memref<1x64xf32, #tpu.memory_space<vmem>>, %arg10: memref<3x64x64xbf16, #tpu.memory_space<vmem>>, %arg11: memref<1x64xf32, #tpu.memory_space<vmem>>, %arg12: memref<3x64x64xbf16, #tpu.memory_space<vmem>>, %arg13: memref<1x64xf32, #tpu.memory_space<vmem>>, %arg14: memref<2x64x128xbf16, #tpu.memory_space<vmem>>, %arg15: memref<1x128xf32, #tpu.memory_space<vmem>>, %arg16: memref<128x128xbf16, #tpu.memory_space<vmem>>, %arg17: memref<1x128xf32, #tpu.memory_space<vmem>>, %arg18: memref<128x128xbf16, #tpu.memory_space<vmem>>, %arg19: memref<1x128xf32, #tpu.memory_space<vmem>>, %arg20: memref<16x128xf32, #tpu.memory_space<vmem>>) attributes {dimension_semantics = [#tpu.dimension_semantics<parallel>], iteration_bounds = array<i64: 2>, scalar_prefetch = 0 : i64, scratch_operands = 0 : i64, tpu.core_type = #tpu.core_type<tc>, window_params = [{transform_indices = @transform_0, window_bounds = array<i64: 150, 16, 16>}, {pipeline_mode = #tpu.pipeline_mode<synchronous>, transform_indices = @transform_1, window_bounds = array<i64: 7, 16, 64>}, {pipeline_mode = #tpu.pipeline_mode<synchronous>, transform_indices = @transform_2, window_bounds = array<i64: 1, 64>}, {pipeline_mode = #tpu.pipeline_mode<synchronous>, transform_indices = @transform_3, window_bounds = array<i64: 7, 64, 64>}, {pipeline_mode = #tpu.pipeline_mode<synchronous>, transform_indices = @transform_4, window_bounds = array<i64: 1, 64>}, {pipeline_mode = #tpu.pipeline_mode<synchronous>, transform_indices = @transform_5, window_bounds = array<i64: 3, 64, 64>}, {pipeline_mode = #tpu.pipeline_mode<synchronous>, transform_indices = @transform_6, window_bounds = array<i64: 1, 64>}, {pipeline_mode = #tpu.pipeline_mode<synchronous>, transform_indices = @transform_7, window_bounds = array<i64: 3, 64, 64>}, {pipeline_mode = #tpu.pipeline_mode<synchronous>, transform_indices = @transform_8, window_bounds = array<i64: 1, 64>}, {pipeline_mode = #tpu.pipeline_mode<synchronous>, transform_indices = @transform_9, window_bounds = array<i64: 3, 64, 64>}, {pipeline_mode = #tpu.pipeline_mode<synchronous>, transform_indices = @transform_10, window_bounds = array<i64: 1, 64>}, {pipeline_mode = #tpu.pipeline_mode<synchronous>, transform_indices = @transform_11, window_bounds = array<i64: 3, 64, 64>}, {pipeline_mode = #tpu.pipeline_mode<synchronous>, transform_indices = @transform_12, window_bounds = array<i64: 1, 64>}, {pipeline_mode = #tpu.pipeline_mode<synchronous>, transform_indices = @transform_13, window_bounds = array<i64: 2, 64, 128>}, {pipeline_mode = #tpu.pipeline_mode<synchronous>, transform_indices = @transform_14, window_bounds = array<i64: 1, 128>}, {pipeline_mode = #tpu.pipeline_mode<synchronous>, transform_indices = @transform_15, window_bounds = array<i64: 128, 128>}, {pipeline_mode = #tpu.pipeline_mode<synchronous>, transform_indices = @transform_16, window_bounds = array<i64: 1, 128>}, {pipeline_mode = #tpu.pipeline_mode<synchronous>, transform_indices = @transform_17, window_bounds = array<i64: 128, 128>}, {pipeline_mode = #tpu.pipeline_mode<synchronous>, transform_indices = @transform_18, window_bounds = array<i64: 1, 128>}, {transform_indices = @transform_19, window_bounds = array<i64: 16, 128>}]} {
    %c0 = arith.constant 0 : index
    %c0_0 = arith.constant 0 : index
    %c0_1 = arith.constant 0 : index
    %0 = vector.load %arg1[%c0, %c0_0, %c0_1] : memref<150x16x16xbf16, #tpu.memory_space<vmem>>, vector<150x16x16xbf16>
    %1 = vector.shape_cast %0 : vector<150x16x16xbf16> to vector<2400x16xbf16>
    %c0_2 = arith.constant 0 : index
    %c0_3 = arith.constant 0 : index
    %2 = vector.load %arg3[%c0_2, %c0_3] : memref<1x64xf32, #tpu.memory_space<vmem>>, vector<1x64xf32>
    %3 = vector.extract_strided_slice %1 {offsets = [0, 0], sizes = [2304, 16], strides = [1, 1]} : vector<2400x16xbf16> to vector<2304x16xbf16>
    %c0_4 = arith.constant 0 : index
    %c0_5 = arith.constant 0 : index
    %c0_6 = arith.constant 0 : index
    %4 = vector.load %arg2[%c0_4, %c0_5, %c0_6] : memref<7x16x64xbf16, #tpu.memory_space<vmem>>, vector<1x16x64xbf16>
    %5 = vector.shape_cast %4 : vector<1x16x64xbf16> to vector<16x64xbf16>
    %cst = arith.constant dense<0.000000e+00> : vector<2304x64xf32>
    %6 = tpu.matmul %3, %5, %cst {dimension_numbers = #tpu.dot_dimension_numbers<[1], [0], [0], [1], [0, 0, 1, 1], [], []>} : vector<2304x16xbf16>, vector<16x64xbf16>, vector<2304x64xf32> -> vector<2304x64xf32>
    %7 = vector.extract_strided_slice %1 {offsets = [16, 0], sizes = [2304, 16], strides = [1, 1]} : vector<2400x16xbf16> to vector<2304x16xbf16>
    %c1 = arith.constant 1 : index
    %c0_7 = arith.constant 0 : index
    %c0_8 = arith.constant 0 : index
    %8 = vector.load %arg2[%c1, %c0_7, %c0_8] : memref<7x16x64xbf16, #tpu.memory_space<vmem>>, vector<1x16x64xbf16>
    %9 = vector.shape_cast %8 : vector<1x16x64xbf16> to vector<16x64xbf16>
    %cst_9 = arith.constant dense<0.000000e+00> : vector<2304x64xf32>
    %10 = tpu.matmul %7, %9, %cst_9 {dimension_numbers = #tpu.dot_dimension_numbers<[1], [0], [0], [1], [0, 0, 1, 1], [], []>} : vector<2304x16xbf16>, vector<16x64xbf16>, vector<2304x64xf32> -> vector<2304x64xf32>
    %11 = arith.addf %6, %10 : vector<2304x64xf32>
    %12 = vector.extract_strided_slice %1 {offsets = [32, 0], sizes = [2304, 16], strides = [1, 1]} : vector<2400x16xbf16> to vector<2304x16xbf16>
    %c2 = arith.constant 2 : index
    %c0_10 = arith.constant 0 : index
    %c0_11 = arith.constant 0 : index
    %13 = vector.load %arg2[%c2, %c0_10, %c0_11] : memref<7x16x64xbf16, #tpu.memory_space<vmem>>, vector<1x16x64xbf16>
    %14 = vector.shape_cast %13 : vector<1x16x64xbf16> to vector<16x64xbf16>
    %cst_12 = arith.constant dense<0.000000e+00> : vector<2304x64xf32>
    %15 = tpu.matmul %12, %14, %cst_12 {dimension_numbers = #tpu.dot_dimension_numbers<[1], [0], [0], [1], [0, 0, 1, 1], [], []>} : vector<2304x16xbf16>, vector<16x64xbf16>, vector<2304x64xf32> -> vector<2304x64xf32>
    %16 = arith.addf %11, %15 : vector<2304x64xf32>
    %17 = vector.extract_strided_slice %1 {offsets = [48, 0], sizes = [2304, 16], strides = [1, 1]} : vector<2400x16xbf16> to vector<2304x16xbf16>
    %c3 = arith.constant 3 : index
    %c0_13 = arith.constant 0 : index
    %c0_14 = arith.constant 0 : index
    %18 = vector.load %arg2[%c3, %c0_13, %c0_14] : memref<7x16x64xbf16, #tpu.memory_space<vmem>>, vector<1x16x64xbf16>
    %19 = vector.shape_cast %18 : vector<1x16x64xbf16> to vector<16x64xbf16>
    %cst_15 = arith.constant dense<0.000000e+00> : vector<2304x64xf32>
    %20 = tpu.matmul %17, %19, %cst_15 {dimension_numbers = #tpu.dot_dimension_numbers<[1], [0], [0], [1], [0, 0, 1, 1], [], []>} : vector<2304x16xbf16>, vector<16x64xbf16>, vector<2304x64xf32> -> vector<2304x64xf32>
    %21 = arith.addf %16, %20 : vector<2304x64xf32>
    %22 = vector.extract_strided_slice %1 {offsets = [64, 0], sizes = [2304, 16], strides = [1, 1]} : vector<2400x16xbf16> to vector<2304x16xbf16>
    %c4 = arith.constant 4 : index
    %c0_16 = arith.constant 0 : index
    %c0_17 = arith.constant 0 : index
    %23 = vector.load %arg2[%c4, %c0_16, %c0_17] : memref<7x16x64xbf16, #tpu.memory_space<vmem>>, vector<1x16x64xbf16>
    %24 = vector.shape_cast %23 : vector<1x16x64xbf16> to vector<16x64xbf16>
    %cst_18 = arith.constant dense<0.000000e+00> : vector<2304x64xf32>
    %25 = tpu.matmul %22, %24, %cst_18 {dimension_numbers = #tpu.dot_dimension_numbers<[1], [0], [0], [1], [0, 0, 1, 1], [], []>} : vector<2304x16xbf16>, vector<16x64xbf16>, vector<2304x64xf32> -> vector<2304x64xf32>
    %26 = arith.addf %21, %25 : vector<2304x64xf32>
    %27 = vector.extract_strided_slice %1 {offsets = [80, 0], sizes = [2304, 16], strides = [1, 1]} : vector<2400x16xbf16> to vector<2304x16xbf16>
    %c5 = arith.constant 5 : index
    %c0_19 = arith.constant 0 : index
    %c0_20 = arith.constant 0 : index
    %28 = vector.load %arg2[%c5, %c0_19, %c0_20] : memref<7x16x64xbf16, #tpu.memory_space<vmem>>, vector<1x16x64xbf16>
    %29 = vector.shape_cast %28 : vector<1x16x64xbf16> to vector<16x64xbf16>
    %cst_21 = arith.constant dense<0.000000e+00> : vector<2304x64xf32>
    %30 = tpu.matmul %27, %29, %cst_21 {dimension_numbers = #tpu.dot_dimension_numbers<[1], [0], [0], [1], [0, 0, 1, 1], [], []>} : vector<2304x16xbf16>, vector<16x64xbf16>, vector<2304x64xf32> -> vector<2304x64xf32>
    %31 = arith.addf %26, %30 : vector<2304x64xf32>
    %32 = vector.extract_strided_slice %1 {offsets = [96, 0], sizes = [2304, 16], strides = [1, 1]} : vector<2400x16xbf16> to vector<2304x16xbf16>
    %c6 = arith.constant 6 : index
    %c0_22 = arith.constant 0 : index
    %c0_23 = arith.constant 0 : index
    %33 = vector.load %arg2[%c6, %c0_22, %c0_23] : memref<7x16x64xbf16, #tpu.memory_space<vmem>>, vector<1x16x64xbf16>
    %34 = vector.shape_cast %33 : vector<1x16x64xbf16> to vector<16x64xbf16>
    %cst_24 = arith.constant dense<0.000000e+00> : vector<2304x64xf32>
    %35 = tpu.matmul %32, %34, %cst_24 {dimension_numbers = #tpu.dot_dimension_numbers<[1], [0], [0], [1], [0, 0, 1, 1], [], []>} : vector<2304x16xbf16>, vector<16x64xbf16>, vector<2304x64xf32> -> vector<2304x64xf32>
    %36 = arith.addf %31, %35 : vector<2304x64xf32>
    %37 = vector.broadcast %2 : vector<1x64xf32> to vector<2304x64xf32>
    %38 = arith.addf %36, %37 : vector<2304x64xf32>
    %cst_25 = arith.constant 0.000000e+00 : f32
    %39 = vector.broadcast %cst_25 : f32 to vector<2304x64xf32>
    %40 = arith.maximumf %38, %39 : vector<2304x64xf32>
    %41 = vector.shape_cast %40 : vector<2304x64xf32> to vector<48x48x64xf32>
    %42 = vector.extract_strided_slice %41 {offsets = [0, 0, 0], sizes = [48, 16, 64], strides = [1, 1, 1]} : vector<48x48x64xf32> to vector<48x16x64xf32>
    %43 = vector.extract_strided_slice %41 {offsets = [0, 16, 0], sizes = [48, 16, 64], strides = [1, 1, 1]} : vector<48x48x64xf32> to vector<48x16x64xf32>
    %44 = arith.maximumf %42, %43 : vector<48x16x64xf32>
    %45 = vector.extract_strided_slice %41 {offsets = [0, 32, 0], sizes = [48, 16, 64], strides = [1, 1, 1]} : vector<48x48x64xf32> to vector<48x16x64xf32>
    %46 = arith.maximumf %44, %45 : vector<48x16x64xf32>
    %47 = vector.shape_cast %46 : vector<48x16x64xf32> to vector<768x64xf32>
    %48 = arith.truncf %47 : vector<768x64xf32> to vector<768x64xbf16>
    %c0_26 = arith.constant 0 : index
    %c0_27 = arith.constant 0 : index
    %49 = vector.load %arg5[%c0_26, %c0_27] : memref<1x64xf32, #tpu.memory_space<vmem>>, vector<1x64xf32>
    %50 = vector.extract_strided_slice %48 {offsets = [0, 0], sizes = [672, 64], strides = [1, 1]} : vector<768x64xbf16> to vector<672x64xbf16>
    %c0_28 = arith.constant 0 : index
    %c0_29 = arith.constant 0 : index
    %c0_30 = arith.constant 0 : index
    %51 = vector.load %arg4[%c0_28, %c0_29, %c0_30] : memref<7x64x64xbf16, #tpu.memory_space<vmem>>, vector<1x64x64xbf16>
    %52 = vector.shape_cast %51 : vector<1x64x64xbf16> to vector<64x64xbf16>
    %cst_31 = arith.constant dense<0.000000e+00> : vector<672x64xf32>
    %53 = tpu.matmul %50, %52, %cst_31 {dimension_numbers = #tpu.dot_dimension_numbers<[1], [0], [0], [1], [0, 0, 1, 1], [], []>} : vector<672x64xbf16>, vector<64x64xbf16>, vector<672x64xf32> -> vector<672x64xf32>
    %54 = vector.extract_strided_slice %48 {offsets = [16, 0], sizes = [672, 64], strides = [1, 1]} : vector<768x64xbf16> to vector<672x64xbf16>
    %c1_32 = arith.constant 1 : index
    %c0_33 = arith.constant 0 : index
    %c0_34 = arith.constant 0 : index
    %55 = vector.load %arg4[%c1_32, %c0_33, %c0_34] : memref<7x64x64xbf16, #tpu.memory_space<vmem>>, vector<1x64x64xbf16>
    %56 = vector.shape_cast %55 : vector<1x64x64xbf16> to vector<64x64xbf16>
    %cst_35 = arith.constant dense<0.000000e+00> : vector<672x64xf32>
    %57 = tpu.matmul %54, %56, %cst_35 {dimension_numbers = #tpu.dot_dimension_numbers<[1], [0], [0], [1], [0, 0, 1, 1], [], []>} : vector<672x64xbf16>, vector<64x64xbf16>, vector<672x64xf32> -> vector<672x64xf32>
    %58 = arith.addf %53, %57 : vector<672x64xf32>
    %59 = vector.extract_strided_slice %48 {offsets = [32, 0], sizes = [672, 64], strides = [1, 1]} : vector<768x64xbf16> to vector<672x64xbf16>
    %c2_36 = arith.constant 2 : index
    %c0_37 = arith.constant 0 : index
    %c0_38 = arith.constant 0 : index
    %60 = vector.load %arg4[%c2_36, %c0_37, %c0_38] : memref<7x64x64xbf16, #tpu.memory_space<vmem>>, vector<1x64x64xbf16>
    %61 = vector.shape_cast %60 : vector<1x64x64xbf16> to vector<64x64xbf16>
    %cst_39 = arith.constant dense<0.000000e+00> : vector<672x64xf32>
    %62 = tpu.matmul %59, %61, %cst_39 {dimension_numbers = #tpu.dot_dimension_numbers<[1], [0], [0], [1], [0, 0, 1, 1], [], []>} : vector<672x64xbf16>, vector<64x64xbf16>, vector<672x64xf32> -> vector<672x64xf32>
    %63 = arith.addf %58, %62 : vector<672x64xf32>
    %64 = vector.extract_strided_slice %48 {offsets = [48, 0], sizes = [672, 64], strides = [1, 1]} : vector<768x64xbf16> to vector<672x64xbf16>
    %c3_40 = arith.constant 3 : index
    %c0_41 = arith.constant 0 : index
    %c0_42 = arith.constant 0 : index
    %65 = vector.load %arg4[%c3_40, %c0_41, %c0_42] : memref<7x64x64xbf16, #tpu.memory_space<vmem>>, vector<1x64x64xbf16>
    %66 = vector.shape_cast %65 : vector<1x64x64xbf16> to vector<64x64xbf16>
    %cst_43 = arith.constant dense<0.000000e+00> : vector<672x64xf32>
    %67 = tpu.matmul %64, %66, %cst_43 {dimension_numbers = #tpu.dot_dimension_numbers<[1], [0], [0], [1], [0, 0, 1, 1], [], []>} : vector<672x64xbf16>, vector<64x64xbf16>, vector<672x64xf32> -> vector<672x64xf32>
    %68 = arith.addf %63, %67 : vector<672x64xf32>
    %69 = vector.extract_strided_slice %48 {offsets = [64, 0], sizes = [672, 64], strides = [1, 1]} : vector<768x64xbf16> to vector<672x64xbf16>
    %c4_44 = arith.constant 4 : index
    %c0_45 = arith.constant 0 : index
    %c0_46 = arith.constant 0 : index
    %70 = vector.load %arg4[%c4_44, %c0_45, %c0_46] : memref<7x64x64xbf16, #tpu.memory_space<vmem>>, vector<1x64x64xbf16>
    %71 = vector.shape_cast %70 : vector<1x64x64xbf16> to vector<64x64xbf16>
    %cst_47 = arith.constant dense<0.000000e+00> : vector<672x64xf32>
    %72 = tpu.matmul %69, %71, %cst_47 {dimension_numbers = #tpu.dot_dimension_numbers<[1], [0], [0], [1], [0, 0, 1, 1], [], []>} : vector<672x64xbf16>, vector<64x64xbf16>, vector<672x64xf32> -> vector<672x64xf32>
    %73 = arith.addf %68, %72 : vector<672x64xf32>
    %74 = vector.extract_strided_slice %48 {offsets = [80, 0], sizes = [672, 64], strides = [1, 1]} : vector<768x64xbf16> to vector<672x64xbf16>
    %c5_48 = arith.constant 5 : index
    %c0_49 = arith.constant 0 : index
    %c0_50 = arith.constant 0 : index
    %75 = vector.load %arg4[%c5_48, %c0_49, %c0_50] : memref<7x64x64xbf16, #tpu.memory_space<vmem>>, vector<1x64x64xbf16>
    %76 = vector.shape_cast %75 : vector<1x64x64xbf16> to vector<64x64xbf16>
    %cst_51 = arith.constant dense<0.000000e+00> : vector<672x64xf32>
    %77 = tpu.matmul %74, %76, %cst_51 {dimension_numbers = #tpu.dot_dimension_numbers<[1], [0], [0], [1], [0, 0, 1, 1], [], []>} : vector<672x64xbf16>, vector<64x64xbf16>, vector<672x64xf32> -> vector<672x64xf32>
    %78 = arith.addf %73, %77 : vector<672x64xf32>
    %79 = vector.extract_strided_slice %48 {offsets = [96, 0], sizes = [672, 64], strides = [1, 1]} : vector<768x64xbf16> to vector<672x64xbf16>
    %c6_52 = arith.constant 6 : index
    %c0_53 = arith.constant 0 : index
    %c0_54 = arith.constant 0 : index
    %80 = vector.load %arg4[%c6_52, %c0_53, %c0_54] : memref<7x64x64xbf16, #tpu.memory_space<vmem>>, vector<1x64x64xbf16>
    %81 = vector.shape_cast %80 : vector<1x64x64xbf16> to vector<64x64xbf16>
    %cst_55 = arith.constant dense<0.000000e+00> : vector<672x64xf32>
    %82 = tpu.matmul %79, %81, %cst_55 {dimension_numbers = #tpu.dot_dimension_numbers<[1], [0], [0], [1], [0, 0, 1, 1], [], []>} : vector<672x64xbf16>, vector<64x64xbf16>, vector<672x64xf32> -> vector<672x64xf32>
    %83 = arith.addf %78, %82 : vector<672x64xf32>
    %84 = vector.broadcast %49 : vector<1x64xf32> to vector<672x64xf32>
    %85 = arith.addf %83, %84 : vector<672x64xf32>
    %cst_56 = arith.constant 0.000000e+00 : f32
    %86 = vector.broadcast %cst_56 : f32 to vector<672x64xf32>
    %87 = arith.maximumf %85, %86 : vector<672x64xf32>
    %88 = vector.shape_cast %87 : vector<672x64xf32> to vector<14x48x64xf32>
    %89 = vector.extract_strided_slice %88 {offsets = [0, 0, 0], sizes = [14, 16, 64], strides = [1, 1, 1]} : vector<14x48x64xf32> to vector<14x16x64xf32>
    %90 = vector.extract_strided_slice %88 {offsets = [0, 16, 0], sizes = [14, 16, 64], strides = [1, 1, 1]} : vector<14x48x64xf32> to vector<14x16x64xf32>
    %91 = arith.maximumf %89, %90 : vector<14x16x64xf32>
    %92 = vector.extract_strided_slice %88 {offsets = [0, 32, 0], sizes = [14, 16, 64], strides = [1, 1, 1]} : vector<14x48x64xf32> to vector<14x16x64xf32>
    %93 = arith.maximumf %91, %92 : vector<14x16x64xf32>
    %94 = vector.shape_cast %93 : vector<14x16x64xf32> to vector<224x64xf32>
    %95 = arith.truncf %94 : vector<224x64xf32> to vector<224x64xbf16>
    %c0_57 = arith.constant 0 : index
    %c0_58 = arith.constant 0 : index
    %96 = vector.load %arg7[%c0_57, %c0_58] : memref<1x64xf32, #tpu.memory_space<vmem>>, vector<1x64xf32>
    %97 = vector.extract_strided_slice %95 {offsets = [0, 0], sizes = [192, 64], strides = [1, 1]} : vector<224x64xbf16> to vector<192x64xbf16>
    %c0_59 = arith.constant 0 : index
    %c0_60 = arith.constant 0 : index
    %c0_61 = arith.constant 0 : index
    %98 = vector.load %arg6[%c0_59, %c0_60, %c0_61] : memref<3x64x64xbf16, #tpu.memory_space<vmem>>, vector<1x64x64xbf16>
    %99 = vector.shape_cast %98 : vector<1x64x64xbf16> to vector<64x64xbf16>
    %cst_62 = arith.constant dense<0.000000e+00> : vector<192x64xf32>
    %100 = tpu.matmul %97, %99, %cst_62 {dimension_numbers = #tpu.dot_dimension_numbers<[1], [0], [0], [1], [0, 0, 1, 1], [], []>} : vector<192x64xbf16>, vector<64x64xbf16>, vector<192x64xf32> -> vector<192x64xf32>
    %101 = vector.extract_strided_slice %95 {offsets = [16, 0], sizes = [192, 64], strides = [1, 1]} : vector<224x64xbf16> to vector<192x64xbf16>
    %c1_63 = arith.constant 1 : index
    %c0_64 = arith.constant 0 : index
    %c0_65 = arith.constant 0 : index
    %102 = vector.load %arg6[%c1_63, %c0_64, %c0_65] : memref<3x64x64xbf16, #tpu.memory_space<vmem>>, vector<1x64x64xbf16>
    %103 = vector.shape_cast %102 : vector<1x64x64xbf16> to vector<64x64xbf16>
    %cst_66 = arith.constant dense<0.000000e+00> : vector<192x64xf32>
    %104 = tpu.matmul %101, %103, %cst_66 {dimension_numbers = #tpu.dot_dimension_numbers<[1], [0], [0], [1], [0, 0, 1, 1], [], []>} : vector<192x64xbf16>, vector<64x64xbf16>, vector<192x64xf32> -> vector<192x64xf32>
    %105 = arith.addf %100, %104 : vector<192x64xf32>
    %106 = vector.extract_strided_slice %95 {offsets = [32, 0], sizes = [192, 64], strides = [1, 1]} : vector<224x64xbf16> to vector<192x64xbf16>
    %c2_67 = arith.constant 2 : index
    %c0_68 = arith.constant 0 : index
    %c0_69 = arith.constant 0 : index
    %107 = vector.load %arg6[%c2_67, %c0_68, %c0_69] : memref<3x64x64xbf16, #tpu.memory_space<vmem>>, vector<1x64x64xbf16>
    %108 = vector.shape_cast %107 : vector<1x64x64xbf16> to vector<64x64xbf16>
    %cst_70 = arith.constant dense<0.000000e+00> : vector<192x64xf32>
    %109 = tpu.matmul %106, %108, %cst_70 {dimension_numbers = #tpu.dot_dimension_numbers<[1], [0], [0], [1], [0, 0, 1, 1], [], []>} : vector<192x64xbf16>, vector<64x64xbf16>, vector<192x64xf32> -> vector<192x64xf32>
    %110 = arith.addf %105, %109 : vector<192x64xf32>
    %111 = vector.broadcast %96 : vector<1x64xf32> to vector<192x64xf32>
    %112 = arith.addf %110, %111 : vector<192x64xf32>
    %cst_71 = arith.constant 0.000000e+00 : f32
    %113 = vector.broadcast %cst_71 : f32 to vector<192x64xf32>
    %114 = arith.maximumf %112, %113 : vector<192x64xf32>
    %115 = arith.truncf %114 : vector<192x64xf32> to vector<192x64xbf16>
    %c0_72 = arith.constant 0 : index
    %c0_73 = arith.constant 0 : index
    %116 = vector.load %arg9[%c0_72, %c0_73] : memref<1x64xf32, #tpu.memory_space<vmem>>, vector<1x64xf32>
    %117 = vector.extract_strided_slice %115 {offsets = [0, 0], sizes = [160, 64], strides = [1, 1]} : vector<192x64xbf16> to vector<160x64xbf16>
    %c0_74 = arith.constant 0 : index
    %c0_75 = arith.constant 0 : index
    %c0_76 = arith.constant 0 : index
    %118 = vector.load %arg8[%c0_74, %c0_75, %c0_76] : memref<3x64x64xbf16, #tpu.memory_space<vmem>>, vector<1x64x64xbf16>
    %119 = vector.shape_cast %118 : vector<1x64x64xbf16> to vector<64x64xbf16>
    %cst_77 = arith.constant dense<0.000000e+00> : vector<160x64xf32>
    %120 = tpu.matmul %117, %119, %cst_77 {dimension_numbers = #tpu.dot_dimension_numbers<[1], [0], [0], [1], [0, 0, 1, 1], [], []>} : vector<160x64xbf16>, vector<64x64xbf16>, vector<160x64xf32> -> vector<160x64xf32>
    %121 = vector.extract_strided_slice %115 {offsets = [16, 0], sizes = [160, 64], strides = [1, 1]} : vector<192x64xbf16> to vector<160x64xbf16>
    %c1_78 = arith.constant 1 : index
    %c0_79 = arith.constant 0 : index
    %c0_80 = arith.constant 0 : index
    %122 = vector.load %arg8[%c1_78, %c0_79, %c0_80] : memref<3x64x64xbf16, #tpu.memory_space<vmem>>, vector<1x64x64xbf16>
    %123 = vector.shape_cast %122 : vector<1x64x64xbf16> to vector<64x64xbf16>
    %cst_81 = arith.constant dense<0.000000e+00> : vector<160x64xf32>
    %124 = tpu.matmul %121, %123, %cst_81 {dimension_numbers = #tpu.dot_dimension_numbers<[1], [0], [0], [1], [0, 0, 1, 1], [], []>} : vector<160x64xbf16>, vector<64x64xbf16>, vector<160x64xf32> -> vector<160x64xf32>
    %125 = arith.addf %120, %124 : vector<160x64xf32>
    %126 = vector.extract_strided_slice %115 {offsets = [32, 0], sizes = [160, 64], strides = [1, 1]} : vector<192x64xbf16> to vector<160x64xbf16>
    %c2_82 = arith.constant 2 : index
    %c0_83 = arith.constant 0 : index
    %c0_84 = arith.constant 0 : index
    %127 = vector.load %arg8[%c2_82, %c0_83, %c0_84] : memref<3x64x64xbf16, #tpu.memory_space<vmem>>, vector<1x64x64xbf16>
    %128 = vector.shape_cast %127 : vector<1x64x64xbf16> to vector<64x64xbf16>
    %cst_85 = arith.constant dense<0.000000e+00> : vector<160x64xf32>
    %129 = tpu.matmul %126, %128, %cst_85 {dimension_numbers = #tpu.dot_dimension_numbers<[1], [0], [0], [1], [0, 0, 1, 1], [], []>} : vector<160x64xbf16>, vector<64x64xbf16>, vector<160x64xf32> -> vector<160x64xf32>
    %130 = arith.addf %125, %129 : vector<160x64xf32>
    %131 = vector.broadcast %116 : vector<1x64xf32> to vector<160x64xf32>
    %132 = arith.addf %130, %131 : vector<160x64xf32>
    %cst_86 = arith.constant 0.000000e+00 : f32
    %133 = vector.broadcast %cst_86 : f32 to vector<160x64xf32>
    %134 = arith.maximumf %132, %133 : vector<160x64xf32>
    %135 = arith.truncf %134 : vector<160x64xf32> to vector<160x64xbf16>
    %c0_87 = arith.constant 0 : index
    %c0_88 = arith.constant 0 : index
    %136 = vector.load %arg11[%c0_87, %c0_88] : memref<1x64xf32, #tpu.memory_space<vmem>>, vector<1x64xf32>
    %137 = vector.extract_strided_slice %135 {offsets = [0, 0], sizes = [128, 64], strides = [1, 1]} : vector<160x64xbf16> to vector<128x64xbf16>
    %c0_89 = arith.constant 0 : index
    %c0_90 = arith.constant 0 : index
    %c0_91 = arith.constant 0 : index
    %138 = vector.load %arg10[%c0_89, %c0_90, %c0_91] : memref<3x64x64xbf16, #tpu.memory_space<vmem>>, vector<1x64x64xbf16>
    %139 = vector.shape_cast %138 : vector<1x64x64xbf16> to vector<64x64xbf16>
    %cst_92 = arith.constant dense<0.000000e+00> : vector<128x64xf32>
    %140 = tpu.matmul %137, %139, %cst_92 {dimension_numbers = #tpu.dot_dimension_numbers<[1], [0], [0], [1], [0, 0, 1, 1], [], []>} : vector<128x64xbf16>, vector<64x64xbf16>, vector<128x64xf32> -> vector<128x64xf32>
    %141 = vector.extract_strided_slice %135 {offsets = [16, 0], sizes = [128, 64], strides = [1, 1]} : vector<160x64xbf16> to vector<128x64xbf16>
    %c1_93 = arith.constant 1 : index
    %c0_94 = arith.constant 0 : index
    %c0_95 = arith.constant 0 : index
    %142 = vector.load %arg10[%c1_93, %c0_94, %c0_95] : memref<3x64x64xbf16, #tpu.memory_space<vmem>>, vector<1x64x64xbf16>
    %143 = vector.shape_cast %142 : vector<1x64x64xbf16> to vector<64x64xbf16>
    %cst_96 = arith.constant dense<0.000000e+00> : vector<128x64xf32>
    %144 = tpu.matmul %141, %143, %cst_96 {dimension_numbers = #tpu.dot_dimension_numbers<[1], [0], [0], [1], [0, 0, 1, 1], [], []>} : vector<128x64xbf16>, vector<64x64xbf16>, vector<128x64xf32> -> vector<128x64xf32>
    %145 = arith.addf %140, %144 : vector<128x64xf32>
    %146 = vector.extract_strided_slice %135 {offsets = [32, 0], sizes = [128, 64], strides = [1, 1]} : vector<160x64xbf16> to vector<128x64xbf16>
    %c2_97 = arith.constant 2 : index
    %c0_98 = arith.constant 0 : index
    %c0_99 = arith.constant 0 : index
    %147 = vector.load %arg10[%c2_97, %c0_98, %c0_99] : memref<3x64x64xbf16, #tpu.memory_space<vmem>>, vector<1x64x64xbf16>
    %148 = vector.shape_cast %147 : vector<1x64x64xbf16> to vector<64x64xbf16>
    %cst_100 = arith.constant dense<0.000000e+00> : vector<128x64xf32>
    %149 = tpu.matmul %146, %148, %cst_100 {dimension_numbers = #tpu.dot_dimension_numbers<[1], [0], [0], [1], [0, 0, 1, 1], [], []>} : vector<128x64xbf16>, vector<64x64xbf16>, vector<128x64xf32> -> vector<128x64xf32>
    %150 = arith.addf %145, %149 : vector<128x64xf32>
    %151 = vector.broadcast %136 : vector<1x64xf32> to vector<128x64xf32>
    %152 = arith.addf %150, %151 : vector<128x64xf32>
    %cst_101 = arith.constant 0.000000e+00 : f32
    %153 = vector.broadcast %cst_101 : f32 to vector<128x64xf32>
    %154 = arith.maximumf %152, %153 : vector<128x64xf32>
    %155 = arith.truncf %154 : vector<128x64xf32> to vector<128x64xbf16>
    %c0_102 = arith.constant 0 : index
    %c0_103 = arith.constant 0 : index
    %156 = vector.load %arg13[%c0_102, %c0_103] : memref<1x64xf32, #tpu.memory_space<vmem>>, vector<1x64xf32>
    %157 = vector.extract_strided_slice %155 {offsets = [0, 0], sizes = [96, 64], strides = [1, 1]} : vector<128x64xbf16> to vector<96x64xbf16>
    %c0_104 = arith.constant 0 : index
    %c0_105 = arith.constant 0 : index
    %c0_106 = arith.constant 0 : index
    %158 = vector.load %arg12[%c0_104, %c0_105, %c0_106] : memref<3x64x64xbf16, #tpu.memory_space<vmem>>, vector<1x64x64xbf16>
    %159 = vector.shape_cast %158 : vector<1x64x64xbf16> to vector<64x64xbf16>
    %cst_107 = arith.constant dense<0.000000e+00> : vector<96x64xf32>
    %160 = tpu.matmul %157, %159, %cst_107 {dimension_numbers = #tpu.dot_dimension_numbers<[1], [0], [0], [1], [0, 0, 1, 1], [], []>} : vector<96x64xbf16>, vector<64x64xbf16>, vector<96x64xf32> -> vector<96x64xf32>
    %161 = vector.extract_strided_slice %155 {offsets = [16, 0], sizes = [96, 64], strides = [1, 1]} : vector<128x64xbf16> to vector<96x64xbf16>
    %c1_108 = arith.constant 1 : index
    %c0_109 = arith.constant 0 : index
    %c0_110 = arith.constant 0 : index
    %162 = vector.load %arg12[%c1_108, %c0_109, %c0_110] : memref<3x64x64xbf16, #tpu.memory_space<vmem>>, vector<1x64x64xbf16>
    %163 = vector.shape_cast %162 : vector<1x64x64xbf16> to vector<64x64xbf16>
    %cst_111 = arith.constant dense<0.000000e+00> : vector<96x64xf32>
    %164 = tpu.matmul %161, %163, %cst_111 {dimension_numbers = #tpu.dot_dimension_numbers<[1], [0], [0], [1], [0, 0, 1, 1], [], []>} : vector<96x64xbf16>, vector<64x64xbf16>, vector<96x64xf32> -> vector<96x64xf32>
    %165 = arith.addf %160, %164 : vector<96x64xf32>
    %166 = vector.extract_strided_slice %155 {offsets = [32, 0], sizes = [96, 64], strides = [1, 1]} : vector<128x64xbf16> to vector<96x64xbf16>
    %c2_112 = arith.constant 2 : index
    %c0_113 = arith.constant 0 : index
    %c0_114 = arith.constant 0 : index
    %167 = vector.load %arg12[%c2_112, %c0_113, %c0_114] : memref<3x64x64xbf16, #tpu.memory_space<vmem>>, vector<1x64x64xbf16>
    %168 = vector.shape_cast %167 : vector<1x64x64xbf16> to vector<64x64xbf16>
    %cst_115 = arith.constant dense<0.000000e+00> : vector<96x64xf32>
    %169 = tpu.matmul %166, %168, %cst_115 {dimension_numbers = #tpu.dot_dimension_numbers<[1], [0], [0], [1], [0, 0, 1, 1], [], []>} : vector<96x64xbf16>, vector<64x64xbf16>, vector<96x64xf32> -> vector<96x64xf32>
    %170 = arith.addf %165, %169 : vector<96x64xf32>
    %171 = vector.broadcast %156 : vector<1x64xf32> to vector<96x64xf32>
    %172 = arith.addf %170, %171 : vector<96x64xf32>
    %cst_116 = arith.constant 0.000000e+00 : f32
    %173 = vector.broadcast %cst_116 : f32 to vector<96x64xf32>
    %174 = arith.maximumf %172, %173 : vector<96x64xf32>
    %175 = vector.shape_cast %174 : vector<96x64xf32> to vector<2x48x64xf32>
    %176 = vector.extract_strided_slice %175 {offsets = [0, 0, 0], sizes = [2, 16, 64], strides = [1, 1, 1]} : vector<2x48x64xf32> to vector<2x16x64xf32>
    %177 = vector.extract_strided_slice %175 {offsets = [0, 16, 0], sizes = [2, 16, 64], strides = [1, 1, 1]} : vector<2x48x64xf32> to vector<2x16x64xf32>
    %178 = arith.maximumf %176, %177 : vector<2x16x64xf32>
    %179 = vector.extract_strided_slice %175 {offsets = [0, 32, 0], sizes = [2, 16, 64], strides = [1, 1, 1]} : vector<2x48x64xf32> to vector<2x16x64xf32>
    %180 = arith.maximumf %178, %179 : vector<2x16x64xf32>
    %181 = vector.shape_cast %180 : vector<2x16x64xf32> to vector<32x64xf32>
    %182 = arith.truncf %181 : vector<32x64xf32> to vector<32x64xbf16>
    %183 = vector.extract_strided_slice %182 {offsets = [0, 0], sizes = [16, 64], strides = [1, 1]} : vector<32x64xbf16> to vector<16x64xbf16>
    %c0_117 = arith.constant 0 : index
    %c0_118 = arith.constant 0 : index
    %c0_119 = arith.constant 0 : index
    %184 = vector.load %arg14[%c0_117, %c0_118, %c0_119] : memref<2x64x128xbf16, #tpu.memory_space<vmem>>, vector<1x64x128xbf16>
    %185 = vector.shape_cast %184 : vector<1x64x128xbf16> to vector<64x128xbf16>
    %cst_120 = arith.constant dense<0.000000e+00> : vector<16x128xf32>
    %186 = tpu.matmul %183, %185, %cst_120 {dimension_numbers = #tpu.dot_dimension_numbers<[1], [0], [0], [1], [0, 0, 1, 1], [], []>} : vector<16x64xbf16>, vector<64x128xbf16>, vector<16x128xf32> -> vector<16x128xf32>
    %187 = vector.extract_strided_slice %182 {offsets = [16, 0], sizes = [16, 64], strides = [1, 1]} : vector<32x64xbf16> to vector<16x64xbf16>
    %c1_121 = arith.constant 1 : index
    %c0_122 = arith.constant 0 : index
    %c0_123 = arith.constant 0 : index
    %188 = vector.load %arg14[%c1_121, %c0_122, %c0_123] : memref<2x64x128xbf16, #tpu.memory_space<vmem>>, vector<1x64x128xbf16>
    %189 = vector.shape_cast %188 : vector<1x64x128xbf16> to vector<64x128xbf16>
    %cst_124 = arith.constant dense<0.000000e+00> : vector<16x128xf32>
    %190 = tpu.matmul %187, %189, %cst_124 {dimension_numbers = #tpu.dot_dimension_numbers<[1], [0], [0], [1], [0, 0, 1, 1], [], []>} : vector<16x64xbf16>, vector<64x128xbf16>, vector<16x128xf32> -> vector<16x128xf32>
    %191 = arith.addf %186, %190 : vector<16x128xf32>
    %c0_125 = arith.constant 0 : index
    %c0_126 = arith.constant 0 : index
    %192 = vector.load %arg15[%c0_125, %c0_126] : memref<1x128xf32, #tpu.memory_space<vmem>>, vector<1x128xf32>
    %193 = vector.broadcast %192 : vector<1x128xf32> to vector<16x128xf32>
    %194 = arith.addf %191, %193 : vector<16x128xf32>
    %cst_127 = arith.constant 0.000000e+00 : f32
    %195 = vector.broadcast %cst_127 : f32 to vector<16x128xf32>
    %196 = arith.maximumf %194, %195 : vector<16x128xf32>
    %197 = arith.truncf %196 : vector<16x128xf32> to vector<16x128xbf16>
    %c0_128 = arith.constant 0 : index
    %c0_129 = arith.constant 0 : index
    %198 = vector.load %arg16[%c0_128, %c0_129] : memref<128x128xbf16, #tpu.memory_space<vmem>>, vector<128x128xbf16>
    %cst_130 = arith.constant dense<0.000000e+00> : vector<16x128xf32>
    %199 = tpu.matmul %197, %198, %cst_130 {dimension_numbers = #tpu.dot_dimension_numbers<[1], [0], [0], [1], [0, 0, 1, 1], [], []>} : vector<16x128xbf16>, vector<128x128xbf16>, vector<16x128xf32> -> vector<16x128xf32>
    %c0_131 = arith.constant 0 : index
    %c0_132 = arith.constant 0 : index
    %200 = vector.load %arg17[%c0_131, %c0_132] : memref<1x128xf32, #tpu.memory_space<vmem>>, vector<1x128xf32>
    %201 = vector.broadcast %200 : vector<1x128xf32> to vector<16x128xf32>
    %202 = arith.addf %199, %201 : vector<16x128xf32>
    %cst_133 = arith.constant 0.000000e+00 : f32
    %203 = vector.broadcast %cst_133 : f32 to vector<16x128xf32>
    %204 = arith.maximumf %202, %203 : vector<16x128xf32>
    %205 = arith.truncf %204 : vector<16x128xf32> to vector<16x128xbf16>
    %c0_134 = arith.constant 0 : index
    %c0_135 = arith.constant 0 : index
    %206 = vector.load %arg18[%c0_134, %c0_135] : memref<128x128xbf16, #tpu.memory_space<vmem>>, vector<128x128xbf16>
    %cst_136 = arith.constant dense<0.000000e+00> : vector<16x128xf32>
    %207 = tpu.matmul %205, %206, %cst_136 {dimension_numbers = #tpu.dot_dimension_numbers<[1], [0], [0], [1], [0, 0, 1, 1], [], []>} : vector<16x128xbf16>, vector<128x128xbf16>, vector<16x128xf32> -> vector<16x128xf32>
    %c0_137 = arith.constant 0 : index
    %c0_138 = arith.constant 0 : index
    %208 = vector.load %arg19[%c0_137, %c0_138] : memref<1x128xf32, #tpu.memory_space<vmem>>, vector<1x128xf32>
    %209 = vector.broadcast %208 : vector<1x128xf32> to vector<16x128xf32>
    %210 = arith.addf %207, %209 : vector<16x128xf32>
    %c0_139 = arith.constant 0 : index
    %c0_140 = arith.constant 0 : index
    %211 = vector.load %arg20[%c0_139, %c0_140] : memref<16x128xf32, #tpu.memory_space<vmem>>, vector<16x128xf32>
    tpu.vector_store %arg20[%c0_139, %c0_140], %210 {strides = array<i32>} : memref<16x128xf32, #tpu.memory_space<vmem>>, vector<16x128xf32>,
    return
  }
  func.func @transform_0(%arg0: i32) -> (i32, i32, i32) {
    %c0_i32 = arith.constant 0 : i32
    %c0_i32_0 = arith.constant 0 : i32
    %c0_i32_1 = arith.constant 0 : i32
    return %c0_i32, %arg0, %c0_i32_0 : i32, i32, i32
  }
  func.func @transform_1(%arg0: i32) -> (i32, i32, i32) {
    %c0_i32 = arith.constant 0 : i32
    %c0_i32_0 = arith.constant 0 : i32
    %c0_i32_1 = arith.constant 0 : i32
    %c0_i32_2 = arith.constant 0 : i32
    return %c0_i32, %c0_i32_0, %c0_i32_1 : i32, i32, i32
  }
  func.func @transform_2(%arg0: i32) -> (i32, i32) {
    %c0_i32 = arith.constant 0 : i32
    %c0_i32_0 = arith.constant 0 : i32
    %c0_i32_1 = arith.constant 0 : i32
    return %c0_i32, %c0_i32_0 : i32, i32
  }
  func.func @transform_3(%arg0: i32) -> (i32, i32, i32) {
    %c0_i32 = arith.constant 0 : i32
    %c0_i32_0 = arith.constant 0 : i32
    %c0_i32_1 = arith.constant 0 : i32
    %c0_i32_2 = arith.constant 0 : i32
    return %c0_i32, %c0_i32_0, %c0_i32_1 : i32, i32, i32
  }
  func.func @transform_4(%arg0: i32) -> (i32, i32) {
    %c0_i32 = arith.constant 0 : i32
    %c0_i32_0 = arith.constant 0 : i32
    %c0_i32_1 = arith.constant 0 : i32
    return %c0_i32, %c0_i32_0 : i32, i32
  }
  func.func @transform_5(%arg0: i32) -> (i32, i32, i32) {
    %c0_i32 = arith.constant 0 : i32
    %c0_i32_0 = arith.constant 0 : i32
    %c0_i32_1 = arith.constant 0 : i32
    %c0_i32_2 = arith.constant 0 : i32
    return %c0_i32, %c0_i32_0, %c0_i32_1 : i32, i32, i32
  }
  func.func @transform_6(%arg0: i32) -> (i32, i32) {
    %c0_i32 = arith.constant 0 : i32
    %c0_i32_0 = arith.constant 0 : i32
    %c0_i32_1 = arith.constant 0 : i32
    return %c0_i32, %c0_i32_0 : i32, i32
  }
  func.func @transform_7(%arg0: i32) -> (i32, i32, i32) {
    %c0_i32 = arith.constant 0 : i32
    %c0_i32_0 = arith.constant 0 : i32
    %c0_i32_1 = arith.constant 0 : i32
    %c0_i32_2 = arith.constant 0 : i32
    return %c0_i32, %c0_i32_0, %c0_i32_1 : i32, i32, i32
  }
  func.func @transform_8(%arg0: i32) -> (i32, i32) {
    %c0_i32 = arith.constant 0 : i32
    %c0_i32_0 = arith.constant 0 : i32
    %c0_i32_1 = arith.constant 0 : i32
    return %c0_i32, %c0_i32_0 : i32, i32
  }
  func.func @transform_9(%arg0: i32) -> (i32, i32, i32) {
    %c0_i32 = arith.constant 0 : i32
    %c0_i32_0 = arith.constant 0 : i32
    %c0_i32_1 = arith.constant 0 : i32
    %c0_i32_2 = arith.constant 0 : i32
    return %c0_i32, %c0_i32_0, %c0_i32_1 : i32, i32, i32
  }
  func.func @transform_10(%arg0: i32) -> (i32, i32) {
    %c0_i32 = arith.constant 0 : i32
    %c0_i32_0 = arith.constant 0 : i32
    %c0_i32_1 = arith.constant 0 : i32
    return %c0_i32, %c0_i32_0 : i32, i32
  }
  func.func @transform_11(%arg0: i32) -> (i32, i32, i32) {
    %c0_i32 = arith.constant 0 : i32
    %c0_i32_0 = arith.constant 0 : i32
    %c0_i32_1 = arith.constant 0 : i32
    %c0_i32_2 = arith.constant 0 : i32
    return %c0_i32, %c0_i32_0, %c0_i32_1 : i32, i32, i32
  }
  func.func @transform_12(%arg0: i32) -> (i32, i32) {
    %c0_i32 = arith.constant 0 : i32
    %c0_i32_0 = arith.constant 0 : i32
    %c0_i32_1 = arith.constant 0 : i32
    return %c0_i32, %c0_i32_0 : i32, i32
  }
  func.func @transform_13(%arg0: i32) -> (i32, i32, i32) {
    %c0_i32 = arith.constant 0 : i32
    %c0_i32_0 = arith.constant 0 : i32
    %c0_i32_1 = arith.constant 0 : i32
    %c0_i32_2 = arith.constant 0 : i32
    return %c0_i32, %c0_i32_0, %c0_i32_1 : i32, i32, i32
  }
  func.func @transform_14(%arg0: i32) -> (i32, i32) {
    %c0_i32 = arith.constant 0 : i32
    %c0_i32_0 = arith.constant 0 : i32
    %c0_i32_1 = arith.constant 0 : i32
    return %c0_i32, %c0_i32_0 : i32, i32
  }
  func.func @transform_15(%arg0: i32) -> (i32, i32) {
    %c0_i32 = arith.constant 0 : i32
    %c0_i32_0 = arith.constant 0 : i32
    %c0_i32_1 = arith.constant 0 : i32
    return %c0_i32, %c0_i32_0 : i32, i32
  }
  func.func @transform_16(%arg0: i32) -> (i32, i32) {
    %c0_i32 = arith.constant 0 : i32
    %c0_i32_0 = arith.constant 0 : i32
    %c0_i32_1 = arith.constant 0 : i32
    return %c0_i32, %c0_i32_0 : i32, i32
  }
  func.func @transform_17(%arg0: i32) -> (i32, i32) {
    %c0_i32 = arith.constant 0 : i32
    %c0_i32_0 = arith.constant 0 : i32
    %c0_i32_1 = arith.constant 0 : i32
    return %c0_i32, %c0_i32_0 : i32, i32
  }
  func.func @transform_18(%arg0: i32) -> (i32, i32) {
    %c0_i32 = arith.constant 0 : i32
    %c0_i32_0 = arith.constant 0 : i32
    %c0_i32_1 = arith.constant 0 : i32
    return %c0_i32, %c0_i32_0 : i32, i32
  }
  func.func @transform_19(%arg0: i32) -> (i32, i32) {
    %c0_i32 = arith.constant 0 : i32
    %c0_i32_0 = arith.constant 0 : i32
    return %arg0, %c0_i32 : i32, i32
  }
}

</mosaic_0001>

<bundles_post_ra>
// kernel: char_cnn_forward.1
= control target key start
LH: loop header
LB: loop body
LE: loop exit
PB: predicated region body
PF: predicated region fallthrough
CT: control target
= control target key end

     0   :  { %s35611_s0 = inlined_call_operand.vmem [shape: bf16[150,32,16], index: 0, kind: input, shape index: {}]   ;;  %s35612_s1 = inlined_call_operand.vmem [shape: bf16[7,16,64], index: 1, kind: input, shape index: {}]   ;;  %s35613_s2 = inlined_call_operand.vmem [shape: f32[1,64], index: 2, kind: input, shape index: {}]   ;;  %s35614_s3 = inlined_call_operand.vmem [shape: bf16[7,64,64], index: 3, kind: input, shape index: {}]   ;;  %s35615_s4 = inlined_call_operand.vmem [shape: f32[1,64], index: 4, kind: input, shape index: {}]   ;;  %s35616_s5 = inlined_call_operand.vmem [shape: bf16[3,64,64], index: 5, kind: input, shape index: {}]   ;;  %s35617_s6 = inlined_call_operand.vmem [shape: f32[1,64], index: 6, kind: input, shape index: {}]   ;;  %s35618_s7 = inlined_call_operand.vmem [shape: bf16[3,64,64], index: 7, kind: input, shape index: {}]   ;;  %s35619_s8 = inlined_call_operand.vmem [shape: f32[1,64], index: 8, kind: input, shape index: {}]   ;;  %s35620_s9 = inlined_call_operand.vmem [shape: bf16[3,64,64], index: 9, kind: input, shape index: {}]   ;;  %s35621_s10 = inlined_call_operand.vmem [shape: f32[1,64], index: 10, kind: input, shape index: {}]   ;;  %s35622_s11 = inlined_call_operand.vmem [shape: bf16[3,64,64], index: 11, kind: input, shape index: {}]   ;;  %s35623_s12 = inlined_call_operand.vmem [shape: f32[1,64], index: 12, kind: input, shape index: {}]   ;;  %s35624_s13 = inlined_call_operand.vmem [shape: bf16[2,64,128], index: 13, kind: input, shape index: {}]   ;;  %s35625_s14 = inlined_call_operand.vmem [shape: f32[1,128], index: 14, kind: input, shape index: {}]   ;;  %s35626_s15 = inlined_call_operand.vmem [shape: bf16[128,128], index: 15, kind: input, shape index: {}]   ;;  %s35627_s16 = inlined_call_operand.vmem [shape: f32[1,128], index: 16, kind: input, shape index: {}]   ;;  %s35628_s17 = inlined_call_operand.vmem [shape: bf16[128,128], index: 17, kind: input, shape index: {}]   ;;  %s35629_s18 = inlined_call_operand.vmem [shape: f32[1,128], index: 18, kind: input, shape index: {}]   ;;  %s35630_s19 = inlined_call_operand.vmem [shape: f32[32,128], index: 19, kind: output, shape index: {}]  }
   0x1   :  { %35731 = sst [smem:[#allocation326_spill]] %s35611_s0 }
   0x2   :  { %35732 = sst [smem:[#allocation327_spill]] %s35612_s1 }
   0x3   :  { %35733 = sst [smem:[#allocation328_spill]] %s35613_s2 }
   0x4   :  { %35734 = sst [smem:[#allocation329_spill]] %s35614_s3 }
   0x5   :  { %s29694_s0 = smov 0   ;;  %s29696_s30 = smov 0  }
   0x6   :  { %s29698_s20 = smov 0  }
   0x7 LB: > { %s29711_s1 = sadd.s32 1, %s29590_s20   ;;  %s36_s2 = sadd.s32 1, %s29586_s30  ;;  %s29590_s20 = sphi %s29698_s20, %s36679_s20   ;;  %s29586_s30 = sphi %s29696_s30, %s36678_s30   ;;  %s29582_s0 = sphi %s29694_s0, %s36677_s0  }
   0x8   : > { %s33_s22 = ssub.s32 %s29590_s20, %s29711_s1  ;;  %p43_p1 = scmp.ne.s32.totalorder %s29586_s30, %s29582_s0 }
   0x9   : > { %p34_p0 = scmp.eq.s32.totalorder %s33_s22, 0  ;;  %p44_p2 = scmp.eq.s32.totalorder %s29590_s20, 0 }
   0xa   : > { %p20115_p4 = scmp.ge.s32.totalorder %s29590_s20, 2 }
   0xb   : > { %s29720_s23 = scalar_select %p34_p0, %s29586_s30, %s36_s2  }
   0xc   : > { %p45_p3 = por %p44_p2, %p43_p1  ;;  %527 = sbr.rel (%p20115_p4) target bundleno = 104 (0x68), region = 88 }
  0x13   : > { %530 = sbr.rel (!%p45_p3) target bundleno = 104 (0x68), region = 92  ;;  %s532_s24 = sand.u32 (%p45_p3), 1, %s29586_s30  }
  0x14   : > { %s21933_s25 = sshll.u32 (%p45_p3), %s29590_s20, 3  ;;  %s28883_s3 = smul.u32 (%p45_p3), 1200, %s532_s24 }
  0x15   : > { %s35735_s28 = sld [smem:[#allocation326_spill]] (%p45_p3) }
  0x16   : > { %s29736_s22 = scalar_lea.vmem (%p45_p3), [#allocation2], %s28883_s3 }
  0x1b   : > { %s29728_s29 = scalar_lea.vmem %s35735_s28, %s21933_s25 }
  0x1c   : > { %v553_v0 = vld [vmem:[%s29728_s29] sm:$0xff]   ;;  %v557_v1 = vld [vmem:[%s29728_s29 + $0x10] sm:$0xff]  }
  0x1d   : > { %v561_v2 = vld [vmem:[%s29728_s29 + $0x20] sm:$0xff]   ;;  %v565_v3 = vld [vmem:[%s29728_s29 + $0x30] sm:$0xff]   ;;  %554 = vst [vmem:[%s29736_s22] sm:$0xff] %v553_v0   ;;  %558 = vst [vmem:[%s29736_s22 + $0x8] sm:$0xff] %v557_v1  }
  0x1e   : > { %v569_v4 = vld [vmem:[%s29728_s29 + $0x40] sm:$0xff]   ;;  %v573_v5 = vld [vmem:[%s29728_s29 + $0x50] sm:$0xff]   ;;  %562 = vst [vmem:[%s29736_s22 + $0x10] sm:$0xff] %v561_v2   ;;  %566 = vst [vmem:[%s29736_s22 + $0x18] sm:$0xff] %v565_v3  }
  0x1f   : > { %570 = vst [vmem:[%s29736_s22 + $0x20] sm:$0xff] %v569_v4   ;;  %574 = vst [vmem:[%s29736_s22 + $0x28] sm:$0xff] %v573_v5   ;;  %v577_v6 = vld [vmem:[%s29728_s29 + $0x60] sm:$0xff]   ;;  %v581_v7 = vld [vmem:[%s29728_s29 + $0x70] sm:$0xff]  }
  0x20   : > { %v585_v8 = vld [vmem:[%s29728_s29 + $0x80] sm:$0xff]   ;;  %578 = vst [vmem:[%s29736_s22 + $0x30] sm:$0xff] %v577_v6   ;;  %582 = vst [vmem:[%s29736_s22 + $0x38] sm:$0xff] %v581_v7   ;;  %v589_v9 = vld [vmem:[%s29728_s29 + $0x90] sm:$0xff]  }
  0x21   : > { %586 = vst [vmem:[%s29736_s22 + $0x40] sm:$0xff] %v585_v8   ;;  %v593_v10 = vld [vmem:[%s29728_s29 + $0xa0] sm:$0xff]   ;;  %v597_v11 = vld [vmem:[%s29728_s29 + $0xb0] sm:$0xff]   ;;  %590 = vst [vmem:[%s29736_s22 + $0x48] sm:$0xff] %v589_v9  }
  0x22   : > { %594 = vst [vmem:[%s29736_s22 + $0x50] sm:$0xff] %v593_v10   ;;  %598 = vst [vmem:[%s29736_s22 + $0x58] sm:$0xff] %v597_v11   ;;  %v601_v12 = vld [vmem:[%s29728_s29 + $0xc0] sm:$0xff]   ;;  %v605_v13 = vld [vmem:[%s29728_s29 + $0xd0] sm:$0xff]  }
  0x23   : > { %v609_v14 = vld [vmem:[%s29728_s29 + $0xe0] sm:$0xff]   ;;  %602 = vst [vmem:[%s29736_s22 + $0x60] sm:$0xff] %v601_v12   ;;  %606 = vst [vmem:[%s29736_s22 + $0x68] sm:$0xff] %v605_v13   ;;  %v613_v15 = vld [vmem:[%s29728_s29 + $0xf0] sm:$0xff]  }
  0x24   : > { %610 = vst [vmem:[%s29736_s22 + $0x70] sm:$0xff] %v609_v14   ;;  %v617_v16 = vld [vmem:[%s29728_s29 + $0x100] sm:$0xff]   ;;  %v621_v17 = vld [vmem:[%s29728_s29 + $0x110] sm:$0xff]   ;;  %614 = vst [vmem:[%s29736_s22 + $0x78] sm:$0xff] %v613_v15  }
  0x25   : > { %618 = vst [vmem:[%s29736_s22 + $0x80] sm:$0xff] %v617_v16   ;;  %622 = vst [vmem:[%s29736_s22 + $0x88] sm:$0xff] %v621_v17   ;;  %v625_v18 = vld [vmem:[%s29728_s29 + $0x120] sm:$0xff]   ;;  %v629_v19 = vld [vmem:[%s29728_s29 + $0x130] sm:$0xff]  }
  0x26   : > { %v633_v20 = vld [vmem:[%s29728_s29 + $0x140] sm:$0xff]   ;;  %626 = vst [vmem:[%s29736_s22 + $0x90] sm:$0xff] %v625_v18   ;;  %630 = vst [vmem:[%s29736_s22 + $0x98] sm:$0xff] %v629_v19   ;;  %v637_v21 = vld [vmem:[%s29728_s29 + $0x150] sm:$0xff]  }
  0x27   : > { %634 = vst [vmem:[%s29736_s22 + $0xa0] sm:$0xff] %v633_v20   ;;  %v641_v22 = vld [vmem:[%s29728_s29 + $0x160] sm:$0xff]   ;;  %v645_v23 = vld [vmem:[%s29728_s29 + $0x170] sm:$0xff]   ;;  %638 = vst [vmem:[%s29736_s22 + $0xa8] sm:$0xff] %v637_v21  }
  0x28   : > { %642 = vst [vmem:[%s29736_s22 + $0xb0] sm:$0xff] %v641_v22   ;;  %646 = vst [vmem:[%s29736_s22 + $0xb8] sm:$0xff] %v645_v23   ;;  %v649_v24 = vld [vmem:[%s29728_s29 + $0x180] sm:$0xff]   ;;  %v653_v25 = vld [vmem:[%s29728_s29 + $0x190] sm:$0xff]  }
  0x29   : > { %v657_v26 = vld [vmem:[%s29728_s29 + $0x1a0] sm:$0xff]   ;;  %650 = vst [vmem:[%s29736_s22 + $0xc0] sm:$0xff] %v649_v24   ;;  %654 = vst [vmem:[%s29736_s22 + $0xc8] sm:$0xff] %v653_v25   ;;  %v661_v27 = vld [vmem:[%s29728_s29 + $0x1b0] sm:$0xff]  }
  0x2a   : > { %658 = vst [vmem:[%s29736_s22 + $0xd0] sm:$0xff] %v657_v26   ;;  %v665_v28 = vld [vmem:[%s29728_s29 + $0x1c0] sm:$0xff]   ;;  %v669_v29 = vld [vmem:[%s29728_s29 + $0x1d0] sm:$0xff]   ;;  %662 = vst [vmem:[%s29736_s22 + $0xd8] sm:$0xff] %v661_v27  }
  0x2b   : > { %666 = vst [vmem:[%s29736_s22 + $0xe0] sm:$0xff] %v665_v28   ;;  %670 = vst [vmem:[%s29736_s22 + $0xe8] sm:$0xff] %v669_v29   ;;  %v673_v30 = vld [vmem:[%s29728_s29 + $0x1e0] sm:$0xff]   ;;  %v677_v31 = vld [vmem:[%s29728_s29 + $0x1f0] sm:$0xff]  }
  0x2c   : > { %v681_v32 = vld [vmem:[%s29728_s29 + $0x200] sm:$0xff]   ;;  %674 = vst [vmem:[%s29736_s22 + $0xf0] sm:$0xff] %v673_v30   ;;  %678 = vst [vmem:[%s29736_s22 + $0xf8] sm:$0xff] %v677_v31   ;;  %v685_v33 = vld [vmem:[%s29728_s29 + $0x210] sm:$0xff]  }
  0x2d   : > { %682 = vst [vmem:[%s29736_s22 + $0x100] sm:$0xff] %v681_v32   ;;  %v689_v34 = vld [vmem:[%s29728_s29 + $0x220] sm:$0xff]   ;;  %v693_v35 = vld [vmem:[%s29728_s29 + $0x230] sm:$0xff]   ;;  %686 = vst [vmem:[%s29736_s22 + $0x108] sm:$0xff] %v685_v33  }
  0x2e   : > { %690 = vst [vmem:[%s29736_s22 + $0x110] sm:$0xff] %v689_v34   ;;  %694 = vst [vmem:[%s29736_s22 + $0x118] sm:$0xff] %v693_v35   ;;  %v697_v36 = vld [vmem:[%s29728_s29 + $0x240] sm:$0xff]   ;;  %v701_v37 = vld [vmem:[%s29728_s29 + $0x250] sm:$0xff]  }
  0x2f   : > { %v705_v38 = vld [vmem:[%s29728_s29 + $0x260] sm:$0xff]   ;;  %698 = vst [vmem:[%s29736_s22 + $0x120] sm:$0xff] %v697_v36   ;;  %702 = vst [vmem:[%s29736_s22 + $0x128] sm:$0xff] %v701_v37   ;;  %v709_v39 = vld [vmem:[%s29728_s29 + $0x270] sm:$0xff]  }
  0x30   : > { %706 = vst [vmem:[%s29736_s22 + $0x130] sm:$0xff] %v705_v38   ;;  %v713_v40 = vld [vmem:[%s29728_s29 + $0x280] sm:$0xff]   ;;  %v717_v41 = vld [vmem:[%s29728_s29 + $0x290] sm:$0xff]   ;;  %710 = vst [vmem:[%s29736_s22 + $0x138] sm:$0xff] %v709_v39  }
  0x31   : > { %714 = vst [vmem:[%s29736_s22 + $0x140] sm:$0xff] %v713_v40   ;;  %718 = vst [vmem:[%s29736_s22 + $0x148] sm:$0xff] %v717_v41   ;;  %v721_v42 = vld [vmem:[%s29728_s29 + $0x2a0] sm:$0xff]   ;;  %v725_v43 = vld [vmem:[%s29728_s29 + $0x2b0] sm:$0xff]  }
  0x32   : > { %v729_v44 = vld [vmem:[%s29728_s29 + $0x2c0] sm:$0xff]   ;;  %722 = vst [vmem:[%s29736_s22 + $0x150] sm:$0xff] %v721_v42   ;;  %726 = vst [vmem:[%s29736_s22 + $0x158] sm:$0xff] %v725_v43   ;;  %v733_v45 = vld [vmem:[%s29728_s29 + $0x2d0] sm:$0xff]  }
  0x33   : > { %730 = vst [vmem:[%s29736_s22 + $0x160] sm:$0xff] %v729_v44   ;;  %v737_v46 = vld [vmem:[%s29728_s29 + $0x2e0] sm:$0xff]   ;;  %v741_v47 = vld [vmem:[%s29728_s29 + $0x2f0] sm:$0xff]   ;;  %734 = vst [vmem:[%s29736_s22 + $0x168] sm:$0xff] %v733_v45  }
  0x34   : > { %738 = vst [vmem:[%s29736_s22 + $0x170] sm:$0xff] %v737_v46   ;;  %742 = vst [vmem:[%s29736_s22 + $0x178] sm:$0xff] %v741_v47   ;;  %v745_v48 = vld [vmem:[%s29728_s29 + $0x300] sm:$0xff]   ;;  %v749_v49 = vld [vmem:[%s29728_s29 + $0x310] sm:$0xff]  }
  0x35   : > { %v753_v50 = vld [vmem:[%s29728_s29 + $0x320] sm:$0xff]   ;;  %746 = vst [vmem:[%s29736_s22 + $0x180] sm:$0xff] %v745_v48   ;;  %750 = vst [vmem:[%s29736_s22 + $0x188] sm:$0xff] %v749_v49   ;;  %v757_v51 = vld [vmem:[%s29728_s29 + $0x330] sm:$0xff]  }
  0x36   : > { %754 = vst [vmem:[%s29736_s22 + $0x190] sm:$0xff] %v753_v50   ;;  %v761_v52 = vld [vmem:[%s29728_s29 + $0x340] sm:$0xff]   ;;  %v765_v53 = vld [vmem:[%s29728_s29 + $0x350] sm:$0xff]   ;;  %758 = vst [vmem:[%s29736_s22 + $0x198] sm:$0xff] %v757_v51  }
  0x37   : > { %762 = vst [vmem:[%s29736_s22 + $0x1a0] sm:$0xff] %v761_v52   ;;  %766 = vst [vmem:[%s29736_s22 + $0x1a8] sm:$0xff] %v765_v53   ;;  %v769_v54 = vld [vmem:[%s29728_s29 + $0x360] sm:$0xff]   ;;  %v773_v55 = vld [vmem:[%s29728_s29 + $0x370] sm:$0xff]  }
  0x38   : > { %v777_v56 = vld [vmem:[%s29728_s29 + $0x380] sm:$0xff]   ;;  %770 = vst [vmem:[%s29736_s22 + $0x1b0] sm:$0xff] %v769_v54   ;;  %774 = vst [vmem:[%s29736_s22 + $0x1b8] sm:$0xff] %v773_v55   ;;  %v781_v57 = vld [vmem:[%s29728_s29 + $0x390] sm:$0xff]  }
  0x39   : > { %778 = vst [vmem:[%s29736_s22 + $0x1c0] sm:$0xff] %v777_v56   ;;  %v785_v58 = vld [vmem:[%s29728_s29 + $0x3a0] sm:$0xff]   ;;  %v789_v59 = vld [vmem:[%s29728_s29 + $0x3b0] sm:$0xff]   ;;  %782 = vst [vmem:[%s29736_s22 + $0x1c8] sm:$0xff] %v781_v57  }
  0x3a   : > { %786 = vst [vmem:[%s29736_s22 + $0x1d0] sm:$0xff] %v785_v58   ;;  %790 = vst [vmem:[%s29736_s22 + $0x1d8] sm:$0xff] %v789_v59   ;;  %v793_v60 = vld [vmem:[%s29728_s29 + $0x3c0] sm:$0xff]   ;;  %v797_v61 = vld [vmem:[%s29728_s29 + $0x3d0] sm:$0xff]  }
  0x3b   : > { %v801_v62 = vld [vmem:[%s29728_s29 + $0x3e0] sm:$0xff]   ;;  %794 = vst [vmem:[%s29736_s22 + $0x1e0] sm:$0xff] %v793_v60   ;;  %798 = vst [vmem:[%s29736_s22 + $0x1e8] sm:$0xff] %v797_v61   ;;  %v805_v63 = vld [vmem:[%s29728_s29 + $0x3f0] sm:$0xff]  }
  0x3c   : > { %802 = vst [vmem:[%s29736_s22 + $0x1f0] sm:$0xff] %v801_v62   ;;  %v809_v0 = vld [vmem:[%s29728_s29 + $0x400] sm:$0xff]   ;;  %v813_v1 = vld [vmem:[%s29728_s29 + $0x410] sm:$0xff]   ;;  %806 = vst [vmem:[%s29736_s22 + $0x1f8] sm:$0xff] %v805_v63  }
  0x3d   : > { %810 = vst [vmem:[%s29736_s22 + $0x200] sm:$0xff] %v809_v0   ;;  %814 = vst [vmem:[%s29736_s22 + $0x208] sm:$0xff] %v813_v1   ;;  %v817_v2 = vld [vmem:[%s29728_s29 + $0x420] sm:$0xff]   ;;  %v821_v3 = vld [vmem:[%s29728_s29 + $0x430] sm:$0xff]  }
  0x3e   : > { %v825_v4 = vld [vmem:[%s29728_s29 + $0x440] sm:$0xff]   ;;  %818 = vst [vmem:[%s29736_s22 + $0x210] sm:$0xff] %v817_v2   ;;  %822 = vst [vmem:[%s29736_s22 + $0x218] sm:$0xff] %v821_v3   ;;  %v829_v5 = vld [vmem:[%s29728_s29 + $0x450] sm:$0xff]  }
  0x3f   : > { %826 = vst [vmem:[%s29736_s22 + $0x220] sm:$0xff] %v825_v4   ;;  %v833_v6 = vld [vmem:[%s29728_s29 + $0x460] sm:$0xff]   ;;  %v837_v7 = vld [vmem:[%s29728_s29 + $0x470] sm:$0xff]   ;;  %830 = vst [vmem:[%s29736_s22 + $0x228] sm:$0xff] %v829_v5  }
  0x40   : > { %834 = vst [vmem:[%s29736_s22 + $0x230] sm:$0xff] %v833_v6   ;;  %838 = vst [vmem:[%s29736_s22 + $0x238] sm:$0xff] %v837_v7   ;;  %v841_v8 = vld [vmem:[%s29728_s29 + $0x480] sm:$0xff]   ;;  %v845_v9 = vld [vmem:[%s29728_s29 + $0x490] sm:$0xff]  }
  0x41   : > { %v849_v10 = vld [vmem:[%s29728_s29 + $0x4a0] sm:$0xff]   ;;  %842 = vst [vmem:[%s29736_s22 + $0x240] sm:$0xff] %v841_v8   ;;  %846 = vst [vmem:[%s29736_s22 + $0x248] sm:$0xff] %v845_v9   ;;  %v853_v11 = vld [vmem:[%s29728_s29 + $0x4b0] sm:$0xff]  }
  0x42   : > { %850 = vst [vmem:[%s29736_s22 + $0x250] sm:$0xff] %v849_v10   ;;  %v857_v12 = vld [vmem:[%s29728_s29 + $0x4c0] sm:$0xff]   ;;  %v861_v13 = vld [vmem:[%s29728_s29 + $0x4d0] sm:$0xff]   ;;  %854 = vst [vmem:[%s29736_s22 + $0x258] sm:$0xff] %v853_v11  }
  0x43   : > { %858 = vst [vmem:[%s29736_s22 + $0x260] sm:$0xff] %v857_v12   ;;  %862 = vst [vmem:[%s29736_s22 + $0x268] sm:$0xff] %v861_v13   ;;  %v865_v14 = vld [vmem:[%s29728_s29 + $0x4e0] sm:$0xff]   ;;  %v869_v15 = vld [vmem:[%s29728_s29 + $0x4f0] sm:$0xff]  }
  0x44   : > { %v873_v16 = vld [vmem:[%s29728_s29 + $0x500] sm:$0xff]   ;;  %866 = vst [vmem:[%s29736_s22 + $0x270] sm:$0xff] %v865_v14   ;;  %870 = vst [vmem:[%s29736_s22 + $0x278] sm:$0xff] %v869_v15   ;;  %v877_v17 = vld [vmem:[%s29728_s29 + $0x510] sm:$0xff]  }
  0x45   : > { %874 = vst [vmem:[%s29736_s22 + $0x280] sm:$0xff] %v873_v16   ;;  %v881_v18 = vld [vmem:[%s29728_s29 + $0x520] sm:$0xff]   ;;  %v885_v19 = vld [vmem:[%s29728_s29 + $0x530] sm:$0xff]   ;;  %878 = vst [vmem:[%s29736_s22 + $0x288] sm:$0xff] %v877_v17  }
  0x46   : > { %882 = vst [vmem:[%s29736_s22 + $0x290] sm:$0xff] %v881_v18   ;;  %886 = vst [vmem:[%s29736_s22 + $0x298] sm:$0xff] %v885_v19   ;;  %v889_v20 = vld [vmem:[%s29728_s29 + $0x540] sm:$0xff]   ;;  %v893_v21 = vld [vmem:[%s29728_s29 + $0x550] sm:$0xff]  }
  0x47   : > { %v897_v22 = vld [vmem:[%s29728_s29 + $0x560] sm:$0xff]   ;;  %890 = vst [vmem:[%s29736_s22 + $0x2a0] sm:$0xff] %v889_v20   ;;  %894 = vst [vmem:[%s29736_s22 + $0x2a8] sm:$0xff] %v893_v21   ;;  %v901_v23 = vld [vmem:[%s29728_s29 + $0x570] sm:$0xff]  }
  0x48   : > { %898 = vst [vmem:[%s29736_s22 + $0x2b0] sm:$0xff] %v897_v22   ;;  %v905_v24 = vld [vmem:[%s29728_s29 + $0x580] sm:$0xff]   ;;  %v909_v25 = vld [vmem:[%s29728_s29 + $0x590] sm:$0xff]   ;;  %902 = vst [vmem:[%s29736_s22 + $0x2b8] sm:$0xff] %v901_v23  }
  0x49   : > { %906 = vst [vmem:[%s29736_s22 + $0x2c0] sm:$0xff] %v905_v24   ;;  %910 = vst [vmem:[%s29736_s22 + $0x2c8] sm:$0xff] %v909_v25   ;;  %v913_v26 = vld [vmem:[%s29728_s29 + $0x5a0] sm:$0xff]   ;;  %v917_v27 = vld [vmem:[%s29728_s29 + $0x5b0] sm:$0xff]  }
  0x4a   : > { %v921_v28 = vld [vmem:[%s29728_s29 + $0x5c0] sm:$0xff]   ;;  %914 = vst [vmem:[%s29736_s22 + $0x2d0] sm:$0xff] %v913_v26   ;;  %918 = vst [vmem:[%s29736_s22 + $0x2d8] sm:$0xff] %v917_v27   ;;  %v925_v29 = vld [vmem:[%s29728_s29 + $0x5d0] sm:$0xff]  }
  0x4b   : > { %922 = vst [vmem:[%s29736_s22 + $0x2e0] sm:$0xff] %v921_v28   ;;  %v929_v30 = vld [vmem:[%s29728_s29 + $0x5e0] sm:$0xff]   ;;  %v933_v31 = vld [vmem:[%s29728_s29 + $0x5f0] sm:$0xff]   ;;  %926 = vst [vmem:[%s29736_s22 + $0x2e8] sm:$0xff] %v925_v29  }
  0x4c   : > { %930 = vst [vmem:[%s29736_s22 + $0x2f0] sm:$0xff] %v929_v30   ;;  %934 = vst [vmem:[%s29736_s22 + $0x2f8] sm:$0xff] %v933_v31   ;;  %v937_v32 = vld [vmem:[%s29728_s29 + $0x600] sm:$0xff]   ;;  %v941_v33 = vld [vmem:[%s29728_s29 + $0x610] sm:$0xff]  }
  0x4d   : > { %v945_v34 = vld [vmem:[%s29728_s29 + $0x620] sm:$0xff]   ;;  %938 = vst [vmem:[%s29736_s22 + $0x300] sm:$0xff] %v937_v32   ;;  %942 = vst [vmem:[%s29736_s22 + $0x308] sm:$0xff] %v941_v33   ;;  %v949_v35 = vld [vmem:[%s29728_s29 + $0x630] sm:$0xff]  }
  0x4e   : > { %946 = vst [vmem:[%s29736_s22 + $0x310] sm:$0xff] %v945_v34   ;;  %v953_v36 = vld [vmem:[%s29728_s29 + $0x640] sm:$0xff]   ;;  %v957_v37 = vld [vmem:[%s29728_s29 + $0x650] sm:$0xff]   ;;  %950 = vst [vmem:[%s29736_s22 + $0x318] sm:$0xff] %v949_v35  }
  0x4f   : > { %954 = vst [vmem:[%s29736_s22 + $0x320] sm:$0xff] %v953_v36   ;;  %958 = vst [vmem:[%s29736_s22 + $0x328] sm:$0xff] %v957_v37   ;;  %v961_v38 = vld [vmem:[%s29728_s29 + $0x660] sm:$0xff]   ;;  %v965_v39 = vld [vmem:[%s29728_s29 + $0x670] sm:$0xff]  }
  0x50   : > { %v969_v40 = vld [vmem:[%s29728_s29 + $0x680] sm:$0xff]   ;;  %962 = vst [vmem:[%s29736_s22 + $0x330] sm:$0xff] %v961_v38   ;;  %966 = vst [vmem:[%s29736_s22 + $0x338] sm:$0xff] %v965_v39   ;;  %v973_v41 = vld [vmem:[%s29728_s29 + $0x690] sm:$0xff]  }
  0x51   : > { %970 = vst [vmem:[%s29736_s22 + $0x340] sm:$0xff] %v969_v40   ;;  %v977_v42 = vld [vmem:[%s29728_s29 + $0x6a0] sm:$0xff]   ;;  %v981_v43 = vld [vmem:[%s29728_s29 + $0x6b0] sm:$0xff]   ;;  %974 = vst [vmem:[%s29736_s22 + $0x348] sm:$0xff] %v973_v41  }
  0x52   : > { %978 = vst [vmem:[%s29736_s22 + $0x350] sm:$0xff] %v977_v42   ;;  %982 = vst [vmem:[%s29736_s22 + $0x358] sm:$0xff] %v981_v43   ;;  %v985_v44 = vld [vmem:[%s29728_s29 + $0x6c0] sm:$0xff]   ;;  %v989_v45 = vld [vmem:[%s29728_s29 + $0x6d0] sm:$0xff]  }
  0x53   : > { %v993_v46 = vld [vmem:[%s29728_s29 + $0x6e0] sm:$0xff]   ;;  %986 = vst [vmem:[%s29736_s22 + $0x360] sm:$0xff] %v985_v44   ;;  %990 = vst [vmem:[%s29736_s22 + $0x368] sm:$0xff] %v989_v45   ;;  %v997_v47 = vld [vmem:[%s29728_s29 + $0x6f0] sm:$0xff]  }
  0x54   : > { %994 = vst [vmem:[%s29736_s22 + $0x370] sm:$0xff] %v993_v46   ;;  %v1001_v48 = vld [vmem:[%s29728_s29 + $0x700] sm:$0xff]   ;;  %v1005_v49 = vld [vmem:[%s29728_s29 + $0x710] sm:$0xff]   ;;  %998 = vst [vmem:[%s29736_s22 + $0x378] sm:$0xff] %v997_v47  }
  0x55   : > { %1002 = vst [vmem:[%s29736_s22 + $0x380] sm:$0xff] %v1001_v48   ;;  %1006 = vst [vmem:[%s29736_s22 + $0x388] sm:$0xff] %v1005_v49   ;;  %v1009_v50 = vld [vmem:[%s29728_s29 + $0x720] sm:$0xff]   ;;  %v1013_v51 = vld [vmem:[%s29728_s29 + $0x730] sm:$0xff]  }
  0x56   : > { %v1017_v52 = vld [vmem:[%s29728_s29 + $0x740] sm:$0xff]   ;;  %1010 = vst [vmem:[%s29736_s22 + $0x390] sm:$0xff] %v1009_v50   ;;  %1014 = vst [vmem:[%s29736_s22 + $0x398] sm:$0xff] %v1013_v51   ;;  %v1021_v53 = vld [vmem:[%s29728_s29 + $0x750] sm:$0xff]  }
  0x57   : > { %1018 = vst [vmem:[%s29736_s22 + $0x3a0] sm:$0xff] %v1017_v52   ;;  %v1025_v54 = vld [vmem:[%s29728_s29 + $0x760] sm:$0xff]   ;;  %v1029_v55 = vld [vmem:[%s29728_s29 + $0x770] sm:$0xff]   ;;  %1022 = vst [vmem:[%s29736_s22 + $0x3a8] sm:$0xff] %v1021_v53  }
  0x58   : > { %1026 = vst [vmem:[%s29736_s22 + $0x3b0] sm:$0xff] %v1025_v54   ;;  %1030 = vst [vmem:[%s29736_s22 + $0x3b8] sm:$0xff] %v1029_v55   ;;  %v1033_v56 = vld [vmem:[%s29728_s29 + $0x780] sm:$0xff]   ;;  %v1037_v57 = vld [vmem:[%s29728_s29 + $0x790] sm:$0xff]  }
  0x59   : > { %v1041_v58 = vld [vmem:[%s29728_s29 + $0x7a0] sm:$0xff]   ;;  %1034 = vst [vmem:[%s29736_s22 + $0x3c0] sm:$0xff] %v1033_v56   ;;  %1038 = vst [vmem:[%s29736_s22 + $0x3c8] sm:$0xff] %v1037_v57   ;;  %v1045_v59 = vld [vmem:[%s29728_s29 + $0x7b0] sm:$0xff]  }
  0x5a   : > { %1042 = vst [vmem:[%s29736_s22 + $0x3d0] sm:$0xff] %v1041_v58   ;;  %v1049_v60 = vld [vmem:[%s29728_s29 + $0x7c0] sm:$0xff]   ;;  %v1053_v61 = vld [vmem:[%s29728_s29 + $0x7d0] sm:$0xff]   ;;  %1046 = vst [vmem:[%s29736_s22 + $0x3d8] sm:$0xff] %v1045_v59  }
  0x5b   : > { %1050 = vst [vmem:[%s29736_s22 + $0x3e0] sm:$0xff] %v1049_v60   ;;  %1054 = vst [vmem:[%s29736_s22 + $0x3e8] sm:$0xff] %v1053_v61   ;;  %v1057_v62 = vld [vmem:[%s29728_s29 + $0x7e0] sm:$0xff]   ;;  %v1061_v63 = vld [vmem:[%s29728_s29 + $0x7f0] sm:$0xff]  }
  0x5c   : > { %v1065_v0 = vld [vmem:[%s29728_s29 + $0x800] sm:$0xff]   ;;  %1058 = vst [vmem:[%s29736_s22 + $0x3f0] sm:$0xff] %v1057_v62   ;;  %1062 = vst [vmem:[%s29736_s22 + $0x3f8] sm:$0xff] %v1061_v63   ;;  %v1069_v1 = vld [vmem:[%s29728_s29 + $0x810] sm:$0xff]  }
  0x5d   : > { %1066 = vst [vmem:[%s29736_s22 + $0x400] sm:$0xff] %v1065_v0   ;;  %v1073_v2 = vld [vmem:[%s29728_s29 + $0x820] sm:$0xff]   ;;  %v1077_v3 = vld [vmem:[%s29728_s29 + $0x830] sm:$0xff]   ;;  %1070 = vst [vmem:[%s29736_s22 + $0x408] sm:$0xff] %v1069_v1  }
  0x5e   : > { %1074 = vst [vmem:[%s29736_s22 + $0x410] sm:$0xff] %v1073_v2   ;;  %1078 = vst [vmem:[%s29736_s22 + $0x418] sm:$0xff] %v1077_v3   ;;  %v1081_v4 = vld [vmem:[%s29728_s29 + $0x840] sm:$0xff]   ;;  %v1085_v5 = vld [vmem:[%s29728_s29 + $0x850] sm:$0xff]  }
  0x5f   : > { %v1089_v6 = vld [vmem:[%s29728_s29 + $0x860] sm:$0xff]   ;;  %1082 = vst [vmem:[%s29736_s22 + $0x420] sm:$0xff] %v1081_v4   ;;  %1086 = vst [vmem:[%s29736_s22 + $0x428] sm:$0xff] %v1085_v5   ;;  %v1093_v7 = vld [vmem:[%s29728_s29 + $0x870] sm:$0xff]  }
  0x60   : > { %1090 = vst [vmem:[%s29736_s22 + $0x430] sm:$0xff] %v1089_v6   ;;  %v1097_v8 = vld [vmem:[%s29728_s29 + $0x880] sm:$0xff]   ;;  %v1101_v9 = vld [vmem:[%s29728_s29 + $0x890] sm:$0xff]   ;;  %1094 = vst [vmem:[%s29736_s22 + $0x438] sm:$0xff] %v1093_v7  }
  0x61   : > { %1098 = vst [vmem:[%s29736_s22 + $0x440] sm:$0xff] %v1097_v8   ;;  %1102 = vst [vmem:[%s29736_s22 + $0x448] sm:$0xff] %v1101_v9   ;;  %v1105_v10 = vld [vmem:[%s29728_s29 + $0x8a0] sm:$0xff]   ;;  %v1109_v11 = vld [vmem:[%s29728_s29 + $0x8b0] sm:$0xff]  }
  0x62   : > { %v1113_v12 = vld [vmem:[%s29728_s29 + $0x8c0] sm:$0xff]   ;;  %1106 = vst [vmem:[%s29736_s22 + $0x450] sm:$0xff] %v1105_v10   ;;  %1110 = vst [vmem:[%s29736_s22 + $0x458] sm:$0xff] %v1109_v11   ;;  %v1117_v13 = vld [vmem:[%s29728_s29 + $0x8d0] sm:$0xff]  }
  0x63   : > { %1114 = vst [vmem:[%s29736_s22 + $0x460] sm:$0xff] %v1113_v12   ;;  %v1121_v14 = vld [vmem:[%s29728_s29 + $0x8e0] sm:$0xff]   ;;  %v1125_v15 = vld [vmem:[%s29728_s29 + $0x8f0] sm:$0xff]   ;;  %1118 = vst [vmem:[%s29736_s22 + $0x468] sm:$0xff] %v1117_v13  }
  0x64   : > { %1122 = vst [vmem:[%s29736_s22 + $0x470] sm:$0xff] %v1121_v14   ;;  %1126 = vst [vmem:[%s29736_s22 + $0x478] sm:$0xff] %v1125_v15   ;;  %v1129_v16 = vld [vmem:[%s29728_s29 + $0x900] sm:$0xff]   ;;  %v1133_v17 = vld [vmem:[%s29728_s29 + $0x910] sm:$0xff]  }
  0x65   : > { %v1137_v18 = vld [vmem:[%s29728_s29 + $0x920] sm:$0xff]   ;;  %1130 = vst [vmem:[%s29736_s22 + $0x480] sm:$0xff] %v1129_v16   ;;  %1134 = vst [vmem:[%s29736_s22 + $0x488] sm:$0xff] %v1133_v17   ;;  %v1141_v19 = vld [vmem:[%s29728_s29 + $0x930] sm:$0xff]  }
  0x66   : > { %1138 = vst [vmem:[%s29736_s22 + $0x490] sm:$0xff] %v1137_v18   ;;  %v1145_v20 = vld [vmem:[%s29728_s29 + $0x940] sm:$0xff]   ;;  %v1149_v21 = vld [vmem:[%s29728_s29 + $0x950] sm:$0xff]   ;;  %1142 = vst [vmem:[%s29736_s22 + $0x498] sm:$0xff] %v1141_v19  }
  0x67   : > { %1146 = vst [vmem:[%s29736_s22 + $0x4a0] sm:$0xff] %v1145_v20   ;;  %1150 = vst [vmem:[%s29736_s22 + $0x4a8] sm:$0xff] %v1149_v21  }
  0x68 PF: > { %p20118_p5 = scmp.ge.s32.totalorder %s29590_s20, 1  ;;  %p1774_p6 = scmp.lt.s32.totalorder %s29590_s20, 3 }
  0x6a   : > { %p1775_p7 = pnand %p20118_p5, %p1774_p6 }
  0x6c   : > { %1778 = sbr.rel (%p1775_p7) target bundleno = 6225 (0x1851), region = 133 }
  0x73   : > { %s35736_s25 = sld [smem:[#allocation327_spill]]  ;;  %s1781_s3 = sand.u32 1, %s29582_s0   ;;  %vm2876_vm0 = vcmask 130048   ;;  %vm14007_vm1 = vcmask 523264   ;;  %vm29593_vm2 = vmmov 0  }
  0x74   : > { %s28884_s28 = smul.u32 1200, %s1781_s3  ;;  %s36418_s3 = sld [smem:[#allocation329_spill]] }
  0x75   : > { %s36419_s26 = sld [smem:[#allocation328_spill]]  ;;  %s36676_s0 = sadd.s32 4294967295, %s29590_s20  }
  0x76   : > { %s30044_s21 = scalar_lea.vmem [#allocation2], %s28884_s28  ;;  %s20119_s2 = sshll.u32 %s36676_s0, 1 }
  0x77   : > { %v28913_v25 = vld [vmem:[%s30044_s21 + $0x8] sm:$0xff]   ;;  %v28914_v26 = vld [vmem:[%s30044_s21 + $0x10] sm:$0xff]   ;;  %v28916_v27 = vld [vmem:[%s30044_s21 + $0x18] sm:$0xff]   ;;  %p1838_p8 = scmp.lt.s32.totalorder %s20119_s2, 3 }
  0x78   : > { %23457 = vmatprep.mubr.msk.bf16.mxu1 %vm2876_vm0, %v28913_v25  ;;  %24037 = vmatprep.mubr.msk.bf16.mxu0 %vm2876_vm0, %v28914_v26  ;;  %v28917_v28 = vld [vmem:[%s30044_s21 + $0x20] sm:$0xff]   ;;  %v28918_v29 = vld [vmem:[%s30044_s21 + $0x28] sm:$0xff]   ;;  %v28919_v30 = vld [vmem:[%s30044_s21 + $0x30] sm:$0xff]  }
  0x79   : > { %v28911_v22 = vld [vmem:[%s35736_s25 + $0x10] sm:$0xff]   ;;  %v28912_v23 = vld [vmem:[%s35736_s25 + $0x8] sm:$0xff]   ;;  %v28915_v24 = vld [vmem:[%s35736_s25 + $0x18] sm:$0xff]   ;;  %s36681_s2 = smov (!%p1838_p8, %s20119_s2), 3 }
  0x7a   : > { %24035 = vmatprep.subr.bf16.mxu0 %v28911_v22  ;;  %23455 = vmatprep.subr.bf16.mxu1 %v28912_v23  ;;  %v28920_v31 = vld [vmem:[%s30044_s21 + $0x38] sm:$0xff]   ;;  %v28921_v32 = vld [vmem:[%s30044_s21 + $0x40] sm:$0xff]   ;;  %v28922_v33 = vld [vmem:[%s30044_s21 + $0x48] sm:$0xff]   ;;  %s20120_s24 = sshll.u32 %s36681_s2, 3 }
  0x7b   : > { %24036 = vmatpush3.bf16.msra.mxu0 %v28911_v22  ;;  %23456 = vmatpush3.bf16.msra.mxu1 %v28912_v23  ;;  %v28923_v34 = vld [vmem:[%s30044_s21 + $0x50] sm:$0xff]   ;;  %v28924_v35 = vld [vmem:[%s30044_s21 + $0x58] sm:$0xff]   ;;  %v28925_v36 = vld [vmem:[%s30044_s21 + $0x60] sm:$0xff]   ;;  %s1841_s22 = scalar_lea.vmem %s35630_s19, %s20120_s24 }
  0x7c   : > { %24325 = vmatprep.subr.bf16.mxu0 %v28915_v24  ;;  %v28926_v37 = vld [vmem:[%s30044_s21 + $0x68] sm:$0xff]   ;;  %v28927_v38 = vld [vmem:[%s30044_s21 + $0x70] sm:$0xff]   ;;  %v28928_v39 = vld [vmem:[%s30044_s21 + $0x78] sm:$0xff]  }
  0x7d   : > { %v28929_v40 = vld [vmem:[%s30044_s21 + $0x80] sm:$0xff]   ;;  %v28930_v41 = vld [vmem:[%s30044_s21 + $0x88] sm:$0xff]   ;;  %v28931_v42 = vld [vmem:[%s30044_s21 + $0x90] sm:$0xff]  }
  0x7e   : > { %23458 = vmatmul.mubr.msk.bf16.vlgmr.msra.gmra.mrb[0].mxu1 %vm2876_vm0, %v28914_v26  ;;  %24038 = vmatmul.mubr.msk.bf16.vlgmr.msra.gmra.mrb[0].mxu0 %vm2876_vm0, %v28916_v27  ;;  %v28932_v43 = vld [vmem:[%s30044_s21 + $0x98] sm:$0xff]   ;;  %v28933_v44 = vld [vmem:[%s30044_s21 + $0xa0] sm:$0xff]   ;;  %v28934_v45 = vld [vmem:[%s30044_s21 + $0xa8] sm:$0xff]  }
  0x7f   : > { %23461 = vmatprep.mubr.msk.bf16.mxu1 %vm2876_vm0, %v28916_v27  ;;  %24326 = vmatpush3.bf16.msra.mxu0 %v28915_v24  ;;  %v28935_v46 = vld [vmem:[%s30044_s21 + $0xb0] sm:$0xff]   ;;  %v28936_v47 = vld [vmem:[%s30044_s21 + $0xb8] sm:$0xff]   ;;  %v28937_v48 = vld [vmem:[%s30044_s21 + $0xc0] sm:$0xff]  }
  0x80   : > { %24041 = vmatprep.mubr.msk.bf16.mxu0 %vm2876_vm0, %v28917_v28  ;;  %v28938_v49 = vld [vmem:[%s30044_s21 + $0xc8] sm:$0xff]   ;;  %v28939_v50 = vld [vmem:[%s30044_s21 + $0xd0] sm:$0xff]   ;;  %v28940_v51 = vld [vmem:[%s30044_s21 + $0xd8] sm:$0xff]  }
  0x81   : > { %v28941_v52 = vld [vmem:[%s30044_s21 + $0xe0] sm:$0xff]   ;;  %v28942_v53 = vld [vmem:[%s30044_s21 + $0xe8] sm:$0xff]   ;;  %v28943_v54 = vld [vmem:[%s30044_s21 + $0xf0] sm:$0xff]  }
  0x82   : > { %v28944_v55 = vld [vmem:[%s30044_s21 + $0xf8] sm:$0xff]   ;;  %v28945_v56 = vld [vmem:[%s30044_s21 + $0x100] sm:$0xff]   ;;  %v28946_v57 = vld [vmem:[%s30044_s21 + $0x108] sm:$0xff]  }
  0x83   : > { %v28947_v58 = vld [vmem:[%s30044_s21 + $0x110] sm:$0xff]   ;;  %v28948_v59 = vld [vmem:[%s30044_s21 + $0x118] sm:$0xff]   ;;  %v28949_v60 = vld [vmem:[%s30044_s21 + $0x120] sm:$0xff]  }
  0x84   : > { %v28950_v61 = vld [vmem:[%s30044_s21 + $0x128] sm:$0xff]   ;;  %v28951_v62 = vld [vmem:[%s30044_s21 + $0x130] sm:$0xff]   ;;  %v28952_v63 = vld [vmem:[%s30044_s21 + $0x138] sm:$0xff]  }
  0x85   : > { %v28953_v0 = vld [vmem:[%s30044_s21 + $0x140] sm:$0xff]   ;;  %v28954_v1 = vld [vmem:[%s30044_s21 + $0x148] sm:$0xff]   ;;  %v28955_v2 = vld [vmem:[%s30044_s21 + $0x150] sm:$0xff]  }
  0x86   : > { %23462 = vmatmul.mubr.msk.bf16.gmra.mrb[4].mxu1 %vm2876_vm0, %v28917_v28  ;;  %24042 = vmatmul.mubr.msk.bf16.gmra.mrb[4].mxu0 %vm2876_vm0, %v28918_v29  ;;  %v28956_v3 = vld [vmem:[%s30044_s21 + $0x158] sm:$0xff]   ;;  %v28957_v4 = vld [vmem:[%s30044_s21 + $0x160] sm:$0xff]   ;;  %v28958_v5 = vld [vmem:[%s30044_s21 + $0x168] sm:$0xff]  }
  0x87   : > { %23465 = vmatprep.mubr.msk.bf16.mxu1 %vm2876_vm0, %v28918_v29  ;;  %24045 = vmatprep.mubr.msk.bf16.mxu0 %vm2876_vm0, %v28919_v30  ;;  %v28959_v6 = vld [vmem:[%s30044_s21 + $0x170] sm:$0xff]   ;;  %v30183_v7 = vld [vmem:[%s30044_s21 + $0x178] sm:$0xff]   ;;  %v30186_v8 = vld [vmem:[%s30044_s21 + $0x180] sm:$0xff]  }
  0x88   : > { %v30196_v9 = vld [vmem:[%s30044_s21 + $0x188] sm:$0xff]   ;;  %v30199_v10 = vld [vmem:[%s30044_s21 + $0x190] sm:$0xff]   ;;  %v30210_v11 = vld [vmem:[%s30044_s21 + $0x198] sm:$0xff]  }
  0x89   : > { %v30213_v12 = vld [vmem:[%s30044_s21 + $0x1a0] sm:$0xff]   ;;  %v30224_v13 = vld [vmem:[%s30044_s21 + $0x1a8] sm:$0xff]   ;;  %v30227_v14 = vld [vmem:[%s30044_s21 + $0x1b0] sm:$0xff]  }
  0x8a   : > { %v30238_v15 = vld [vmem:[%s30044_s21 + $0x1b8] sm:$0xff]   ;;  %v30241_v16 = vld [vmem:[%s30044_s21 + $0x1c0] sm:$0xff]   ;;  %v30252_v17 = vld [vmem:[%s30044_s21 + $0x1c8] sm:$0xff]  }
  0x8b   : > { %v30255_v18 = vld [vmem:[%s30044_s21 + $0x1d0] sm:$0xff]   ;;  %v30266_v19 = vld [vmem:[%s30044_s21 + $0x1d8] sm:$0xff]   ;;  %v30269_v20 = vld [vmem:[%s30044_s21 + $0x1e0] sm:$0xff]  }
  0x8c   : > { %v30280_v21 = vld [vmem:[%s30044_s21 + $0x1e8] sm:$0xff]   ;;  %v30283_v22 = vld [vmem:[%s30044_s21 + $0x1f0] sm:$0xff]   ;;  %v30294_v23 = vld [vmem:[%s30044_s21 + $0x1f8] sm:$0xff]  }
  0x8d   : > { %v30297_v24 = vld [vmem:[%s30044_s21 + $0x200] sm:$0xff]   ;;  %v30308_v25 = vld [vmem:[%s30044_s21 + $0x208] sm:$0xff]   ;;  %v30311_v26 = vld [vmem:[%s30044_s21 + $0x210] sm:$0xff]  }
  0x8e   : > { %23466 = vmatmul.mubr.msk.bf16.gmra.mrb[8].mxu1 %vm2876_vm0, %v28919_v30  ;;  %24046 = vmatmul.mubr.msk.bf16.gmra.mrb[8].mxu0 %vm2876_vm0, %v28920_v31  ;;  %v30322_v27 = vld [vmem:[%s30044_s21 + $0x218] sm:$0xff]   ;;  %v30325_v28 = vld [vmem:[%s30044_s21 + $0x220] sm:$0xff]   ;;  %v30336_v29 = vld [vmem:[%s30044_s21 + $0x228] sm:$0xff]  }
  0x8f   : > { %23469 = vmatprep.mubr.msk.bf16.mxu1 %vm2876_vm0, %v28920_v31  ;;  %24049 = vmatprep.mubr.msk.bf16.mxu0 %vm2876_vm0, %v28921_v32  ;;  %v30339_v30 = vld [vmem:[%s30044_s21 + $0x230] sm:$0xff]   ;;  %v30350_v31 = vld [vmem:[%s30044_s21 + $0x238] sm:$0xff]  }
  0x96   : > { %23470 = vmatmul.mubr.msk.bf16.gmra.mrb[12].mxu1 %vm2876_vm0, %v28921_v32  ;;  %24050 = vmatmul.mubr.msk.bf16.gmra.mrb[12].mxu0 %vm2876_vm0, %v28922_v33  ;;  %v30353_v32 = vld [vmem:[%s30044_s21 + $0x240] sm:$0xff]  }
  0x97   : > { %23473 = vmatprep.mubr.msk.bf16.mxu1 %vm2876_vm0, %v28922_v33  ;;  %24053 = vmatprep.mubr.msk.bf16.mxu0 %vm2876_vm0, %v28923_v34  ;;  %v30364_v33 = vld [vmem:[%s30044_s21 + $0x248] sm:$0xff]  }
  0x9e   : > { %23474 = vmatmul.mubr.msk.bf16.gmra.mrb[16].mxu1 %vm2876_vm0, %v28923_v34  ;;  %24054 = vmatmul.mubr.msk.bf16.gmra.mrb[16].mxu0 %vm2876_vm0, %v28924_v35  ;;  %v30367_v34 = vld [vmem:[%s30044_s21 + $0x250] sm:$0xff]  }
  0x9f   : > { %23477 = vmatprep.mubr.msk.bf16.mxu1 %vm2876_vm0, %v28924_v35  ;;  %24057 = vmatprep.mubr.msk.bf16.mxu0 %vm2876_vm0, %v28925_v36  ;;  %v30378_v35 = vld [vmem:[%s30044_s21 + $0x258] sm:$0xff]  }
  0xa6   : > { %23478 = vmatmul.mubr.msk.bf16.gmra.mrb[20].mxu1 %vm2876_vm0, %v28925_v36  ;;  %24058 = vmatmul.mubr.msk.bf16.gmra.mrb[20].mxu0 %vm2876_vm0, %v28926_v37  ;;  %v30381_v36 = vld [vmem:[%s30044_s21 + $0x260] sm:$0xff]  }
  0xa7   : > { %23481 = vmatprep.mubr.msk.bf16.mxu1 %vm2876_vm0, %v28926_v37  ;;  %24061 = vmatprep.mubr.msk.bf16.mxu0 %vm2876_vm0, %v28927_v38  ;;  %v30392_v37 = vld [vmem:[%s30044_s21 + $0x268] sm:$0xff]  }
  0xae   : > { %23482 = vmatmul.mubr.msk.bf16.gmra.mrb[24].mxu1 %vm2876_vm0, %v28927_v38  ;;  %24062 = vmatmul.mubr.msk.bf16.gmra.mrb[24].mxu0 %vm2876_vm0, %v28928_v39  ;;  %v30395_v38 = vld [vmem:[%s30044_s21 + $0x270] sm:$0xff]  }
  0xaf   : > { %23485 = vmatprep.mubr.msk.bf16.mxu1 %vm2876_vm0, %v28928_v39  ;;  %24065 = vmatprep.mubr.msk.bf16.mxu0 %vm2876_vm0, %v28929_v40  ;;  %v30406_v39 = vld [vmem:[%s30044_s21 + $0x278] sm:$0xff]  }
  0xb6   : > { %23486 = vmatmul.mubr.msk.bf16.gmra.mrb[28].mxu1 %vm2876_vm0, %v28929_v40  ;;  %24066 = vmatmul.mubr.msk.bf16.gmra.mrb[28].mxu0 %vm2876_vm0, %v28930_v41  ;;  %v30409_v40 = vld [vmem:[%s30044_s21 + $0x280] sm:$0xff]  }
  0xb7   : > { %23489 = vmatprep.mubr.msk.bf16.mxu1 %vm2876_vm0, %v28930_v41  ;;  %24069 = vmatprep.mubr.msk.bf16.mxu0 %vm2876_vm0, %v28931_v42  ;;  %v30420_v41 = vld [vmem:[%s30044_s21 + $0x288] sm:$0xff]  }
  0xbe   : > { %23490 = vmatmul.mubr.msk.bf16.gmra.mrb[32].mxu1 %vm2876_vm0, %v28931_v42  ;;  %24070 = vmatmul.mubr.msk.bf16.gmra.mrb[32].mxu0 %vm2876_vm0, %v28932_v43  ;;  %v30423_v42 = vld [vmem:[%s30044_s21 + $0x290] sm:$0xff]  }
  0xbf   : > { %23493 = vmatprep.mubr.msk.bf16.mxu1 %vm2876_vm0, %v28932_v43  ;;  %24073 = vmatprep.mubr.msk.bf16.mxu0 %vm2876_vm0, %v28933_v44  ;;  %v30434_v43 = vld [vmem:[%s30044_s21 + $0x298] sm:$0xff]  }
  0xc6   : > { %23494 = vmatmul.mubr.msk.bf16.gmra.mrb[36].mxu1 %vm2876_vm0, %v28933_v44  ;;  %24074 = vmatmul.mubr.msk.bf16.gmra.mrb[36].mxu0 %vm2876_vm0, %v28934_v45  ;;  %v30437_v44 = vld [vmem:[%s30044_s21 + $0x2a0] sm:$0xff]  }
  0xc7   : > { %23497 = vmatprep.mubr.msk.bf16.mxu1 %vm2876_vm0, %v28934_v45  ;;  %24077 = vmatprep.mubr.msk.bf16.mxu0 %vm2876_vm0, %v28935_v46  ;;  %v30448_v45 = vld [vmem:[%s30044_s21 + $0x2a8] sm:$0xff]  }
  0xce   : > { %23498 = vmatmul.mubr.msk.bf16.gmra.mrb[40].mxu1 %vm2876_vm0, %v28935_v46  ;;  %24078 = vmatmul.mubr.msk.bf16.gmra.mrb[40].mxu0 %vm2876_vm0, %v28936_v47  ;;  %v30451_v46 = vld [vmem:[%s30044_s21 + $0x2b0] sm:$0xff]  }
  0xcf   : > { %23501 = vmatprep.mubr.msk.bf16.mxu1 %vm2876_vm0, %v28936_v47  ;;  %24081 = vmatprep.mubr.msk.bf16.mxu0 %vm2876_vm0, %v28937_v48  ;;  %v30462_v47 = vld [vmem:[%s30044_s21 + $0x2b8] sm:$0xff]  }
  0xd6   : > { %23502 = vmatmul.mubr.msk.bf16.gmra.mrb[44].mxu1 %vm2876_vm0, %v28937_v48  ;;  %24082 = vmatmul.mubr.msk.bf16.gmra.mrb[44].mxu0 %vm2876_vm0, %v28938_v49  ;;  %v30465_v48 = vld [vmem:[%s30044_s21 + $0x2c0] sm:$0xff]  }
  0xd7   : > { %23505 = vmatprep.mubr.msk.bf16.mxu1 %vm2876_vm0, %v28938_v49  ;;  %24085 = vmatprep.mubr.msk.bf16.mxu0 %vm2876_vm0, %v28939_v50  ;;  %v30476_v49 = vld [vmem:[%s30044_s21 + $0x2c8] sm:$0xff]  }
  0xde   : > { %23506 = vmatmul.mubr.msk.bf16.gmra.mrb[48].mxu1 %vm2876_vm0, %v28939_v50  ;;  %24086 = vmatmul.mubr.msk.bf16.gmra.mrb[48].mxu0 %vm2876_vm0, %v28940_v51  ;;  %v30479_v50 = vld [vmem:[%s30044_s21 + $0x2d0] sm:$0xff]  }
  0xdf   : > { %23509 = vmatprep.mubr.msk.bf16.mxu1 %vm2876_vm0, %v28940_v51  ;;  %24089 = vmatprep.mubr.msk.bf16.mxu0 %vm2876_vm0, %v28941_v52  ;;  %v30490_v51 = vld [vmem:[%s30044_s21 + $0x2d8] sm:$0xff]  }
  0xe6   : > { %23510 = vmatmul.mubr.msk.bf16.gmra.mrb[52].mxu1 %vm2876_vm0, %v28941_v52  ;;  %24090 = vmatmul.mubr.msk.bf16.gmra.mrb[52].mxu0 %vm2876_vm0, %v28942_v53  ;;  %v30493_v52 = vld [vmem:[%s30044_s21 + $0x2e0] sm:$0xff]  }
  0xe7   : > { %23513 = vmatprep.mubr.msk.bf16.mxu1 %vm2876_vm0, %v28942_v53  ;;  %24093 = vmatprep.mubr.msk.bf16.mxu0 %vm2876_vm0, %v28943_v54  ;;  %v30504_v53 = vld [vmem:[%s30044_s21 + $0x2e8] sm:$0xff]  }
  0xee   : > { %23514 = vmatmul.mubr.msk.bf16.gmra.mrb[56].mxu1 %vm2876_vm0, %v28943_v54  ;;  %24094 = vmatmul.mubr.msk.bf16.gmra.mrb[56].mxu0 %vm2876_vm0, %v28944_v55  ;;  %v29007_v54 = vld [vmem:[%s30044_s21 + $0x2f0] sm:$0xff]  }
  0xef   : > { %23517 = vmatprep.mubr.msk.bf16.mxu1 %vm2876_vm0, %v28944_v55  ;;  %24097 = vmatprep.mubr.msk.bf16.mxu0 %vm2876_vm0, %v28945_v56  ;;  %v30515_v55 = vld [vmem:[%s30044_s21 + $0x2f8] sm:$0xff]  }
  0xf6   : > { %23518 = vmatmul.mubr.msk.bf16.gmra.mrb[60].mxu1 %vm2876_vm0, %v28945_v56  ;;  %24098 = vmatmul.mubr.msk.bf16.gmra.mrb[60].mxu0 %vm2876_vm0, %v28946_v57  ;;  %v29009_v56 = vld [vmem:[%s30044_s21 + $0x300] sm:$0xff]  }
  0xf7   : > { %23521 = vmatprep.mubr.msk.bf16.mxu1 %vm2876_vm0, %v28946_v57  ;;  %24101 = vmatprep.mubr.msk.bf16.mxu0 %vm2876_vm0, %v28947_v58  ;;  %v29010_v57 = vld [vmem:[%s30044_s21 + $0x308] sm:$0xff]  }
  0xfe   : > { %23522 = vmatmul.mubr.msk.bf16.gmra.mrb[64].mxu1 %vm2876_vm0, %v28947_v58  ;;  %24102 = vmatmul.mubr.msk.bf16.gmra.mrb[64].mxu0 %vm2876_vm0, %v28948_v59  ;;  %v29011_v58 = vld [vmem:[%s30044_s21 + $0x310] sm:$0xff]  }
  0xff   : > { %23525 = vmatprep.mubr.msk.bf16.mxu1 %vm2876_vm0, %v28948_v59  ;;  %24105 = vmatprep.mubr.msk.bf16.mxu0 %vm2876_vm0, %v28949_v60  ;;  %v29012_v59 = vld [vmem:[%s30044_s21 + $0x318] sm:$0xff]  }
 0x106   : > { %23526 = vmatmul.mubr.msk.bf16.gmra.mrb[68].mxu1 %vm2876_vm0, %v28949_v60  ;;  %24106 = vmatmul.mubr.msk.bf16.gmra.mrb[68].mxu0 %vm2876_vm0, %v28950_v61  ;;  %v29013_v60 = vld [vmem:[%s30044_s21 + $0x320] sm:$0xff]  }
 0x107   : > { %23529 = vmatprep.mubr.msk.bf16.mxu1 %vm2876_vm0, %v28950_v61  ;;  %24109 = vmatprep.mubr.msk.bf16.mxu0 %vm2876_vm0, %v28951_v62  ;;  %v29014_v61 = vld [vmem:[%s30044_s21 + $0x328] sm:$0xff]  }
 0x10e   : > { %23530 = vmatmul.mubr.msk.bf16.gmra.mrb[72].mxu1 %vm2876_vm0, %v28951_v62  ;;  %24110 = vmatmul.mubr.msk.bf16.gmra.mrb[72].mxu0 %vm2876_vm0, %v28952_v63  ;;  %v29015_v62 = vld [vmem:[%s30044_s21 + $0x330] sm:$0xff]  }
 0x10f   : > { %23533 = vmatprep.mubr.msk.bf16.mxu1 %vm2876_vm0, %v28952_v63  ;;  %24113 = vmatprep.mubr.msk.bf16.mxu0 %vm2876_vm0, %v28953_v0  ;;  %v29016_v63 = vld [vmem:[%s30044_s21 + $0x338] sm:$0xff]  }
 0x116   : > { %23534 = vmatmul.mubr.msk.bf16.gmra.mrb[76].mxu1 %vm2876_vm0, %v28953_v0  ;;  %24114 = vmatmul.mubr.msk.bf16.gmra.mrb[76].mxu0 %vm2876_vm0, %v28954_v1  ;;  %v29017_v0 = vld [vmem:[%s30044_s21 + $0x340] sm:$0xff]  }
 0x117   : > { %23537 = vmatprep.mubr.msk.bf16.mxu1 %vm2876_vm0, %v28954_v1  ;;  %24117 = vmatprep.mubr.msk.bf16.mxu0 %vm2876_vm0, %v28955_v2  ;;  %v29018_v1 = vld [vmem:[%s30044_s21 + $0x348] sm:$0xff]  }
 0x11e   : > { %23538 = vmatmul.mubr.msk.bf16.gmra.mrb[80].mxu1 %vm2876_vm0, %v28955_v2  ;;  %24118 = vmatmul.mubr.msk.bf16.gmra.mrb[80].mxu0 %vm2876_vm0, %v28956_v3  ;;  %v29019_v2 = vld [vmem:[%s30044_s21 + $0x350] sm:$0xff]  }
 0x11f   : > { %23541 = vmatprep.mubr.msk.bf16.mxu1 %vm2876_vm0, %v28956_v3  ;;  %24121 = vmatprep.mubr.msk.bf16.mxu0 %vm2876_vm0, %v28957_v4  ;;  %v29020_v3 = vld [vmem:[%s30044_s21 + $0x358] sm:$0xff]  }
 0x126   : > { %23542 = vmatmul.mubr.msk.bf16.gmra.mrb[84].mxu1 %vm2876_vm0, %v28957_v4  ;;  %24122 = vmatmul.mubr.msk.bf16.gmra.mrb[84].mxu0 %vm2876_vm0, %v28958_v5  ;;  %v29021_v4 = vld [vmem:[%s30044_s21 + $0x360] sm:$0xff]  }
 0x127   : > { %23545 = vmatprep.mubr.msk.bf16.mxu1 %vm2876_vm0, %v28958_v5  ;;  %24125 = vmatprep.mubr.msk.bf16.mxu0 %vm2876_vm0, %v28959_v6  ;;  %v29022_v5 = vld [vmem:[%s30044_s21 + $0x368] sm:$0xff]  }
 0x12e   : > { %23546 = vmatmul.mubr.msk.bf16.gmra.mrb[88].mxu1 %vm2876_vm0, %v28959_v6  ;;  %24126 = vmatmul.mubr.msk.bf16.gmra.mrb[88].mxu0 %vm2876_vm0, %v30183_v7  ;;  %v29023_v6 = vld [vmem:[%s30044_s21 + $0x370] sm:$0xff]  }
 0x12f   : > { %23549 = vmatprep.mubr.msk.bf16.mxu1 %vm2876_vm0, %v30183_v7  ;;  %24129 = vmatprep.mubr.msk.bf16.mxu0 %vm2876_vm0, %v30186_v8 }
 0x136   : > { %23550 = vmatmul.mubr.msk.bf16.gmra.mrb[92].mxu1 %vm2876_vm0, %v30186_v8  ;;  %24130 = vmatmul.mubr.msk.bf16.gmra.mrb[92].mxu0 %vm2876_vm0, %v30196_v9 }
 0x137   : > { %23553 = vmatprep.mubr.msk.bf16.mxu1 %vm2876_vm0, %v30196_v9  ;;  %24133 = vmatprep.mubr.msk.bf16.mxu0 %vm2876_vm0, %v30199_v10 }
 0x13e   : > { %23554 = vmatmul.mubr.msk.bf16.gmra.mrb[96].mxu1 %vm2876_vm0, %v30199_v10  ;;  %24134 = vmatmul.mubr.msk.bf16.gmra.mrb[96].mxu0 %vm2876_vm0, %v30210_v11 }
 0x13f   : > { %23557 = vmatprep.mubr.msk.bf16.mxu1 %vm2876_vm0, %v30210_v11  ;;  %24137 = vmatprep.mubr.msk.bf16.mxu0 %vm2876_vm0, %v30213_v12 }
 0x146   : > { %23558 = vmatmul.mubr.msk.bf16.gmra.mrb[100].mxu1 %vm2876_vm0, %v30213_v12  ;;  %24138 = vmatmul.mubr.msk.bf16.gmra.mrb[100].mxu0 %vm2876_vm0, %v30224_v13 }
 0x147   : > { %23561 = vmatprep.mubr.msk.bf16.mxu1 %vm2876_vm0, %v30224_v13  ;;  %24141 = vmatprep.mubr.msk.bf16.mxu0 %vm2876_vm0, %v30227_v14 }
 0x14e   : > { %23562 = vmatmul.mubr.msk.bf16.gmra.mrb[104].mxu1 %vm2876_vm0, %v30227_v14  ;;  %24142 = vmatmul.mubr.msk.bf16.gmra.mrb[104].mxu0 %vm2876_vm0, %v30238_v15 }
 0x14f   : > { %23565 = vmatprep.mubr.msk.bf16.mxu1 %vm2876_vm0, %v30238_v15  ;;  %24145 = vmatprep.mubr.msk.bf16.mxu0 %vm2876_vm0, %v30241_v16 }
 0x156   : > { %23566 = vmatmul.mubr.msk.bf16.gmra.mrb[108].mxu1 %vm2876_vm0, %v30241_v16  ;;  %24146 = vmatmul.mubr.msk.bf16.gmra.mrb[108].mxu0 %vm2876_vm0, %v30252_v17 }
 0x157   : > { %23569 = vmatprep.mubr.msk.bf16.mxu1 %vm2876_vm0, %v30252_v17  ;;  %24149 = vmatprep.mubr.msk.bf16.mxu0 %vm2876_vm0, %v30255_v18 }
 0x15e   : > { %23570 = vmatmul.mubr.msk.bf16.gmra.mrb[112].mxu1 %vm2876_vm0, %v30255_v18  ;;  %24150 = vmatmul.mubr.msk.bf16.gmra.mrb[112].mxu0 %vm2876_vm0, %v30266_v19 }
 0x15f   : > { %23573 = vmatprep.mubr.msk.bf16.mxu1 %vm2876_vm0, %v30266_v19  ;;  %24153 = vmatprep.mubr.msk.bf16.mxu0 %vm2876_vm0, %v30269_v20 }
 0x166   : > { %23574 = vmatmul.mubr.msk.bf16.gmra.mrb[116].mxu1 %vm2876_vm0, %v30269_v20  ;;  %24154 = vmatmul.mubr.msk.bf16.gmra.mrb[116].mxu0 %vm2876_vm0, %v30280_v21 }
 0x167   : > { %23577 = vmatprep.mubr.msk.bf16.mxu1 %vm2876_vm0, %v30280_v21  ;;  %24157 = vmatprep.mubr.msk.bf16.mxu0 %vm2876_vm0, %v30283_v22 }
 0x16e   : > { %23578 = vmatmul.mubr.msk.bf16.gmra.mrb[120].mxu1 %vm2876_vm0, %v30283_v22  ;;  %24158 = vmatmul.mubr.msk.bf16.gmra.mrb[120].mxu0 %vm2876_vm0, %v30294_v23 }
 0x16f   : > { %23581 = vmatprep.mubr.msk.bf16.mxu1 %vm2876_vm0, %v30294_v23  ;;  %24161 = vmatprep.mubr.msk.bf16.mxu0 %vm2876_vm0, %v30297_v24 }
 0x176   : > { %23582 = vmatmul.mubr.msk.bf16.gmra.mrb[124].mxu1 %vm2876_vm0, %v30297_v24  ;;  %24162 = vmatmul.mubr.msk.bf16.gmra.mrb[124].mxu0 %vm2876_vm0, %v30308_v25 }
 0x177   : > { %23585 = vmatprep.mubr.msk.bf16.mxu1 %vm2876_vm0, %v30308_v25  ;;  %24165 = vmatprep.mubr.msk.bf16.mxu0 %vm2876_vm0, %v30311_v26 }
 0x17e   : > { %23586 = vmatmul.mubr.msk.bf16.gmra.mrb[128].mxu1 %vm2876_vm0, %v30311_v26  ;;  %24166 = vmatmul.mubr.msk.bf16.gmra.mrb[128].mxu0 %vm2876_vm0, %v30322_v27 }
 0x17f   : > { %23589 = vmatprep.mubr.msk.bf16.mxu1 %vm2876_vm0, %v30322_v27  ;;  %24169 = vmatprep.mubr.msk.bf16.mxu0 %vm2876_vm0, %v30325_v28 }
 0x186   : > { %23590 = vmatmul.mubr.msk.bf16.gmra.mrb[132].mxu1 %vm2876_vm0, %v30325_v28  ;;  %24170 = vmatmul.mubr.msk.bf16.gmra.mrb[132].mxu0 %vm2876_vm0, %v30336_v29 }
 0x187   : > { %23593 = vmatprep.mubr.msk.bf16.mxu1 %vm2876_vm0, %v30336_v29  ;;  %24173 = vmatprep.mubr.msk.bf16.mxu0 %vm2876_vm0, %v30339_v30 }
 0x18e   : > { %23594 = vmatmul.mubr.msk.bf16.gmra.mrb[136].mxu1 %vm2876_vm0, %v30339_v30  ;;  %24174 = vmatmul.mubr.msk.bf16.gmra.mrb[136].mxu0 %vm2876_vm0, %v30350_v31 }
 0x18f   : > { %23597 = vmatprep.mubr.msk.bf16.mxu1 %vm2876_vm0, %v30350_v31  ;;  %24177 = vmatprep.mubr.msk.bf16.mxu0 %vm2876_vm0, %v30353_v32 }
 0x196   : > { %23598 = vmatmul.mubr.msk.bf16.gmra.mrb[140].mxu1 %vm2876_vm0, %v30353_v32  ;;  %24178 = vmatmul.mubr.msk.bf16.gmra.mrb[140].mxu0 %vm2876_vm0, %v30364_v33 }
 0x197   : > { %23601 = vmatprep.mubr.msk.bf16.mxu1 %vm2876_vm0, %v30364_v33  ;;  %24181 = vmatprep.mubr.msk.bf16.mxu0 %vm2876_vm0, %v30367_v34 }
 0x19e   : > { %23602 = vmatmul.mubr.msk.bf16.gmra.mrb[144].mxu1 %vm2876_vm0, %v30367_v34  ;;  %24182 = vmatmul.mubr.msk.bf16.gmra.mrb[144].mxu0 %vm2876_vm0, %v30378_v35 }
 0x19f   : > { %23605 = vmatprep.mubr.msk.bf16.mxu1 %vm2876_vm0, %v30378_v35  ;;  %24185 = vmatprep.mubr.msk.bf16.mxu0 %vm2876_vm0, %v30381_v36 }
 0x1a6   : > { %23606 = vmatmul.mubr.msk.bf16.gmra.mrb[148].mxu1 %vm2876_vm0, %v30381_v36  ;;  %24186 = vmatmul.mubr.msk.bf16.gmra.mrb[148].mxu0 %vm2876_vm0, %v30392_v37 }
 0x1a7   : > { %23609 = vmatprep.mubr.msk.bf16.mxu1 %vm2876_vm0, %v30392_v37  ;;  %24189 = vmatprep.mubr.msk.bf16.mxu0 %vm2876_vm0, %v30395_v38 }
 0x1ae   : > { %23610 = vmatmul.mubr.msk.bf16.gmra.mrb[152].mxu1 %vm2876_vm0, %v30395_v38  ;;  %24190 = vmatmul.mubr.msk.bf16.gmra.mrb[152].mxu0 %vm2876_vm0, %v30406_v39 }
 0x1af   : > { %23613 = vmatprep.mubr.msk.bf16.mxu1 %vm2876_vm0, %v30406_v39  ;;  %24193 = vmatprep.mubr.msk.bf16.mxu0 %vm2876_vm0, %v30409_v40 }
 0x1b6   : > { %23614 = vmatmul.mubr.msk.bf16.gmra.mrb[156].mxu1 %vm2876_vm0, %v30409_v40  ;;  %24194 = vmatmul.mubr.msk.bf16.gmra.mrb[156].mxu0 %vm2876_vm0, %v30420_v41 }
 0x1b7   : > { %23617 = vmatprep.mubr.msk.bf16.mxu1 %vm2876_vm0, %v30420_v41  ;;  %24197 = vmatprep.mubr.msk.bf16.mxu0 %vm2876_vm0, %v30423_v42 }
 0x1be   : > { %23618 = vmatmul.mubr.msk.bf16.gmra.mrb[160].mxu1 %vm2876_vm0, %v30423_v42  ;;  %24198 = vmatmul.mubr.msk.bf16.gmra.mrb[160].mxu0 %vm2876_vm0, %v30434_v43 }
 0x1bf   : > { %23621 = vmatprep.mubr.msk.bf16.mxu1 %vm2876_vm0, %v30434_v43  ;;  %24201 = vmatprep.mubr.msk.bf16.mxu0 %vm2876_vm0, %v30437_v44 }
 0x1c6   : > { %23622 = vmatmul.mubr.msk.bf16.gmra.mrb[164].mxu1 %vm2876_vm0, %v30437_v44  ;;  %24202 = vmatmul.mubr.msk.bf16.gmra.mrb[164].mxu0 %vm2876_vm0, %v30448_v45 }
 0x1c7   : > { %23625 = vmatprep.mubr.msk.bf16.mxu1 %vm2876_vm0, %v30448_v45  ;;  %24205 = vmatprep.mubr.msk.bf16.mxu0 %vm2876_vm0, %v30451_v46 }
 0x1ce   : > { %23626 = vmatmul.mubr.msk.bf16.gmra.mrb[168].mxu1 %vm2876_vm0, %v30451_v46  ;;  %24206 = vmatmul.mubr.msk.bf16.gmra.mrb[168].mxu0 %vm2876_vm0, %v30462_v47 }
 0x1cf   : > { %23629 = vmatprep.mubr.msk.bf16.mxu1 %vm2876_vm0, %v30462_v47  ;;  %24209 = vmatprep.mubr.msk.bf16.mxu0 %vm2876_vm0, %v30465_v48 }
 0x1d6   : > { %23630 = vmatmul.mubr.msk.bf16.gmra.mrb[172].mxu1 %vm2876_vm0, %v30465_v48  ;;  %24210 = vmatmul.mubr.msk.bf16.gmra.mrb[172].mxu0 %vm2876_vm0, %v30476_v49 }
 0x1d7   : > { %23633 = vmatprep.mubr.msk.bf16.mxu1 %vm2876_vm0, %v30476_v49  ;;  %24213 = vmatprep.mubr.msk.bf16.mxu0 %vm2876_vm0, %v30479_v50 }
 0x1de   : > { %23634 = vmatmul.mubr.msk.bf16.gmra.mrb[176].mxu1 %vm2876_vm0, %v30479_v50  ;;  %24214 = vmatmul.mubr.msk.bf16.gmra.mrb[176].mxu0 %vm2876_vm0, %v30490_v51 }
 0x1df   : > { %23637 = vmatprep.mubr.msk.bf16.mxu1 %vm2876_vm0, %v30490_v51  ;;  %24217 = vmatprep.mubr.msk.bf16.mxu0 %vm2876_vm0, %v30493_v52 }
 0x1e6   : > { %23638 = vmatmul.mubr.msk.bf16.gmra.mrb[180].mxu1 %vm2876_vm0, %v30493_v52  ;;  %24218 = vmatmul.mubr.msk.bf16.gmra.mrb[180].mxu0 %vm2876_vm0, %v30504_v53 }
 0x1e7   : > { %23641 = vmatprep.mubr.msk.bf16.mxu1 %vm2876_vm0, %v30504_v53  ;;  %24221 = vmatprep.mubr.msk.bf16.mxu0 %vm2876_vm0, %v29007_v54 }
 0x1ee   : > { %23642 = vmatmul.mubr.msk.bf16.gmra.mrb[184].mxu1 %vm2876_vm0, %v29007_v54  ;;  %24222 = vmatmul.mubr.msk.bf16.gmra.mrb[184].mxu0 %vm2876_vm0, %v30515_v55  ;;  %v29024_v54 = vld [vmem:[%s30044_s21 + $0x378] sm:$0xff]  }
 0x1ef   : > { %23645 = vmatprep.mubr.msk.bf16.mxu1 %vm2876_vm0, %v30515_v55  ;;  %24225 = vmatprep.mubr.msk.bf16.mxu0 %vm2876_vm0, %v29009_v56 }
 0x1f6   : > { %23646 = vmatmul.mubr.msk.bf16.gmra.mrb[188].mxu1 %vm2876_vm0, %v29009_v56  ;;  %24226 = vmatmul.mubr.msk.bf16.gmra.mrb[188].mxu0 %vm2876_vm0, %v29010_v57  ;;  %v30570_v56 = vld [vmem:[%s35736_s25 + $0x20] sm:$0xff]  }
 0x1f7   : > { %23649 = vmatprep.mubr.msk.bf16.mxu1 %vm2876_vm0, %v29010_v57  ;;  %24229 = vmatprep.mubr.msk.bf16.mxu0 %vm2876_vm0, %v29011_v58  ;;  %v29025_v57 = vld [vmem:[%s30044_s21 + $0x380] sm:$0xff]  }
 0x1f8   : > { %24615 = vmatprep.subr.bf16.mxu0 %v30570_v56 }
 0x1fe   : > { %23650 = vmatmul.mubr.msk.bf16.gmra.mrb[192].mxu1 %vm2876_vm0, %v29011_v58  ;;  %24230 = vmatmul.mubr.msk.bf16.gmra.mrb[192].mxu0 %vm2876_vm0, %v29012_v59  ;;  %v29026_v58 = vld [vmem:[%s30044_s21 + $0x388] sm:$0xff]  }
 0x1ff   : > { %23653 = vmatprep.mubr.msk.bf16.mxu1 %vm2876_vm0, %v29012_v59  ;;  %24233 = vmatprep.mubr.msk.bf16.mxu0 %vm2876_vm0, %v29013_v60  ;;  %v29027_v59 = vld [vmem:[%s30044_s21 + $0x390] sm:$0xff]  }
 0x206   : > { %23654 = vmatmul.mubr.msk.bf16.gmra.mrb[196].mxu1 %vm2876_vm0, %v29013_v60  ;;  %24234 = vmatmul.mubr.msk.bf16.gmra.mrb[196].mxu0 %vm2876_vm0, %v29014_v61  ;;  %v29059_v60 = vld [vmem:[%s35736_s25] sm:$0xff]  }
 0x207   : > { %23657 = vmatprep.mubr.msk.bf16.mxu1 %vm2876_vm0, %v29014_v61  ;;  %24237 = vmatprep.mubr.msk.bf16.mxu0 %vm2876_vm0, %v29015_v62  ;;  %v29028_v61 = vld [vmem:[%s30044_s21 + $0x398] sm:$0xff]  }
 0x208   : > { %23745 = vmatprep.subr.bf16.mxu1 %v29059_v60 }
 0x209   : > { %23746 = vmatpush3.bf16.msra.mxu1 %v29059_v60  ;;  %v29041_v60 = vld [vmem:[%s30044_s21 + $0x400] sm:$0xff]  }
 0x20e   : > { %23658 = vmatmul.mubr.msk.bf16.gmra.mrb[200].mxu1 %vm2876_vm0, %v29015_v62  ;;  %24238 = vmatmul.mubr.msk.bf16.gmra.mrb[200].mxu0 %vm2876_vm0, %v29016_v63  ;;  %v30591_v62 = vld [vmem:[%s35736_s25 + $0x10] sm:$0xff]  }
 0x20f   : > { %23661 = vmatprep.mubr.msk.bf16.mxu1 %vm2876_vm0, %v29016_v63  ;;  %24241 = vmatprep.mubr.msk.bf16.mxu0 %vm2876_vm0, %v29017_v0  ;;  %v29029_v63 = vld [vmem:[%s30044_s21 + $0x3a0] sm:$0xff]  }
 0x210   : > { %26505 = vmatprep.subr.bf16.mxu1 %v30591_v62 }
 0x216   : > { %23662 = vmatmul.mubr.msk.bf16.gmra.mrb[204].mxu1 %vm2876_vm0, %v29017_v0  ;;  %24242 = vmatmul.mubr.msk.bf16.gmra.mrb[204].mxu0 %vm2876_vm0, %v29018_v1  ;;  %v29030_v0 = vld [vmem:[%s30044_s21 + $0x3a8] sm:$0xff]  }
 0x217   : > { %23665 = vmatprep.mubr.msk.bf16.mxu1 %vm2876_vm0, %v29018_v1  ;;  %24245 = vmatprep.mubr.msk.bf16.mxu0 %vm2876_vm0, %v29019_v2  ;;  %v29031_v1 = vld [vmem:[%s30044_s21 + $0x3b0] sm:$0xff]  }
 0x21e   : > { %23666 = vmatmul.mubr.msk.bf16.gmra.mrb[208].mxu1 %vm2876_vm0, %v29019_v2  ;;  %24246 = vmatmul.mubr.msk.bf16.gmra.mrb[208].mxu0 %vm2876_vm0, %v29020_v3  ;;  %v29032_v2 = vld [vmem:[%s30044_s21 + $0x3b8] sm:$0xff]  }
 0x21f   : > { %23669 = vmatprep.mubr.msk.bf16.mxu1 %vm2876_vm0, %v29020_v3  ;;  %24249 = vmatprep.mubr.msk.bf16.mxu0 %vm2876_vm0, %v29021_v4  ;;  %v29033_v3 = vld [vmem:[%s30044_s21 + $0x3c0] sm:$0xff]  }
 0x226   : > { %23670 = vmatmul.mubr.msk.bf16.gmra.mrb[212].mxu1 %vm2876_vm0, %v29021_v4  ;;  %24250 = vmatmul.mubr.msk.bf16.gmra.mrb[212].mxu0 %vm2876_vm0, %v29022_v5  ;;  %v29034_v4 = vld [vmem:[%s30044_s21 + $0x3c8] sm:$0xff]  }
 0x227   : > { %23673 = vmatprep.mubr.msk.bf16.mxu1 %vm2876_vm0, %v29022_v5  ;;  %24253 = vmatprep.mubr.msk.bf16.mxu0 %vm2876_vm0, %v29023_v6  ;;  %v29035_v5 = vld [vmem:[%s30044_s21 + $0x3d0] sm:$0xff]  }
 0x22e   : > { %23674 = vmatmul.mubr.msk.bf16.gmra.mrb[216].mxu1 %vm2876_vm0, %v29023_v6  ;;  %24254 = vmatmul.mubr.msk.bf16.gmra.mrb[216].mxu0 %vm2876_vm0, %v29024_v54  ;;  %v29036_v6 = vld [vmem:[%s30044_s21 + $0x3d8] sm:$0xff]  }
 0x22f   : > { %23677 = vmatprep.mubr.msk.bf16.mxu1 %vm2876_vm0, %v29024_v54  ;;  %24257 = vmatprep.mubr.msk.bf16.mxu0 %vm2876_vm0, %v29025_v57  ;;  %v29037_v54 = vld [vmem:[%s30044_s21 + $0x3e0] sm:$0xff]  }
 0x236   : > { %23678 = vmatmul.mubr.msk.bf16.gmra.mrb[220].mxu1 %vm2876_vm0, %v29025_v57  ;;  %24258 = vmatmul.mubr.msk.bf16.gmra.mrb[220].mxu0 %vm2876_vm0, %v29026_v58  ;;  %v29038_v57 = vld [vmem:[%s30044_s21 + $0x3e8] sm:$0xff]  }
 0x237   : > { %23681 = vmatprep.mubr.msk.bf16.mxu1 %vm2876_vm0, %v29026_v58  ;;  %24261 = vmatprep.mubr.msk.bf16.mxu0 %vm2876_vm0, %v29027_v59  ;;  %v29039_v58 = vld [vmem:[%s30044_s21 + $0x3f0] sm:$0xff]  }
 0x23e   : > { %23682 = vmatmul.mubr.msk.bf16.gmra.mrb[224].mxu1 %vm2876_vm0, %v29027_v59  ;;  %24262 = vmatmul.mubr.msk.bf16.gmra.mrb[224].mxu0 %vm2876_vm0, %v29028_v61  ;;  %v29040_v59 = vld [vmem:[%s30044_s21 + $0x3f8] sm:$0xff]  }
 0x23f   : > { %23685 = vmatprep.mubr.msk.bf16.mxu1 %vm2876_vm0, %v29028_v61  ;;  %24265 = vmatprep.mubr.msk.bf16.mxu0 %vm2876_vm0, %v29029_v63  ;;  %v29042_v61 = vld [vmem:[%s30044_s21 + $0x408] sm:$0xff]  }
 0x246   : > { %23686 = vmatmul.mubr.msk.bf16.gmra.mrb[228].mxu1 %vm2876_vm0, %v29029_v63  ;;  %24266 = vmatmul.mubr.msk.bf16.gmra.mrb[228].mxu0 %vm2876_vm0, %v29030_v0  ;;  %v29043_v63 = vld [vmem:[%s30044_s21 + $0x410] sm:$0xff]  }
 0x247   : > { %23689 = vmatprep.mubr.msk.bf16.mxu1 %vm2876_vm0, %v29030_v0  ;;  %24269 = vmatprep.mubr.msk.bf16.mxu0 %vm2876_vm0, %v29031_v1 }
 0x24e   : > { %23690 = vmatmul.mubr.msk.bf16.gmra.mrb[232].mxu1 %vm2876_vm0, %v29031_v1  ;;  %24270 = vmatmul.mubr.msk.bf16.gmra.mrb[232].mxu0 %vm2876_vm0, %v29032_v2 }
 0x24f   : > { %23693 = vmatprep.mubr.msk.bf16.mxu1 %vm2876_vm0, %v29032_v2  ;;  %24273 = vmatprep.mubr.msk.bf16.mxu0 %vm2876_vm0, %v29033_v3 }
 0x256   : > { %23694 = vmatmul.mubr.msk.bf16.gmra.mrb[236].mxu1 %vm2876_vm0, %v29033_v3  ;;  %24274 = vmatmul.mubr.msk.bf16.gmra.mrb[236].mxu0 %vm2876_vm0, %v29034_v4 }
 0x257   : > { %23697 = vmatprep.mubr.msk.bf16.mxu1 %vm2876_vm0, %v29034_v4  ;;  %24277 = vmatprep.mubr.msk.bf16.mxu0 %vm2876_vm0, %v29035_v5 }
 0x25e   : > { %23698 = vmatmul.mubr.msk.bf16.gmra.mrb[240].mxu1 %vm2876_vm0, %v29035_v5  ;;  %24278 = vmatmul.mubr.msk.bf16.gmra.mrb[240].mxu0 %vm2876_vm0, %v29036_v6  ;;  %v29044_v5 = vld [vmem:[%s30044_s21 + $0x418] sm:$0xff]  }
 0x25f   : > { %23701 = vmatprep.mubr.msk.bf16.mxu1 %vm2876_vm0, %v29036_v6  ;;  %24281 = vmatprep.mubr.msk.bf16.mxu0 %vm2876_vm0, %v29037_v54 }
 0x266   : > { %23702 = vmatmul.mubr.msk.bf16.gmra.mrb[244].mxu1 %vm2876_vm0, %v29037_v54  ;;  %24282 = vmatmul.mubr.msk.bf16.gmra.mrb[244].mxu0 %vm2876_vm0, %v29038_v57 }
 0x267   : > { %23705 = vmatprep.mubr.msk.bf16.mxu1 %vm2876_vm0, %v29038_v57  ;;  %24285 = vmatprep.mubr.msk.bf16.mxu0 %vm2876_vm0, %v29039_v58  ;;  %v29045_v57 = vld [vmem:[%s30044_s21 + $0x420] sm:$0xff]  }
 0x26e   : > { %23706 = vmatmul.mubr.msk.bf16.gmra.mrb[248].mxu1 %vm2876_vm0, %v29039_v58  ;;  %24286 = vmatmul.mubr.msk.bf16.gmra.mrb[248].mxu0 %vm2876_vm0, %v29040_v59 }
 0x26f   : > { %23709 = vmatprep.mubr.msk.bf16.mxu1 %vm2876_vm0, %v29040_v59  ;;  %24289 = vmatprep.mubr.msk.bf16.mxu0 %vm2876_vm0, %v29041_v60 }
 0x276   : > { %23710 = vmatmul.mubr.msk.bf16.gmra.mrb[252].mxu1 %vm2876_vm0, %v29041_v60  ;;  %24290 = vmatmul.mubr.msk.bf16.gmra.mrb[252].mxu0 %vm2876_vm0, %v29042_v61 }
 0x277   : > { %23713 = vmatprep.mubr.msk.bf16.mxu1 %vm2876_vm0, %v29042_v61  ;;  %24293 = vmatprep.mubr.msk.bf16.mxu0 %vm2876_vm0, %v29043_v63 }
 0x279   : > { %v30641_v0 = vpop.f32.mrb[148].mxu1  ;;  %v30643_v1 = vpop.f32.mrb[148].mxu0 }
 0x27a   : > { %v30645_v2 = vpop.f32.mrb[149].mxu1  ;;  %v30647_v3 = vpop.f32.mrb[149].mxu0 }
 0x27b   : > { %35737 = vst [vmem:[#allocation3_spill] sm:$0xff] %v30647_v3  ;;  %v30649_v4 = vpop.f32.mrb[150].mxu1  ;;  %v30652_v6 = vpop.f32.mrb[150].mxu0 }
 0x27c   : > { %35738 = vst [vmem:[#allocation4_spill] sm:$0xff] %v30649_v4  ;;  %35739 = vst [vmem:[#allocation5_spill] sm:$0xff] %v30652_v6  ;;  %v30654_v54 = vpop.f32.mrb[151].mxu1  ;;  %v30657_v58 = vpop.f32.mrb[151].mxu0 }
 0x27d   : > { %35740 = vst [vmem:[#allocation6_spill] sm:$0xff] %v30654_v54  ;;  %35741 = vst [vmem:[#allocation7_spill] sm:$0xff] %v30657_v58  ;;  %v29046_v58 = vld [vmem:[%s30044_s21 + $0x428] sm:$0xff]  }
 0x27e   : > { %23714 = vmatmul.mubr.msk.bf16.gmra.mrb[148].mxu1 %vm2876_vm0, %v29043_v63  ;;  %24294 = vmatmul.mubr.msk.bf16.gmra.mrb[148].mxu0 %vm2876_vm0, %v29044_v5 }
 0x27f   : > { %23717 = vmatprep.mubr.msk.bf16.mxu1 %vm2876_vm0, %v29044_v5  ;;  %24297 = vmatprep.mubr.msk.bf16.mxu0 %vm2876_vm0, %v29045_v57  ;;  %v29047_v5 = vld [vmem:[%s30044_s21 + $0x430] sm:$0xff]  }
 0x281   : > { %v30663_v59 = vpop.f32.mrb[152].mxu1  ;;  %v30665_v60 = vpop.f32.mrb[152].mxu0 }
 0x282   : > { %35742 = vst [vmem:[#allocation8_spill] sm:$0xff] %v30663_v59  ;;  %35743 = vst [vmem:[#allocation9_spill] sm:$0xff] %v30665_v60  ;;  %v30667_v61 = vpop.f32.mrb[153].mxu1  ;;  %v30669_v6 = vpop.f32.mrb[153].mxu0 }
 0x283   : > { %35744 = vst [vmem:[#allocation10_spill] sm:$0xff] %v30667_v61  ;;  %35745 = vst [vmem:[#allocation11_spill] sm:$0xff] %v30669_v6  ;;  %v30671_v54 = vpop.f32.mrb[154].mxu1  ;;  %v30674_v3 = vpop.f32.mrb[154].mxu0 }
 0x284   : > { %35746 = vst [vmem:[#allocation12_spill] sm:$0xff] %v30671_v54  ;;  %35747 = vst [vmem:[#allocation13_spill] sm:$0xff] %v30674_v3  ;;  %v30676_v63 = vpop.f32.mrb[155].mxu1  ;;  %v30679_v4 = vpop.f32.mrb[155].mxu0 }
 0x285   : > { %35748 = vst [vmem:[#allocation14_spill] sm:$0xff] %v30676_v63  ;;  %35749 = vst [vmem:[#allocation15_spill] sm:$0xff] %v30679_v4  ;;  %v29048_v4 = vld [vmem:[%s30044_s21 + $0x438] sm:$0xff]  }
 0x286   : > { %23718 = vmatmul.mubr.msk.bf16.gmra.mrb[152].mxu1 %vm2876_vm0, %v29045_v57  ;;  %24298 = vmatmul.mubr.msk.bf16.gmra.mrb[152].mxu0 %vm2876_vm0, %v29046_v58 }
 0x287   : > { %23721 = vmatprep.mubr.msk.bf16.mxu1 %vm2876_vm0, %v29046_v58  ;;  %24301 = vmatprep.mubr.msk.bf16.mxu0 %vm2876_vm0, %v29047_v5  ;;  %v29049_v58 = vld [vmem:[%s30044_s21 + $0x440] sm:$0xff]  }
 0x289   : > { %v30685_v6 = vpop.f32.mrb[156].mxu1  ;;  %v30687_v54 = vpop.f32.mrb[156].mxu0 }
 0x28a   : > { %35750 = vst [vmem:[#allocation16_spill] sm:$0xff] %v30685_v6  ;;  %35751 = vst [vmem:[#allocation17_spill] sm:$0xff] %v30687_v54  ;;  %v30689_v60 = vpop.f32.mrb[157].mxu1  ;;  %v30691_v3 = vpop.f32.mrb[157].mxu0 }
 0x28b   : > { %35752 = vst [vmem:[#allocation18_spill] sm:$0xff] %v30689_v60  ;;  %35753 = vst [vmem:[#allocation19_spill] sm:$0xff] %v30691_v3  ;;  %v30693_v63 = vpop.f32.mrb[158].mxu1  ;;  %v30696_v61 = vpop.f32.mrb[158].mxu0 }
 0x28c   : > { %35754 = vst [vmem:[#allocation20_spill] sm:$0xff] %v30693_v63  ;;  %35755 = vst [vmem:[#allocation21_spill] sm:$0xff] %v30696_v61  ;;  %v30698_v57 = vpop.f32.mrb[159].mxu1  ;;  %v30701_v59 = vpop.f32.mrb[159].mxu0 }
 0x28d   : > { %35756 = vst [vmem:[#allocation22_spill] sm:$0xff] %v30698_v57  ;;  %35757 = vst [vmem:[#allocation23_spill] sm:$0xff] %v30701_v59  ;;  %v29050_v59 = vld [vmem:[%s30044_s21 + $0x448] sm:$0xff]  }
 0x28e   : > { %23722 = vmatmul.mubr.msk.bf16.gmra.mrb[156].mxu1 %vm2876_vm0, %v29047_v5  ;;  %24302 = vmatmul.mubr.msk.bf16.gmra.mrb[156].mxu0 %vm2876_vm0, %v29048_v4 }
 0x28f   : > { %23725 = vmatprep.mubr.msk.bf16.mxu1 %vm2876_vm0, %v29048_v4  ;;  %24305 = vmatprep.mubr.msk.bf16.mxu0 %vm2876_vm0, %v29049_v58  ;;  %v29051_v4 = vld [vmem:[%s30044_s21 + $0x450] sm:$0xff]  }
 0x291   : > { %v30707_v3 = vpop.f32.mrb[160].mxu1  ;;  %v30709_v63 = vpop.f32.mrb[160].mxu0 }
 0x292   : > { %35758 = vst [vmem:[#allocation24_spill] sm:$0xff] %v30707_v3  ;;  %35759 = vst [vmem:[#allocation25_spill] sm:$0xff] %v30709_v63  ;;  %v30711_v54 = vpop.f32.mrb[161].mxu1  ;;  %v30713_v61 = vpop.f32.mrb[161].mxu0  ;;  %v29053_v3 = vld [vmem:[%s30044_s21 + $0x460] sm:$0xff]  }
 0x293   : > { %35760 = vst [vmem:[#allocation26_spill] sm:$0xff] %v30711_v54  ;;  %35761 = vst [vmem:[#allocation27_spill] sm:$0xff] %v30713_v61  ;;  %v30715_v57 = vpop.f32.mrb[162].mxu1  ;;  %v30718_v60 = vpop.f32.mrb[162].mxu0 }
 0x294   : > { %35762 = vst [vmem:[#allocation28_spill] sm:$0xff] %v30715_v57  ;;  %35763 = vst [vmem:[#allocation29_spill] sm:$0xff] %v30718_v60  ;;  %v30720_v5 = vpop.f32.mrb[163].mxu1  ;;  %v30723_v6 = vpop.f32.mrb[163].mxu0 }
 0x295   : > { %35764 = vst [vmem:[#allocation30_spill] sm:$0xff] %v30720_v5  ;;  %35765 = vst [vmem:[#allocation31_spill] sm:$0xff] %v30723_v6  ;;  %v29052_v6 = vld [vmem:[%s30044_s21 + $0x458] sm:$0xff]  }
 0x296   : > { %23726 = vmatmul.mubr.msk.bf16.gmra.mrb[160].mxu1 %vm2876_vm0, %v29049_v58  ;;  %24306 = vmatmul.mubr.msk.bf16.gmra.mrb[160].mxu0 %vm2876_vm0, %v29050_v59 }
 0x297   : > { %23729 = vmatprep.mubr.msk.bf16.mxu1 %vm2876_vm0, %v29050_v59  ;;  %24309 = vmatprep.mubr.msk.bf16.mxu0 %vm2876_vm0, %v29051_v4 }
 0x299   : > { %v30729_v61 = vpop.f32.mrb[164].mxu1  ;;  %v30731_v57 = vpop.f32.mrb[164].mxu0 }
 0x29a   : > { %35766 = vst [vmem:[#allocation32_spill] sm:$0xff] %v30731_v57  ;;  %v30733_v63 = vpop.f32.mrb[165].mxu1  ;;  %v30735_v60 = vpop.f32.mrb[165].mxu0 }
 0x29b   : > { %35767 = vst [vmem:[#allocation33_spill] sm:$0xff] %v30733_v63  ;;  %35768 = vst [vmem:[#allocation34_spill] sm:$0xff] %v30735_v60  ;;  %v30737_v5 = vpop.f32.mrb[166].mxu1  ;;  %v30740_v54 = vpop.f32.mrb[166].mxu0 }
 0x29c   : > { %35769 = vst [vmem:[#allocation35_spill] sm:$0xff] %v30737_v5  ;;  %35770 = vst [vmem:[#allocation36_spill] sm:$0xff] %v30740_v54  ;;  %v30742_v58 = vpop.f32.mrb[167].mxu1  ;;  %v30745_v59 = vpop.f32.mrb[167].mxu0 }
 0x29d   : > { %35771 = vst [vmem:[#allocation37_spill] sm:$0xff] %v30742_v58  ;;  %35772 = vst [vmem:[#allocation38_spill] sm:$0xff] %v30745_v59 }
 0x29e   : > { %23730 = vmatmul.mubr.msk.bf16.gmra.mrb[164].mxu1 %vm2876_vm0, %v29051_v4  ;;  %24310 = vmatmul.mubr.msk.bf16.gmra.mrb[164].mxu0 %vm2876_vm0, %v29052_v6  ;;  %v29054_v4 = vld [vmem:[%s30044_s21 + $0x468] sm:$0xff]  }
 0x29f   : > { %23733 = vmatprep.mubr.msk.bf16.mxu1 %vm2876_vm0, %v29052_v6  ;;  %24313 = vmatprep.mubr.msk.bf16.mxu0 %vm2876_vm0, %v29053_v3 }
 0x2a1   : > { %v30751_v60 = vpop.f32.mrb[168].mxu1  ;;  %v30753_v5 = vpop.f32.mrb[168].mxu0 }
 0x2a2   : > { %35773 = vst [vmem:[#allocation39_spill] sm:$0xff] %v30751_v60  ;;  %35774 = vst [vmem:[#allocation40_spill] sm:$0xff] %v30753_v5  ;;  %v30755_v54 = vpop.f32.mrb[169].mxu1  ;;  %v30757_v58 = vpop.f32.mrb[169].mxu0  ;;  %v29169_v5 = vld [vmem:[%s30044_s21 + $0x18] sm:$0xff]  }
 0x2a3   : > { %35775 = vst [vmem:[#allocation41_spill] sm:$0xff] %v30755_v54  ;;  %35776 = vst [vmem:[#allocation42_spill] sm:$0xff] %v30757_v58  ;;  %v30759_v59 = vpop.f32.mrb[170].mxu1  ;;  %v30762_v57 = vpop.f32.mrb[170].mxu0  ;;  %v29170_v54 = vld [vmem:[%s30044_s21 + $0x20] sm:$0xff]  }
 0x2a4   : > { %35777 = vst [vmem:[#allocation43_spill] sm:$0xff] %v30759_v59  ;;  %35778 = vst [vmem:[#allocation44_spill] sm:$0xff] %v30762_v57  ;;  %v30764_v63 = vpop.f32.mrb[171].mxu1  ;;  %v30766_v6 = vpop.f32.mrb[171].mxu0  ;;  %v29056_v57 = vld [vmem:[%s30044_s21 + $0x470] sm:$0xff]  }
 0x2a5   : > { %35779 = vst [vmem:[#allocation45_spill] sm:$0xff] %v30764_v63  ;;  %35780 = vst [vmem:[#allocation46_spill] sm:$0xff] %v30766_v6  ;;  %v29057_v6 = vld [vmem:[%s30044_s21 + $0x478] sm:$0xff]  }
 0x2a6   : > { %23734 = vmatmul.mubr.msk.bf16.gmra.mrb[168].mxu1 %vm2876_vm0, %v29053_v3  ;;  %24314 = vmatmul.mubr.msk.bf16.gmra.mrb[168].mxu0 %vm2876_vm0, %v29054_v4 }
 0x2a7   : > { %23737 = vmatprep.mubr.msk.bf16.mxu1 %vm2876_vm0, %v29054_v4  ;;  %24327 = vmatprep.mubr.msk.bf16.mxu0 %vm2876_vm0, %v29169_v5  ;;  %v29171_v4 = vld [vmem:[%s30044_s21 + $0x28] sm:$0xff]  }
 0x2a9   : > { %v30773_v58 = vpop.f32.mrb[172].mxu1 }
 0x2aa   : > { %35781 = vst [vmem:[#allocation47_spill] sm:$0xff] %v30773_v58  ;;  %v30775_v59 = vpop.f32.mrb[173].mxu1  ;;  %v29060_v58 = vld [vmem:[%s30044_s21] sm:$0xff]  }
 0x2ab   : > { %35782 = vst [vmem:[#allocation48_spill] sm:$0xff] %v30775_v59  ;;  %v30778_v63 = vpop.f32.mrb[174].mxu1 }
 0x2ac   : > { %35783 = vst [vmem:[#allocation49_spill] sm:$0xff] %v30778_v63  ;;  %v30781_v3 = vpop.f32.mrb[175].mxu1 }
 0x2ad   : > { %35784 = vst [vmem:[#allocation50_spill] sm:$0xff] %v30781_v3  ;;  %v29058_v3 = vld [vmem:[%s30044_s21 + $0x480] sm:$0xff]  }
 0x2ae   : > { %23738 = vmatmul.mubr.msk.bf16.gmra.mrb[172].mxu1 %vm2876_vm0, %v29056_v57  ;;  %24328 = vmatmul.mubr.msk.bf16.vlgmr.msra.gmra.mrb[0].mxu0 %vm2876_vm0, %v29170_v54 }
 0x2af   : > { %23741 = vmatprep.mubr.msk.bf16.mxu1 %vm2876_vm0, %v29057_v6  ;;  %24616 = vmatpush3.bf16.msra.mxu0 %v30570_v56  ;;  %v29172_v56 = vld [vmem:[%s30044_s21 + $0x30] sm:$0xff]   ;;  %v29173_v6 = vld [vmem:[%s30044_s21 + $0x38] sm:$0xff]  }
 0x2b0   : > { %24331 = vmatprep.mubr.msk.bf16.mxu0 %vm2876_vm0, %v29171_v4 }
 0x2b1   : > { %v30790_v63 = vpop.f32.mrb[176].mxu1 }
 0x2b2   : > { %v30792_v59 = vpop.f32.mrb[177].mxu1 }
 0x2b3   : > { %35785 = vst [vmem:[#allocation51_spill] sm:$0xff] %v30792_v59  ;;  %v30795_v57 = vpop.f32.mrb[178].mxu1  ;;  %v29174_v59 = vld [vmem:[%s30044_s21 + $0x8] sm:$0xff]  }
 0x2b4   : > { %35786 = vst [vmem:[#allocation52_spill] sm:$0xff] %v30795_v57  ;;  %v30798_v60 = vpop.f32.mrb[179].mxu1  ;;  %v29175_v57 = vld [vmem:[%s30044_s21 + $0x40] sm:$0xff]  }
 0x2b5   : > { %35787 = vst [vmem:[#allocation53_spill] sm:$0xff] %v30798_v60  ;;  %v29176_v60 = vld [vmem:[%s30044_s21 + $0x10] sm:$0xff]  }
 0x2b6   : > { %23742 = vmatmul.mubr.msk.bf16.gmra.mrb[176].mxu1 %vm2876_vm0, %v29058_v3  ;;  %24332 = vmatmul.mubr.msk.bf16.gmra.mrb[4].mxu0 %vm2876_vm0, %v29172_v56  ;;  %v29177_v3 = vld [vmem:[%s30044_s21 + $0x48] sm:$0xff]  }
 0x2b7   : > { %23747 = vmatprep.mubr.msk.bf16.mxu1 %vm2876_vm0, %v29060_v58  ;;  %24335 = vmatprep.mubr.msk.bf16.mxu0 %vm2876_vm0, %v29173_v6  ;;  %v29178_v58 = vld [vmem:[%s30044_s21 + $0x50] sm:$0xff]  }
 0x2be   : > { %23748 = vmatmul.mubr.msk.bf16.vlgmr.msra.gmra.mrb[0].mxu1 %vm2876_vm0, %v29174_v59  ;;  %24336 = vmatmul.mubr.msk.bf16.gmra.mrb[8].mxu0 %vm2876_vm0, %v29175_v57  ;;  %v29179_v59 = vld [vmem:[%s30044_s21 + $0x58] sm:$0xff]  }
 0x2bf   : > { %23751 = vmatprep.mubr.msk.bf16.mxu1 %vm2876_vm0, %v29176_v60  ;;  %24339 = vmatprep.mubr.msk.bf16.mxu0 %vm2876_vm0, %v29177_v3  ;;  %v29180_v60 = vld [vmem:[%s30044_s21 + $0x60] sm:$0xff]  }
 0x2c0   : > { %26506 = vmatpush3.bf16.msra.mxu1 %v30591_v62  ;;  %v29181_v62 = vld [vmem:[%s30044_s21 + $0x68] sm:$0xff]  }
 0x2c6   : > { %23752 = vmatmul.mubr.msk.bf16.gmra.mrb[4].mxu1 %vm2876_vm0, %v29169_v5  ;;  %24340 = vmatmul.mubr.msk.bf16.gmra.mrb[12].mxu0 %vm2876_vm0, %v29178_v58  ;;  %v29183_v5 = vld [vmem:[%s30044_s21 + $0x78] sm:$0xff]  }
 0x2c7   : > { %23755 = vmatprep.mubr.msk.bf16.mxu1 %vm2876_vm0, %v29170_v54  ;;  %24343 = vmatprep.mubr.msk.bf16.mxu0 %vm2876_vm0, %v29179_v59  ;;  %v29182_v54 = vld [vmem:[%s30044_s21 + $0x70] sm:$0xff]  }
 0x2ce   : > { %23756 = vmatmul.mubr.msk.bf16.gmra.mrb[8].mxu1 %vm2876_vm0, %v29171_v4  ;;  %24344 = vmatmul.mubr.msk.bf16.gmra.mrb[16].mxu0 %vm2876_vm0, %v29180_v60  ;;  %v29184_v4 = vld [vmem:[%s30044_s21 + $0x80] sm:$0xff]  }
 0x2cf   : > { %23759 = vmatprep.mubr.msk.bf16.mxu1 %vm2876_vm0, %v29172_v56  ;;  %24347 = vmatprep.mubr.msk.bf16.mxu0 %vm2876_vm0, %v29181_v62  ;;  %v29185_v56 = vld [vmem:[%s30044_s21 + $0x88] sm:$0xff]  }
 0x2d6   : > { %23760 = vmatmul.mubr.msk.bf16.gmra.mrb[12].mxu1 %vm2876_vm0, %v29173_v6  ;;  %24348 = vmatmul.mubr.msk.bf16.gmra.mrb[20].mxu0 %vm2876_vm0, %v29182_v54  ;;  %v29187_v6 = vld [vmem:[%s30044_s21 + $0x98] sm:$0xff]  }
 0x2d7   : > { %23763 = vmatprep.mubr.msk.bf16.mxu1 %vm2876_vm0, %v29175_v57  ;;  %24351 = vmatprep.mubr.msk.bf16.mxu0 %vm2876_vm0, %v29183_v5  ;;  %v29186_v57 = vld [vmem:[%s30044_s21 + $0x90] sm:$0xff]  }
 0x2de   : > { %23764 = vmatmul.mubr.msk.bf16.gmra.mrb[16].mxu1 %vm2876_vm0, %v29177_v3  ;;  %24352 = vmatmul.mubr.msk.bf16.gmra.mrb[24].mxu0 %vm2876_vm0, %v29184_v4  ;;  %v29188_v3 = vld [vmem:[%s30044_s21 + $0xa0] sm:$0xff]  }
 0x2df   : > { %23767 = vmatprep.mubr.msk.bf16.mxu1 %vm2876_vm0, %v29178_v58  ;;  %24355 = vmatprep.mubr.msk.bf16.mxu0 %vm2876_vm0, %v29185_v56  ;;  %v29189_v58 = vld [vmem:[%s30044_s21 + $0xa8] sm:$0xff]  }
 0x2e6   : > { %23768 = vmatmul.mubr.msk.bf16.gmra.mrb[20].mxu1 %vm2876_vm0, %v29179_v59  ;;  %24356 = vmatmul.mubr.msk.bf16.gmra.mrb[28].mxu0 %vm2876_vm0, %v29186_v57  ;;  %v29190_v59 = vld [vmem:[%s30044_s21 + $0xb0] sm:$0xff]  }
 0x2e7   : > { %23771 = vmatprep.mubr.msk.bf16.mxu1 %vm2876_vm0, %v29180_v60  ;;  %24359 = vmatprep.mubr.msk.bf16.mxu0 %vm2876_vm0, %v29187_v6  ;;  %v29191_v60 = vld [vmem:[%s30044_s21 + $0xb8] sm:$0xff]  }
 0x2ee   : > { %23772 = vmatmul.mubr.msk.bf16.gmra.mrb[24].mxu1 %vm2876_vm0, %v29181_v62  ;;  %24360 = vmatmul.mubr.msk.bf16.gmra.mrb[32].mxu0 %vm2876_vm0, %v29188_v3  ;;  %v29192_v62 = vld [vmem:[%s30044_s21 + $0xc0] sm:$0xff]  }
 0x2ef   : > { %23775 = vmatprep.mubr.msk.bf16.mxu1 %vm2876_vm0, %v29182_v54  ;;  %24363 = vmatprep.mubr.msk.bf16.mxu0 %vm2876_vm0, %v29189_v58  ;;  %v29193_v54 = vld [vmem:[%s30044_s21 + $0xc8] sm:$0xff]  }
 0x2f6   : > { %23776 = vmatmul.mubr.msk.bf16.gmra.mrb[28].mxu1 %vm2876_vm0, %v29183_v5  ;;  %24364 = vmatmul.mubr.msk.bf16.gmra.mrb[36].mxu0 %vm2876_vm0, %v29190_v59  ;;  %v29194_v5 = vld [vmem:[%s30044_s21 + $0xd0] sm:$0xff]  }
 0x2f7   : > { %23779 = vmatprep.mubr.msk.bf16.mxu1 %vm2876_vm0, %v29184_v4  ;;  %24367 = vmatprep.mubr.msk.bf16.mxu0 %vm2876_vm0, %v29191_v60  ;;  %v29195_v4 = vld [vmem:[%s30044_s21 + $0xd8] sm:$0xff]  }
 0x2fe   : > { %23780 = vmatmul.mubr.msk.bf16.gmra.mrb[32].mxu1 %vm2876_vm0, %v29185_v56  ;;  %24368 = vmatmul.mubr.msk.bf16.gmra.mrb[40].mxu0 %vm2876_vm0, %v29192_v62  ;;  %v29196_v56 = vld [vmem:[%s30044_s21 + $0xe0] sm:$0xff]  }
 0x2ff   : > { %23783 = vmatprep.mubr.msk.bf16.mxu1 %vm2876_vm0, %v29186_v57  ;;  %24371 = vmatprep.mubr.msk.bf16.mxu0 %vm2876_vm0, %v29193_v54  ;;  %v29197_v57 = vld [vmem:[%s30044_s21 + $0xe8] sm:$0xff]  }
 0x306   : > { %23784 = vmatmul.mubr.msk.bf16.gmra.mrb[36].mxu1 %vm2876_vm0, %v29187_v6  ;;  %24372 = vmatmul.mubr.msk.bf16.gmra.mrb[44].mxu0 %vm2876_vm0, %v29194_v5  ;;  %v29198_v6 = vld [vmem:[%s30044_s21 + $0xf0] sm:$0xff]  }
 0x307   : > { %23787 = vmatprep.mubr.msk.bf16.mxu1 %vm2876_vm0, %v29188_v3  ;;  %24375 = vmatprep.mubr.msk.bf16.mxu0 %vm2876_vm0, %v29195_v4  ;;  %v29199_v3 = vld [vmem:[%s30044_s21 + $0xf8] sm:$0xff]  }
 0x30e   : > { %23788 = vmatmul.mubr.msk.bf16.gmra.mrb[40].mxu1 %vm2876_vm0, %v29189_v58  ;;  %24376 = vmatmul.mubr.msk.bf16.gmra.mrb[48].mxu0 %vm2876_vm0, %v29196_v56  ;;  %v29200_v58 = vld [vmem:[%s30044_s21 + $0x100] sm:$0xff]  }
 0x30f   : > { %23791 = vmatprep.mubr.msk.bf16.mxu1 %vm2876_vm0, %v29190_v59  ;;  %24379 = vmatprep.mubr.msk.bf16.mxu0 %vm2876_vm0, %v29197_v57  ;;  %v29201_v59 = vld [vmem:[%s30044_s21 + $0x108] sm:$0xff]  }
 0x316   : > { %23792 = vmatmul.mubr.msk.bf16.gmra.mrb[44].mxu1 %vm2876_vm0, %v29191_v60  ;;  %24380 = vmatmul.mubr.msk.bf16.gmra.mrb[52].mxu0 %vm2876_vm0, %v29198_v6  ;;  %v29202_v60 = vld [vmem:[%s30044_s21 + $0x110] sm:$0xff]  }
 0x317   : > { %23795 = vmatprep.mubr.msk.bf16.mxu1 %vm2876_vm0, %v29192_v62  ;;  %24383 = vmatprep.mubr.msk.bf16.mxu0 %vm2876_vm0, %v29199_v3  ;;  %v29203_v62 = vld [vmem:[%s30044_s21 + $0x118] sm:$0xff]  }
 0x31e   : > { %23796 = vmatmul.mubr.msk.bf16.gmra.mrb[48].mxu1 %vm2876_vm0, %v29193_v54  ;;  %24384 = vmatmul.mubr.msk.bf16.gmra.mrb[56].mxu0 %vm2876_vm0, %v29200_v58  ;;  %v29204_v54 = vld [vmem:[%s30044_s21 + $0x120] sm:$0xff]  }
 0x31f   : > { %23799 = vmatprep.mubr.msk.bf16.mxu1 %vm2876_vm0, %v29194_v5  ;;  %24387 = vmatprep.mubr.msk.bf16.mxu0 %vm2876_vm0, %v29201_v59  ;;  %v29205_v5 = vld [vmem:[%s30044_s21 + $0x128] sm:$0xff]  }
 0x326   : > { %23800 = vmatmul.mubr.msk.bf16.gmra.mrb[52].mxu1 %vm2876_vm0, %v29195_v4  ;;  %24388 = vmatmul.mubr.msk.bf16.gmra.mrb[60].mxu0 %vm2876_vm0, %v29202_v60  ;;  %v29206_v4 = vld [vmem:[%s30044_s21 + $0x130] sm:$0xff]  }
 0x327   : > { %23803 = vmatprep.mubr.msk.bf16.mxu1 %vm2876_vm0, %v29196_v56  ;;  %24391 = vmatprep.mubr.msk.bf16.mxu0 %vm2876_vm0, %v29203_v62  ;;  %v29207_v56 = vld [vmem:[%s30044_s21 + $0x138] sm:$0xff]  }
 0x32e   : > { %23804 = vmatmul.mubr.msk.bf16.gmra.mrb[56].mxu1 %vm2876_vm0, %v29197_v57  ;;  %24392 = vmatmul.mubr.msk.bf16.gmra.mrb[64].mxu0 %vm2876_vm0, %v29204_v54  ;;  %v29208_v57 = vld [vmem:[%s30044_s21 + $0x140] sm:$0xff]  }
 0x32f   : > { %23807 = vmatprep.mubr.msk.bf16.mxu1 %vm2876_vm0, %v29198_v6  ;;  %24395 = vmatprep.mubr.msk.bf16.mxu0 %vm2876_vm0, %v29205_v5  ;;  %v29209_v6 = vld [vmem:[%s30044_s21 + $0x148] sm:$0xff]  }
 0x336   : > { %23808 = vmatmul.mubr.msk.bf16.gmra.mrb[60].mxu1 %vm2876_vm0, %v29199_v3  ;;  %24396 = vmatmul.mubr.msk.bf16.gmra.mrb[68].mxu0 %vm2876_vm0, %v29206_v4  ;;  %v29210_v3 = vld [vmem:[%s30044_s21 + $0x150] sm:$0xff]  }
 0x337   : > { %23811 = vmatprep.mubr.msk.bf16.mxu1 %vm2876_vm0, %v29200_v58  ;;  %24399 = vmatprep.mubr.msk.bf16.mxu0 %vm2876_vm0, %v29207_v56  ;;  %v29211_v58 = vld [vmem:[%s30044_s21 + $0x158] sm:$0xff]  }
 0x33e   : > { %23812 = vmatmul.mubr.msk.bf16.gmra.mrb[64].mxu1 %vm2876_vm0, %v29201_v59  ;;  %24400 = vmatmul.mubr.msk.bf16.gmra.mrb[72].mxu0 %vm2876_vm0, %v29208_v57  ;;  %v29212_v59 = vld [vmem:[%s30044_s21 + $0x160] sm:$0xff]  }
 0x33f   : > { %23815 = vmatprep.mubr.msk.bf16.mxu1 %vm2876_vm0, %v29202_v60  ;;  %24403 = vmatprep.mubr.msk.bf16.mxu0 %vm2876_vm0, %v29209_v6  ;;  %v29213_v60 = vld [vmem:[%s30044_s21 + $0x168] sm:$0xff]  }
 0x346   : > { %23816 = vmatmul.mubr.msk.bf16.gmra.mrb[68].mxu1 %vm2876_vm0, %v29203_v62  ;;  %24404 = vmatmul.mubr.msk.bf16.gmra.mrb[76].mxu0 %vm2876_vm0, %v29210_v3  ;;  %v29214_v62 = vld [vmem:[%s30044_s21 + $0x170] sm:$0xff]  }
 0x347   : > { %23819 = vmatprep.mubr.msk.bf16.mxu1 %vm2876_vm0, %v29204_v54  ;;  %24407 = vmatprep.mubr.msk.bf16.mxu0 %vm2876_vm0, %v29211_v58 }
 0x34e   : > { %23820 = vmatmul.mubr.msk.bf16.gmra.mrb[72].mxu1 %vm2876_vm0, %v29205_v5  ;;  %24408 = vmatmul.mubr.msk.bf16.gmra.mrb[80].mxu0 %vm2876_vm0, %v29212_v59 }
 0x34f   : > { %23823 = vmatprep.mubr.msk.bf16.mxu1 %vm2876_vm0, %v29206_v4  ;;  %24411 = vmatprep.mubr.msk.bf16.mxu0 %vm2876_vm0, %v29213_v60 }
 0x356   : > { %23824 = vmatmul.mubr.msk.bf16.gmra.mrb[76].mxu1 %vm2876_vm0, %v29207_v56  ;;  %24412 = vmatmul.mubr.msk.bf16.gmra.mrb[84].mxu0 %vm2876_vm0, %v29214_v62 }
 0x357   : > { %23827 = vmatprep.mubr.msk.bf16.mxu1 %vm2876_vm0, %v29208_v57  ;;  %24415 = vmatprep.mubr.msk.bf16.mxu0 %vm2876_vm0, %v30183_v7  ;;  %v29215_v7 = vld [vmem:[%s30044_s21 + $0x178] sm:$0xff]  }
 0x35e   : > { %23828 = vmatmul.mubr.msk.bf16.gmra.mrb[80].mxu1 %vm2876_vm0, %v29209_v6  ;;  %24416 = vmatmul.mubr.msk.bf16.gmra.mrb[88].mxu0 %vm2876_vm0, %v30186_v8  ;;  %v29216_v8 = vld [vmem:[%s30044_s21 + $0x180] sm:$0xff]  }
 0x35f   : > { %23831 = vmatprep.mubr.msk.bf16.mxu1 %vm2876_vm0, %v29210_v3  ;;  %24419 = vmatprep.mubr.msk.bf16.mxu0 %vm2876_vm0, %v30196_v9 }
 0x366   : > { %23832 = vmatmul.mubr.msk.bf16.gmra.mrb[84].mxu1 %vm2876_vm0, %v29211_v58  ;;  %24420 = vmatmul.mubr.msk.bf16.gmra.mrb[92].mxu0 %vm2876_vm0, %v30199_v10 }
 0x367   : > { %23835 = vmatprep.mubr.msk.bf16.mxu1 %vm2876_vm0, %v29212_v59  ;;  %24423 = vmatprep.mubr.msk.bf16.mxu0 %vm2876_vm0, %v30210_v11 }
 0x36e   : > { %23836 = vmatmul.mubr.msk.bf16.gmra.mrb[88].mxu1 %vm2876_vm0, %v29213_v60  ;;  %24424 = vmatmul.mubr.msk.bf16.gmra.mrb[96].mxu0 %vm2876_vm0, %v30213_v12 }
 0x36f   : > { %23839 = vmatprep.mubr.msk.bf16.mxu1 %vm2876_vm0, %v29214_v62  ;;  %24427 = vmatprep.mubr.msk.bf16.mxu0 %vm2876_vm0, %v30224_v13 }
 0x376   : > { %23840 = vmatmul.mubr.msk.bf16.gmra.mrb[92].mxu1 %vm2876_vm0, %v29215_v7  ;;  %24428 = vmatmul.mubr.msk.bf16.gmra.mrb[100].mxu0 %vm2876_vm0, %v30227_v14 }
 0x377   : > { %23843 = vmatprep.mubr.msk.bf16.mxu1 %vm2876_vm0, %v29216_v8  ;;  %24431 = vmatprep.mubr.msk.bf16.mxu0 %vm2876_vm0, %v30238_v15 }
 0x37e   : > { %23844 = vmatmul.mubr.msk.bf16.gmra.mrb[96].mxu1 %vm2876_vm0, %v30196_v9  ;;  %24432 = vmatmul.mubr.msk.bf16.gmra.mrb[104].mxu0 %vm2876_vm0, %v30241_v16 }
 0x37f   : > { %23847 = vmatprep.mubr.msk.bf16.mxu1 %vm2876_vm0, %v30199_v10  ;;  %24435 = vmatprep.mubr.msk.bf16.mxu0 %vm2876_vm0, %v30252_v17 }
 0x386   : > { %23848 = vmatmul.mubr.msk.bf16.gmra.mrb[100].mxu1 %vm2876_vm0, %v30210_v11  ;;  %24436 = vmatmul.mubr.msk.bf16.gmra.mrb[108].mxu0 %vm2876_vm0, %v30255_v18 }
 0x387   : > { %23851 = vmatprep.mubr.msk.bf16.mxu1 %vm2876_vm0, %v30213_v12  ;;  %24439 = vmatprep.mubr.msk.bf16.mxu0 %vm2876_vm0, %v30266_v19 }
 0x38e   : > { %23852 = vmatmul.mubr.msk.bf16.gmra.mrb[104].mxu1 %vm2876_vm0, %v30224_v13  ;;  %24440 = vmatmul.mubr.msk.bf16.gmra.mrb[112].mxu0 %vm2876_vm0, %v30269_v20 }
 0x38f   : > { %23855 = vmatprep.mubr.msk.bf16.mxu1 %vm2876_vm0, %v30227_v14  ;;  %24443 = vmatprep.mubr.msk.bf16.mxu0 %vm2876_vm0, %v30280_v21 }
 0x391   : > { %v30979_v9 = vpop.f32.mrb[0].mxu1 }
 0x392   : > { %35788 = vst [vmem:[#allocation54_spill] sm:$0xff] %v30979_v9  ;;  %v30981_v10 = vpop.f32.mrb[1].mxu1 }
 0x393   : > { %35789 = vst [vmem:[#allocation55_spill] sm:$0xff] %v30981_v10  ;;  %v30983_v11 = vpop.f32.mrb[2].mxu1 }
 0x394   : > { %35790 = vst [vmem:[#allocation56_spill] sm:$0xff] %v30983_v11  ;;  %v30985_v12 = vpop.f32.mrb[3].mxu1 }
 0x395   : > { %35791 = vst [vmem:[#allocation57_spill] sm:$0xff] %v30985_v12 }
 0x396   : > { %23856 = vmatmul.mubr.msk.bf16.gmra.mrb[108].mxu1 %vm2876_vm0, %v30238_v15  ;;  %24444 = vmatmul.mubr.msk.bf16.gmra.mrb[116].mxu0 %vm2876_vm0, %v30283_v22 }
 0x397   : > { %23859 = vmatprep.mubr.msk.bf16.mxu1 %vm2876_vm0, %v30241_v16  ;;  %24447 = vmatprep.mubr.msk.bf16.mxu0 %vm2876_vm0, %v30294_v23 }
 0x399   : > { %v30995_v13 = vpop.f32.mrb[4].mxu1 }
 0x39a   : > { %35792 = vst [vmem:[#allocation58_spill] sm:$0xff] %v30995_v13  ;;  %v30997_v14 = vpop.f32.mrb[5].mxu1 }
 0x39b   : > { %35793 = vst [vmem:[#allocation59_spill] sm:$0xff] %v30997_v14  ;;  %v30999_v54 = vpop.f32.mrb[6].mxu1 }
 0x39c   : > { %35794 = vst [vmem:[#allocation60_spill] sm:$0xff] %v30999_v54  ;;  %v31001_v5 = vpop.f32.mrb[7].mxu1  ;;  %v31582_v54 = vld [vmem:[%s30044_s21 + $0x3d8] sm:$0xff]  }
 0x39d   : > { %35795 = vst [vmem:[#allocation61_spill] sm:$0xff] %v31001_v5  ;;  %v31575_v5 = vld [vmem:[%s30044_s21 + $0x3d0] sm:$0xff]   ;;  %35917 = vst [vmem:[#allocation183_spill] sm:$0xff] %v31582_v54 }
 0x39e   : > { %23860 = vmatmul.mubr.msk.bf16.gmra.mrb[112].mxu1 %vm2876_vm0, %v30252_v17  ;;  %24448 = vmatmul.mubr.msk.bf16.gmra.mrb[120].mxu0 %vm2876_vm0, %v30297_v24  ;;  %35916 = vst [vmem:[#allocation182_spill] sm:$0xff] %v31575_v5 }
 0x39f   : > { %23863 = vmatprep.mubr.msk.bf16.mxu1 %vm2876_vm0, %v30255_v18  ;;  %24451 = vmatprep.mubr.msk.bf16.mxu0 %vm2876_vm0, %v30308_v25 }
 0x3a1   : > { %v31011_v15 = vpop.f32.mrb[8].mxu1 }
 0x3a2   : > { %35796 = vst [vmem:[#allocation62_spill] sm:$0xff] %v31011_v15  ;;  %v31013_v16 = vpop.f32.mrb[9].mxu1 }
 0x3a3   : > { %35797 = vst [vmem:[#allocation63_spill] sm:$0xff] %v31013_v16  ;;  %v31015_v4 = vpop.f32.mrb[10].mxu1 }
 0x3a4   : > { %35798 = vst [vmem:[#allocation64_spill] sm:$0xff] %v31015_v4  ;;  %v31017_v56 = vpop.f32.mrb[11].mxu1 }
 0x3a5   : > { %35799 = vst [vmem:[#allocation65_spill] sm:$0xff] %v31017_v56 }
 0x3a6   : > { %23864 = vmatmul.mubr.msk.bf16.gmra.mrb[116].mxu1 %vm2876_vm0, %v30266_v19  ;;  %24452 = vmatmul.mubr.msk.bf16.gmra.mrb[124].mxu0 %vm2876_vm0, %v30311_v26 }
 0x3a7   : > { %23867 = vmatprep.mubr.msk.bf16.mxu1 %vm2876_vm0, %v30269_v20  ;;  %24455 = vmatprep.mubr.msk.bf16.mxu0 %vm2876_vm0, %v30322_v27 }
 0x3a9   : > { %v31027_v17 = vpop.f32.mrb[12].mxu1 }
 0x3aa   : > { %35800 = vst [vmem:[#allocation66_spill] sm:$0xff] %v31027_v17  ;;  %v31029_v18 = vpop.f32.mrb[13].mxu1  ;;  %v31560_v17 = vld [vmem:[%s30044_s21 + $0x3c8] sm:$0xff]  }
 0x3ab   : > { %35801 = vst [vmem:[#allocation67_spill] sm:$0xff] %v31029_v18  ;;  %v31031_v57 = vpop.f32.mrb[14].mxu1  ;;  %v31553_v18 = vld [vmem:[%s30044_s21 + $0x3c0] sm:$0xff]   ;;  %35911 = vst [vmem:[#allocation177_spill] sm:$0xff] %v31560_v17 }
 0x3ac   : > { %35802 = vst [vmem:[#allocation68_spill] sm:$0xff] %v31031_v57  ;;  %v31033_v6 = vpop.f32.mrb[15].mxu1  ;;  %35910 = vst [vmem:[#allocation176_spill] sm:$0xff] %v31553_v18 }
 0x3ad   : > { %35803 = vst [vmem:[#allocation69_spill] sm:$0xff] %v31033_v6 }
 0x3ae   : > { %23868 = vmatmul.mubr.msk.bf16.gmra.mrb[120].mxu1 %vm2876_vm0, %v30280_v21  ;;  %24456 = vmatmul.mubr.msk.bf16.gmra.mrb[128].mxu0 %vm2876_vm0, %v30325_v28 }
 0x3af   : > { %23871 = vmatprep.mubr.msk.bf16.mxu1 %vm2876_vm0, %v30283_v22  ;;  %24459 = vmatprep.mubr.msk.bf16.mxu0 %vm2876_vm0, %v30336_v29 }
 0x3b1   : > { %v31043_v19 = vpop.f32.mrb[16].mxu1 }
 0x3b2   : > { %35804 = vst [vmem:[#allocation70_spill] sm:$0xff] %v31043_v19  ;;  %v31045_v20 = vpop.f32.mrb[17].mxu1 }
 0x3b3   : > { %35805 = vst [vmem:[#allocation71_spill] sm:$0xff] %v31045_v20  ;;  %v31047_v3 = vpop.f32.mrb[18].mxu1 }
 0x3b4   : > { %35806 = vst [vmem:[#allocation72_spill] sm:$0xff] %v31047_v3  ;;  %v31049_v58 = vpop.f32.mrb[19].mxu1  ;;  %v31538_v3 = vld [vmem:[%s30044_s21 + $0x3b8] sm:$0xff]  }
 0x3b5   : > { %35807 = vst [vmem:[#allocation73_spill] sm:$0xff] %v31049_v58  ;;  %v31531_v58 = vld [vmem:[%s30044_s21 + $0x3b0] sm:$0xff]   ;;  %35905 = vst [vmem:[#allocation171_spill] sm:$0xff] %v31538_v3 }
 0x3b6   : > { %23872 = vmatmul.mubr.msk.bf16.gmra.mrb[124].mxu1 %vm2876_vm0, %v30294_v23  ;;  %24460 = vmatmul.mubr.msk.bf16.gmra.mrb[132].mxu0 %vm2876_vm0, %v30339_v30  ;;  %35904 = vst [vmem:[#allocation170_spill] sm:$0xff] %v31531_v58 }
 0x3b7   : > { %23875 = vmatprep.mubr.msk.bf16.mxu1 %vm2876_vm0, %v30297_v24  ;;  %24463 = vmatprep.mubr.msk.bf16.mxu0 %vm2876_vm0, %v30350_v31 }
 0x3b9   : > { %v31059_v21 = vpop.f32.mrb[20].mxu1 }
 0x3ba   : > { %35808 = vst [vmem:[#allocation74_spill] sm:$0xff] %v31059_v21  ;;  %v31061_v22 = vpop.f32.mrb[21].mxu1 }
 0x3bb   : > { %35809 = vst [vmem:[#allocation75_spill] sm:$0xff] %v31061_v22  ;;  %v31063_v59 = vpop.f32.mrb[22].mxu1  ;;  %v31509_v22 = vld [vmem:[%s30044_s21 + $0x3a0] sm:$0xff]  }
 0x3bc   : > { %35810 = vst [vmem:[#allocation76_spill] sm:$0xff] %v31063_v59  ;;  %v31065_v60 = vpop.f32.mrb[23].mxu1  ;;  %35898 = vst [vmem:[#allocation164_spill] sm:$0xff] %v31509_v22 }
 0x3bd   : > { %35811 = vst [vmem:[#allocation77_spill] sm:$0xff] %v31065_v60 }
 0x3be   : > { %23876 = vmatmul.mubr.msk.bf16.gmra.mrb[128].mxu1 %vm2876_vm0, %v30308_v25  ;;  %24464 = vmatmul.mubr.msk.bf16.gmra.mrb[136].mxu0 %vm2876_vm0, %v30353_v32 }
 0x3bf   : > { %23879 = vmatprep.mubr.msk.bf16.mxu1 %vm2876_vm0, %v30311_v26  ;;  %24467 = vmatprep.mubr.msk.bf16.mxu0 %vm2876_vm0, %v30364_v33 }
 0x3c1   : > { %v31075_v23 = vpop.f32.mrb[24].mxu1 }
 0x3c2   : > { %35812 = vst [vmem:[#allocation78_spill] sm:$0xff] %v31075_v23  ;;  %v31077_v24 = vpop.f32.mrb[25].mxu1 }
 0x3c3   : > { %35813 = vst [vmem:[#allocation79_spill] sm:$0xff] %v31077_v24  ;;  %v31079_v62 = vpop.f32.mrb[26].mxu1 }
 0x3c4   : > { %35814 = vst [vmem:[#allocation80_spill] sm:$0xff] %v31079_v62  ;;  %v31081_v7 = vpop.f32.mrb[27].mxu1 }
 0x3c5   : > { %35815 = vst [vmem:[#allocation81_spill] sm:$0xff] %v31081_v7 }
 0x3c6   : > { %23880 = vmatmul.mubr.msk.bf16.gmra.mrb[132].mxu1 %vm2876_vm0, %v30322_v27  ;;  %24468 = vmatmul.mubr.msk.bf16.gmra.mrb[140].mxu0 %vm2876_vm0, %v30367_v34 }
 0x3c7   : > { %23883 = vmatprep.mubr.msk.bf16.mxu1 %vm2876_vm0, %v30325_v28  ;;  %24471 = vmatprep.mubr.msk.bf16.mxu0 %vm2876_vm0, %v30378_v35 }
 0x3c9   : > { %v31091_v25 = vpop.f32.mrb[28].mxu1 }
 0x3ca   : > { %35816 = vst [vmem:[#allocation82_spill] sm:$0xff] %v31091_v25  ;;  %v31093_v26 = vpop.f32.mrb[29].mxu1 }
 0x3cb   : > { %35817 = vst [vmem:[#allocation83_spill] sm:$0xff] %v31093_v26  ;;  %v31095_v8 = vpop.f32.mrb[30].mxu1 }
 0x3cc   : > { %35818 = vst [vmem:[#allocation84_spill] sm:$0xff] %v31095_v8  ;;  %v31097_v12 = vpop.f32.mrb[31].mxu1 }
 0x3cd   : > { %35819 = vst [vmem:[#allocation85_spill] sm:$0xff] %v31097_v12 }
 0x3ce   : > { %23884 = vmatmul.mubr.msk.bf16.gmra.mrb[136].mxu1 %vm2876_vm0, %v30336_v29  ;;  %24472 = vmatmul.mubr.msk.bf16.gmra.mrb[144].mxu0 %vm2876_vm0, %v30381_v36 }
 0x3cf   : > { %23887 = vmatprep.mubr.msk.bf16.mxu1 %vm2876_vm0, %v30339_v30  ;;  %24475 = vmatprep.mubr.msk.bf16.mxu0 %vm2876_vm0, %v30392_v37 }
 0x3d1   : > { %v31107_v27 = vpop.f32.mrb[32].mxu1  ;;  %v24369_v28 = vpop.f32.mrb[40].mxu0 }
 0x3d2   : > { %35820 = vst [vmem:[#allocation86_spill] sm:$0xff] %v31107_v27  ;;  %v31109_v26 = vpop.f32.mrb[33].mxu1  ;;  %v7394_v8 = vpop.f32.mrb[41].mxu0 }
 0x3d3   : > { %35821 = vst [vmem:[#allocation87_spill] sm:$0xff] %v31109_v26  ;;  %v31111_v25 = vpop.f32.mrb[34].mxu1  ;;  %v24370_v12 = vpop.f32.mrb[42].mxu0 }
 0x3d4   : > { %35822 = vst [vmem:[#allocation88_spill] sm:$0xff] %v31111_v25  ;;  %v31113_v11 = vpop.f32.mrb[35].mxu1  ;;  %v7397_v29 = vpop.f32.mrb[43].mxu0 }
 0x3d5   : > { %35823 = vst [vmem:[#allocation89_spill] sm:$0xff] %v31113_v11 }
 0x3d6   : > { %23888 = vmatmul.mubr.msk.bf16.gmra.mrb[140].mxu1 %vm2876_vm0, %v30350_v31  ;;  %24476 = vmatmul.mubr.msk.bf16.gmra.mrb[40].mxu0 %vm2876_vm0, %v30395_v38 }
 0x3d7   : > { %23891 = vmatprep.mubr.msk.bf16.mxu1 %vm2876_vm0, %v30353_v32  ;;  %24479 = vmatprep.mubr.msk.bf16.mxu0 %vm2876_vm0, %v30406_v39 }
 0x3d9   : > { %v31123_v30 = vpop.f32.mrb[36].mxu1  ;;  %v24373_v26 = vpop.f32.mrb[44].mxu0 }
 0x3da   : > { %35824 = vst [vmem:[#allocation90_spill] sm:$0xff] %v31123_v30  ;;  %v31125_v25 = vpop.f32.mrb[37].mxu1  ;;  %v7410_v27 = vpop.f32.mrb[45].mxu0 }
 0x3db   : > { %35825 = vst [vmem:[#allocation91_spill] sm:$0xff] %v31125_v25  ;;  %v31127_v11 = vpop.f32.mrb[38].mxu1  ;;  %v24374_v10 = vpop.f32.mrb[46].mxu0 }
 0x3dc   : > { %35826 = vst [vmem:[#allocation92_spill] sm:$0xff] %v31127_v11  ;;  %v31129_v9 = vpop.f32.mrb[39].mxu1  ;;  %v7413_v31 = vpop.f32.mrb[47].mxu0 }
 0x3dd   : > { %35827 = vst [vmem:[#allocation93_spill] sm:$0xff] %v31129_v9 }
 0x3de   : > { %23892 = vmatmul.mubr.msk.bf16.gmra.mrb[144].mxu1 %vm2876_vm0, %v30364_v33  ;;  %24480 = vmatmul.mubr.msk.bf16.gmra.mrb[44].mxu0 %vm2876_vm0, %v30409_v40 }
 0x3df   : > { %23895 = vmatprep.mubr.msk.bf16.mxu1 %vm2876_vm0, %v30367_v34  ;;  %24483 = vmatprep.mubr.msk.bf16.mxu0 %vm2876_vm0, %v30420_v41 }
 0x3e1   : > { %v23789_v32 = vpop.f32.mrb[40].mxu1  ;;  %v24377_v25 = vpop.f32.mrb[48].mxu0 }
 0x3e2   : > { %v4702_v30 = vpop.f32.mrb[41].mxu1  ;;  %v31139_v11 = vadd.f32 %v24369_v28, %v23789_v32  ;;  %v7426_v7 = vpop.f32.mrb[49].mxu0 }
 0x3e3   : > { %v23790_v9 = vpop.f32.mrb[42].mxu1  ;;  %v31141_v62 = vadd.f32 %v7394_v8, %v4702_v30  ;;  %v24378_v24 = vpop.f32.mrb[50].mxu0 }
 0x3e4   : > { %35828 = vst [vmem:[#allocation94_spill] sm:$0xff] %v31139_v11  ;;  %v4705_v33 = vpop.f32.mrb[43].mxu1  ;;  %v31143_v23 = vadd.f32 %v24370_v12, %v23790_v9  ;;  %v7429_v60 = vpop.f32.mrb[51].mxu0  ;;  %v31503_v11 = vld [vmem:[%s35736_s25 + $0x28] sm:$0xff]  }
 0x3e5   : > { %35829 = vst [vmem:[#allocation95_spill] sm:$0xff] %v31141_v62  ;;  %v31145_v59 = vadd.f32 %v7397_v29, %v4705_v33  ;;  %24905 = vmatprep.subr.bf16.mxu0 %v31503_v11 }
 0x3e6   : > { %35830 = vst [vmem:[#allocation96_spill] sm:$0xff] %v31143_v23  ;;  %23896 = vmatmul.mubr.msk.bf16.gmra.mrb[40].mxu1 %vm2876_vm0, %v30378_v35  ;;  %24484 = vmatmul.mubr.msk.bf16.gmra.mrb[48].mxu0 %vm2876_vm0, %v30423_v42  ;;  %v31481_v23 = vld [vmem:[%s30044_s21 + $0x390] sm:$0xff]  }
 0x3e7   : > { %35831 = vst [vmem:[#allocation97_spill] sm:$0xff] %v31145_v59  ;;  %23899 = vmatprep.mubr.msk.bf16.mxu1 %vm2876_vm0, %v30381_v36  ;;  %24487 = vmatprep.mubr.msk.bf16.mxu0 %vm2876_vm0, %v30434_v43  ;;  %v31466_v59 = vld [vmem:[%s30044_s21 + $0x388] sm:$0xff]   ;;  %35892 = vst [vmem:[#allocation158_spill] sm:$0xff] %v31481_v23 }
 0x3e8   : > { %35887 = vst [vmem:[#allocation153_spill] sm:$0xff] %v31466_v59 }
 0x3e9   : > { %v23793_v34 = vpop.f32.mrb[44].mxu1  ;;  %v24381_v41 = vpop.f32.mrb[52].mxu0 }
 0x3ea   : > { %v4718_v8 = vpop.f32.mrb[45].mxu1  ;;  %v31155_v9 = vadd.f32 %v24373_v26, %v23793_v34  ;;  %v7442_v12 = vpop.f32.mrb[53].mxu0 }
 0x3eb   : > { %v23794_v28 = vpop.f32.mrb[46].mxu1  ;;  %v31157_v29 = vadd.f32 %v7410_v27, %v4718_v8  ;;  %v24382_v30 = vpop.f32.mrb[54].mxu0 }
 0x3ec   : > { %35832 = vst [vmem:[#allocation98_spill] sm:$0xff] %v31155_v9  ;;  %v4721_v35 = vpop.f32.mrb[47].mxu1  ;;  %v31159_v32 = vadd.f32 %v24374_v10, %v23794_v28  ;;  %v7445_v42 = vpop.f32.mrb[55].mxu0  ;;  %v31459_v9 = vld [vmem:[%s30044_s21 + $0x380] sm:$0xff]  }
 0x3ed   : > { %35833 = vst [vmem:[#allocation99_spill] sm:$0xff] %v31157_v29  ;;  %v31161_v33 = vadd.f32 %v7413_v31, %v4721_v35  ;;  %v31444_v29 = vld [vmem:[%s30044_s21 + $0x378] sm:$0xff]   ;;  %35886 = vst [vmem:[#allocation152_spill] sm:$0xff] %v31459_v9 }
 0x3ee   : > { %35834 = vst [vmem:[#allocation100_spill] sm:$0xff] %v31159_v32  ;;  %23900 = vmatmul.mubr.msk.bf16.gmra.mrb[44].mxu1 %vm2876_vm0, %v30392_v37  ;;  %24488 = vmatmul.mubr.msk.bf16.gmra.mrb[52].mxu0 %vm2876_vm0, %v30437_v44  ;;  %v31437_v32 = vld [vmem:[%s30044_s21 + $0x370] sm:$0xff]   ;;  %35881 = vst [vmem:[#allocation147_spill] sm:$0xff] %v31444_v29 }
 0x3ef   : > { %35835 = vst [vmem:[#allocation101_spill] sm:$0xff] %v31161_v33  ;;  %23903 = vmatprep.mubr.msk.bf16.mxu1 %vm2876_vm0, %v30395_v38  ;;  %24491 = vmatprep.mubr.msk.bf16.mxu0 %vm2876_vm0, %v30448_v45  ;;  %v31422_v33 = vld [vmem:[%s30044_s21 + $0x368] sm:$0xff]   ;;  %35880 = vst [vmem:[#allocation146_spill] sm:$0xff] %v31437_v32 }
 0x3f1   : > { %v23797_v36 = vpop.f32.mrb[48].mxu1  ;;  %v24385_v43 = vpop.f32.mrb[56].mxu0 }
 0x3f2   : > { %v4734_v26 = vpop.f32.mrb[49].mxu1  ;;  %v31171_v10 = vadd.f32 %v24377_v25, %v23797_v36  ;;  %v7458_v27 = vpop.f32.mrb[57].mxu0 }
 0x3f3   : > { %v23798_v31 = vpop.f32.mrb[50].mxu1  ;;  %v31173_v34 = vadd.f32 %v7426_v7, %v4734_v26  ;;  %v24386_v8 = vpop.f32.mrb[58].mxu0 }
 0x3f4   : > { %35836 = vst [vmem:[#allocation102_spill] sm:$0xff] %v31171_v10  ;;  %v4737_v37 = vpop.f32.mrb[51].mxu1  ;;  %v31175_v28 = vadd.f32 %v24378_v24, %v23798_v31  ;;  %v7461_v44 = vpop.f32.mrb[59].mxu0  ;;  %v31415_v10 = vld [vmem:[%s30044_s21 + $0x360] sm:$0xff]  }
 0x3f5   : > { %35837 = vst [vmem:[#allocation103_spill] sm:$0xff] %v31173_v34  ;;  %v31177_v35 = vadd.f32 %v7429_v60, %v4737_v37  ;;  %v29217_v37 = vld [vmem:[%s30044_s21 + $0x288] sm:$0xff]   ;;  %v31400_v34 = vld [vmem:[%s30044_s21 + $0x358] sm:$0xff]  }
 0x3f6   : > { %35838 = vst [vmem:[#allocation104_spill] sm:$0xff] %v31175_v28  ;;  %23904 = vmatmul.mubr.msk.bf16.gmra.mrb[48].mxu1 %vm2876_vm0, %v30406_v39  ;;  %24492 = vmatmul.mubr.msk.bf16.gmra.mrb[56].mxu0 %vm2876_vm0, %v30451_v46  ;;  %v31371_v28 = vld [vmem:[%s30044_s21 + $0x340] sm:$0xff]  }
 0x3f7   : > { %35839 = vst [vmem:[#allocation105_spill] sm:$0xff] %v31177_v35  ;;  %23907 = vmatprep.mubr.msk.bf16.mxu1 %vm2876_vm0, %v30409_v40  ;;  %24495 = vmatprep.mubr.msk.bf16.mxu0 %vm2876_vm0, %v30462_v47  ;;  %v29218_v47 = vld [vmem:[%s30044_s21 + $0x290] sm:$0xff]  }
 0x3f9   : > { %v23801_v38 = vpop.f32.mrb[52].mxu1  ;;  %v24389_v45 = vpop.f32.mrb[60].mxu0 }
 0x3fa   : > { %v4750_v24 = vpop.f32.mrb[53].mxu1  ;;  %v31187_v7 = vadd.f32 %v24381_v41, %v23801_v38  ;;  %v7474_v60 = vpop.f32.mrb[61].mxu0 }
 0x3fb   : > { %v23802_v25 = vpop.f32.mrb[54].mxu1  ;;  %v31189_v36 = vadd.f32 %v7442_v12, %v4750_v24  ;;  %v24390_v39 = vpop.f32.mrb[62].mxu0 }
 0x3fc   : > { %35840 = vst [vmem:[#allocation106_spill] sm:$0xff] %v31187_v7  ;;  %v4753_v26 = vpop.f32.mrb[55].mxu1  ;;  %v31191_v31 = vadd.f32 %v24382_v30, %v23802_v25  ;;  %v7477_v46 = vpop.f32.mrb[63].mxu0  ;;  %v31346_v7 = vld [vmem:[%s30044_s21 + $0x2f8] sm:$0xff]  }
 0x3fd   : > { %35841 = vst [vmem:[#allocation107_spill] sm:$0xff] %v31189_v36  ;;  %v31193_v40 = vadd.f32 %v7445_v42, %v4753_v26 }
 0x3fe   : > { %35842 = vst [vmem:[#allocation108_spill] sm:$0xff] %v31191_v31  ;;  %23908 = vmatmul.mubr.msk.bf16.gmra.mrb[52].mxu1 %vm2876_vm0, %v29217_v37  ;;  %24496 = vmatmul.mubr.msk.bf16.gmra.mrb[60].mxu0 %vm2876_vm0, %v30465_v48  ;;  %v29219_v48 = vld [vmem:[%s30044_s21 + $0x298] sm:$0xff]   ;;  %v31327_v31 = vld [vmem:[%s30044_s21 + $0x320] sm:$0xff]  }
 0x3ff   : > { %35843 = vst [vmem:[#allocation109_spill] sm:$0xff] %v31193_v40  ;;  %23911 = vmatprep.mubr.msk.bf16.mxu1 %vm2876_vm0, %v29218_v47  ;;  %24499 = vmatprep.mubr.msk.bf16.mxu0 %vm2876_vm0, %v30476_v49  ;;  %v29220_v49 = vld [vmem:[%s30044_s21 + $0x2a0] sm:$0xff]   ;;  %v31322_v40 = vld [vmem:[%s30044_s21 + $0x2e8] sm:$0xff]  }
 0x401   : > { %v23805_v41 = vpop.f32.mrb[56].mxu1 }
 0x402   : > { %v4766_v12 = vpop.f32.mrb[57].mxu1  ;;  %v31203_v30 = vadd.f32 %v24385_v43, %v23805_v41 }
 0x403   : > { %v23806_v38 = vpop.f32.mrb[58].mxu1  ;;  %v31205_v42 = vadd.f32 %v7458_v27, %v4766_v12  ;;  %v31228_v12 = vld [vmem:[%s30044_s21 + $0x2a8] sm:$0xff]  }
 0x404   : > { %35844 = vst [vmem:[#allocation110_spill] sm:$0xff] %v31203_v30  ;;  %v4769_v24 = vpop.f32.mrb[59].mxu1  ;;  %v31207_v25 = vadd.f32 %v24386_v8, %v23806_v38  ;;  %v29224_v38 = vld [vmem:[%s30044_s21 + $0x2f0] sm:$0xff]  }
 0x405   : > { %35845 = vst [vmem:[#allocation111_spill] sm:$0xff] %v31205_v42  ;;  %v31209_v26 = vadd.f32 %v7461_v44, %v4769_v24 }
 0x406   : > { %35846 = vst [vmem:[#allocation112_spill] sm:$0xff] %v31207_v25  ;;  %23912 = vmatmul.mubr.msk.bf16.gmra.mrb[56].mxu1 %vm2876_vm0, %v29219_v48  ;;  %24500 = vmatmul.mubr.msk.bf16.gmra.mrb[172].mxu0 %vm2876_vm0, %v30479_v50  ;;  %v31299_v25 = vld [vmem:[%s30044_s21 + $0x310] sm:$0xff]  }
 0x407   : > { %35847 = vst [vmem:[#allocation113_spill] sm:$0xff] %v31209_v26  ;;  %23915 = vmatprep.mubr.msk.bf16.mxu1 %vm2876_vm0, %v29220_v49  ;;  %24503 = vmatprep.mubr.msk.bf16.mxu0 %vm2876_vm0, %v30490_v51  ;;  %v31235_v51 = vld [vmem:[%s30044_s21 + $0x2b0] sm:$0xff]   ;;  %v31294_v26 = vld [vmem:[%s30044_s21 + $0x2d8] sm:$0xff]  }
 0x409   : > { %v23809_v43 = vpop.f32.mrb[60].mxu1 }
 0x40a   : > { %v4782_v27 = vpop.f32.mrb[61].mxu1  ;;  %v31219_v8 = vadd.f32 %v24389_v45, %v23809_v43 }
 0x40b   : > { %v23810_v44 = vpop.f32.mrb[62].mxu1  ;;  %v31221_v37 = vadd.f32 %v7474_v60, %v4782_v27  ;;  %v31272_v27 = vld [vmem:[%s30044_s21 + $0x2c8] sm:$0xff]  }
 0x40c   : > { %35848 = vst [vmem:[#allocation114_spill] sm:$0xff] %v31219_v8  ;;  %v4785_v47 = vpop.f32.mrb[63].mxu1  ;;  %v31223_v41 = vadd.f32 %v24390_v39, %v23810_v44  ;;  %v29227_v44 = vld [vmem:[%s30044_s21 + $0x300] sm:$0xff]  }
 0x40d   : > { %35849 = vst [vmem:[#allocation115_spill] sm:$0xff] %v31221_v37  ;;  %v31225_v50 = vadd.f32 %v7477_v46, %v4785_v47  ;;  %v29229_v47 = vld [vmem:[%s30044_s21 + $0x308] sm:$0xff]  }
 0x40e   : > { %35850 = vst [vmem:[#allocation116_spill] sm:$0xff] %v31223_v41  ;;  %23916 = vmatmul.mubr.msk.bf16.gmra.mrb[60].mxu1 %vm2876_vm0, %v31228_v12  ;;  %24504 = vmatmul.mubr.msk.bf16.gmra.mrb[176].mxu0 %vm2876_vm0, %v30493_v52  ;;  %v31250_v52 = vld [vmem:[%s30044_s21 + $0x2b8] sm:$0xff]  }
 0x40f   : > { %35851 = vst [vmem:[#allocation117_spill] sm:$0xff] %v31225_v50  ;;  %23919 = vmatprep.mubr.msk.bf16.mxu1 %vm2876_vm0, %v31235_v51  ;;  %24507 = vmatprep.mubr.msk.bf16.mxu0 %vm2876_vm0, %v30504_v53  ;;  %v31257_v53 = vld [vmem:[%s30044_s21 + $0x2c0] sm:$0xff]  }
 0x411   : > { %v31241_v45 = vpop.f32.mrb[64].mxu1 }
 0x412   : > { %v31243_v60 = vpop.f32.mrb[65].mxu1 }
 0x413   : > { %v31245_v39 = vpop.f32.mrb[66].mxu1 }
 0x414   : > { %v31247_v46 = vpop.f32.mrb[67].mxu1 }
 0x416   : > { %23920 = vmatmul.mubr.msk.bf16.gmra.mrb[64].mxu1 %vm2876_vm0, %v31250_v52  ;;  %24508 = vmatmul.mubr.msk.bf16.gmra.mrb[180].mxu0 %vm2876_vm0, %v29224_v38 }
 0x417   : > { %23923 = vmatprep.mubr.msk.bf16.mxu1 %vm2876_vm0, %v31257_v53  ;;  %24511 = vmatprep.mubr.msk.bf16.mxu0 %vm2876_vm0, %v30515_v55  ;;  %v31279_v55 = vld [vmem:[%s30044_s21 + $0x2d0] sm:$0xff]  }
 0x419   : > { %v31263_v24 = vpop.f32.mrb[68].mxu1 }
 0x41a   : > { %v31265_v48 = vpop.f32.mrb[69].mxu1 }
 0x41b   : > { %v31267_v49 = vpop.f32.mrb[70].mxu1 }
 0x41c   : > { %v31269_v43 = vpop.f32.mrb[71].mxu1 }
 0x41e   : > { %23924 = vmatmul.mubr.msk.bf16.gmra.mrb[68].mxu1 %vm2876_vm0, %v31272_v27  ;;  %24512 = vmatmul.mubr.msk.bf16.gmra.mrb[184].mxu0 %vm2876_vm0, %v29227_v44 }
 0x41f   : > { %23927 = vmatprep.mubr.msk.bf16.mxu1 %vm2876_vm0, %v31279_v55  ;;  %24515 = vmatprep.mubr.msk.bf16.mxu0 %vm2876_vm0, %v29229_v47 }
 0x421   : > { %v31285_v50 = vpop.f32.mrb[72].mxu1 }
 0x422   : > { %35852 = vst [vmem:[#allocation118_spill] sm:$0xff] %v31285_v50  ;;  %v31287_v41 = vpop.f32.mrb[73].mxu1  ;;  %v31304_v50 = vld [vmem:[%s30044_s21 + $0x2e0] sm:$0xff]  }
 0x423   : > { %35853 = vst [vmem:[#allocation119_spill] sm:$0xff] %v31287_v41  ;;  %v31289_v37 = vpop.f32.mrb[74].mxu1 }
 0x424   : > { %35854 = vst [vmem:[#allocation120_spill] sm:$0xff] %v31289_v37  ;;  %v31291_v8 = vpop.f32.mrb[75].mxu1  ;;  %v31309_v37 = vld [vmem:[%s30044_s21 + $0x318] sm:$0xff]  }
 0x425   : > { %35855 = vst [vmem:[#allocation121_spill] sm:$0xff] %v31291_v8 }
 0x426   : > { %23928 = vmatmul.mubr.msk.bf16.gmra.mrb[180].mxu1 %vm2876_vm0, %v31294_v26  ;;  %24516 = vmatmul.mubr.msk.bf16.gmra.mrb[188].mxu0 %vm2876_vm0, %v31299_v25 }
 0x427   : > { %23931 = vmatprep.mubr.msk.bf16.mxu1 %vm2876_vm0, %v31304_v50  ;;  %24519 = vmatprep.mubr.msk.bf16.mxu0 %vm2876_vm0, %v31309_v37 }
 0x429   : > { %v31313_v8 = vpop.f32.mrb[76].mxu1 }
 0x42a   : > { %35856 = vst [vmem:[#allocation122_spill] sm:$0xff] %v31313_v8  ;;  %v31315_v41 = vpop.f32.mrb[77].mxu1  ;;  %v31333_v8 = vld [vmem:[%s30044_s21 + $0x328] sm:$0xff]  }
 0x42b   : > { %35857 = vst [vmem:[#allocation123_spill] sm:$0xff] %v31315_v41  ;;  %v31317_v42 = vpop.f32.mrb[78].mxu1 }
 0x42c   : > { %35858 = vst [vmem:[#allocation124_spill] sm:$0xff] %v31317_v42  ;;  %v31319_v30 = vpop.f32.mrb[79].mxu1 }
 0x42d   : > { %35859 = vst [vmem:[#allocation125_spill] sm:$0xff] %v31319_v30 }
 0x42e   : > { %23932 = vmatmul.mubr.msk.bf16.gmra.mrb[184].mxu1 %vm2876_vm0, %v31322_v40  ;;  %24520 = vmatmul.mubr.msk.bf16.gmra.mrb[192].mxu0 %vm2876_vm0, %v31327_v31 }
 0x42f   : > { %23935 = vmatprep.mubr.msk.bf16.mxu1 %vm2876_vm0, %v29224_v38  ;;  %24523 = vmatprep.mubr.msk.bf16.mxu0 %vm2876_vm0, %v31333_v8  ;;  %v31351_v38 = vld [vmem:[%s30044_s21 + $0x330] sm:$0xff]  }
 0x431   : > { %v31337_v42 = vpop.f32.mrb[80].mxu1 }
 0x432   : > { %35860 = vst [vmem:[#allocation126_spill] sm:$0xff] %v31337_v42  ;;  %v31339_v30 = vpop.f32.mrb[81].mxu1  ;;  %v31357_v42 = vld [vmem:[%s30044_s21 + $0x338] sm:$0xff]  }
 0x433   : > { %35861 = vst [vmem:[#allocation127_spill] sm:$0xff] %v31339_v30  ;;  %v31341_v41 = vpop.f32.mrb[82].mxu1 }
 0x434   : > { %35862 = vst [vmem:[#allocation128_spill] sm:$0xff] %v31341_v41  ;;  %v31343_v36 = vpop.f32.mrb[83].mxu1 }
 0x435   : > { %35863 = vst [vmem:[#allocation129_spill] sm:$0xff] %v31343_v36 }
 0x436   : > { %23936 = vmatmul.mubr.msk.bf16.gmra.mrb[188].mxu1 %vm2876_vm0, %v31346_v7  ;;  %24524 = vmatmul.mubr.msk.bf16.gmra.mrb[196].mxu0 %vm2876_vm0, %v31351_v38 }
 0x437   : > { %23939 = vmatprep.mubr.msk.bf16.mxu1 %vm2876_vm0, %v29227_v44  ;;  %24527 = vmatprep.mubr.msk.bf16.mxu0 %vm2876_vm0, %v31357_v42  ;;  %v31378_v44 = vld [vmem:[%s30044_s21 + $0x348] sm:$0xff]  }
 0x439   : > { %v31361_v36 = vpop.f32.mrb[84].mxu1 }
 0x43a   : > { %35864 = vst [vmem:[#allocation130_spill] sm:$0xff] %v31361_v36  ;;  %v31363_v41 = vpop.f32.mrb[85].mxu1  ;;  %v31393_v36 = vld [vmem:[%s30044_s21 + $0x350] sm:$0xff]  }
 0x43b   : > { %35865 = vst [vmem:[#allocation131_spill] sm:$0xff] %v31363_v41  ;;  %v31365_v30 = vpop.f32.mrb[86].mxu1 }
 0x43c   : > { %35866 = vst [vmem:[#allocation132_spill] sm:$0xff] %v31365_v30  ;;  %v31367_v35 = vpop.f32.mrb[87].mxu1 }
 0x43d   : > { %35867 = vst [vmem:[#allocation133_spill] sm:$0xff] %v31367_v35 }
 0x43e   : > { %23940 = vmatmul.mubr.msk.bf16.gmra.mrb[192].mxu1 %vm2876_vm0, %v29229_v47  ;;  %24528 = vmatmul.mubr.msk.bf16.gmra.mrb[200].mxu0 %vm2876_vm0, %v31371_v28 }
 0x43f   : > { %23943 = vmatprep.mubr.msk.bf16.mxu1 %vm2876_vm0, %v31299_v25  ;;  %24531 = vmatprep.mubr.msk.bf16.mxu0 %vm2876_vm0, %v31378_v44 }
 0x441   : > { %v31382_v30 = vpop.f32.mrb[88].mxu1 }
 0x442   : > { %35868 = vst [vmem:[#allocation134_spill] sm:$0xff] %v31382_v30  ;;  %v31384_v41 = vpop.f32.mrb[89].mxu1 }
 0x443   : > { %35869 = vst [vmem:[#allocation135_spill] sm:$0xff] %v31384_v41  ;;  %v31386_v35 = vpop.f32.mrb[90].mxu1 }
 0x444   : > { %35870 = vst [vmem:[#allocation136_spill] sm:$0xff] %v31386_v35  ;;  %v31388_v47 = vpop.f32.mrb[91].mxu1 }
 0x445   : > { %35871 = vst [vmem:[#allocation137_spill] sm:$0xff] %v31388_v47 }
 0x446   : > { %23944 = vmatmul.mubr.msk.bf16.gmra.mrb[196].mxu1 %vm2876_vm0, %v31309_v37  ;;  %24532 = vmatmul.mubr.msk.bf16.gmra.mrb[204].mxu0 %vm2876_vm0, %v31393_v36 }
 0x447   : > { %23947 = vmatprep.mubr.msk.bf16.mxu1 %vm2876_vm0, %v31327_v31  ;;  %24535 = vmatprep.mubr.msk.bf16.mxu0 %vm2876_vm0, %v31400_v34 }
 0x449   : > { %v31404_v35 = vpop.f32.mrb[92].mxu1 }
 0x44a   : > { %35872 = vst [vmem:[#allocation138_spill] sm:$0xff] %v31404_v35  ;;  %v31406_v47 = vpop.f32.mrb[93].mxu1 }
 0x44b   : > { %35873 = vst [vmem:[#allocation139_spill] sm:$0xff] %v31406_v47  ;;  %v31408_v41 = vpop.f32.mrb[94].mxu1 }
 0x44c   : > { %35874 = vst [vmem:[#allocation140_spill] sm:$0xff] %v31408_v41  ;;  %v31410_v30 = vpop.f32.mrb[95].mxu1 }
 0x44d   : > { %35875 = vst [vmem:[#allocation141_spill] sm:$0xff] %v31410_v30 }
 0x44e   : > { %23948 = vmatmul.mubr.msk.bf16.gmra.mrb[200].mxu1 %vm2876_vm0, %v31333_v8  ;;  %24536 = vmatmul.mubr.msk.bf16.gmra.mrb[208].mxu0 %vm2876_vm0, %v31415_v10 }
 0x44f   : > { %23951 = vmatprep.mubr.msk.bf16.mxu1 %vm2876_vm0, %v31351_v38  ;;  %24539 = vmatprep.mubr.msk.bf16.mxu0 %vm2876_vm0, %v31422_v33 }
 0x451   : > { %v31426_v41 = vpop.f32.mrb[96].mxu1 }
 0x452   : > { %35876 = vst [vmem:[#allocation142_spill] sm:$0xff] %v31426_v41  ;;  %v31428_v30 = vpop.f32.mrb[97].mxu1 }
 0x453   : > { %35877 = vst [vmem:[#allocation143_spill] sm:$0xff] %v31428_v30  ;;  %v31430_v47 = vpop.f32.mrb[98].mxu1 }
 0x454   : > { %35878 = vst [vmem:[#allocation144_spill] sm:$0xff] %v31430_v47  ;;  %v31432_v35 = vpop.f32.mrb[99].mxu1 }
 0x455   : > { %35879 = vst [vmem:[#allocation145_spill] sm:$0xff] %v31432_v35 }
 0x456   : > { %23952 = vmatmul.mubr.msk.bf16.gmra.mrb[204].mxu1 %vm2876_vm0, %v31357_v42  ;;  %24540 = vmatmul.mubr.msk.bf16.gmra.mrb[212].mxu0 %vm2876_vm0, %v31437_v32 }
 0x457   : > { %23955 = vmatprep.mubr.msk.bf16.mxu1 %vm2876_vm0, %v31371_v28  ;;  %24543 = vmatprep.mubr.msk.bf16.mxu0 %vm2876_vm0, %v31444_v29 }
 0x459   : > { %v31448_v47 = vpop.f32.mrb[100].mxu1 }
 0x45a   : > { %35882 = vst [vmem:[#allocation148_spill] sm:$0xff] %v31448_v47  ;;  %v31450_v35 = vpop.f32.mrb[101].mxu1 }
 0x45b   : > { %35883 = vst [vmem:[#allocation149_spill] sm:$0xff] %v31450_v35  ;;  %v31452_v30 = vpop.f32.mrb[102].mxu1 }
 0x45c   : > { %35884 = vst [vmem:[#allocation150_spill] sm:$0xff] %v31452_v30  ;;  %v31454_v41 = vpop.f32.mrb[103].mxu1 }
 0x45d   : > { %35885 = vst [vmem:[#allocation151_spill] sm:$0xff] %v31454_v41 }
 0x45e   : > { %23956 = vmatmul.mubr.msk.bf16.gmra.mrb[208].mxu1 %vm2876_vm0, %v31378_v44  ;;  %24544 = vmatmul.mubr.msk.bf16.gmra.mrb[216].mxu0 %vm2876_vm0, %v31459_v9 }
 0x45f   : > { %23959 = vmatprep.mubr.msk.bf16.mxu1 %vm2876_vm0, %v31393_v36  ;;  %24547 = vmatprep.mubr.msk.bf16.mxu0 %vm2876_vm0, %v31466_v59 }
 0x461   : > { %v31470_v30 = vpop.f32.mrb[104].mxu1 }
 0x462   : > { %35888 = vst [vmem:[#allocation154_spill] sm:$0xff] %v31470_v30  ;;  %v31472_v35 = vpop.f32.mrb[105].mxu1  ;;  %v31488_v30 = vld [vmem:[%s30044_s21 + $0x398] sm:$0xff]  }
 0x463   : > { %35889 = vst [vmem:[#allocation155_spill] sm:$0xff] %v31472_v35  ;;  %v31474_v41 = vpop.f32.mrb[106].mxu1  ;;  %35893 = vst [vmem:[#allocation159_spill] sm:$0xff] %v31488_v30 }
 0x464   : > { %35890 = vst [vmem:[#allocation156_spill] sm:$0xff] %v31474_v41  ;;  %v31476_v47 = vpop.f32.mrb[107].mxu1 }
 0x465   : > { %35891 = vst [vmem:[#allocation157_spill] sm:$0xff] %v31476_v47 }
 0x466   : > { %23960 = vmatmul.mubr.msk.bf16.gmra.mrb[212].mxu1 %vm2876_vm0, %v31400_v34  ;;  %24548 = vmatmul.mubr.msk.bf16.gmra.mrb[220].mxu0 %vm2876_vm0, %v31481_v23 }
 0x467   : > { %23963 = vmatprep.mubr.msk.bf16.mxu1 %vm2876_vm0, %v31415_v10  ;;  %24551 = vmatprep.mubr.msk.bf16.mxu0 %vm2876_vm0, %v31488_v30 }
 0x469   : > { %v31492_v41 = vpop.f32.mrb[108].mxu1 }
 0x46a   : > { %35894 = vst [vmem:[#allocation160_spill] sm:$0xff] %v31492_v41  ;;  %v31494_v47 = vpop.f32.mrb[109].mxu1 }
 0x46b   : > { %35895 = vst [vmem:[#allocation161_spill] sm:$0xff] %v31494_v47  ;;  %v31496_v35 = vpop.f32.mrb[110].mxu1 }
 0x46c   : > { %35896 = vst [vmem:[#allocation162_spill] sm:$0xff] %v31496_v35  ;;  %v31498_v62 = vpop.f32.mrb[111].mxu1 }
 0x46d   : > { %35897 = vst [vmem:[#allocation163_spill] sm:$0xff] %v31498_v62  ;;  %v31516_v62 = vld [vmem:[%s30044_s21 + $0x3a8] sm:$0xff]  }
 0x46e   : > { %23964 = vmatmul.mubr.msk.bf16.gmra.mrb[216].mxu1 %vm2876_vm0, %v31422_v33  ;;  %24552 = vmatmul.mubr.msk.bf16.gmra.mrb[224].mxu0 %vm2876_vm0, %v31509_v22  ;;  %35899 = vst [vmem:[#allocation165_spill] sm:$0xff] %v31516_v62 }
 0x46f   : > { %23967 = vmatprep.mubr.msk.bf16.mxu1 %vm2876_vm0, %v31437_v32  ;;  %24555 = vmatprep.mubr.msk.bf16.mxu0 %vm2876_vm0, %v31516_v62 }
 0x471   : > { %v31520_v35 = vpop.f32.mrb[112].mxu1 }
 0x472   : > { %35900 = vst [vmem:[#allocation166_spill] sm:$0xff] %v31520_v35  ;;  %v31522_v47 = vpop.f32.mrb[113].mxu1  ;;  %v36008_v35 = vld [vmem:[#allocation37_spill] sm:$0xff] }
 0x473   : > { %35901 = vst [vmem:[#allocation167_spill] sm:$0xff] %v31522_v47  ;;  %v31524_v41 = vpop.f32.mrb[114].mxu1 }
 0x474   : > { %35902 = vst [vmem:[#allocation168_spill] sm:$0xff] %v31524_v41  ;;  %v31526_v21 = vpop.f32.mrb[115].mxu1  ;;  %v35959_v41 = vld [vmem:[#allocation5_spill] sm:$0xff] }
 0x475   : > { %35903 = vst [vmem:[#allocation169_spill] sm:$0xff] %v31526_v21 }
 0x476   : > { %23968 = vmatmul.mubr.msk.bf16.gmra.mrb[220].mxu1 %vm2876_vm0, %v31444_v29  ;;  %24556 = vmatmul.mubr.msk.bf16.gmra.mrb[228].mxu0 %vm2876_vm0, %v31531_v58  ;;  %v36020_v29 = vld [vmem:[#allocation45_spill] sm:$0xff] }
 0x477   : > { %23971 = vmatprep.mubr.msk.bf16.mxu1 %vm2876_vm0, %v31459_v9  ;;  %24559 = vmatprep.mubr.msk.bf16.mxu0 %vm2876_vm0, %v31538_v3 }
 0x479   : > { %v31542_v20 = vpop.f32.mrb[116].mxu1 }
 0x47a   : > { %35906 = vst [vmem:[#allocation172_spill] sm:$0xff] %v31542_v20  ;;  %v31544_v19 = vpop.f32.mrb[117].mxu1 }
 0x47b   : > { %35907 = vst [vmem:[#allocation173_spill] sm:$0xff] %v31544_v19  ;;  %v31546_v6 = vpop.f32.mrb[118].mxu1  ;;  %v35955_v19 = vld [vmem:[#allocation4_spill] sm:$0xff] }
 0x47c   : > { %35908 = vst [vmem:[#allocation174_spill] sm:$0xff] %v31546_v6  ;;  %v31548_v57 = vpop.f32.mrb[119].mxu1 }
 0x47d   : > { %35909 = vst [vmem:[#allocation175_spill] sm:$0xff] %v31548_v57 }
 0x47e   : > { %23972 = vmatmul.mubr.msk.bf16.gmra.mrb[224].mxu1 %vm2876_vm0, %v31466_v59  ;;  %24560 = vmatmul.mubr.msk.bf16.gmra.mrb[232].mxu0 %vm2876_vm0, %v31553_v18  ;;  %v36018_v59 = vld [vmem:[#allocation42_spill] sm:$0xff] }
 0x47f   : > { %23975 = vmatprep.mubr.msk.bf16.mxu1 %vm2876_vm0, %v31481_v23  ;;  %24563 = vmatprep.mubr.msk.bf16.mxu0 %vm2876_vm0, %v31560_v17 }
 0x481   : > { %v31564_v56 = vpop.f32.mrb[120].mxu1 }
 0x482   : > { %35912 = vst [vmem:[#allocation178_spill] sm:$0xff] %v31564_v56  ;;  %v31566_v4 = vpop.f32.mrb[121].mxu1  ;;  %v31604_v56 = vld [vmem:[%s30044_s21 + $0x3e8] sm:$0xff]  }
 0x483   : > { %35913 = vst [vmem:[#allocation179_spill] sm:$0xff] %v31566_v4  ;;  %v31568_v16 = vpop.f32.mrb[122].mxu1  ;;  %v31597_v4 = vld [vmem:[%s30044_s21 + $0x3e0] sm:$0xff]   ;;  %35923 = vst [vmem:[#allocation189_spill] sm:$0xff] %v31604_v56 }
 0x484   : > { %35914 = vst [vmem:[#allocation180_spill] sm:$0xff] %v31568_v16  ;;  %v31570_v15 = vpop.f32.mrb[123].mxu1  ;;  %35922 = vst [vmem:[#allocation188_spill] sm:$0xff] %v31597_v4 }
 0x485   : > { %35915 = vst [vmem:[#allocation181_spill] sm:$0xff] %v31570_v15 }
 0x486   : > { %23976 = vmatmul.mubr.msk.bf16.gmra.mrb[228].mxu1 %vm2876_vm0, %v31488_v30  ;;  %24564 = vmatmul.mubr.msk.bf16.gmra.mrb[236].mxu0 %vm2876_vm0, %v31575_v5  ;;  %v35958_v30 = vld [vmem:[#allocation6_spill] sm:$0xff] }
 0x487   : > { %23979 = vmatprep.mubr.msk.bf16.mxu1 %vm2876_vm0, %v31509_v22  ;;  %24567 = vmatprep.mubr.msk.bf16.mxu0 %vm2876_vm0, %v31582_v54 }
 0x489   : > { %v31586_v14 = vpop.f32.mrb[124].mxu1 }
 0x48a   : > { %35918 = vst [vmem:[#allocation184_spill] sm:$0xff] %v31586_v14  ;;  %v31588_v13 = vpop.f32.mrb[125].mxu1 }
 0x48b   : > { %35919 = vst [vmem:[#allocation185_spill] sm:$0xff] %v31588_v13  ;;  %v31590_v15 = vpop.f32.mrb[126].mxu1 }
 0x48c   : > { %35920 = vst [vmem:[#allocation186_spill] sm:$0xff] %v31590_v15  ;;  %v31592_v16 = vpop.f32.mrb[127].mxu1 }
 0x48d   : > { %35921 = vst [vmem:[#allocation187_spill] sm:$0xff] %v31592_v16 }
 0x48e   : > { %23980 = vmatmul.mubr.msk.bf16.gmra.mrb[232].mxu1 %vm2876_vm0, %v31516_v62  ;;  %24568 = vmatmul.mubr.msk.bf16.gmra.mrb[240].mxu0 %vm2876_vm0, %v31597_v4  ;;  %v31619_v62 = vld [vmem:[%s30044_s21 + $0x3f0] sm:$0xff]  }
 0x48f   : > { %23983 = vmatprep.mubr.msk.bf16.mxu1 %vm2876_vm0, %v31531_v58  ;;  %24571 = vmatprep.mubr.msk.bf16.mxu0 %vm2876_vm0, %v31604_v56  ;;  %35928 = vst [vmem:[#allocation194_spill] sm:$0xff] %v31619_v62  ;;  %v31626_v58 = vld [vmem:[%s30044_s21 + $0x3f8] sm:$0xff]  }
 0x490   : > { %35929 = vst [vmem:[#allocation195_spill] sm:$0xff] %v31626_v58 }
 0x491   : > { %v31608_v15 = vpop.f32.mrb[128].mxu1 }
 0x492   : > { %35924 = vst [vmem:[#allocation190_spill] sm:$0xff] %v31608_v15  ;;  %v31610_v16 = vpop.f32.mrb[129].mxu1 }
 0x493   : > { %35925 = vst [vmem:[#allocation191_spill] sm:$0xff] %v31610_v16  ;;  %v31612_v13 = vpop.f32.mrb[130].mxu1 }
 0x494   : > { %35926 = vst [vmem:[#allocation192_spill] sm:$0xff] %v31612_v13  ;;  %v31614_v14 = vpop.f32.mrb[131].mxu1 }
 0x495   : > { %35927 = vst [vmem:[#allocation193_spill] sm:$0xff] %v31614_v14 }
 0x496   : > { %23984 = vmatmul.mubr.msk.bf16.gmra.mrb[236].mxu1 %vm2876_vm0, %v31538_v3  ;;  %24572 = vmatmul.mubr.msk.bf16.gmra.mrb[244].mxu0 %vm2876_vm0, %v31619_v62  ;;  %v31641_v3 = vld [vmem:[%s30044_s21 + $0x400] sm:$0xff]  }
 0x497   : > { %23987 = vmatprep.mubr.msk.bf16.mxu1 %vm2876_vm0, %v31553_v18  ;;  %24575 = vmatprep.mubr.msk.bf16.mxu0 %vm2876_vm0, %v31626_v58  ;;  %35934 = vst [vmem:[#allocation200_spill] sm:$0xff] %v31641_v3  ;;  %v31648_v18 = vld [vmem:[%s30044_s21 + $0x408] sm:$0xff]  }
 0x498   : > { %35935 = vst [vmem:[#allocation201_spill] sm:$0xff] %v31648_v18 }
 0x499   : > { %v31630_v13 = vpop.f32.mrb[132].mxu1 }
 0x49a   : > { %35930 = vst [vmem:[#allocation196_spill] sm:$0xff] %v31630_v13  ;;  %v31632_v14 = vpop.f32.mrb[133].mxu1 }
 0x49b   : > { %35931 = vst [vmem:[#allocation197_spill] sm:$0xff] %v31632_v14  ;;  %v31634_v16 = vpop.f32.mrb[134].mxu1 }
 0x49c   : > { %35932 = vst [vmem:[#allocation198_spill] sm:$0xff] %v31634_v16  ;;  %v31636_v15 = vpop.f32.mrb[135].mxu1 }
 0x49d   : > { %35933 = vst [vmem:[#allocation199_spill] sm:$0xff] %v31636_v15 }
 0x49e   : > { %23988 = vmatmul.mubr.msk.bf16.gmra.mrb[240].mxu1 %vm2876_vm0, %v31560_v17  ;;  %24576 = vmatmul.mubr.msk.bf16.gmra.mrb[248].mxu0 %vm2876_vm0, %v31641_v3  ;;  %v31663_v17 = vld [vmem:[%s30044_s21 + $0x410] sm:$0xff]  }
 0x49f   : > { %23991 = vmatprep.mubr.msk.bf16.mxu1 %vm2876_vm0, %v31575_v5  ;;  %24579 = vmatprep.mubr.msk.bf16.mxu0 %vm2876_vm0, %v31648_v18  ;;  %35940 = vst [vmem:[#allocation206_spill] sm:$0xff] %v31663_v17  ;;  %v31670_v5 = vld [vmem:[%s30044_s21 + $0x418] sm:$0xff]  }
 0x4a0   : > { %35941 = vst [vmem:[#allocation207_spill] sm:$0xff] %v31670_v5 }
 0x4a1   : > { %v31652_v16 = vpop.f32.mrb[136].mxu1 }
 0x4a2   : > { %35936 = vst [vmem:[#allocation202_spill] sm:$0xff] %v31652_v16  ;;  %v31654_v15 = vpop.f32.mrb[137].mxu1 }
 0x4a3   : > { %35937 = vst [vmem:[#allocation203_spill] sm:$0xff] %v31654_v15  ;;  %v31656_v14 = vpop.f32.mrb[138].mxu1 }
 0x4a4   : > { %35938 = vst [vmem:[#allocation204_spill] sm:$0xff] %v31656_v14  ;;  %v31658_v13 = vpop.f32.mrb[139].mxu1 }
 0x4a5   : > { %35939 = vst [vmem:[#allocation205_spill] sm:$0xff] %v31658_v13 }
 0x4a6   : > { %23992 = vmatmul.mubr.msk.bf16.gmra.mrb[244].mxu1 %vm2876_vm0, %v31582_v54  ;;  %24580 = vmatmul.mubr.msk.bf16.gmra.mrb[252].mxu0 %vm2876_vm0, %v31663_v17  ;;  %v31685_v54 = vld [vmem:[%s30044_s21 + $0x420] sm:$0xff]  }
 0x4a7   : > { %23995 = vmatprep.mubr.msk.bf16.mxu1 %vm2876_vm0, %v31597_v4  ;;  %24583 = vmatprep.mubr.msk.bf16.mxu0 %vm2876_vm0, %v31670_v5  ;;  %35946 = vst [vmem:[#allocation212_spill] sm:$0xff] %v31685_v54  ;;  %v31692_v4 = vld [vmem:[%s30044_s21 + $0x428] sm:$0xff]  }
 0x4a8   : > { %35947 = vst [vmem:[#allocation213_spill] sm:$0xff] %v31692_v4 }
 0x4a9   : > { %v31674_v14 = vpop.f32.mrb[140].mxu1 }
 0x4aa   : > { %35942 = vst [vmem:[#allocation208_spill] sm:$0xff] %v31674_v14  ;;  %v31676_v13 = vpop.f32.mrb[141].mxu1 }
 0x4ab   : > { %35943 = vst [vmem:[#allocation209_spill] sm:$0xff] %v31676_v13  ;;  %v31678_v15 = vpop.f32.mrb[142].mxu1 }
 0x4ac   : > { %35944 = vst [vmem:[#allocation210_spill] sm:$0xff] %v31678_v15  ;;  %v31680_v16 = vpop.f32.mrb[143].mxu1 }
 0x4ad   : > { %35945 = vst [vmem:[#allocation211_spill] sm:$0xff] %v31680_v16 }
 0x4ae   : > { %23996 = vmatmul.mubr.msk.bf16.gmra.mrb[248].mxu1 %vm2876_vm0, %v31604_v56  ;;  %24584 = vmatmul.mubr.msk.bf16.gmra.mrb[148].mxu0 %vm2876_vm0, %v31685_v54  ;;  %v31707_v56 = vld [vmem:[%s30044_s21 + $0x430] sm:$0xff]  }
 0x4af   : > { %23999 = vmatprep.mubr.msk.bf16.mxu1 %vm2876_vm0, %v31619_v62  ;;  %24587 = vmatprep.mubr.msk.bf16.mxu0 %vm2876_vm0, %v31692_v4  ;;  %35952 = vst [vmem:[#allocation218_spill] sm:$0xff] %v31707_v56  ;;  %v31714_v62 = vld [vmem:[%s30044_s21 + $0x438] sm:$0xff]  }
 0x4b0   : > { %35953 = vst [vmem:[#allocation219_spill] sm:$0xff] %v31714_v62 }
 0x4b1   : > { %v31696_v15 = vpop.f32.mrb[144].mxu1 }
 0x4b2   : > { %35948 = vst [vmem:[#allocation214_spill] sm:$0xff] %v31696_v15  ;;  %v31698_v13 = vpop.f32.mrb[145].mxu1 }
 0x4b3   : > { %35949 = vst [vmem:[#allocation215_spill] sm:$0xff] %v31698_v13  ;;  %v31700_v16 = vpop.f32.mrb[146].mxu1 }
 0x4b4   : > { %35950 = vst [vmem:[#allocation216_spill] sm:$0xff] %v31700_v16  ;;  %v31702_v14 = vpop.f32.mrb[147].mxu1 }
 0x4b5   : > { %35951 = vst [vmem:[#allocation217_spill] sm:$0xff] %v31702_v14 }
 0x4b6   : > { %24000 = vmatmul.mubr.msk.bf16.gmra.mrb[252].mxu1 %vm2876_vm0, %v31626_v58  ;;  %24588 = vmatmul.mubr.msk.bf16.gmra.mrb[152].mxu0 %vm2876_vm0, %v31707_v56 }
 0x4b7   : > { %24003 = vmatprep.mubr.msk.bf16.mxu1 %vm2876_vm0, %v31641_v3  ;;  %24591 = vmatprep.mubr.msk.bf16.mxu0 %vm2876_vm0, %v31714_v62  ;;  %v35956_v3 = vld [vmem:[#allocation3_spill] sm:$0xff] }
 0x4b9   : > { %v23897_v16 = vpop.f32.mrb[40].mxu1 }
 0x4ba   : > { %v5134_v14 = vpop.f32.mrb[41].mxu1  ;;  %v5143_v13 = vadd.f32 %v23897_v16, %v30641_v0  ;;  %v31734_v0 = vld [vmem:[%s30044_s21 + $0x440] sm:$0xff]   ;;  %v35965_v16 = vld [vmem:[#allocation8_spill] sm:$0xff] }
 0x4bb   : > { %v23898_v15 = vpop.f32.mrb[42].mxu1  ;;  %v5135_v58 = vadd.f32 %v5134_v14, %v30645_v2  ;;  %35961 = vst [vmem:[#allocation6_spill] sm:$0xff] %v31734_v0 }
 0x4bc   : > { %v5137_v57 = vpop.f32.mrb[43].mxu1  ;;  %v31721_v6 = vadd.f32 %v30643_v1, %v5143_v13  ;;  %v5146_v20 = vadd.f32 %v23898_v15, %v35955_v19  ;;  %v35962_v1 = vld [vmem:[#allocation7_spill] sm:$0xff]  ;;  %v31744_v13 = vld [vmem:[%s30044_s21 + $0x448] sm:$0xff]  }
 0x4bd   : > { %v31725_v22 = vadd.f32 %v35956_v3, %v5135_v58  ;;  %v5138_v21 = vadd.f32 %v5137_v57, %v35958_v30  ;;  %35964 = vst [vmem:[#allocation7_spill] sm:$0xff] %v31744_v13  ;;  %v35967_v30 = vld [vmem:[#allocation9_spill] sm:$0xff] }
 0x4be   : > { %35954 = vst [vmem:[#allocation220_spill] sm:$0xff] %v31721_v6  ;;  %24004 = vmatmul.mubr.msk.bf16.gmra.mrb[148].mxu1 %vm2876_vm0, %v31648_v18  ;;  %v31731_v47 = vadd.f32 %v35959_v41, %v5146_v20  ;;  %24592 = vmatmul.mubr.msk.bf16.gmra.mrb[156].mxu0 %vm2876_vm0, %v31734_v0  ;;  %v35966_v20 = vld [vmem:[#allocation10_spill] sm:$0xff] }
 0x4bf   : > { %35957 = vst [vmem:[#allocation4_spill] sm:$0xff] %v31725_v22  ;;  %24007 = vmatprep.mubr.msk.bf16.mxu1 %vm2876_vm0, %v31663_v17  ;;  %v31741_v2 = vadd.f32 %v35962_v1, %v5138_v21  ;;  %24595 = vmatprep.mubr.msk.bf16.mxu0 %vm2876_vm0, %v31744_v13  ;;  %v35970_v1 = vld [vmem:[#allocation11_spill] sm:$0xff]  ;;  %v35972_v22 = vld [vmem:[#allocation14_spill] sm:$0xff]  ;;  %v35973_v17 = vld [vmem:[#allocation13_spill] sm:$0xff] }
 0x4c0   : > { %35960 = vst [vmem:[#allocation3_spill] sm:$0xff] %v31731_v47  ;;  %v35969_v47 = vld [vmem:[#allocation12_spill] sm:$0xff] }
 0x4c1   : > { %35963 = vst [vmem:[#allocation5_spill] sm:$0xff] %v31741_v2  ;;  %v23901_v14 = vpop.f32.mrb[44].mxu1 }
 0x4c2   : > { %v5150_v15 = vpop.f32.mrb[45].mxu1  ;;  %v5159_v57 = vadd.f32 %v23901_v14, %v35965_v16  ;;  %v31764_v14 = vld [vmem:[%s30044_s21 + $0x450] sm:$0xff]   ;;  %v31774_v16 = vld [vmem:[%s30044_s21 + $0x458] sm:$0xff]  }
 0x4c3   : > { %v23902_v19 = vpop.f32.mrb[46].mxu1  ;;  %v5151_v3 = vadd.f32 %v5150_v15, %v35966_v20  ;;  %35975 = vst [vmem:[#allocation12_spill] sm:$0xff] %v31764_v14 }
 0x4c4   : > { %v5153_v58 = vpop.f32.mrb[47].mxu1  ;;  %v31751_v41 = vadd.f32 %v35967_v30, %v5159_v57  ;;  %v5162_v21 = vadd.f32 %v23902_v19, %v35969_v47  ;;  %v35976_v47 = vld [vmem:[#allocation15_spill] sm:$0xff]  ;;  %v35978_v57 = vld [vmem:[#allocation16_spill] sm:$0xff] }
 0x4c5   : > { %v31755_v2 = vadd.f32 %v35970_v1, %v5151_v3  ;;  %v5154_v6 = vadd.f32 %v5153_v58, %v35972_v22  ;;  %v35979_v3 = vld [vmem:[#allocation18_spill] sm:$0xff] }
 0x4c6   : > { %35968 = vst [vmem:[#allocation8_spill] sm:$0xff] %v31751_v41  ;;  %24008 = vmatmul.mubr.msk.bf16.gmra.mrb[152].mxu1 %vm2876_vm0, %v31670_v5  ;;  %v31761_v18 = vadd.f32 %v35973_v17, %v5162_v21  ;;  %24596 = vmatmul.mubr.msk.bf16.gmra.mrb[160].mxu0 %vm2876_vm0, %v31764_v14  ;;  %v35980_v21 = vld [vmem:[#allocation17_spill] sm:$0xff] }
 0x4c7   : > { %35971 = vst [vmem:[#allocation10_spill] sm:$0xff] %v31755_v2  ;;  %24011 = vmatprep.mubr.msk.bf16.mxu1 %vm2876_vm0, %v31685_v54  ;;  %v31771_v15 = vadd.f32 %v35976_v47, %v5154_v6  ;;  %24599 = vmatprep.mubr.msk.bf16.mxu0 %vm2876_vm0, %v31774_v16  ;;  %v35983_v47 = vld [vmem:[#allocation19_spill] sm:$0xff]  ;;  %v35985_v2 = vld [vmem:[#allocation22_spill] sm:$0xff]  ;;  %v35986_v54 = vld [vmem:[#allocation21_spill] sm:$0xff] }
 0x4c8   : > { %35974 = vst [vmem:[#allocation9_spill] sm:$0xff] %v31761_v18  ;;  %v35982_v18 = vld [vmem:[#allocation20_spill] sm:$0xff] }
 0x4c9   : > { %35977 = vst [vmem:[#allocation11_spill] sm:$0xff] %v31771_v15  ;;  %v23905_v22 = vpop.f32.mrb[48].mxu1 }
 0x4ca   : > { %v5166_v17 = vpop.f32.mrb[49].mxu1  ;;  %v5175_v19 = vadd.f32 %v23905_v22, %v35978_v57  ;;  %v31794_v22 = vld [vmem:[%s30044_s21 + $0x460] sm:$0xff]   ;;  %v31804_v57 = vld [vmem:[%s30044_s21 + $0x468] sm:$0xff]  }
 0x4cb   : > { %v23906_v20 = vpop.f32.mrb[50].mxu1  ;;  %v5167_v58 = vadd.f32 %v5166_v17, %v35979_v3 }
 0x4cc   : > { %v5169_v30 = vpop.f32.mrb[51].mxu1  ;;  %v31781_v1 = vadd.f32 %v35980_v21, %v5175_v19  ;;  %v5178_v6 = vadd.f32 %v23906_v20, %v35982_v18  ;;  %v35988_v18 = vld [vmem:[#allocation23_spill] sm:$0xff]  ;;  %v35990_v19 = vld [vmem:[#allocation24_spill] sm:$0xff] }
 0x4cd   : > { %v31785_v15 = vadd.f32 %v35983_v47, %v5167_v58  ;;  %v5170_v41 = vadd.f32 %v5169_v30, %v35985_v2  ;;  %v35991_v58 = vld [vmem:[#allocation26_spill] sm:$0xff] }
 0x4ce   : > { %35981 = vst [vmem:[#allocation14_spill] sm:$0xff] %v31781_v1  ;;  %24012 = vmatmul.mubr.msk.bf16.gmra.mrb[156].mxu1 %vm2876_vm0, %v31692_v4  ;;  %v31791_v5 = vadd.f32 %v35986_v54, %v5178_v6  ;;  %24600 = vmatmul.mubr.msk.bf16.gmra.mrb[164].mxu0 %vm2876_vm0, %v31794_v22  ;;  %v35992_v6 = vld [vmem:[#allocation25_spill] sm:$0xff] }
 0x4cf   : > { %35984 = vst [vmem:[#allocation13_spill] sm:$0xff] %v31785_v15  ;;  %24015 = vmatprep.mubr.msk.bf16.mxu1 %vm2876_vm0, %v31707_v56  ;;  %v31801_v17 = vadd.f32 %v35988_v18, %v5170_v41  ;;  %24603 = vmatprep.mubr.msk.bf16.mxu0 %vm2876_vm0, %v31804_v57  ;;  %v35995_v18 = vld [vmem:[#allocation27_spill] sm:$0xff]  ;;  %v35997_v15 = vld [vmem:[#allocation30_spill] sm:$0xff]  ;;  %v35998_v56 = vld [vmem:[#allocation29_spill] sm:$0xff] }
 0x4d0   : > { %35987 = vst [vmem:[#allocation15_spill] sm:$0xff] %v31791_v5  ;;  %v35994_v5 = vld [vmem:[#allocation28_spill] sm:$0xff] }
 0x4d1   : > { %35989 = vst [vmem:[#allocation16_spill] sm:$0xff] %v31801_v17  ;;  %v23909_v2 = vpop.f32.mrb[52].mxu1 }
 0x4d2   : > { %v5182_v54 = vpop.f32.mrb[53].mxu1  ;;  %v5191_v20 = vadd.f32 %v23909_v2, %v35990_v19  ;;  %v31824_v2 = vld [vmem:[%s30044_s21 + $0x470] sm:$0xff]   ;;  %v31834_v19 = vld [vmem:[%s30044_s21 + $0x478] sm:$0xff]  }
 0x4d3   : > { %v23910_v3 = vpop.f32.mrb[54].mxu1  ;;  %v5183_v30 = vadd.f32 %v5182_v54, %v35991_v58 }
 0x4d4   : > { %v5185_v21 = vpop.f32.mrb[55].mxu1  ;;  %v31811_v47 = vadd.f32 %v35992_v6, %v5191_v20  ;;  %v5194_v41 = vadd.f32 %v23910_v3, %v35994_v5  ;;  %v36000_v5 = vld [vmem:[#allocation31_spill] sm:$0xff] }
 0x4d5   : > { %v31815_v17 = vadd.f32 %v35995_v18, %v5183_v30  ;;  %v5186_v1 = vadd.f32 %v5185_v21, %v35997_v15  ;;  %v36002_v21 = vld [vmem:[#allocation33_spill] sm:$0xff] }
 0x4d6   : > { %35993 = vst [vmem:[#allocation18_spill] sm:$0xff] %v31811_v47  ;;  %24016 = vmatmul.mubr.msk.bf16.gmra.mrb[160].mxu1 %vm2876_vm0, %v31714_v62  ;;  %v31821_v4 = vadd.f32 %v35998_v56, %v5194_v41  ;;  %24604 = vmatmul.mubr.msk.bf16.gmra.mrb[168].mxu0 %vm2876_vm0, %v31824_v2 }
 0x4d7   : > { %35996 = vst [vmem:[#allocation17_spill] sm:$0xff] %v31815_v17  ;;  %24019 = vmatprep.mubr.msk.bf16.mxu1 %vm2876_vm0, %v31734_v0  ;;  %v31831_v54 = vadd.f32 %v36000_v5, %v5186_v1  ;;  %24607 = vmatprep.mubr.msk.bf16.mxu0 %vm2876_vm0, %v31834_v19  ;;  %v36003_v1 = vld [vmem:[#allocation32_spill] sm:$0xff]  ;;  %v36006_v0 = vld [vmem:[#allocation34_spill] sm:$0xff] }
 0x4d8   : > { %35999 = vst [vmem:[#allocation20_spill] sm:$0xff] %v31821_v4  ;;  %v31841_v4 = vld [vmem:[%s30044_s21 + $0x488] sm:$0xff]  }
 0x4d9   : > { %36001 = vst [vmem:[#allocation19_spill] sm:$0xff] %v31831_v54  ;;  %v23913_v15 = vpop.f32.mrb[56].mxu1  ;;  %v24501_v56 = vpop.f32.mrb[172].mxu0  ;;  %v36005_v54 = vld [vmem:[#allocation35_spill] sm:$0xff] }
 0x4da   : > { %v5198_v20 = vpop.f32.mrb[57].mxu1  ;;  %v5207_v3 = vadd.f32 %v23913_v15, %v30729_v61  ;;  %v7922_v58 = vpop.f32.mrb[173].mxu0  ;;  %v36009_v15 = vld [vmem:[#allocation36_spill] sm:$0xff] }
 0x4db   : > { %v23914_v30 = vpop.f32.mrb[58].mxu1  ;;  %v5199_v6 = vadd.f32 %v5198_v20, %v36002_v21  ;;  %v24502_v41 = vpop.f32.mrb[174].mxu0  ;;  %v31857_v21 = vld [vmem:[%s30044_s21 + $0x480] sm:$0xff]  }
 0x4dc   : > { %v5201_v18 = vpop.f32.mrb[59].mxu1  ;;  %v31844_v5 = vadd.f32 %v36003_v1, %v5207_v3  ;;  %v5210_v17 = vadd.f32 %v23914_v30, %v36005_v54  ;;  %v7925_v47 = vpop.f32.mrb[175].mxu0  ;;  %v36011_v54 = vld [vmem:[#allocation38_spill] sm:$0xff] }
 0x4dd   : > { %v31848_v62 = vadd.f32 %v36006_v0, %v5199_v6  ;;  %v5202_v61 = vadd.f32 %v5201_v18, %v36008_v35  ;;  %v36013_v6 = vld [vmem:[#allocation39_spill] sm:$0xff] }
 0x4de   : > { %36004 = vst [vmem:[#allocation22_spill] sm:$0xff] %v31844_v5  ;;  %24020 = vmatmul.mubr.msk.bf16.gmra.mrb[164].mxu1 %vm2876_vm0, %v31744_v13  ;;  %v31854_v20 = vadd.f32 %v36009_v15, %v5210_v17  ;;  %24608 = vmatmul.mubr.msk.bf16.gmra.mrb[172].mxu0 %vm2876_vm0, %v31857_v21  ;;  %v31870_v15 = vld [vmem:[%s30044_s21 + $0x490] sm:$0xff]   ;;  %v36015_v13 = vld [vmem:[#allocation40_spill] sm:$0xff] }
 0x4df   : > { %36007 = vst [vmem:[#allocation21_spill] sm:$0xff] %v31848_v62  ;;  %24023 = vmatprep.mubr.msk.bf16.mxu1 %vm2876_vm0, %v31764_v14  ;;  %v31864_v3 = vadd.f32 %v36011_v54, %v5202_v61  ;;  %24611 = vmatprep.mubr.msk.bf16.mxu0 %vm2876_vm0, %v31841_v4  ;;  %v36017_v54 = vld [vmem:[#allocation43_spill] sm:$0xff] }
 0x4e0   : > { %36010 = vst [vmem:[#allocation23_spill] sm:$0xff] %v31854_v20  ;;  %v36014_v20 = vld [vmem:[#allocation41_spill] sm:$0xff] }
 0x4e1   : > { %36012 = vst [vmem:[#allocation24_spill] sm:$0xff] %v31864_v3  ;;  %v23917_v35 = vpop.f32.mrb[60].mxu1  ;;  %v24505_v0 = vpop.f32.mrb[176].mxu0 }
 0x4e2   : > { %v5214_v30 = vpop.f32.mrb[61].mxu1  ;;  %v5223_v17 = vadd.f32 %v23917_v35, %v36013_v6  ;;  %v7938_v18 = vpop.f32.mrb[177].mxu0  ;;  %v36021_v6 = vld [vmem:[#allocation44_spill] sm:$0xff] }
 0x4e3   : > { %v23918_v1 = vpop.f32.mrb[62].mxu1  ;;  %v5215_v62 = vadd.f32 %v5214_v30, %v36014_v20  ;;  %v24506_v5 = vpop.f32.mrb[178].mxu0 }
 0x4e4   : > { %v5217_v14 = vpop.f32.mrb[63].mxu1  ;;  %v31874_v61 = vadd.f32 %v36015_v13, %v5223_v17  ;;  %v5226_v3 = vadd.f32 %v23918_v1, %v36017_v54  ;;  %v7941_v23 = vpop.f32.mrb[179].mxu0  ;;  %v36023_v13 = vld [vmem:[#allocation46_spill] sm:$0xff]  ;;  %v36026_v17 = vld [vmem:[#allocation48_spill] sm:$0xff] }
 0x4e5   : > { %v31878_v9 = vadd.f32 %v36018_v59, %v5215_v62  ;;  %v5218_v35 = vadd.f32 %v5217_v14, %v36020_v29  ;;  %v29281_v59 = vld [vmem:[%s30044_s21 + $0x20] sm:$0xff]  }
 0x4e6   : > { %36016 = vst [vmem:[#allocation26_spill] sm:$0xff] %v31874_v61  ;;  %24024 = vmatmul.mubr.msk.bf16.gmra.mrb[168].mxu1 %vm2876_vm0, %v31774_v16  ;;  %v31884_v32 = vadd.f32 %v36021_v6, %v5226_v3  ;;  %24612 = vmatmul.mubr.msk.bf16.gmra.mrb[176].mxu0 %vm2876_vm0, %v31870_v15  ;;  %v36025_v14 = vld [vmem:[#allocation47_spill] sm:$0xff] }
 0x4e7   : > { %36019 = vst [vmem:[#allocation25_spill] sm:$0xff] %v31878_v9  ;;  %24027 = vmatprep.mubr.msk.bf16.mxu1 %vm2876_vm0, %v31794_v22  ;;  %v31891_v20 = vadd.f32 %v36023_v13, %v5218_v35  ;;  %24617 = vmatprep.mubr.msk.bf16.mxu0 %vm2876_vm0, %v29281_v59  ;;  %v36030_v35 = vld [vmem:[#allocation50_spill] sm:$0xff] }
 0x4e8   : > { %36022 = vst [vmem:[#allocation28_spill] sm:$0xff] %v31884_v32  ;;  %v36028_v32 = vld [vmem:[#allocation49_spill] sm:$0xff] }
 0x4e9   : > { %36024 = vst [vmem:[#allocation27_spill] sm:$0xff] %v31891_v20  ;;  %v23921_v62 = vpop.f32.mrb[64].mxu1  ;;  %v31908_v20 = vld [vmem:[%s30044_s21 + $0x28] sm:$0xff]  }
 0x4ea   : > { %v5230_v29 = vpop.f32.mrb[65].mxu1  ;;  %v5239_v30 = vadd.f32 %v23921_v62, %v36025_v14 }
 0x4eb   : > { %v23922_v3 = vpop.f32.mrb[66].mxu1  ;;  %v5231_v1 = vadd.f32 %v5230_v29, %v36026_v17  ;;  %v36033_v29 = vld [vmem:[#allocation51_spill] sm:$0xff] }
 0x4ec   : > { %v5233_v54 = vpop.f32.mrb[67].mxu1  ;;  %v31897_v6 = vadd.f32 %v24501_v56, %v5239_v30  ;;  %v5242_v9 = vadd.f32 %v23922_v3, %v36028_v32  ;;  %v31918_v32 = vld [vmem:[%s30044_s21 + $0x30] sm:$0xff]  }
 0x4ed   : > { %v31900_v61 = vadd.f32 %v7922_v58, %v5231_v1  ;;  %v5234_v13 = vadd.f32 %v5233_v54, %v36030_v35  ;;  %v36037_v1 = vld [vmem:[#allocation53_spill] sm:$0xff] }
 0x4ee   : > { %36027 = vst [vmem:[#allocation30_spill] sm:$0xff] %v31897_v6  ;;  %24028 = vmatmul.mubr.msk.bf16.gmra.mrb[172].mxu1 %vm2876_vm0, %v31804_v57  ;;  %v31905_v59 = vadd.f32 %v24502_v41, %v5242_v9  ;;  %24618 = vmatmul.mubr.msk.bf16.vlgmr.msra.gmra.mrb[0].mxu0 %vm2876_vm0, %v31908_v20 }
 0x4ef   : > { %36029 = vst [vmem:[#allocation29_spill] sm:$0xff] %v31900_v61  ;;  %24031 = vmatprep.mubr.msk.bf16.mxu1 %vm2876_vm0, %v31824_v2  ;;  %v31914_v56 = vadd.f32 %v7925_v47, %v5234_v13  ;;  %24906 = vmatpush3.bf16.msra.mxu0 %v31503_v11  ;;  %v36035_v47 = vld [vmem:[#allocation52_spill] sm:$0xff] }
 0x4f0   : > { %36031 = vst [vmem:[#allocation31_spill] sm:$0xff] %v31905_v59  ;;  %24621 = vmatprep.mubr.msk.bf16.mxu0 %vm2876_vm0, %v31918_v32  ;;  %v32022_v59 = vld [vmem:[%s30044_s21 + $0x80] sm:$0xff]  }
 0x4f1   : > { %36032 = vst [vmem:[#allocation33_spill] sm:$0xff] %v31914_v56  ;;  %v23925_v9 = vpop.f32.mrb[68].mxu1  ;;  %v32017_v56 = vld [vmem:[%s30044_s21 + $0x78] sm:$0xff]   ;;  %36063 = vst [vmem:[#allocation227_spill] sm:$0xff] %v32022_v59 }
 0x4f2   : > { %v5246_v58 = vpop.f32.mrb[69].mxu1  ;;  %v5255_v41 = vadd.f32 %v23925_v9, %v30790_v63  ;;  %v31935_v63 = vld [vmem:[%s30044_s21 + $0x38] sm:$0xff]   ;;  %36062 = vst [vmem:[#allocation226_spill] sm:$0xff] %v32017_v56 }
 0x4f3   : > { %v23926_v62 = vpop.f32.mrb[70].mxu1  ;;  %v5247_v14 = vadd.f32 %v5246_v58, %v36033_v29 }
 0x4f4   : > { %v5249_v30 = vpop.f32.mrb[71].mxu1  ;;  %v31924_v3 = vadd.f32 %v24505_v0, %v5255_v41  ;;  %v5258_v17 = vadd.f32 %v23926_v62, %v36035_v47  ;;  %v31966_v41 = vld [vmem:[%s30044_s21 + $0x50] sm:$0xff]   ;;  %v31981_v47 = vld [vmem:[%s30044_s21 + $0x58] sm:$0xff]  }
 0x4f5   : > { %v31927_v11 = vadd.f32 %v7938_v18, %v5247_v14  ;;  %v5250_v54 = vadd.f32 %v5249_v30, %v36037_v1  ;;  %v31944_v18 = vld [vmem:[%s30044_s21 + $0x40] sm:$0xff]   ;;  %36045 = vst [vmem:[#allocation43_spill] sm:$0xff] %v31966_v41  ;;  %36050 = vst [vmem:[#allocation47_spill] sm:$0xff] %v31981_v47 }
 0x4f6   : > { %36034 = vst [vmem:[#allocation32_spill] sm:$0xff] %v31924_v3  ;;  %24032 = vmatmul.mubr.msk.bf16.gmra.mrb[176].mxu1 %vm2876_vm0, %v31834_v19  ;;  %v31932_v35 = vadd.f32 %v24506_v5, %v5258_v17  ;;  %24622 = vmatmul.mubr.msk.bf16.gmra.mrb[4].mxu0 %vm2876_vm0, %v31935_v63  ;;  %v31986_v17 = vld [vmem:[%s30044_s21 + $0x60] sm:$0xff]  }
 0x4f7   : > { %36036 = vst [vmem:[#allocation35_spill] sm:$0xff] %v31927_v11  ;;  %24317 = vmatprep.mubr.msk.bf16.mxu1 %vm2876_vm0, %v31824_v2  ;;  %v31941_v0 = vadd.f32 %v7941_v23, %v5250_v54  ;;  %24625 = vmatprep.mubr.msk.bf16.mxu0 %vm2876_vm0, %v31944_v18  ;;  %v31959_v23 = vld [vmem:[%s30044_s21 + $0x48] sm:$0xff]   ;;  %36051 = vst [vmem:[#allocation48_spill] sm:$0xff] %v31986_v17 }
 0x4f8   : > { %36038 = vst [vmem:[#allocation34_spill] sm:$0xff] %v31932_v35  ;;  %36044 = vst [vmem:[#allocation40_spill] sm:$0xff] %v31959_v23 }
 0x4f9   : > { %36039 = vst [vmem:[#allocation37_spill] sm:$0xff] %v31941_v0  ;;  %v31948_v13 = vpop.f32.mrb[180].mxu1 }
 0x4fa   : > { %36040 = vst [vmem:[#allocation36_spill] sm:$0xff] %v31948_v13  ;;  %v31950_v5 = vpop.f32.mrb[181].mxu1  ;;  %v32004_v13 = vld [vmem:[%s30044_s21 + $0x70] sm:$0xff]  }
 0x4fb   : > { %36041 = vst [vmem:[#allocation38_spill] sm:$0xff] %v31950_v5  ;;  %v31952_v9 = vpop.f32.mrb[182].mxu1  ;;  %v31999_v5 = vld [vmem:[%s30044_s21 + $0x68] sm:$0xff]   ;;  %36057 = vst [vmem:[#allocation221_spill] sm:$0xff] %v32004_v13 }
 0x4fc   : > { %36042 = vst [vmem:[#allocation39_spill] sm:$0xff] %v31952_v9  ;;  %v31954_v58 = vpop.f32.mrb[183].mxu1  ;;  %36056 = vst [vmem:[#allocation53_spill] sm:$0xff] %v31999_v5 }
 0x4fd   : > { %36043 = vst [vmem:[#allocation41_spill] sm:$0xff] %v31954_v58 }
 0x4fe   : > { %24318 = vmatmul.mubr.msk.bf16.vlgmr.msra.gmra.mrb[172].mxu1 %vm2876_vm0, %v31834_v19  ;;  %24626 = vmatmul.mubr.msk.bf16.gmra.mrb[8].mxu0 %vm2876_vm0, %v31959_v23  ;;  %v32143_v23 = vld [vmem:[%s30044_s21 + $0xe8] sm:$0xff]  }
 0x4ff   : > { %24321 = vmatprep.mubr.msk.bf16.mxu1 %vm2876_vm0, %v31857_v21  ;;  %24629 = vmatprep.mubr.msk.bf16.mxu0 %vm2876_vm0, %v31966_v41  ;;  %36104 = vst [vmem:[#allocation268_spill] sm:$0xff] %v32143_v23 }
 0x501   : > { %v31970_v62 = vpop.f32.mrb[184].mxu1 }
 0x502   : > { %36046 = vst [vmem:[#allocation42_spill] sm:$0xff] %v31970_v62  ;;  %v31972_v29 = vpop.f32.mrb[185].mxu1 }
 0x503   : > { %36047 = vst [vmem:[#allocation45_spill] sm:$0xff] %v31972_v29  ;;  %v31974_v14 = vpop.f32.mrb[186].mxu1 }
 0x504   : > { %36048 = vst [vmem:[#allocation44_spill] sm:$0xff] %v31974_v14  ;;  %v31976_v30 = vpop.f32.mrb[187].mxu1  ;;  %v32094_v14 = vld [vmem:[%s30044_s21 + $0xc0] sm:$0xff]  }
 0x505   : > { %36049 = vst [vmem:[#allocation46_spill] sm:$0xff] %v31976_v30  ;;  %36087 = vst [vmem:[#allocation251_spill] sm:$0xff] %v32094_v14 }
 0x506   : > { %24322 = vmatmul.mubr.msk.bf16.gmra.mrb[176].mxu1 %vm2876_vm0, %v31841_v4  ;;  %24630 = vmatmul.mubr.msk.bf16.gmra.mrb[12].mxu0 %vm2876_vm0, %v31981_v47 }
 0x507   : > { %24633 = vmatprep.mubr.msk.bf16.mxu0 %vm2876_vm0, %v31986_v17 }
 0x509   : > { %v31990_v1 = vpop.f32.mrb[188].mxu1 }
 0x50a   : > { %36052 = vst [vmem:[#allocation49_spill] sm:$0xff] %v31990_v1  ;;  %v31992_v54 = vpop.f32.mrb[189].mxu1  ;;  %v32076_v1 = vld [vmem:[%s30044_s21 + $0xb0] sm:$0xff]  }
 0x50b   : > { %36053 = vst [vmem:[#allocation50_spill] sm:$0xff] %v31992_v54  ;;  %v31994_v58 = vpop.f32.mrb[190].mxu1  ;;  %36081 = vst [vmem:[#allocation245_spill] sm:$0xff] %v32076_v1 }
 0x50c   : > { %36054 = vst [vmem:[#allocation51_spill] sm:$0xff] %v31994_v58  ;;  %v31996_v9 = vpop.f32.mrb[191].mxu1  ;;  %v32058_v58 = vld [vmem:[%s30044_s21 + $0xa0] sm:$0xff]  }
 0x50d   : > { %36055 = vst [vmem:[#allocation52_spill] sm:$0xff] %v31996_v9  ;;  %36075 = vst [vmem:[#allocation239_spill] sm:$0xff] %v32058_v58 }
 0x50e   : > { %24634 = vmatmul.mubr.msk.bf16.gmra.mrb[16].mxu0 %vm2876_vm0, %v31999_v5 }
 0x50f   : > { %24637 = vmatprep.mubr.msk.bf16.mxu0 %vm2876_vm0, %v32004_v13 }
 0x511   : > { %v32008_v0 = vpop.f32.mrb[192].mxu1 }
 0x512   : > { %36058 = vst [vmem:[#allocation222_spill] sm:$0xff] %v32008_v0  ;;  %v32010_v35 = vpop.f32.mrb[193].mxu1  ;;  %v32040_v0 = vld [vmem:[%s30044_s21 + $0x90] sm:$0xff]  }
 0x513   : > { %36059 = vst [vmem:[#allocation223_spill] sm:$0xff] %v32010_v35  ;;  %v32012_v11 = vpop.f32.mrb[194].mxu1  ;;  %36069 = vst [vmem:[#allocation233_spill] sm:$0xff] %v32040_v0 }
 0x514   : > { %36060 = vst [vmem:[#allocation224_spill] sm:$0xff] %v32012_v11  ;;  %v32014_v3 = vpop.f32.mrb[195].mxu1 }
 0x515   : > { %36061 = vst [vmem:[#allocation225_spill] sm:$0xff] %v32014_v3  ;;  %v32035_v3 = vld [vmem:[%s30044_s21 + $0x88] sm:$0xff]  }
 0x516   : > { %24638 = vmatmul.mubr.msk.bf16.gmra.mrb[20].mxu0 %vm2876_vm0, %v32017_v56  ;;  %36068 = vst [vmem:[#allocation232_spill] sm:$0xff] %v32035_v3 }
 0x517   : > { %24641 = vmatprep.mubr.msk.bf16.mxu0 %vm2876_vm0, %v32022_v59  ;;  %v32125_v59 = vld [vmem:[%s30044_s21 + $0xd8] sm:$0xff]  }
 0x518   : > { %36098 = vst [vmem:[#allocation262_spill] sm:$0xff] %v32125_v59 }
 0x519   : > { %v32026_v61 = vpop.f32.mrb[196].mxu1 }
 0x51a   : > { %36064 = vst [vmem:[#allocation228_spill] sm:$0xff] %v32026_v61  ;;  %v32028_v6 = vpop.f32.mrb[197].mxu1 }
 0x51b   : > { %36065 = vst [vmem:[#allocation229_spill] sm:$0xff] %v32028_v6  ;;  %v32030_v35 = vpop.f32.mrb[198].mxu1 }
 0x51c   : > { %36066 = vst [vmem:[#allocation230_spill] sm:$0xff] %v32030_v35  ;;  %v32032_v11 = vpop.f32.mrb[199].mxu1 }
 0x51d   : > { %36067 = vst [vmem:[#allocation231_spill] sm:$0xff] %v32032_v11  ;;  %v32053_v11 = vld [vmem:[%s30044_s21 + $0x98] sm:$0xff]  }
 0x51e   : > { %24642 = vmatmul.mubr.msk.bf16.gmra.mrb[24].mxu0 %vm2876_vm0, %v32035_v3  ;;  %36074 = vst [vmem:[#allocation238_spill] sm:$0xff] %v32053_v11 }
 0x51f   : > { %24645 = vmatprep.mubr.msk.bf16.mxu0 %vm2876_vm0, %v32040_v0 }
 0x521   : > { %v32044_v9 = vpop.f32.mrb[200].mxu1 }
 0x522   : > { %36070 = vst [vmem:[#allocation234_spill] sm:$0xff] %v32044_v9  ;;  %v32046_v61 = vpop.f32.mrb[201].mxu1 }
 0x523   : > { %36071 = vst [vmem:[#allocation235_spill] sm:$0xff] %v32046_v61  ;;  %v32048_v6 = vpop.f32.mrb[202].mxu1 }
 0x524   : > { %36072 = vst [vmem:[#allocation236_spill] sm:$0xff] %v32048_v6  ;;  %v32050_v35 = vpop.f32.mrb[203].mxu1 }
 0x525   : > { %36073 = vst [vmem:[#allocation237_spill] sm:$0xff] %v32050_v35  ;;  %v32071_v35 = vld [vmem:[%s30044_s21 + $0xa8] sm:$0xff]  }
 0x526   : > { %24646 = vmatmul.mubr.msk.bf16.gmra.mrb[28].mxu0 %vm2876_vm0, %v32053_v11  ;;  %36080 = vst [vmem:[#allocation244_spill] sm:$0xff] %v32071_v35 }
 0x527   : > { %24649 = vmatprep.mubr.msk.bf16.mxu0 %vm2876_vm0, %v32058_v58 }
 0x529   : > { %v32062_v54 = vpop.f32.mrb[204].mxu1 }
 0x52a   : > { %36076 = vst [vmem:[#allocation240_spill] sm:$0xff] %v32062_v54  ;;  %v32064_v9 = vpop.f32.mrb[205].mxu1 }
 0x52b   : > { %36077 = vst [vmem:[#allocation241_spill] sm:$0xff] %v32064_v9  ;;  %v32066_v61 = vpop.f32.mrb[206].mxu1 }
 0x52c   : > { %36078 = vst [vmem:[#allocation242_spill] sm:$0xff] %v32066_v61  ;;  %v32068_v6 = vpop.f32.mrb[207].mxu1 }
 0x52d   : > { %36079 = vst [vmem:[#allocation243_spill] sm:$0xff] %v32068_v6  ;;  %v32089_v6 = vld [vmem:[%s30044_s21 + $0xb8] sm:$0xff]  }
 0x52e   : > { %24650 = vmatmul.mubr.msk.bf16.gmra.mrb[32].mxu0 %vm2876_vm0, %v32071_v35  ;;  %36086 = vst [vmem:[#allocation250_spill] sm:$0xff] %v32089_v6 }
 0x52f   : > { %24653 = vmatprep.mubr.msk.bf16.mxu0 %vm2876_vm0, %v32076_v1 }
 0x531   : > { %v32080_v30 = vpop.f32.mrb[208].mxu1 }
 0x532   : > { %36082 = vst [vmem:[#allocation246_spill] sm:$0xff] %v32080_v30  ;;  %v32082_v54 = vpop.f32.mrb[209].mxu1 }
 0x533   : > { %36083 = vst [vmem:[#allocation247_spill] sm:$0xff] %v32082_v54  ;;  %v32084_v9 = vpop.f32.mrb[210].mxu1 }
 0x534   : > { %36084 = vst [vmem:[#allocation248_spill] sm:$0xff] %v32084_v9  ;;  %v32086_v61 = vpop.f32.mrb[211].mxu1 }
 0x535   : > { %36085 = vst [vmem:[#allocation249_spill] sm:$0xff] %v32086_v61 }
 0x536   : > { %24654 = vmatmul.mubr.msk.bf16.gmra.mrb[36].mxu0 %vm2876_vm0, %v32089_v6  ;;  %v32107_v6 = vld [vmem:[%s30044_s21 + $0xc8] sm:$0xff]  }
 0x537   : > { %24657 = vmatprep.mubr.msk.bf16.mxu0 %vm2876_vm0, %v32094_v14  ;;  %36092 = vst [vmem:[#allocation256_spill] sm:$0xff] %v32107_v6  ;;  %v32112_v14 = vld [vmem:[%s30044_s21 + $0xd0] sm:$0xff]  }
 0x538   : > { %36093 = vst [vmem:[#allocation257_spill] sm:$0xff] %v32112_v14 }
 0x539   : > { %v32098_v29 = vpop.f32.mrb[212].mxu1  ;;  %v24549_v30 = vpop.f32.mrb[220].mxu0 }
 0x53a   : > { %36088 = vst [vmem:[#allocation252_spill] sm:$0xff] %v32098_v29  ;;  %v32100_v62 = vpop.f32.mrb[213].mxu1  ;;  %v8114_v54 = vpop.f32.mrb[221].mxu0 }
 0x53b   : > { %36089 = vst [vmem:[#allocation253_spill] sm:$0xff] %v32100_v62  ;;  %v32102_v9 = vpop.f32.mrb[214].mxu1  ;;  %v24550_v61 = vpop.f32.mrb[222].mxu0 }
 0x53c   : > { %36090 = vst [vmem:[#allocation254_spill] sm:$0xff] %v32102_v9  ;;  %v32104_v1 = vpop.f32.mrb[215].mxu1  ;;  %v8117_v35 = vpop.f32.mrb[223].mxu0 }
 0x53d   : > { %36091 = vst [vmem:[#allocation255_spill] sm:$0xff] %v32104_v1 }
 0x53e   : > { %24658 = vmatmul.mubr.msk.bf16.gmra.mrb[220].mxu0 %vm2876_vm0, %v32107_v6  ;;  %v32130_v6 = vld [vmem:[%s30044_s21 + $0xe0] sm:$0xff]  }
 0x53f   : > { %24661 = vmatprep.mubr.msk.bf16.mxu0 %vm2876_vm0, %v32112_v14  ;;  %36099 = vst [vmem:[#allocation263_spill] sm:$0xff] %v32130_v6 }
 0x541   : > { %v32116_v62 = vpop.f32.mrb[216].mxu1  ;;  %v24553_v29 = vpop.f32.mrb[224].mxu0 }
 0x542   : > { %36094 = vst [vmem:[#allocation258_spill] sm:$0xff] %v32116_v62  ;;  %v32118_v9 = vpop.f32.mrb[217].mxu1  ;;  %v8130_v58 = vpop.f32.mrb[225].mxu0 }
 0x543   : > { %36095 = vst [vmem:[#allocation259_spill] sm:$0xff] %v32118_v9  ;;  %v32120_v11 = vpop.f32.mrb[218].mxu1  ;;  %v24554_v1 = vpop.f32.mrb[226].mxu0 }
 0x544   : > { %36096 = vst [vmem:[#allocation260_spill] sm:$0xff] %v32120_v11  ;;  %v32122_v0 = vpop.f32.mrb[219].mxu1  ;;  %v8133_v3 = vpop.f32.mrb[227].mxu0 }
 0x545   : > { %36097 = vst [vmem:[#allocation261_spill] sm:$0xff] %v32122_v0 }
 0x546   : > { %24662 = vmatmul.mubr.msk.bf16.gmra.mrb[224].mxu0 %vm2876_vm0, %v32125_v59 }
 0x547   : > { %24665 = vmatprep.mubr.msk.bf16.mxu0 %vm2876_vm0, %v32130_v6  ;;  %v32161_v6 = vld [vmem:[%s30044_s21 + $0xf8] sm:$0xff]  }
 0x548   : > { %36110 = vst [vmem:[#allocation274_spill] sm:$0xff] %v32161_v6 }
 0x549   : > { %v23969_v9 = vpop.f32.mrb[220].mxu1  ;;  %v24557_v11 = vpop.f32.mrb[228].mxu0 }
 0x54a   : > { %v32134_v62 = vadd.f32 %v24549_v30, %v23969_v9  ;;  %v5422_v14 = vpop.f32.mrb[221].mxu1  ;;  %v8146_v0 = vpop.f32.mrb[229].mxu0  ;;  %v32148_v9 = vld [vmem:[%s30044_s21 + $0xf0] sm:$0xff]  }
 0x54b   : > { %v32136_v56 = vadd.f32 %v8114_v54, %v5422_v14  ;;  %v23970_v13 = vpop.f32.mrb[222].mxu1  ;;  %v24558_v17 = vpop.f32.mrb[230].mxu0  ;;  %36105 = vst [vmem:[#allocation269_spill] sm:$0xff] %v32148_v9 }
 0x54c   : > { %36100 = vst [vmem:[#allocation264_spill] sm:$0xff] %v32134_v62  ;;  %v32138_v5 = vadd.f32 %v24550_v61, %v23970_v13  ;;  %v5425_v47 = vpop.f32.mrb[223].mxu1  ;;  %v8149_v41 = vpop.f32.mrb[231].mxu0 }
 0x54d   : > { %36101 = vst [vmem:[#allocation265_spill] sm:$0xff] %v32136_v56  ;;  %v32140_v59 = vadd.f32 %v8117_v35, %v5425_v47 }
 0x54e   : > { %36102 = vst [vmem:[#allocation266_spill] sm:$0xff] %v32138_v5  ;;  %24666 = vmatmul.mubr.msk.bf16.gmra.mrb[228].mxu0 %vm2876_vm0, %v32143_v23 }
 0x54f   : > { %36103 = vst [vmem:[#allocation267_spill] sm:$0xff] %v32140_v59  ;;  %24669 = vmatprep.mubr.msk.bf16.mxu0 %vm2876_vm0, %v32148_v9  ;;  %v32179_v9 = vld [vmem:[%s30044_s21 + $0x108] sm:$0xff]  }
 0x550   : > { %36116 = vst [vmem:[#allocation280_spill] sm:$0xff] %v32179_v9 }
 0x551   : > { %v23973_v14 = vpop.f32.mrb[224].mxu1  ;;  %v24561_v13 = vpop.f32.mrb[232].mxu0 }
 0x552   : > { %v32152_v61 = vadd.f32 %v24553_v29, %v23973_v14  ;;  %v5438_v30 = vpop.f32.mrb[225].mxu1  ;;  %v8162_v47 = vpop.f32.mrb[233].mxu0  ;;  %v32166_v29 = vld [vmem:[%s30044_s21 + $0x100] sm:$0xff]  }
 0x553   : > { %v32154_v35 = vadd.f32 %v8130_v58, %v5438_v30  ;;  %v23974_v54 = vpop.f32.mrb[226].mxu1  ;;  %v24562_v5 = vpop.f32.mrb[234].mxu0  ;;  %36111 = vst [vmem:[#allocation275_spill] sm:$0xff] %v32166_v29 }
 0x554   : > { %36106 = vst [vmem:[#allocation270_spill] sm:$0xff] %v32152_v61  ;;  %v32156_v59 = vadd.f32 %v24554_v1, %v23974_v54  ;;  %v5441_v56 = vpop.f32.mrb[227].mxu1  ;;  %v8165_v23 = vpop.f32.mrb[235].mxu0 }
 0x555   : > { %36107 = vst [vmem:[#allocation271_spill] sm:$0xff] %v32154_v35  ;;  %v32158_v62 = vadd.f32 %v8133_v3, %v5441_v56 }
 0x556   : > { %36108 = vst [vmem:[#allocation272_spill] sm:$0xff] %v32156_v59  ;;  %24670 = vmatmul.mubr.msk.bf16.gmra.mrb[232].mxu0 %vm2876_vm0, %v32161_v6 }
 0x557   : > { %36109 = vst [vmem:[#allocation273_spill] sm:$0xff] %v32158_v62  ;;  %24673 = vmatprep.mubr.msk.bf16.mxu0 %vm2876_vm0, %v32166_v29  ;;  %v32197_v29 = vld [vmem:[%s30044_s21 + $0x118] sm:$0xff]  }
 0x559   : > { %v23977_v58 = vpop.f32.mrb[228].mxu1  ;;  %v24565_v14 = vpop.f32.mrb[236].mxu0 }
 0x55a   : > { %v32170_v1 = vadd.f32 %v24557_v11, %v23977_v58  ;;  %v5454_v30 = vpop.f32.mrb[229].mxu1  ;;  %v8178_v3 = vpop.f32.mrb[237].mxu0  ;;  %v32184_v11 = vld [vmem:[%s30044_s21 + $0x110] sm:$0xff]  }
 0x55b   : > { %v32172_v56 = vadd.f32 %v8146_v0, %v5454_v30  ;;  %v23978_v54 = vpop.f32.mrb[230].mxu1  ;;  %v24566_v59 = vpop.f32.mrb[238].mxu0 }
 0x55c   : > { %36112 = vst [vmem:[#allocation276_spill] sm:$0xff] %v32170_v1  ;;  %v32174_v62 = vadd.f32 %v24558_v17, %v23978_v54  ;;  %v5457_v35 = vpop.f32.mrb[231].mxu1  ;;  %v8181_v6 = vpop.f32.mrb[239].mxu0 }
 0x55d   : > { %36113 = vst [vmem:[#allocation277_spill] sm:$0xff] %v32172_v56  ;;  %v32176_v61 = vadd.f32 %v8149_v41, %v5457_v35 }
 0x55e   : > { %36114 = vst [vmem:[#allocation278_spill] sm:$0xff] %v32174_v62  ;;  %24674 = vmatmul.mubr.msk.bf16.gmra.mrb[236].mxu0 %vm2876_vm0, %v32179_v9 }
 0x55f   : > { %36115 = vst [vmem:[#allocation279_spill] sm:$0xff] %v32176_v61  ;;  %24677 = vmatprep.mubr.msk.bf16.mxu0 %vm2876_vm0, %v32184_v11 }
 0x561   : > { %v23981_v0 = vpop.f32.mrb[232].mxu1  ;;  %v24569_v58 = vpop.f32.mrb[240].mxu0 }
 0x562   : > { %v32188_v17 = vadd.f32 %v24561_v13, %v23981_v0  ;;  %v5470_v30 = vpop.f32.mrb[233].mxu1  ;;  %v8194_v35 = vpop.f32.mrb[241].mxu0  ;;  %v32202_v13 = vld [vmem:[%s30044_s21 + $0x120] sm:$0xff]  }
 0x563   : > { %v32190_v41 = vadd.f32 %v8162_v47, %v5470_v30  ;;  %v23982_v54 = vpop.f32.mrb[234].mxu1  ;;  %v24570_v62 = vpop.f32.mrb[242].mxu0 }
 0x564   : > { %36117 = vst [vmem:[#allocation281_spill] sm:$0xff] %v32188_v17  ;;  %v32192_v61 = vadd.f32 %v24562_v5, %v23982_v54  ;;  %v5473_v56 = vpop.f32.mrb[235].mxu1  ;;  %v8197_v9 = vpop.f32.mrb[243].mxu0  ;;  %v32313_v17 = vld [vmem:[%s30044_s21 + $0x1b8] sm:$0xff]  }
 0x565   : > { %36118 = vst [vmem:[#allocation282_spill] sm:$0xff] %v32190_v41  ;;  %v32194_v1 = vadd.f32 %v8165_v23, %v5473_v56  ;;  %v32220_v41 = vld [vmem:[%s30044_s21 + $0x130] sm:$0xff]   ;;  %36133 = vst [vmem:[#allocation297_spill] sm:$0xff] %v32313_v17 }
 0x566   : > { %36119 = vst [vmem:[#allocation283_spill] sm:$0xff] %v32192_v61  ;;  %24678 = vmatmul.mubr.msk.bf16.gmra.mrb[240].mxu0 %vm2876_vm0, %v32197_v29  ;;  %v32215_v61 = vld [vmem:[%s30044_s21 + $0x128] sm:$0xff]  }
 0x567   : > { %36120 = vst [vmem:[#allocation284_spill] sm:$0xff] %v32194_v1  ;;  %24681 = vmatprep.mubr.msk.bf16.mxu0 %vm2876_vm0, %v32202_v13 }
 0x569   : > { %v23985_v47 = vpop.f32.mrb[236].mxu1 }
 0x56a   : > { %v32206_v5 = vadd.f32 %v24565_v14, %v23985_v47  ;;  %v5486_v0 = vpop.f32.mrb[237].mxu1 }
 0x56b   : > { %v32208_v30 = vadd.f32 %v8178_v3, %v5486_v0  ;;  %v23986_v23 = vpop.f32.mrb[238].mxu1 }
 0x56c   : > { %36121 = vst [vmem:[#allocation285_spill] sm:$0xff] %v32206_v5  ;;  %v32210_v56 = vadd.f32 %v24566_v59, %v23986_v23  ;;  %v5489_v54 = vpop.f32.mrb[239].mxu1  ;;  %v32308_v5 = vld [vmem:[%s30044_s21 + $0x1b0] sm:$0xff]  }
 0x56d   : > { %36122 = vst [vmem:[#allocation286_spill] sm:$0xff] %v32208_v30  ;;  %v32212_v1 = vadd.f32 %v8181_v6, %v5489_v54  ;;  %v32303_v30 = vld [vmem:[%s30044_s21 + $0x1a8] sm:$0xff]   ;;  %36132 = vst [vmem:[#allocation296_spill] sm:$0xff] %v32308_v5 }
 0x56e   : > { %36123 = vst [vmem:[#allocation287_spill] sm:$0xff] %v32210_v56  ;;  %24682 = vmatmul.mubr.msk.bf16.gmra.mrb[64].mxu0 %vm2876_vm0, %v32215_v61  ;;  %v32298_v56 = vld [vmem:[%s30044_s21 + $0x1a0] sm:$0xff]   ;;  %36131 = vst [vmem:[#allocation295_spill] sm:$0xff] %v32303_v30 }
 0x56f   : > { %36124 = vst [vmem:[#allocation288_spill] sm:$0xff] %v32212_v1  ;;  %24685 = vmatprep.mubr.msk.bf16.mxu0 %vm2876_vm0, %v32220_v41  ;;  %v32233_v1 = vld [vmem:[%s30044_s21 + $0x138] sm:$0xff]   ;;  %36130 = vst [vmem:[#allocation294_spill] sm:$0xff] %v32298_v56 }
 0x571   : > { %v23989_v14 = vpop.f32.mrb[240].mxu1 }
 0x572   : > { %v32224_v59 = vadd.f32 %v24569_v58, %v23989_v14  ;;  %v5502_v3 = vpop.f32.mrb[241].mxu1  ;;  %v32238_v58 = vld [vmem:[%s30044_s21 + $0x140] sm:$0xff]  }
 0x573   : > { %v32226_v6 = vadd.f32 %v8194_v35, %v5502_v3  ;;  %v23990_v47 = vpop.f32.mrb[242].mxu1  ;;  %v32243_v35 = vld [vmem:[%s30044_s21 + $0x148] sm:$0xff]   ;;  %v32258_v14 = vld [vmem:[%s30044_s21 + $0x160] sm:$0xff]  }
 0x574   : > { %36125 = vst [vmem:[#allocation289_spill] sm:$0xff] %v32224_v59  ;;  %v32228_v0 = vadd.f32 %v24570_v62, %v23990_v47  ;;  %v5505_v23 = vpop.f32.mrb[243].mxu1  ;;  %v32248_v62 = vld [vmem:[%s30044_s21 + $0x150] sm:$0xff]   ;;  %v32263_v3 = vld [vmem:[%s30044_s21 + $0x168] sm:$0xff]   ;;  %v32293_v59 = vld [vmem:[%s30044_s21 + $0x198] sm:$0xff]  }
 0x575   : > { %36126 = vst [vmem:[#allocation290_spill] sm:$0xff] %v32226_v6  ;;  %v32230_v54 = vadd.f32 %v8197_v9, %v5505_v23  ;;  %v32253_v9 = vld [vmem:[%s30044_s21 + $0x158] sm:$0xff]   ;;  %v32268_v47 = vld [vmem:[%s30044_s21 + $0x170] sm:$0xff]   ;;  %36129 = vst [vmem:[#allocation293_spill] sm:$0xff] %v32293_v59 }
 0x576   : > { %36127 = vst [vmem:[#allocation291_spill] sm:$0xff] %v32228_v0  ;;  %24686 = vmatmul.mubr.msk.bf16.gmra.mrb[68].mxu0 %vm2876_vm0, %v32233_v1  ;;  %v32273_v23 = vld [vmem:[%s30044_s21 + $0x178] sm:$0xff]   ;;  %v32283_v0 = vld [vmem:[%s30044_s21 + $0x188] sm:$0xff]   ;;  %v32288_v6 = vld [vmem:[%s30044_s21 + $0x190] sm:$0xff]  }
 0x577   : > { %36128 = vst [vmem:[#allocation292_spill] sm:$0xff] %v32230_v54  ;;  %24689 = vmatprep.mubr.msk.bf16.mxu0 %vm2876_vm0, %v32238_v58  ;;  %v32278_v54 = vld [vmem:[%s30044_s21 + $0x180] sm:$0xff]  }
 0x57e   : > { %24690 = vmatmul.mubr.msk.bf16.gmra.mrb[72].mxu0 %vm2876_vm0, %v32243_v35 }
 0x57f   : > { %24693 = vmatprep.mubr.msk.bf16.mxu0 %vm2876_vm0, %v32248_v62 }
 0x586   : > { %24694 = vmatmul.mubr.msk.bf16.gmra.mrb[76].mxu0 %vm2876_vm0, %v32253_v9 }
 0x587   : > { %24697 = vmatprep.mubr.msk.bf16.mxu0 %vm2876_vm0, %v32258_v14 }
 0x58e   : > { %24698 = vmatmul.mubr.msk.bf16.gmra.mrb[80].mxu0 %vm2876_vm0, %v32263_v3 }
 0x58f   : > { %24701 = vmatprep.mubr.msk.bf16.mxu0 %vm2876_vm0, %v32268_v47 }
 0x596   : > { %24702 = vmatmul.mubr.msk.bf16.gmra.mrb[84].mxu0 %vm2876_vm0, %v32273_v23 }
 0x597   : > { %24705 = vmatprep.mubr.msk.bf16.mxu0 %vm2876_vm0, %v32278_v54 }
 0x59e   : > { %24706 = vmatmul.mubr.msk.bf16.gmra.mrb[88].mxu0 %vm2876_vm0, %v32283_v0 }
 0x59f   : > { %24709 = vmatprep.mubr.msk.bf16.mxu0 %vm2876_vm0, %v32288_v6 }
 0x5a6   : > { %24710 = vmatmul.mubr.msk.bf16.gmra.mrb[92].mxu0 %vm2876_vm0, %v32293_v59  ;;  %v32318_v59 = vld [vmem:[%s30044_s21 + $0x1c0] sm:$0xff]  }
 0x5a7   : > { %24713 = vmatprep.mubr.msk.bf16.mxu0 %vm2876_vm0, %v32298_v56  ;;  %36134 = vst [vmem:[#allocation298_spill] sm:$0xff] %v32318_v59  ;;  %v32323_v56 = vld [vmem:[%s30044_s21 + $0x1c8] sm:$0xff]  }
 0x5a8   : > { %36135 = vst [vmem:[#allocation299_spill] sm:$0xff] %v32323_v56 }
 0x5ae   : > { %24714 = vmatmul.mubr.msk.bf16.gmra.mrb[96].mxu0 %vm2876_vm0, %v32303_v30  ;;  %v32328_v30 = vld [vmem:[%s30044_s21 + $0x1d0] sm:$0xff]  }
 0x5af   : > { %24717 = vmatprep.mubr.msk.bf16.mxu0 %vm2876_vm0, %v32308_v5  ;;  %36136 = vst [vmem:[#allocation300_spill] sm:$0xff] %v32328_v30  ;;  %v32333_v5 = vld [vmem:[%s30044_s21 + $0x1d8] sm:$0xff]  }
 0x5b0   : > { %36137 = vst [vmem:[#allocation301_spill] sm:$0xff] %v32333_v5 }
 0x5b6   : > { %24718 = vmatmul.mubr.msk.bf16.gmra.mrb[100].mxu0 %vm2876_vm0, %v32313_v17  ;;  %v32338_v17 = vld [vmem:[%s30044_s21 + $0x1e0] sm:$0xff]  }
 0x5b7   : > { %24721 = vmatprep.mubr.msk.bf16.mxu0 %vm2876_vm0, %v32318_v59  ;;  %36138 = vst [vmem:[#allocation302_spill] sm:$0xff] %v32338_v17  ;;  %v32343_v59 = vld [vmem:[%s30044_s21 + $0x1e8] sm:$0xff]  }
 0x5b8   : > { %36139 = vst [vmem:[#allocation303_spill] sm:$0xff] %v32343_v59 }
 0x5be   : > { %24722 = vmatmul.mubr.msk.bf16.gmra.mrb[104].mxu0 %vm2876_vm0, %v32323_v56  ;;  %v32348_v56 = vld [vmem:[%s30044_s21 + $0x1f0] sm:$0xff]  }
 0x5bf   : > { %24725 = vmatprep.mubr.msk.bf16.mxu0 %vm2876_vm0, %v32328_v30  ;;  %36140 = vst [vmem:[#allocation304_spill] sm:$0xff] %v32348_v56  ;;  %v32353_v30 = vld [vmem:[%s30044_s21 + $0x1f8] sm:$0xff]  }
 0x5c0   : > { %36141 = vst [vmem:[#allocation305_spill] sm:$0xff] %v32353_v30 }
 0x5c6   : > { %24726 = vmatmul.mubr.msk.bf16.gmra.mrb[108].mxu0 %vm2876_vm0, %v32333_v5  ;;  %v32358_v5 = vld [vmem:[%s30044_s21 + $0x200] sm:$0xff]  }
 0x5c7   : > { %24729 = vmatprep.mubr.msk.bf16.mxu0 %vm2876_vm0, %v32338_v17  ;;  %36142 = vst [vmem:[#allocation306_spill] sm:$0xff] %v32358_v5  ;;  %v32363_v17 = vld [vmem:[%s30044_s21 + $0x208] sm:$0xff]  }
 0x5c8   : > { %36143 = vst [vmem:[#allocation307_spill] sm:$0xff] %v32363_v17 }
 0x5ce   : > { %24730 = vmatmul.mubr.msk.bf16.gmra.mrb[112].mxu0 %vm2876_vm0, %v32343_v59  ;;  %v32368_v59 = vld [vmem:[%s30044_s21 + $0x210] sm:$0xff]  }
 0x5cf   : > { %24733 = vmatprep.mubr.msk.bf16.mxu0 %vm2876_vm0, %v32348_v56  ;;  %36144 = vst [vmem:[#allocation308_spill] sm:$0xff] %v32368_v59  ;;  %v32373_v56 = vld [vmem:[%s30044_s21 + $0x218] sm:$0xff]  }
 0x5d0   : > { %36145 = vst [vmem:[#allocation309_spill] sm:$0xff] %v32373_v56 }
 0x5d6   : > { %24734 = vmatmul.mubr.msk.bf16.gmra.mrb[116].mxu0 %vm2876_vm0, %v32353_v30  ;;  %v32378_v30 = vld [vmem:[%s30044_s21 + $0x220] sm:$0xff]  }
 0x5d7   : > { %24737 = vmatprep.mubr.msk.bf16.mxu0 %vm2876_vm0, %v32358_v5  ;;  %36146 = vst [vmem:[#allocation310_spill] sm:$0xff] %v32378_v30  ;;  %v32383_v5 = vld [vmem:[%s30044_s21 + $0x228] sm:$0xff]  }
 0x5d8   : > { %36147 = vst [vmem:[#allocation311_spill] sm:$0xff] %v32383_v5 }
 0x5de   : > { %24738 = vmatmul.mubr.msk.bf16.gmra.mrb[120].mxu0 %vm2876_vm0, %v32363_v17  ;;  %v32388_v17 = vld [vmem:[%s30044_s21 + $0x230] sm:$0xff]  }
 0x5df   : > { %24741 = vmatprep.mubr.msk.bf16.mxu0 %vm2876_vm0, %v32368_v59  ;;  %36148 = vst [vmem:[#allocation312_spill] sm:$0xff] %v32388_v17  ;;  %v32393_v59 = vld [vmem:[%s30044_s21 + $0x238] sm:$0xff]  }
 0x5e0   : > { %36149 = vst [vmem:[#allocation313_spill] sm:$0xff] %v32393_v59 }
 0x5e6   : > { %24742 = vmatmul.mubr.msk.bf16.gmra.mrb[124].mxu0 %vm2876_vm0, %v32373_v56  ;;  %v32398_v56 = vld [vmem:[%s30044_s21 + $0x240] sm:$0xff]  }
 0x5e7   : > { %24745 = vmatprep.mubr.msk.bf16.mxu0 %vm2876_vm0, %v32378_v30  ;;  %36150 = vst [vmem:[#allocation314_spill] sm:$0xff] %v32398_v56  ;;  %v32403_v30 = vld [vmem:[%s30044_s21 + $0x248] sm:$0xff]  }
 0x5e8   : > { %36151 = vst [vmem:[#allocation315_spill] sm:$0xff] %v32403_v30 }
 0x5ee   : > { %24746 = vmatmul.mubr.msk.bf16.gmra.mrb[128].mxu0 %vm2876_vm0, %v32383_v5  ;;  %v32408_v5 = vld [vmem:[%s30044_s21 + $0x250] sm:$0xff]  }
 0x5ef   : > { %24749 = vmatprep.mubr.msk.bf16.mxu0 %vm2876_vm0, %v32388_v17  ;;  %36152 = vst [vmem:[#allocation316_spill] sm:$0xff] %v32408_v5  ;;  %v32413_v17 = vld [vmem:[%s30044_s21 + $0x258] sm:$0xff]  }
 0x5f0   : > { %36153 = vst [vmem:[#allocation317_spill] sm:$0xff] %v32413_v17 }
 0x5f6   : > { %24750 = vmatmul.mubr.msk.bf16.gmra.mrb[132].mxu0 %vm2876_vm0, %v32393_v59  ;;  %v32418_v59 = vld [vmem:[%s30044_s21 + $0x260] sm:$0xff]  }
 0x5f7   : > { %24753 = vmatprep.mubr.msk.bf16.mxu0 %vm2876_vm0, %v32398_v56  ;;  %36154 = vst [vmem:[#allocation318_spill] sm:$0xff] %v32418_v59  ;;  %v32423_v56 = vld [vmem:[%s30044_s21 + $0x268] sm:$0xff]  }
 0x5f8   : > { %36155 = vst [vmem:[#allocation319_spill] sm:$0xff] %v32423_v56 }
 0x5fe   : > { %24754 = vmatmul.mubr.msk.bf16.gmra.mrb[136].mxu0 %vm2876_vm0, %v32403_v30  ;;  %v32428_v30 = vld [vmem:[%s30044_s21 + $0x270] sm:$0xff]  }
 0x5ff   : > { %24757 = vmatprep.mubr.msk.bf16.mxu0 %vm2876_vm0, %v32408_v5  ;;  %36156 = vst [vmem:[#allocation320_spill] sm:$0xff] %v32428_v30  ;;  %v32433_v5 = vld [vmem:[%s30044_s21 + $0x278] sm:$0xff]  }
 0x600   : > { %36157 = vst [vmem:[#allocation321_spill] sm:$0xff] %v32433_v5 }
 0x606   : > { %24758 = vmatmul.mubr.msk.bf16.gmra.mrb[140].mxu0 %vm2876_vm0, %v32413_v17  ;;  %v32438_v17 = vld [vmem:[%s30044_s21 + $0x280] sm:$0xff]  }
 0x607   : > { %24761 = vmatprep.mubr.msk.bf16.mxu0 %vm2876_vm0, %v32418_v59  ;;  %v32443_v59 = vld [vmem:[%s30044_s21 + $0x288] sm:$0xff]  }
 0x608   : > { %36158 = vst [vmem:[#allocation322_spill] sm:$0xff] %v32443_v59 }
 0x60e   : > { %24762 = vmatmul.mubr.msk.bf16.gmra.mrb[144].mxu0 %vm2876_vm0, %v32423_v56  ;;  %v32448_v56 = vld [vmem:[%s30044_s21 + $0x290] sm:$0xff]  }
 0x60f   : > { %24765 = vmatprep.mubr.msk.bf16.mxu0 %vm2876_vm0, %v32428_v30  ;;  %36159 = vst [vmem:[#allocation323_spill] sm:$0xff] %v32448_v56  ;;  %v32453_v30 = vld [vmem:[%s30044_s21 + $0x298] sm:$0xff]  }
 0x610   : > { %36160 = vst [vmem:[#allocation324_spill] sm:$0xff] %v32453_v30 }
 0x616   : > { %24766 = vmatmul.mubr.msk.bf16.gmra.mrb[40].mxu0 %vm2876_vm0, %v32433_v5  ;;  %v32458_v5 = vld [vmem:[%s30044_s21 + $0x2a0] sm:$0xff]  }
 0x617   : > { %24769 = vmatprep.mubr.msk.bf16.mxu0 %vm2876_vm0, %v32438_v17  ;;  %36161 = vst [vmem:[#allocation325_spill] sm:$0xff] %v32458_v5 }
 0x61e   : > { %24770 = vmatmul.mubr.msk.bf16.gmra.mrb[44].mxu0 %vm2876_vm0, %v32443_v59 }
 0x61f   : > { %24773 = vmatprep.mubr.msk.bf16.mxu0 %vm2876_vm0, %v32448_v56 }
 0x626   : > { %24774 = vmatmul.mubr.msk.bf16.gmra.mrb[48].mxu0 %vm2876_vm0, %v32453_v30 }
 0x627   : > { %24777 = vmatprep.mubr.msk.bf16.mxu0 %vm2876_vm0, %v32458_v5 }
 0x62e   : > { %24778 = vmatmul.mubr.msk.bf16.gmra.mrb[52].mxu0 %vm2876_vm0, %v31228_v12 }
 0x62f   : > { %24781 = vmatprep.mubr.msk.bf16.mxu0 %vm2876_vm0, %v31235_v51 }
 0x636   : > { %24782 = vmatmul.mubr.msk.bf16.gmra.mrb[56].mxu0 %vm2876_vm0, %v31250_v52 }
 0x637   : > { %24785 = vmatprep.mubr.msk.bf16.mxu0 %vm2876_vm0, %v31257_v53 }
 0x63e   : > { %24786 = vmatmul.mubr.msk.bf16.gmra.mrb[60].mxu0 %vm2876_vm0, %v31272_v27 }
 0x63f   : > { %24789 = vmatprep.mubr.msk.bf16.mxu0 %vm2876_vm0, %v31279_v55 }
 0x641   : > { %v24683_v30 = vpop.f32.mrb[64].mxu0 }
 0x642   : > { %v8980_v5 = vpop.f32.mrb[65].mxu0  ;;  %v32475_v56 = vadd.f32 %v24683_v30, %v31241_v45 }
 0x643   : > { %v24684_v12 = vpop.f32.mrb[66].mxu0  ;;  %v32478_v51 = vadd.f32 %v8980_v5, %v31243_v60 }
 0x644   : > { %v8983_v52 = vpop.f32.mrb[67].mxu0  ;;  %v32481_v59 = vadd.f32 %v24684_v12, %v31245_v39  ;;  %v36171_v12 = vld [vmem:[#allocation159_spill] sm:$0xff] }
 0x645   : > { %v32484_v53 = vadd.f32 %v8983_v52, %v31247_v46  ;;  %v36172_v52 = vld [vmem:[#allocation164_spill] sm:$0xff] }
 0x646   : > { %24790 = vmatmul.mubr.msk.bf16.gmra.mrb[64].mxu0 %vm2876_vm0, %v31294_v26  ;;  %v32505_v26 = vld [vmem:[%s30044_s21 + $0x2f0] sm:$0xff]  }
 0x647   : > { %24793 = vmatprep.mubr.msk.bf16.mxu0 %vm2876_vm0, %v31304_v50  ;;  %v32512_v50 = vld [vmem:[%s30044_s21 + $0x300] sm:$0xff]  }
 0x649   : > { %v24687_v45 = vpop.f32.mrb[68].mxu0 }
 0x64a   : > { %v8996_v27 = vpop.f32.mrb[69].mxu0  ;;  %v32491_v60 = vadd.f32 %v24687_v45, %v31263_v24  ;;  %v32517_v24 = vld [vmem:[%s30044_s21 + $0x308] sm:$0xff]   ;;  %v32574_v45 = vld [vmem:[%s35736_s25 + $0x30] sm:$0xff]  }
 0x64b   : > { %v24688_v55 = vpop.f32.mrb[70].mxu0  ;;  %v32494_v39 = vadd.f32 %v8996_v27, %v31265_v48  ;;  %25195 = vmatprep.subr.bf16.mxu0 %v32574_v45 }
 0x64c   : > { %v8999_v5 = vpop.f32.mrb[71].mxu0  ;;  %v32497_v46 = vadd.f32 %v24688_v55, %v31267_v49  ;;  %v36169_v49 = vld [vmem:[#allocation168_spill] sm:$0xff] }
 0x64d   : > { %v32500_v30 = vadd.f32 %v8999_v5, %v31269_v43  ;;  %v36173_v5 = vld [vmem:[#allocation172_spill] sm:$0xff] }
 0x64e   : > { %24794 = vmatmul.mubr.msk.bf16.gmra.mrb[68].mxu0 %vm2876_vm0, %v31322_v40  ;;  %v36165_v40 = vld [vmem:[#allocation153_spill] sm:$0xff] }
 0x64f   : > { %24797 = vmatprep.mubr.msk.bf16.mxu0 %vm2876_vm0, %v32505_v26 }
 0x656   : > { %24798 = vmatmul.mubr.msk.bf16.gmra.mrb[180].mxu0 %vm2876_vm0, %v31346_v7  ;;  %v36162_v7 = vld [vmem:[#allocation146_spill] sm:$0xff] }
 0x657   : > { %24801 = vmatprep.mubr.msk.bf16.mxu0 %vm2876_vm0, %v32512_v50 }
 0x65e   : > { %24802 = vmatmul.mubr.msk.bf16.gmra.mrb[184].mxu0 %vm2876_vm0, %v32517_v24 }
 0x65f   : > { %24805 = vmatprep.mubr.msk.bf16.mxu0 %vm2876_vm0, %v31299_v25 }
 0x666   : > { %24806 = vmatmul.mubr.msk.bf16.gmra.mrb[188].mxu0 %vm2876_vm0, %v31309_v37 }
 0x667   : > { %24809 = vmatprep.mubr.msk.bf16.mxu0 %vm2876_vm0, %v31327_v31  ;;  %v36163_v31 = vld [vmem:[#allocation147_spill] sm:$0xff] }
 0x66e   : > { %24810 = vmatmul.mubr.msk.bf16.gmra.mrb[192].mxu0 %vm2876_vm0, %v31333_v8  ;;  %v36168_v8 = vld [vmem:[#allocation167_spill] sm:$0xff] }
 0x66f   : > { %24813 = vmatprep.mubr.msk.bf16.mxu0 %vm2876_vm0, %v31351_v38  ;;  %v36170_v38 = vld [vmem:[#allocation169_spill] sm:$0xff] }
 0x676   : > { %24814 = vmatmul.mubr.msk.bf16.gmra.mrb[196].mxu0 %vm2876_vm0, %v31357_v42  ;;  %v36167_v42 = vld [vmem:[#allocation166_spill] sm:$0xff] }
 0x677   : > { %24817 = vmatprep.mubr.msk.bf16.mxu0 %vm2876_vm0, %v31371_v28  ;;  %v36164_v28 = vld [vmem:[#allocation152_spill] sm:$0xff] }
 0x67e   : > { %24818 = vmatmul.mubr.msk.bf16.gmra.mrb[200].mxu0 %vm2876_vm0, %v31378_v44 }
 0x67f   : > { %24821 = vmatprep.mubr.msk.bf16.mxu0 %vm2876_vm0, %v31393_v36  ;;  %v36166_v36 = vld [vmem:[#allocation158_spill] sm:$0xff] }
 0x686   : > { %24822 = vmatmul.mubr.msk.bf16.gmra.mrb[204].mxu0 %vm2876_vm0, %v31400_v34 }
 0x687   : > { %24825 = vmatprep.mubr.msk.bf16.mxu0 %vm2876_vm0, %v31415_v10 }
 0x68e   : > { %24826 = vmatmul.mubr.msk.bf16.gmra.mrb[208].mxu0 %vm2876_vm0, %v31422_v33 }
 0x68f   : > { %24829 = vmatprep.mubr.msk.bf16.mxu0 %vm2876_vm0, %v36162_v7 }
 0x696   : > { %24830 = vmatmul.mubr.msk.bf16.gmra.mrb[212].mxu0 %vm2876_vm0, %v36163_v31 }
 0x697   : > { %24833 = vmatprep.mubr.msk.bf16.mxu0 %vm2876_vm0, %v36164_v28  ;;  %v36174_v28 = vld [vmem:[#allocation173_spill] sm:$0xff] }
 0x69e   : > { %24834 = vmatmul.mubr.msk.bf16.gmra.mrb[216].mxu0 %vm2876_vm0, %v36165_v40 }
 0x69f   : > { %24837 = vmatprep.mubr.msk.bf16.mxu0 %vm2876_vm0, %v36166_v36 }
 0x6a1   : > { %v24731_v34 = vpop.f32.mrb[112].mxu0 }
 0x6a2   : > { %v9172_v10 = vpop.f32.mrb[113].mxu0  ;;  %v32556_v25 = vadd.f32 %v24731_v34, %v36167_v42  ;;  %v36175_v34 = vld [vmem:[#allocation174_spill] sm:$0xff]  ;;  %v36176_v42 = vld [vmem:[#allocation175_spill] sm:$0xff] }
 0x6a3   : > { %v24732_v33 = vpop.f32.mrb[114].mxu0  ;;  %v32559_v37 = vadd.f32 %v9172_v10, %v36168_v8  ;;  %v36178_v8 = vld [vmem:[#allocation165_spill] sm:$0xff] }
 0x6a4   : > { %v9175_v48 = vpop.f32.mrb[115].mxu0  ;;  %v32562_v43 = vadd.f32 %v24732_v33, %v36169_v49 }
 0x6a5   : > { %v32565_v44 = vadd.f32 %v9175_v48, %v36170_v38  ;;  %v36179_v48 = vld [vmem:[#allocation170_spill] sm:$0xff] }
 0x6a6   : > { %24838 = vmatmul.mubr.msk.bf16.gmra.mrb[112].mxu0 %vm2876_vm0, %v36171_v12  ;;  %v36180_v12 = vld [vmem:[#allocation178_spill] sm:$0xff] }
 0x6a7   : > { %24841 = vmatprep.mubr.msk.bf16.mxu0 %vm2876_vm0, %v36172_v52 }
 0x6a9   : > { %v24735_v27 = vpop.f32.mrb[116].mxu0 }
 0x6aa   : > { %v9188_v55 = vpop.f32.mrb[117].mxu0  ;;  %v32578_v7 = vadd.f32 %v24735_v27, %v36173_v5 }
 0x6ab   : > { %v24736_v31 = vpop.f32.mrb[118].mxu0  ;;  %v32581_v40 = vadd.f32 %v9188_v55, %v36174_v28  ;;  %v36182_v55 = vld [vmem:[#allocation179_spill] sm:$0xff]  ;;  %v36184_v28 = vld [vmem:[#allocation180_spill] sm:$0xff] }
 0x6ac   : > { %v9191_v36 = vpop.f32.mrb[119].mxu0  ;;  %v32584_v10 = vadd.f32 %v24736_v31, %v36175_v34 }
 0x6ad   : > { %v32587_v33 = vadd.f32 %v9191_v36, %v36176_v42  ;;  %v36186_v36 = vld [vmem:[#allocation181_spill] sm:$0xff] }
 0x6ae   : > { %24842 = vmatmul.mubr.msk.bf16.gmra.mrb[116].mxu0 %vm2876_vm0, %v36178_v8  ;;  %v36188_v8 = vld [vmem:[#allocation171_spill] sm:$0xff] }
 0x6af   : > { %36177 = vst [vmem:[#allocation146_spill] sm:$0xff] %v32587_v33  ;;  %24845 = vmatprep.mubr.msk.bf16.mxu0 %vm2876_vm0, %v36179_v48  ;;  %v36189_v48 = vld [vmem:[#allocation176_spill] sm:$0xff] }
 0x6b1   : > { %v24739_v49 = vpop.f32.mrb[120].mxu0 }
 0x6b2   : > { %v9204_v38 = vpop.f32.mrb[121].mxu0  ;;  %v32594_v52 = vadd.f32 %v24739_v49, %v36180_v12  ;;  %v36190_v12 = vld [vmem:[#allocation184_spill] sm:$0xff] }
 0x6b3   : > { %v24740_v27 = vpop.f32.mrb[122].mxu0  ;;  %v32597_v5 = vadd.f32 %v9204_v38, %v36182_v55  ;;  %v36192_v55 = vld [vmem:[#allocation185_spill] sm:$0xff] }
 0x6b4   : > { %36181 = vst [vmem:[#allocation147_spill] sm:$0xff] %v32594_v52  ;;  %v9207_v31 = vpop.f32.mrb[123].mxu0  ;;  %v32600_v34 = vadd.f32 %v24740_v27, %v36184_v28  ;;  %v36194_v28 = vld [vmem:[#allocation186_spill] sm:$0xff] }
 0x6b5   : > { %36183 = vst [vmem:[#allocation152_spill] sm:$0xff] %v32597_v5  ;;  %v32603_v42 = vadd.f32 %v9207_v31, %v36186_v36  ;;  %v36196_v31 = vld [vmem:[#allocation187_spill] sm:$0xff] }
 0x6b6   : > { %36185 = vst [vmem:[#allocation153_spill] sm:$0xff] %v32600_v34  ;;  %24846 = vmatmul.mubr.msk.bf16.gmra.mrb[120].mxu0 %vm2876_vm0, %v36188_v8  ;;  %v36198_v8 = vld [vmem:[#allocation177_spill] sm:$0xff] }
 0x6b7   : > { %36187 = vst [vmem:[#allocation158_spill] sm:$0xff] %v32603_v42  ;;  %24849 = vmatprep.mubr.msk.bf16.mxu0 %vm2876_vm0, %v36189_v48  ;;  %v36199_v48 = vld [vmem:[#allocation182_spill] sm:$0xff] }
 0x6b9   : > { %v24743_v33 = vpop.f32.mrb[124].mxu0 }
 0x6ba   : > { %v9220_v49 = vpop.f32.mrb[125].mxu0  ;;  %v32610_v52 = vadd.f32 %v24743_v33, %v36190_v12  ;;  %v36200_v12 = vld [vmem:[#allocation190_spill] sm:$0xff] }
 0x6bb   : > { %v24744_v38 = vpop.f32.mrb[126].mxu0  ;;  %v32613_v5 = vadd.f32 %v9220_v49, %v36192_v55  ;;  %v36202_v55 = vld [vmem:[#allocation191_spill] sm:$0xff] }
 0x6bc   : > { %36191 = vst [vmem:[#allocation166_spill] sm:$0xff] %v32610_v52  ;;  %v9223_v27 = vpop.f32.mrb[127].mxu0  ;;  %v32616_v34 = vadd.f32 %v24744_v38, %v36194_v28  ;;  %v36204_v28 = vld [vmem:[#allocation192_spill] sm:$0xff] }
 0x6bd   : > { %36193 = vst [vmem:[#allocation167_spill] sm:$0xff] %v32613_v5  ;;  %v32619_v36 = vadd.f32 %v9223_v27, %v36196_v31  ;;  %v36206_v27 = vld [vmem:[#allocation193_spill] sm:$0xff] }
 0x6be   : > { %36195 = vst [vmem:[#allocation168_spill] sm:$0xff] %v32616_v34  ;;  %24850 = vmatmul.mubr.msk.bf16.gmra.mrb[124].mxu0 %vm2876_vm0, %v36198_v8  ;;  %v36208_v8 = vld [vmem:[#allocation183_spill] sm:$0xff] }
 0x6bf   : > { %36197 = vst [vmem:[#allocation169_spill] sm:$0xff] %v32619_v36  ;;  %24853 = vmatprep.mubr.msk.bf16.mxu0 %vm2876_vm0, %v36199_v48  ;;  %v36209_v48 = vld [vmem:[#allocation188_spill] sm:$0xff] }
 0x6c1   : > { %v24747_v42 = vpop.f32.mrb[128].mxu0 }
 0x6c2   : > { %v9236_v33 = vpop.f32.mrb[129].mxu0  ;;  %v32626_v52 = vadd.f32 %v24747_v42, %v36200_v12  ;;  %v36210_v12 = vld [vmem:[#allocation196_spill] sm:$0xff] }
 0x6c3   : > { %v24748_v49 = vpop.f32.mrb[130].mxu0  ;;  %v32629_v5 = vadd.f32 %v9236_v33, %v36202_v55  ;;  %v36211_v55 = vld [vmem:[#allocation197_spill] sm:$0xff] }
 0x6c4   : > { %36201 = vst [vmem:[#allocation159_spill] sm:$0xff] %v32626_v52  ;;  %v9239_v38 = vpop.f32.mrb[131].mxu0  ;;  %v32632_v34 = vadd.f32 %v24748_v49, %v36204_v28  ;;  %v36212_v28 = vld [vmem:[#allocation198_spill] sm:$0xff] }
 0x6c5   : > { %36203 = vst [vmem:[#allocation164_spill] sm:$0xff] %v32629_v5  ;;  %v32635_v31 = vadd.f32 %v9239_v38, %v36206_v27  ;;  %v36213_v38 = vld [vmem:[#allocation199_spill] sm:$0xff] }
 0x6c6   : > { %36205 = vst [vmem:[#allocation172_spill] sm:$0xff] %v32632_v34  ;;  %24854 = vmatmul.mubr.msk.bf16.gmra.mrb[128].mxu0 %vm2876_vm0, %v36208_v8  ;;  %v36214_v8 = vld [vmem:[#allocation189_spill] sm:$0xff] }
 0x6c7   : > { %36207 = vst [vmem:[#allocation173_spill] sm:$0xff] %v32635_v31  ;;  %24857 = vmatprep.mubr.msk.bf16.mxu0 %vm2876_vm0, %v36209_v48  ;;  %v36215_v48 = vld [vmem:[#allocation194_spill] sm:$0xff]  ;;  %v36216_v31 = vld [vmem:[#allocation195_spill] sm:$0xff] }
 0x6c9   : > { %v24751_v36 = vpop.f32.mrb[132].mxu0 }
 0x6ca   : > { %v9252_v42 = vpop.f32.mrb[133].mxu0  ;;  %v32642_v52 = vadd.f32 %v24751_v36, %v36210_v12  ;;  %v36217_v36 = vld [vmem:[#allocation200_spill] sm:$0xff]  ;;  %v36219_v12 = vld [vmem:[#allocation206_spill] sm:$0xff] }
 0x6cb   : > { %v24752_v33 = vpop.f32.mrb[134].mxu0  ;;  %v32645_v5 = vadd.f32 %v9252_v42, %v36211_v55  ;;  %v36218_v42 = vld [vmem:[#allocation201_spill] sm:$0xff]  ;;  %v36221_v55 = vld [vmem:[#allocation212_spill] sm:$0xff] }
 0x6cc   : > { %v9255_v49 = vpop.f32.mrb[135].mxu0  ;;  %v32648_v34 = vadd.f32 %v24752_v33, %v36212_v28  ;;  %v36220_v33 = vld [vmem:[#allocation207_spill] sm:$0xff] }
 0x6cd   : > { %v32651_v27 = vadd.f32 %v9255_v49, %v36213_v38  ;;  %v36222_v49 = vld [vmem:[#allocation213_spill] sm:$0xff]  ;;  %v36224_v28 = vld [vmem:[#allocation219_spill] sm:$0xff]  ;;  %v36225_v38 = vld [vmem:[#allocation6_spill] sm:$0xff] }
 0x6ce   : > { %24858 = vmatmul.mubr.msk.bf16.gmra.mrb[132].mxu0 %vm2876_vm0, %v36214_v8  ;;  %v36226_v8 = vld [vmem:[#allocation7_spill] sm:$0xff] }
 0x6cf   : > { %24861 = vmatprep.mubr.msk.bf16.mxu0 %vm2876_vm0, %v36215_v48  ;;  %v36227_v48 = vld [vmem:[#allocation12_spill] sm:$0xff] }
 0x6d6   : > { %24862 = vmatmul.mubr.msk.bf16.gmra.mrb[244].mxu0 %vm2876_vm0, %v36216_v31  ;;  %v36223_v31 = vld [vmem:[#allocation218_spill] sm:$0xff] }
 0x6d7   : > { %24865 = vmatprep.mubr.msk.bf16.mxu0 %vm2876_vm0, %v36217_v36 }
 0x6de   : > { %24866 = vmatmul.mubr.msk.bf16.gmra.mrb[248].mxu0 %vm2876_vm0, %v36218_v42  ;;  %v36228_v42 = vld [vmem:[#allocation40_spill] sm:$0xff] }
 0x6df   : > { %24869 = vmatprep.mubr.msk.bf16.mxu0 %vm2876_vm0, %v36219_v12  ;;  %v36230_v12 = vld [vmem:[#allocation47_spill] sm:$0xff] }
 0x6e6   : > { %24870 = vmatmul.mubr.msk.bf16.gmra.mrb[252].mxu0 %vm2876_vm0, %v36220_v33  ;;  %v36234_v33 = vld [vmem:[#allocation226_spill] sm:$0xff] }
 0x6e7   : > { %24873 = vmatprep.mubr.msk.bf16.mxu0 %vm2876_vm0, %v36221_v55  ;;  %v36236_v55 = vld [vmem:[#allocation232_spill] sm:$0xff] }
 0x6ee   : > { %24874 = vmatmul.mubr.msk.bf16.gmra.mrb[148].mxu0 %vm2876_vm0, %v36222_v49  ;;  %v36237_v49 = vld [vmem:[#allocation233_spill] sm:$0xff] }
 0x6ef   : > { %24877 = vmatprep.mubr.msk.bf16.mxu0 %vm2876_vm0, %v36223_v31  ;;  %v36238_v31 = vld [vmem:[#allocation238_spill] sm:$0xff] }
 0x6f6   : > { %24878 = vmatmul.mubr.msk.bf16.gmra.mrb[152].mxu0 %vm2876_vm0, %v36224_v28  ;;  %v36239_v28 = vld [vmem:[#allocation239_spill] sm:$0xff] }
 0x6f7   : > { %24881 = vmatprep.mubr.msk.bf16.mxu0 %vm2876_vm0, %v36225_v38  ;;  %v36240_v38 = vld [vmem:[#allocation244_spill] sm:$0xff] }
 0x6fe   : > { %24882 = vmatmul.mubr.msk.bf16.gmra.mrb[156].mxu0 %vm2876_vm0, %v36226_v8  ;;  %v36241_v8 = vld [vmem:[#allocation245_spill] sm:$0xff] }
 0x6ff   : > { %24885 = vmatprep.mubr.msk.bf16.mxu0 %vm2876_vm0, %v36227_v48  ;;  %v36242_v48 = vld [vmem:[#allocation250_spill] sm:$0xff] }
 0x706   : > { %24886 = vmatmul.mubr.msk.bf16.gmra.mrb[160].mxu0 %vm2876_vm0, %v31774_v16  ;;  %v32698_v16 = vld [vmem:[%s30044_s21 + $0x498] sm:$0xff]  }
 0x707   : > { %24889 = vmatprep.mubr.msk.bf16.mxu0 %vm2876_vm0, %v31794_v22  ;;  %v23993_v22 = vpop.f32.mrb[244].mxu1 }
 0x70e   : > { %24890 = vmatmul.mubr.msk.bf16.gmra.mrb[164].mxu0 %vm2876_vm0, %v31804_v57  ;;  %v5518_v57 = vpop.f32.mrb[245].mxu1 }
 0x70f   : > { %24893 = vmatprep.mubr.msk.bf16.mxu0 %vm2876_vm0, %v31824_v2  ;;  %v23994_v2 = vpop.f32.mrb[246].mxu1 }
 0x716   : > { %24894 = vmatmul.mubr.msk.bf16.gmra.mrb[168].mxu0 %vm2876_vm0, %v31834_v19  ;;  %v5521_v19 = vpop.f32.mrb[247].mxu1 }
 0x717   : > { %24897 = vmatprep.mubr.msk.bf16.mxu0 %vm2876_vm0, %v31857_v21  ;;  %v23997_v21 = vpop.f32.mrb[248].mxu1 }
 0x71e   : > { %24898 = vmatmul.mubr.msk.bf16.gmra.mrb[172].mxu0 %vm2876_vm0, %v31841_v4  ;;  %v5534_v4 = vpop.f32.mrb[249].mxu1 }
 0x71f   : > { %24901 = vmatprep.mubr.msk.bf16.mxu0 %vm2876_vm0, %v31870_v15  ;;  %v23998_v15 = vpop.f32.mrb[250].mxu1 }
 0x720   : > { %v5537_v36 = vpop.f32.mrb[251].mxu1 }
 0x726   : > { %24902 = vmatmul.mubr.msk.bf16.gmra.mrb[176].mxu0 %vm2876_vm0, %v32698_v16 }
 0x727   : > { %24907 = vmatprep.mubr.msk.bf16.mxu0 %vm2876_vm0, %v31908_v20  ;;  %v36229_v20 = vld [vmem:[#allocation43_spill] sm:$0xff] }
 0x72e   : > { %24908 = vmatmul.mubr.msk.bf16.vlgmr.msra.gmra.mrb[0].mxu0 %vm2876_vm0, %v31918_v32  ;;  %v36231_v32 = vld [vmem:[#allocation48_spill] sm:$0xff] }
 0x72f   : > { %25196 = vmatpush3.bf16.msra.mxu0 %v32574_v45  ;;  %24911 = vmatprep.mubr.msk.bf16.mxu0 %vm2876_vm0, %v31935_v63  ;;  %v36232_v45 = vld [vmem:[#allocation53_spill] sm:$0xff] }
 0x730   : > { %v36233_v63 = vld [vmem:[#allocation221_spill] sm:$0xff] }
 0x736   : > { %24912 = vmatmul.mubr.msk.bf16.gmra.mrb[4].mxu0 %vm2876_vm0, %v31944_v18  ;;  %v36235_v18 = vld [vmem:[#allocation227_spill] sm:$0xff] }
 0x737   : > { %24915 = vmatprep.mubr.msk.bf16.mxu0 %vm2876_vm0, %v36228_v42  ;;  %v36243_v42 = vld [vmem:[#allocation251_spill] sm:$0xff] }
 0x73e   : > { %24916 = vmatmul.mubr.msk.bf16.gmra.mrb[8].mxu0 %vm2876_vm0, %v36229_v20  ;;  %v36244_v20 = vld [vmem:[#allocation256_spill] sm:$0xff] }
 0x73f   : > { %24919 = vmatprep.mubr.msk.bf16.mxu0 %vm2876_vm0, %v36230_v12  ;;  %v36245_v12 = vld [vmem:[#allocation257_spill] sm:$0xff] }
 0x746   : > { %24920 = vmatmul.mubr.msk.bf16.gmra.mrb[12].mxu0 %vm2876_vm0, %v36231_v32  ;;  %v36246_v32 = vld [vmem:[#allocation262_spill] sm:$0xff] }
 0x747   : > { %24923 = vmatprep.mubr.msk.bf16.mxu0 %vm2876_vm0, %v36232_v45  ;;  %v36247_v45 = vld [vmem:[#allocation263_spill] sm:$0xff] }
 0x74e   : > { %24924 = vmatmul.mubr.msk.bf16.gmra.mrb[16].mxu0 %vm2876_vm0, %v36233_v63  ;;  %v36248_v63 = vld [vmem:[#allocation268_spill] sm:$0xff] }
 0x74f   : > { %24927 = vmatprep.mubr.msk.bf16.mxu0 %vm2876_vm0, %v36234_v33  ;;  %v36249_v33 = vld [vmem:[#allocation269_spill] sm:$0xff] }
 0x756   : > { %24928 = vmatmul.mubr.msk.bf16.gmra.mrb[20].mxu0 %vm2876_vm0, %v36235_v18  ;;  %v36250_v18 = vld [vmem:[#allocation274_spill] sm:$0xff] }
 0x757   : > { %24931 = vmatprep.mubr.msk.bf16.mxu0 %vm2876_vm0, %v36236_v55  ;;  %v36251_v55 = vld [vmem:[#allocation275_spill] sm:$0xff] }
 0x75e   : > { %24932 = vmatmul.mubr.msk.bf16.gmra.mrb[24].mxu0 %vm2876_vm0, %v36237_v49  ;;  %v36252_v49 = vld [vmem:[#allocation280_spill] sm:$0xff] }
 0x75f   : > { %24935 = vmatprep.mubr.msk.bf16.mxu0 %vm2876_vm0, %v36238_v31 }
 0x766   : > { %24936 = vmatmul.mubr.msk.bf16.gmra.mrb[28].mxu0 %vm2876_vm0, %v36239_v28 }
 0x767   : > { %24939 = vmatprep.mubr.msk.bf16.mxu0 %vm2876_vm0, %v36240_v38 }
 0x76e   : > { %24940 = vmatmul.mubr.msk.bf16.gmra.mrb[32].mxu0 %vm2876_vm0, %v36241_v8 }
 0x76f   : > { %24943 = vmatprep.mubr.msk.bf16.mxu0 %vm2876_vm0, %v36242_v48 }
 0x776   : > { %24944 = vmatmul.mubr.msk.bf16.gmra.mrb[36].mxu0 %vm2876_vm0, %v36243_v42 }
 0x777   : > { %24947 = vmatprep.mubr.msk.bf16.mxu0 %vm2876_vm0, %v36244_v20 }
 0x77e   : > { %24948 = vmatmul.mubr.msk.bf16.gmra.mrb[220].mxu0 %vm2876_vm0, %v36245_v12 }
 0x77f   : > { %24951 = vmatprep.mubr.msk.bf16.mxu0 %vm2876_vm0, %v36246_v32 }
 0x786   : > { %24952 = vmatmul.mubr.msk.bf16.gmra.mrb[224].mxu0 %vm2876_vm0, %v36247_v45 }
 0x787   : > { %24955 = vmatprep.mubr.msk.bf16.mxu0 %vm2876_vm0, %v36248_v63  ;;  %v36274_v63 = vld [vmem:[#allocation60_spill] sm:$0xff] }
 0x78e   : > { %24956 = vmatmul.mubr.msk.bf16.gmra.mrb[228].mxu0 %vm2876_vm0, %v36249_v33 }
 0x78f   : > { %24959 = vmatprep.mubr.msk.bf16.mxu0 %vm2876_vm0, %v36250_v18  ;;  %v36275_v18 = vld [vmem:[#allocation61_spill] sm:$0xff] }
 0x796   : > { %24960 = vmatmul.mubr.msk.bf16.gmra.mrb[232].mxu0 %vm2876_vm0, %v36251_v55 }
 0x797   : > { %24963 = vmatprep.mubr.msk.bf16.mxu0 %vm2876_vm0, %v36252_v49  ;;  %v36276_v49 = vld [vmem:[#allocation304_spill] sm:$0xff] }
 0x79e   : > { %24964 = vmatmul.mubr.msk.bf16.gmra.mrb[236].mxu0 %vm2876_vm0, %v32184_v11 }
 0x79f   : > { %24967 = vmatprep.mubr.msk.bf16.mxu0 %vm2876_vm0, %v32197_v29 }
 0x7a6   : > { %24968 = vmatmul.mubr.msk.bf16.gmra.mrb[240].mxu0 %vm2876_vm0, %v32202_v13 }
 0x7a7   : > { %24971 = vmatprep.mubr.msk.bf16.mxu0 %vm2876_vm0, %v32215_v61 }
 0x7a9   : > { %v24863_v31 = vpop.f32.mrb[244].mxu0 }
 0x7aa   : > { %v9700_v28 = vpop.f32.mrb[245].mxu0  ;;  %v32769_v38 = vadd.f32 %v24863_v31, %v23993_v22  ;;  %v36277_v31 = vld [vmem:[#allocation305_spill] sm:$0xff] }
 0x7ab   : > { %v24864_v8 = vpop.f32.mrb[246].mxu0  ;;  %v32771_v48 = vadd.f32 %v9700_v28, %v5518_v57 }
 0x7ac   : > { %36253 = vst [vmem:[#allocation174_spill] sm:$0xff] %v32769_v38  ;;  %v9703_v42 = vpop.f32.mrb[247].mxu0  ;;  %v32773_v20 = vadd.f32 %v24864_v8, %v23994_v2 }
 0x7ad   : > { %36254 = vst [vmem:[#allocation175_spill] sm:$0xff] %v32771_v48  ;;  %v32775_v11 = vadd.f32 %v9703_v42, %v5521_v19  ;;  %v36272_v19 = vld [vmem:[#allocation58_spill] sm:$0xff] }
 0x7ae   : > { %36255 = vst [vmem:[#allocation165_spill] sm:$0xff] %v32773_v20  ;;  %24972 = vmatmul.mubr.msk.bf16.gmra.mrb[244].mxu0 %vm2876_vm0, %v32220_v41  ;;  %v36262_v41 = vld [vmem:[#allocation294_spill] sm:$0xff] }
 0x7af   : > { %36256 = vst [vmem:[#allocation170_spill] sm:$0xff] %v32775_v11  ;;  %24975 = vmatprep.mubr.msk.bf16.mxu0 %vm2876_vm0, %v32233_v1  ;;  %v36261_v1 = vld [vmem:[#allocation293_spill] sm:$0xff]  ;;  %v36278_v42 = vld [vmem:[#allocation62_spill] sm:$0xff] }
 0x7b1   : > { %v24867_v29 = vpop.f32.mrb[248].mxu0 }
 0x7b2   : > { %v9716_v61 = vpop.f32.mrb[249].mxu0  ;;  %v32781_v13 = vadd.f32 %v24867_v29, %v23997_v21 }
 0x7b3   : > { %v24868_v22 = vpop.f32.mrb[250].mxu0  ;;  %v32783_v12 = vadd.f32 %v9716_v61, %v5534_v4 }
 0x7b4   : > { %36257 = vst [vmem:[#allocation178_spill] sm:$0xff] %v32781_v13  ;;  %v9719_v57 = vpop.f32.mrb[251].mxu0  ;;  %v32785_v32 = vadd.f32 %v24868_v22, %v23998_v15  ;;  %v36273_v15 = vld [vmem:[#allocation59_spill] sm:$0xff] }
 0x7b5   : > { %36258 = vst [vmem:[#allocation179_spill] sm:$0xff] %v32783_v12  ;;  %v32787_v2 = vadd.f32 %v9719_v57, %v5537_v36  ;;  %v36279_v22 = vld [vmem:[#allocation63_spill] sm:$0xff] }
 0x7b6   : > { %36259 = vst [vmem:[#allocation180_spill] sm:$0xff] %v32785_v32  ;;  %24976 = vmatmul.mubr.msk.bf16.gmra.mrb[248].mxu0 %vm2876_vm0, %v32238_v58  ;;  %v36263_v58 = vld [vmem:[#allocation295_spill] sm:$0xff] }
 0x7b7   : > { %36260 = vst [vmem:[#allocation181_spill] sm:$0xff] %v32787_v2  ;;  %24979 = vmatprep.mubr.msk.bf16.mxu0 %vm2876_vm0, %v32243_v35  ;;  %v36264_v35 = vld [vmem:[#allocation296_spill] sm:$0xff]  ;;  %v29405_v13 = vld [vmem:[%s30044_s21 + $0x400] sm:$0xff]  }
 0x7be   : > { %24980 = vmatmul.mubr.msk.bf16.gmra.mrb[72].mxu0 %vm2876_vm0, %v32248_v62  ;;  %v36265_v62 = vld [vmem:[#allocation297_spill] sm:$0xff] }
 0x7bf   : > { %24983 = vmatprep.mubr.msk.bf16.mxu0 %vm2876_vm0, %v32253_v9  ;;  %v36269_v9 = vld [vmem:[#allocation301_spill] sm:$0xff] }
 0x7c6   : > { %24984 = vmatmul.mubr.msk.bf16.gmra.mrb[76].mxu0 %vm2876_vm0, %v32258_v14  ;;  %v36270_v14 = vld [vmem:[#allocation302_spill] sm:$0xff] }
 0x7c7   : > { %24987 = vmatprep.mubr.msk.bf16.mxu0 %vm2876_vm0, %v32263_v3  ;;  %v36271_v3 = vld [vmem:[#allocation303_spill] sm:$0xff] }
 0x7ce   : > { %24988 = vmatmul.mubr.msk.bf16.gmra.mrb[80].mxu0 %vm2876_vm0, %v32268_v47 }
 0x7cf   : > { %24991 = vmatprep.mubr.msk.bf16.mxu0 %vm2876_vm0, %v32273_v23 }
 0x7d6   : > { %24992 = vmatmul.mubr.msk.bf16.gmra.mrb[84].mxu0 %vm2876_vm0, %v32278_v54  ;;  %v36266_v54 = vld [vmem:[#allocation298_spill] sm:$0xff] }
 0x7d7   : > { %24995 = vmatprep.mubr.msk.bf16.mxu0 %vm2876_vm0, %v32283_v0  ;;  %v36267_v0 = vld [vmem:[#allocation299_spill] sm:$0xff] }
 0x7de   : > { %24996 = vmatmul.mubr.msk.bf16.gmra.mrb[88].mxu0 %vm2876_vm0, %v32288_v6  ;;  %v36268_v6 = vld [vmem:[#allocation300_spill] sm:$0xff] }
 0x7df   : > { %24999 = vmatprep.mubr.msk.bf16.mxu0 %vm2876_vm0, %v36261_v1 }
 0x7e6   : > { %25000 = vmatmul.mubr.msk.bf16.gmra.mrb[92].mxu0 %vm2876_vm0, %v36262_v41  ;;  %v36280_v41 = vld [vmem:[#allocation64_spill] sm:$0xff] }
 0x7e7   : > { %25003 = vmatprep.mubr.msk.bf16.mxu0 %vm2876_vm0, %v36263_v58 }
 0x7ee   : > { %25004 = vmatmul.mubr.msk.bf16.gmra.mrb[96].mxu0 %vm2876_vm0, %v36264_v35  ;;  %v36281_v35 = vld [vmem:[#allocation65_spill] sm:$0xff] }
 0x7ef   : > { %25007 = vmatprep.mubr.msk.bf16.mxu0 %vm2876_vm0, %v36265_v62 }
 0x7f6   : > { %25008 = vmatmul.mubr.msk.bf16.gmra.mrb[100].mxu0 %vm2876_vm0, %v36266_v54  ;;  %v36282_v54 = vld [vmem:[#allocation306_spill] sm:$0xff] }
 0x7f7   : > { %25011 = vmatprep.mubr.msk.bf16.mxu0 %vm2876_vm0, %v36267_v0  ;;  %v36283_v0 = vld [vmem:[#allocation307_spill] sm:$0xff] }
 0x7fe   : > { %25012 = vmatmul.mubr.msk.bf16.gmra.mrb[104].mxu0 %vm2876_vm0, %v36268_v6 }
 0x7ff   : > { %25015 = vmatprep.mubr.msk.bf16.mxu0 %vm2876_vm0, %v36269_v9 }
 0x806   : > { %25016 = vmatmul.mubr.msk.bf16.gmra.mrb[108].mxu0 %vm2876_vm0, %v36270_v14  ;;  %v36284_v14 = vld [vmem:[#allocation66_spill] sm:$0xff] }
 0x807   : > { %25019 = vmatprep.mubr.msk.bf16.mxu0 %vm2876_vm0, %v36271_v3 }
 0x809   : > { %v24913_v47 = vpop.f32.mrb[4].mxu0 }
 0x80a   : > { %v10230_v23 = vpop.f32.mrb[5].mxu0  ;;  %v32834_v21 = vadd.f32 %v24913_v47, %v36272_v19 }
 0x80b   : > { %v24914_v4 = vpop.f32.mrb[6].mxu0  ;;  %v32837_v36 = vadd.f32 %v10230_v23, %v36273_v15  ;;  %v36285_v23 = vld [vmem:[#allocation67_spill] sm:$0xff]  ;;  %v36286_v15 = vld [vmem:[#allocation68_spill] sm:$0xff] }
 0x80c   : > { %v10233_v45 = vpop.f32.mrb[7].mxu0  ;;  %v32840_v33 = vadd.f32 %v24914_v4, %v36274_v63  ;;  %v36287_v63 = vld [vmem:[#allocation69_spill] sm:$0xff] }
 0x80d   : > { %v32843_v55 = vadd.f32 %v10233_v45, %v36275_v18 }
 0x80e   : > { %25020 = vmatmul.mubr.msk.bf16.gmra.mrb[4].mxu0 %vm2876_vm0, %v36276_v49  ;;  %v36288_v49 = vld [vmem:[#allocation308_spill] sm:$0xff] }
 0x80f   : > { %25023 = vmatprep.mubr.msk.bf16.mxu0 %vm2876_vm0, %v36277_v31  ;;  %v36289_v31 = vld [vmem:[#allocation309_spill] sm:$0xff] }
 0x811   : > { %v24917_v28 = vpop.f32.mrb[8].mxu0 }
 0x812   : > { %v10246_v8 = vpop.f32.mrb[9].mxu0  ;;  %v32850_v29 = vadd.f32 %v24917_v28, %v36278_v42  ;;  %v36290_v42 = vld [vmem:[#allocation70_spill] sm:$0xff] }
 0x813   : > { %v24918_v61 = vpop.f32.mrb[10].mxu0  ;;  %v32853_v57 = vadd.f32 %v10246_v8, %v36279_v22 }
 0x814   : > { %v10249_v1 = vpop.f32.mrb[11].mxu0  ;;  %v32856_v58 = vadd.f32 %v24918_v61, %v36280_v41 }
 0x815   : > { %v32859_v62 = vadd.f32 %v10249_v1, %v36281_v35  ;;  %v36291_v1 = vld [vmem:[#allocation71_spill] sm:$0xff] }
 0x816   : > { %25024 = vmatmul.mubr.msk.bf16.gmra.mrb[8].mxu0 %vm2876_vm0, %v36282_v54  ;;  %v36292_v54 = vld [vmem:[#allocation72_spill] sm:$0xff] }
 0x817   : > { %25027 = vmatprep.mubr.msk.bf16.mxu0 %vm2876_vm0, %v36283_v0 }
 0x819   : > { %v24921_v6 = vpop.f32.mrb[12].mxu0 }
 0x81a   : > { %v10262_v9 = vpop.f32.mrb[13].mxu0  ;;  %v32866_v3 = vadd.f32 %v24921_v6, %v36284_v14  ;;  %v36293_v6 = vld [vmem:[#allocation73_spill] sm:$0xff]  ;;  %v36294_v14 = vld [vmem:[#allocation310_spill] sm:$0xff] }
 0x81b   : > { %v24922_v47 = vpop.f32.mrb[14].mxu0  ;;  %v32869_v19 = vadd.f32 %v10262_v9, %v36285_v23 }
 0x81c   : > { %v10265_v4 = vpop.f32.mrb[15].mxu0  ;;  %v32872_v45 = vadd.f32 %v24922_v47, %v36286_v15  ;;  %v36295_v47 = vld [vmem:[#allocation311_spill] sm:$0xff]  ;;  %v36296_v15 = vld [vmem:[#allocation74_spill] sm:$0xff] }
 0x81d   : > { %v32875_v18 = vadd.f32 %v10265_v4, %v36287_v63 }
 0x81e   : > { %25028 = vmatmul.mubr.msk.bf16.gmra.mrb[12].mxu0 %vm2876_vm0, %v36288_v49 }
 0x81f   : > { %25031 = vmatprep.mubr.msk.bf16.mxu0 %vm2876_vm0, %v36289_v31  ;;  %v36297_v31 = vld [vmem:[#allocation75_spill] sm:$0xff] }
 0x821   : > { %v24925_v28 = vpop.f32.mrb[16].mxu0 }
 0x822   : > { %v10278_v8 = vpop.f32.mrb[17].mxu0  ;;  %v32882_v61 = vadd.f32 %v24925_v28, %v36290_v42  ;;  %v36298_v42 = vld [vmem:[#allocation76_spill] sm:$0xff] }
 0x823   : > { %v24926_v22 = vpop.f32.mrb[18].mxu0  ;;  %v32885_v41 = vadd.f32 %v10278_v8, %v36291_v1  ;;  %v36299_v1 = vld [vmem:[#allocation77_spill] sm:$0xff] }
 0x824   : > { %v10281_v35 = vpop.f32.mrb[19].mxu0  ;;  %v32888_v0 = vadd.f32 %v24926_v22, %v36292_v54  ;;  %v36300_v54 = vld [vmem:[#allocation312_spill] sm:$0xff] }
 0x825   : > { %v32891_v9 = vadd.f32 %v10281_v35, %v36293_v6  ;;  %v36301_v6 = vld [vmem:[#allocation313_spill] sm:$0xff] }
 0x826   : > { %25032 = vmatmul.mubr.msk.bf16.gmra.mrb[16].mxu0 %vm2876_vm0, %v36294_v14 }
 0x827   : > { %25035 = vmatprep.mubr.msk.bf16.mxu0 %vm2876_vm0, %v36295_v47 }
 0x829   : > { %v24929_v23 = vpop.f32.mrb[20].mxu0 }
 0x82a   : > { %v10294_v4 = vpop.f32.mrb[21].mxu0  ;;  %v32898_v63 = vadd.f32 %v24929_v23, %v36296_v15  ;;  %v36302_v23 = vld [vmem:[#allocation78_spill] sm:$0xff] }
 0x82b   : > { %v24930_v49 = vpop.f32.mrb[22].mxu0  ;;  %v32901_v28 = vadd.f32 %v10294_v4, %v36297_v31  ;;  %v36303_v31 = vld [vmem:[#allocation79_spill] sm:$0xff] }
 0x82c   : > { %v10297_v8 = vpop.f32.mrb[23].mxu0  ;;  %v32904_v22 = vadd.f32 %v24930_v49, %v36298_v42  ;;  %v36304_v42 = vld [vmem:[#allocation80_spill] sm:$0xff] }
 0x82d   : > { %v32907_v35 = vadd.f32 %v10297_v8, %v36299_v1  ;;  %v36305_v1 = vld [vmem:[#allocation81_spill] sm:$0xff] }
 0x82e   : > { %25036 = vmatmul.mubr.msk.bf16.gmra.mrb[20].mxu0 %vm2876_vm0, %v36300_v54  ;;  %v36306_v54 = vld [vmem:[#allocation314_spill] sm:$0xff] }
 0x82f   : > { %25039 = vmatprep.mubr.msk.bf16.mxu0 %vm2876_vm0, %v36301_v6  ;;  %v36307_v6 = vld [vmem:[#allocation315_spill] sm:$0xff] }
 0x831   : > { %v24933_v14 = vpop.f32.mrb[24].mxu0 }
 0x832   : > { %v10310_v47 = vpop.f32.mrb[25].mxu0  ;;  %v32914_v15 = vadd.f32 %v24933_v14, %v36302_v23  ;;  %v36308_v14 = vld [vmem:[#allocation316_spill] sm:$0xff]  ;;  %v36310_v23 = vld [vmem:[#allocation318_spill] sm:$0xff] }
 0x833   : > { %v24934_v4 = vpop.f32.mrb[26].mxu0  ;;  %v32917_v2 = vadd.f32 %v10310_v47, %v36303_v31  ;;  %v36309_v47 = vld [vmem:[#allocation317_spill] sm:$0xff]  ;;  %v36312_v31 = vld [vmem:[#allocation320_spill] sm:$0xff] }
 0x834   : > { %v10313_v49 = vpop.f32.mrb[27].mxu0  ;;  %v32920_v8 = vadd.f32 %v24934_v4, %v36304_v42  ;;  %v36311_v4 = vld [vmem:[#allocation319_spill] sm:$0xff]  ;;  %v36314_v42 = vld [vmem:[#allocation322_spill] sm:$0xff] }
 0x835   : > { %v32923_v32 = vadd.f32 %v10313_v49, %v36305_v1  ;;  %v36313_v49 = vld [vmem:[#allocation321_spill] sm:$0xff]  ;;  %v36315_v1 = vld [vmem:[#allocation323_spill] sm:$0xff] }
 0x836   : > { %25040 = vmatmul.mubr.msk.bf16.gmra.mrb[24].mxu0 %vm2876_vm0, %v36306_v54  ;;  %v36316_v54 = vld [vmem:[#allocation324_spill] sm:$0xff] }
 0x837   : > { %25043 = vmatprep.mubr.msk.bf16.mxu0 %vm2876_vm0, %v36307_v6  ;;  %v36317_v6 = vld [vmem:[#allocation325_spill] sm:$0xff] }
 0x83e   : > { %25044 = vmatmul.mubr.msk.bf16.gmra.mrb[136].mxu0 %vm2876_vm0, %v36308_v14  ;;  %v32952_v14 = vld [vmem:[%s30044_s21 + $0x2a8] sm:$0xff]  }
 0x83f   : > { %25047 = vmatprep.mubr.msk.bf16.mxu0 %vm2876_vm0, %v36309_v47  ;;  %v29367_v47 = vld [vmem:[%s30044_s21 + $0x2b8] sm:$0xff]  }
 0x846   : > { %25048 = vmatmul.mubr.msk.bf16.gmra.mrb[140].mxu0 %vm2876_vm0, %v36310_v23  ;;  %v29368_v23 = vld [vmem:[%s30044_s21 + $0x2c0] sm:$0xff]  }
 0x847   : > { %25051 = vmatprep.mubr.msk.bf16.mxu0 %vm2876_vm0, %v36311_v4  ;;  %v29369_v4 = vld [vmem:[%s30044_s21 + $0x2c8] sm:$0xff]  }
 0x84e   : > { %25052 = vmatmul.mubr.msk.bf16.gmra.mrb[144].mxu0 %vm2876_vm0, %v36312_v31  ;;  %v29370_v31 = vld [vmem:[%s30044_s21 + $0x2d0] sm:$0xff]  }
 0x84f   : > { %25055 = vmatprep.mubr.msk.bf16.mxu0 %vm2876_vm0, %v36313_v49  ;;  %v29371_v49 = vld [vmem:[%s30044_s21 + $0x2d8] sm:$0xff]  }
 0x856   : > { %25056 = vmatmul.mubr.msk.bf16.gmra.mrb[40].mxu0 %vm2876_vm0, %v32438_v17  ;;  %v32957_v17 = vld [vmem:[%s30044_s21 + $0x2b0] sm:$0xff]  }
 0x857   : > { %25059 = vmatprep.mubr.msk.bf16.mxu0 %vm2876_vm0, %v36314_v42  ;;  %v29372_v42 = vld [vmem:[%s30044_s21 + $0x2e0] sm:$0xff]  }
 0x85e   : > { %25060 = vmatmul.mubr.msk.bf16.gmra.mrb[44].mxu0 %vm2876_vm0, %v36315_v1  ;;  %v29373_v1 = vld [vmem:[%s30044_s21 + $0x2e8] sm:$0xff]  }
 0x85f   : > { %25063 = vmatprep.mubr.msk.bf16.mxu0 %vm2876_vm0, %v36316_v54  ;;  %v29374_v54 = vld [vmem:[%s30044_s21 + $0x2f8] sm:$0xff]  }
 0x866   : > { %25064 = vmatmul.mubr.msk.bf16.gmra.mrb[48].mxu0 %vm2876_vm0, %v36317_v6  ;;  %v29375_v6 = vld [vmem:[%s30044_s21 + $0x310] sm:$0xff]  }
 0x867   : > { %25067 = vmatprep.mubr.msk.bf16.mxu0 %vm2876_vm0, %v32952_v14 }
 0x86e   : > { %25068 = vmatmul.mubr.msk.bf16.gmra.mrb[52].mxu0 %vm2876_vm0, %v32957_v17 }
 0x86f   : > { %25071 = vmatprep.mubr.msk.bf16.mxu0 %vm2876_vm0, %v29367_v47  ;;  %v29376_v47 = vld [vmem:[%s30044_s21 + $0x318] sm:$0xff]  }
 0x876   : > { %25072 = vmatmul.mubr.msk.bf16.gmra.mrb[56].mxu0 %vm2876_vm0, %v29368_v23  ;;  %v29378_v23 = vld [vmem:[%s30044_s21 + $0x328] sm:$0xff]  }
 0x877   : > { %25075 = vmatprep.mubr.msk.bf16.mxu0 %vm2876_vm0, %v29369_v4  ;;  %v29381_v4 = vld [vmem:[%s30044_s21 + $0x340] sm:$0xff]  }
 0x87e   : > { %25076 = vmatmul.mubr.msk.bf16.gmra.mrb[60].mxu0 %vm2876_vm0, %v29370_v31  ;;  %v29382_v31 = vld [vmem:[%s30044_s21 + $0x348] sm:$0xff]  }
 0x87f   : > { %25079 = vmatprep.mubr.msk.bf16.mxu0 %vm2876_vm0, %v29371_v49  ;;  %v29383_v49 = vld [vmem:[%s30044_s21 + $0x350] sm:$0xff]  }
 0x886   : > { %25080 = vmatmul.mubr.msk.bf16.gmra.mrb[64].mxu0 %vm2876_vm0, %v29372_v42  ;;  %v29384_v42 = vld [vmem:[%s30044_s21 + $0x358] sm:$0xff]  }
 0x887   : > { %25083 = vmatprep.mubr.msk.bf16.mxu0 %vm2876_vm0, %v29373_v1  ;;  %v29385_v1 = vld [vmem:[%s30044_s21 + $0x360] sm:$0xff]  }
 0x88e   : > { %25084 = vmatmul.mubr.msk.bf16.gmra.mrb[68].mxu0 %vm2876_vm0, %v32505_v26  ;;  %v29377_v26 = vld [vmem:[%s30044_s21 + $0x320] sm:$0xff]  }
 0x88f   : > { %25087 = vmatprep.mubr.msk.bf16.mxu0 %vm2876_vm0, %v29374_v54  ;;  %v29386_v54 = vld [vmem:[%s30044_s21 + $0x368] sm:$0xff]  }
 0x896   : > { %25088 = vmatmul.mubr.msk.bf16.gmra.mrb[180].mxu0 %vm2876_vm0, %v32512_v50  ;;  %v29379_v50 = vld [vmem:[%s30044_s21 + $0x330] sm:$0xff]  }
 0x897   : > { %25091 = vmatprep.mubr.msk.bf16.mxu0 %vm2876_vm0, %v32517_v24  ;;  %v29380_v24 = vld [vmem:[%s30044_s21 + $0x338] sm:$0xff]  }
 0x89e   : > { %25092 = vmatmul.mubr.msk.bf16.gmra.mrb[184].mxu0 %vm2876_vm0, %v29375_v6  ;;  %v29387_v6 = vld [vmem:[%s30044_s21 + $0x370] sm:$0xff]  }
 0x89f   : > { %25095 = vmatprep.mubr.msk.bf16.mxu0 %vm2876_vm0, %v29376_v47  ;;  %v29388_v47 = vld [vmem:[%s30044_s21 + $0x378] sm:$0xff]  }
 0x8a6   : > { %25096 = vmatmul.mubr.msk.bf16.gmra.mrb[188].mxu0 %vm2876_vm0, %v29377_v26  ;;  %v29389_v26 = vld [vmem:[%s30044_s21 + $0x380] sm:$0xff]  }
 0x8a7   : > { %25099 = vmatprep.mubr.msk.bf16.mxu0 %vm2876_vm0, %v29378_v23  ;;  %v29390_v23 = vld [vmem:[%s30044_s21 + $0x388] sm:$0xff]  }
 0x8ae   : > { %25100 = vmatmul.mubr.msk.bf16.gmra.mrb[192].mxu0 %vm2876_vm0, %v29379_v50  ;;  %v29391_v50 = vld [vmem:[%s30044_s21 + $0x390] sm:$0xff]  }
 0x8af   : > { %25103 = vmatprep.mubr.msk.bf16.mxu0 %vm2876_vm0, %v29380_v24  ;;  %v29392_v24 = vld [vmem:[%s30044_s21 + $0x398] sm:$0xff]  }
 0x8b6   : > { %25104 = vmatmul.mubr.msk.bf16.gmra.mrb[196].mxu0 %vm2876_vm0, %v29381_v4  ;;  %v29393_v4 = vld [vmem:[%s30044_s21 + $0x3a0] sm:$0xff]  }
 0x8b7   : > { %25107 = vmatprep.mubr.msk.bf16.mxu0 %vm2876_vm0, %v29382_v31  ;;  %v29394_v31 = vld [vmem:[%s30044_s21 + $0x3a8] sm:$0xff]  }
 0x8be   : > { %25108 = vmatmul.mubr.msk.bf16.gmra.mrb[200].mxu0 %vm2876_vm0, %v29383_v49  ;;  %v29395_v49 = vld [vmem:[%s30044_s21 + $0x3b0] sm:$0xff]  }
 0x8bf   : > { %25111 = vmatprep.mubr.msk.bf16.mxu0 %vm2876_vm0, %v29384_v42  ;;  %v29396_v42 = vld [vmem:[%s30044_s21 + $0x3b8] sm:$0xff]  }
 0x8c6   : > { %25112 = vmatmul.mubr.msk.bf16.gmra.mrb[204].mxu0 %vm2876_vm0, %v29385_v1  ;;  %v29397_v1 = vld [vmem:[%s30044_s21 + $0x3c0] sm:$0xff]  }
 0x8c7   : > { %25115 = vmatprep.mubr.msk.bf16.mxu0 %vm2876_vm0, %v29386_v54  ;;  %v29398_v54 = vld [vmem:[%s30044_s21 + $0x3c8] sm:$0xff]  }
 0x8ce   : > { %25116 = vmatmul.mubr.msk.bf16.gmra.mrb[208].mxu0 %vm2876_vm0, %v29387_v6  ;;  %v29399_v6 = vld [vmem:[%s30044_s21 + $0x3d0] sm:$0xff]  }
 0x8cf   : > { %25119 = vmatprep.mubr.msk.bf16.mxu0 %vm2876_vm0, %v29388_v47  ;;  %v29400_v47 = vld [vmem:[%s30044_s21 + $0x3d8] sm:$0xff]  }
 0x8d6   : > { %25120 = vmatmul.mubr.msk.bf16.gmra.mrb[212].mxu0 %vm2876_vm0, %v29389_v26  ;;  %v29401_v26 = vld [vmem:[%s30044_s21 + $0x3e0] sm:$0xff]  }
 0x8d7   : > { %25123 = vmatprep.mubr.msk.bf16.mxu0 %vm2876_vm0, %v29390_v23  ;;  %v29402_v23 = vld [vmem:[%s30044_s21 + $0x3e8] sm:$0xff]  }
 0x8de   : > { %25124 = vmatmul.mubr.msk.bf16.gmra.mrb[216].mxu0 %vm2876_vm0, %v29391_v50  ;;  %v29403_v50 = vld [vmem:[%s30044_s21 + $0x3f0] sm:$0xff]  }
 0x8df   : > { %25127 = vmatprep.mubr.msk.bf16.mxu0 %vm2876_vm0, %v29392_v24  ;;  %v29404_v24 = vld [vmem:[%s30044_s21 + $0x3f8] sm:$0xff]  }
 0x8e6   : > { %25128 = vmatmul.mubr.msk.bf16.gmra.mrb[112].mxu0 %vm2876_vm0, %v29393_v4 }
 0x8e7   : > { %25131 = vmatprep.mubr.msk.bf16.mxu0 %vm2876_vm0, %v29394_v31 }
 0x8ee   : > { %25132 = vmatmul.mubr.msk.bf16.gmra.mrb[116].mxu0 %vm2876_vm0, %v29395_v49  ;;  %v36318_v49 = vld [vmem:[#allocation202_spill] sm:$0xff] }
 0x8ef   : > { %25135 = vmatprep.mubr.msk.bf16.mxu0 %vm2876_vm0, %v29396_v42 }
 0x8f6   : > { %25136 = vmatmul.mubr.msk.bf16.gmra.mrb[120].mxu0 %vm2876_vm0, %v29397_v1 }
 0x8f7   : > { %25139 = vmatprep.mubr.msk.bf16.mxu0 %vm2876_vm0, %v29398_v54  ;;  %v36320_v54 = vld [vmem:[#allocation203_spill] sm:$0xff] }
 0x8fe   : > { %25140 = vmatmul.mubr.msk.bf16.gmra.mrb[124].mxu0 %vm2876_vm0, %v29399_v6 }
 0x8ff   : > { %25143 = vmatprep.mubr.msk.bf16.mxu0 %vm2876_vm0, %v29400_v47 }
 0x906   : > { %25144 = vmatmul.mubr.msk.bf16.gmra.mrb[128].mxu0 %vm2876_vm0, %v29401_v26  ;;  %v36322_v26 = vld [vmem:[#allocation204_spill] sm:$0xff] }
 0x907   : > { %25147 = vmatprep.mubr.msk.bf16.mxu0 %vm2876_vm0, %v29402_v23  ;;  %v36324_v23 = vld [vmem:[#allocation205_spill] sm:$0xff] }
 0x90e   : > { %25148 = vmatmul.mubr.msk.bf16.gmra.mrb[132].mxu0 %vm2876_vm0, %v29403_v50 }
 0x90f   : > { %25151 = vmatprep.mubr.msk.bf16.mxu0 %vm2876_vm0, %v29404_v24  ;;  %v29406_v24 = vld [vmem:[%s30044_s21 + $0x408] sm:$0xff]  }
 0x911   : > { %v25045_v4 = vpop.f32.mrb[136].mxu0 }
 0x912   : > { %v10758_v31 = vpop.f32.mrb[137].mxu0  ;;  %v33044_v42 = vadd.f32 %v25045_v4, %v36318_v49  ;;  %v36326_v49 = vld [vmem:[#allocation208_spill] sm:$0xff] }
 0x913   : > { %v25046_v1 = vpop.f32.mrb[138].mxu0  ;;  %v33047_v6 = vadd.f32 %v10758_v31, %v36320_v54 }
 0x914   : > { %36319 = vst [vmem:[#allocation171_spill] sm:$0xff] %v33044_v42  ;;  %v10761_v47 = vpop.f32.mrb[139].mxu0  ;;  %v33050_v12 = vadd.f32 %v25046_v1, %v36322_v26  ;;  %v36328_v26 = vld [vmem:[#allocation209_spill] sm:$0xff] }
 0x915   : > { %36321 = vst [vmem:[#allocation176_spill] sm:$0xff] %v33047_v6  ;;  %v33053_v50 = vadd.f32 %v10761_v47, %v36324_v23  ;;  %v36330_v23 = vld [vmem:[#allocation210_spill] sm:$0xff] }
 0x916   : > { %36323 = vst [vmem:[#allocation184_spill] sm:$0xff] %v33050_v12  ;;  %25152 = vmatmul.mubr.msk.bf16.gmra.mrb[136].mxu0 %vm2876_vm0, %v29405_v13  ;;  %v36332_v13 = vld [vmem:[#allocation211_spill] sm:$0xff]  ;;  %v29479_v6 = vld [vmem:[%s30044_s21 + $0x1e8] sm:$0xff]  }
 0x917   : > { %36325 = vst [vmem:[#allocation185_spill] sm:$0xff] %v33053_v50  ;;  %25155 = vmatprep.mubr.msk.bf16.mxu0 %vm2876_vm0, %v29406_v24  ;;  %v29407_v24 = vld [vmem:[%s30044_s21 + $0x410] sm:$0xff]  }
 0x919   : > { %v25049_v4 = vpop.f32.mrb[140].mxu0 }
 0x91a   : > { %v10774_v31 = vpop.f32.mrb[141].mxu0  ;;  %v33060_v54 = vadd.f32 %v25049_v4, %v36326_v49  ;;  %v29408_v4 = vld [vmem:[%s30044_s21 + $0x418] sm:$0xff]   ;;  %v29409_v49 = vld [vmem:[%s30044_s21 + $0x420] sm:$0xff]  }
 0x91b   : > { %v25050_v1 = vpop.f32.mrb[142].mxu0  ;;  %v33063_v11 = vadd.f32 %v10774_v31, %v36328_v26  ;;  %v29410_v31 = vld [vmem:[%s30044_s21 + $0x428] sm:$0xff]   ;;  %v29412_v26 = vld [vmem:[%s30044_s21 + $0x438] sm:$0xff]  }
 0x91c   : > { %36327 = vst [vmem:[#allocation186_spill] sm:$0xff] %v33060_v54  ;;  %v10777_v47 = vpop.f32.mrb[143].mxu0  ;;  %v33066_v20 = vadd.f32 %v25050_v1, %v36330_v23  ;;  %v29411_v1 = vld [vmem:[%s30044_s21 + $0x430] sm:$0xff]   ;;  %v29414_v23 = vld [vmem:[%s30044_s21 + $0x448] sm:$0xff]  }
 0x91d   : > { %36329 = vst [vmem:[#allocation187_spill] sm:$0xff] %v33063_v11  ;;  %v33069_v48 = vadd.f32 %v10777_v47, %v36332_v13  ;;  %v29413_v47 = vld [vmem:[%s30044_s21 + $0x440] sm:$0xff]   ;;  %v29415_v13 = vld [vmem:[%s30044_s21 + $0x450] sm:$0xff]  }
 0x91e   : > { %36331 = vst [vmem:[#allocation177_spill] sm:$0xff] %v33066_v20  ;;  %25156 = vmatmul.mubr.msk.bf16.gmra.mrb[140].mxu0 %vm2876_vm0, %v29407_v24  ;;  %v29416_v24 = vld [vmem:[%s30044_s21 + $0x458] sm:$0xff]  }
 0x91f   : > { %36333 = vst [vmem:[#allocation182_spill] sm:$0xff] %v33069_v48  ;;  %25159 = vmatprep.mubr.msk.bf16.mxu0 %vm2876_vm0, %v29408_v4  ;;  %v29417_v4 = vld [vmem:[%s30044_s21 + $0x460] sm:$0xff]   ;;  %v36346_v20 = vld [vmem:[#allocation44_spill] sm:$0xff] }
 0x920   : > { %v36344_v48 = vld [vmem:[#allocation45_spill] sm:$0xff] }
 0x926   : > { %25160 = vmatmul.mubr.msk.bf16.gmra.mrb[252].mxu0 %vm2876_vm0, %v29409_v49  ;;  %v29418_v49 = vld [vmem:[%s30044_s21 + $0x468] sm:$0xff]  }
 0x927   : > { %25163 = vmatprep.mubr.msk.bf16.mxu0 %vm2876_vm0, %v29410_v31  ;;  %v29419_v31 = vld [vmem:[%s30044_s21 + $0x470] sm:$0xff]  }
 0x92e   : > { %25164 = vmatmul.mubr.msk.bf16.gmra.mrb[148].mxu0 %vm2876_vm0, %v29411_v1  ;;  %v29420_v1 = vld [vmem:[%s30044_s21 + $0x478] sm:$0xff]  }
 0x92f   : > { %25167 = vmatprep.mubr.msk.bf16.mxu0 %vm2876_vm0, %v29412_v26  ;;  %v29421_v26 = vld [vmem:[%s30044_s21 + $0x480] sm:$0xff]  }
 0x936   : > { %25168 = vmatmul.mubr.msk.bf16.gmra.mrb[152].mxu0 %vm2876_vm0, %v29413_v47  ;;  %v29422_v47 = vld [vmem:[%s30044_s21 + $0x488] sm:$0xff]  }
 0x937   : > { %25171 = vmatprep.mubr.msk.bf16.mxu0 %vm2876_vm0, %v29414_v23  ;;  %v29423_v23 = vld [vmem:[%s30044_s21 + $0x490] sm:$0xff]  }
 0x93e   : > { %25172 = vmatmul.mubr.msk.bf16.gmra.mrb[156].mxu0 %vm2876_vm0, %v29415_v13  ;;  %v29066_v13 = vld [vmem:[%s30044_s21 + $0x4a0] sm:$0xff]  }
 0x93f   : > { %25175 = vmatprep.mubr.msk.bf16.mxu0 %vm2876_vm0, %v29416_v24  ;;  %v33109_v24 = vpop.f32.mrb[252].mxu1 }
 0x940   : > { %36334 = vst [vmem:[#allocation190_spill] sm:$0xff] %v33109_v24  ;;  %v36342_v24 = vld [vmem:[#allocation42_spill] sm:$0xff] }
 0x946   : > { %25176 = vmatmul.mubr.msk.bf16.gmra.mrb[160].mxu0 %vm2876_vm0, %v29417_v4  ;;  %v29424_v4 = vld [vmem:[%s30044_s21 + $0x30] sm:$0xff]  }
 0x947   : > { %25179 = vmatprep.mubr.msk.bf16.mxu0 %vm2876_vm0, %v29418_v49  ;;  %v33113_v49 = vpop.f32.mrb[253].mxu1 }
 0x948   : > { %36335 = vst [vmem:[#allocation191_spill] sm:$0xff] %v33113_v49 }
 0x94e   : > { %25180 = vmatmul.mubr.msk.bf16.gmra.mrb[164].mxu0 %vm2876_vm0, %v29419_v31  ;;  %v33115_v31 = vpop.f32.mrb[254].mxu1 }
 0x94f   : > { %25183 = vmatprep.mubr.msk.bf16.mxu0 %vm2876_vm0, %v29420_v1  ;;  %36336 = vst [vmem:[#allocation192_spill] sm:$0xff] %v33115_v31  ;;  %v33117_v1 = vpop.f32.mrb[255].mxu1 }
 0x950   : > { %36337 = vst [vmem:[#allocation193_spill] sm:$0xff] %v33117_v1 }
 0x956   : > { %25184 = vmatmul.mubr.msk.bf16.gmra.mrb[168].mxu0 %vm2876_vm0, %v29421_v26  ;;  %v29425_v26 = vld [vmem:[%s30044_s21 + $0x38] sm:$0xff]  }
 0x957   : > { %25187 = vmatprep.mubr.msk.bf16.mxu0 %vm2876_vm0, %v29422_v47  ;;  %v33121_v47 = vpop.f32.mrb[148].mxu1 }
 0x958   : > { %36338 = vst [vmem:[#allocation183_spill] sm:$0xff] %v33121_v47 }
 0x95e   : > { %25188 = vmatmul.mubr.msk.bf16.gmra.mrb[172].mxu0 %vm2876_vm0, %v29423_v23  ;;  %v33125_v23 = vpop.f32.mrb[149].mxu1 }
 0x95f   : > { %25191 = vmatprep.mubr.msk.bf16.mxu0 %vm2876_vm0, %v32698_v16  ;;  %v29426_v16 = vld [vmem:[%s30044_s21 + $0x40] sm:$0xff]   ;;  %36339 = vst [vmem:[#allocation188_spill] sm:$0xff] %v33125_v23  ;;  %v29427_v23 = vld [vmem:[%s30044_s21 + $0x48] sm:$0xff]  }
 0x966   : > { %25192 = vmatmul.mubr.msk.bf16.gmra.mrb[176].mxu0 %vm2876_vm0, %v29066_v13  ;;  %v33127_v13 = vpop.f32.mrb[150].mxu1 }
 0x967   : > { %25197 = vmatprep.mubr.msk.bf16.mxu0 %vm2876_vm0, %v29424_v4  ;;  %36340 = vst [vmem:[#allocation196_spill] sm:$0xff] %v33127_v13  ;;  %v33129_v49 = vpop.f32.mrb[151].mxu1  ;;  %v29428_v13 = vld [vmem:[%s30044_s21 + $0x50] sm:$0xff]  }
 0x968   : > { %36341 = vst [vmem:[#allocation197_spill] sm:$0xff] %v33129_v49  ;;  %v33145_v49 = vpop.f32.mrb[152].mxu1 }
 0x969   : > { %36350 = vst [vmem:[#allocation195_spill] sm:$0xff] %v33145_v49 }
 0x96e   : > { %25198 = vmatmul.mubr.msk.bf16.vlgmr.msra.gmra.mrb[0].mxu0 %vm2876_vm0, %v29425_v26 }
 0x96f   : > { %25201 = vmatprep.mubr.msk.bf16.mxu0 %vm2876_vm0, %v29426_v16  ;;  %v36348_v16 = vld [vmem:[#allocation46_spill] sm:$0xff] }
 0x971   : > { %v25093_v4 = vpop.f32.mrb[184].mxu0 }
 0x972   : > { %v10950_v31 = vpop.f32.mrb[185].mxu0  ;;  %v33132_v1 = vadd.f32 %v25093_v4, %v36342_v24  ;;  %v33149_v24 = vpop.f32.mrb[153].mxu1 }
 0x973   : > { %v25094_v38 = vpop.f32.mrb[186].mxu0  ;;  %v33135_v26 = vadd.f32 %v10950_v31, %v36344_v48  ;;  %36351 = vst [vmem:[#allocation200_spill] sm:$0xff] %v33149_v24  ;;  %v33151_v48 = vpop.f32.mrb[154].mxu1  ;;  %v29429_v24 = vld [vmem:[%s30044_s21 + $0x58] sm:$0xff]  }
 0x974   : > { %36343 = vst [vmem:[#allocation198_spill] sm:$0xff] %v33132_v1  ;;  %v10953_v47 = vpop.f32.mrb[187].mxu0  ;;  %v33138_v11 = vadd.f32 %v25094_v38, %v36346_v20  ;;  %36352 = vst [vmem:[#allocation201_spill] sm:$0xff] %v33151_v48  ;;  %v33153_v38 = vpop.f32.mrb[155].mxu1  ;;  %v29430_v48 = vld [vmem:[%s30044_s21 + $0x60] sm:$0xff]  }
 0x975   : > { %36345 = vst [vmem:[#allocation199_spill] sm:$0xff] %v33135_v26  ;;  %v33141_v54 = vadd.f32 %v10953_v47, %v36348_v16  ;;  %36353 = vst [vmem:[#allocation206_spill] sm:$0xff] %v33153_v38  ;;  %v36354_v47 = vld [vmem:[#allocation49_spill] sm:$0xff]  ;;  %v33169_v38 = vpop.f32.mrb[156].mxu1 }
 0x976   : > { %36347 = vst [vmem:[#allocation189_spill] sm:$0xff] %v33138_v11  ;;  %25202 = vmatmul.mubr.msk.bf16.gmra.mrb[184].mxu0 %vm2876_vm0, %v29427_v23  ;;  %v36358_v11 = vld [vmem:[#allocation51_spill] sm:$0xff]  ;;  %36362 = vst [vmem:[#allocation219_spill] sm:$0xff] %v33169_v38 }
 0x977   : > { %36349 = vst [vmem:[#allocation194_spill] sm:$0xff] %v33141_v54  ;;  %25205 = vmatprep.mubr.msk.bf16.mxu0 %vm2876_vm0, %v29428_v13  ;;  %v36356_v54 = vld [vmem:[#allocation50_spill] sm:$0xff]  ;;  %v36360_v13 = vld [vmem:[#allocation52_spill] sm:$0xff] }
 0x979   : > { %v25097_v31 = vpop.f32.mrb[188].mxu0 }
 0x97a   : > { %v10966_v20 = vpop.f32.mrb[189].mxu0  ;;  %v33156_v4 = vadd.f32 %v25097_v31, %v36354_v47  ;;  %v33173_v31 = vpop.f32.mrb[157].mxu1 }
 0x97b   : > { %v25098_v16 = vpop.f32.mrb[190].mxu0  ;;  %v33159_v23 = vadd.f32 %v10966_v20, %v36356_v54  ;;  %36363 = vst [vmem:[#allocation6_spill] sm:$0xff] %v33173_v31  ;;  %v33175_v54 = vpop.f32.mrb[158].mxu1  ;;  %v29431_v31 = vld [vmem:[%s30044_s21 + $0x68] sm:$0xff]  }
 0x97c   : > { %36355 = vst [vmem:[#allocation207_spill] sm:$0xff] %v33156_v4  ;;  %v10969_v49 = vpop.f32.mrb[191].mxu0  ;;  %v33162_v26 = vadd.f32 %v25098_v16, %v36358_v11  ;;  %36364 = vst [vmem:[#allocation7_spill] sm:$0xff] %v33175_v54  ;;  %v33177_v11 = vpop.f32.mrb[159].mxu1  ;;  %v29432_v54 = vld [vmem:[%s30044_s21 + $0x70] sm:$0xff]  }
 0x97d   : > { %36357 = vst [vmem:[#allocation212_spill] sm:$0xff] %v33159_v23  ;;  %v33165_v1 = vadd.f32 %v10969_v49, %v36360_v13  ;;  %36365 = vst [vmem:[#allocation12_spill] sm:$0xff] %v33177_v11  ;;  %v36366_v49 = vld [vmem:[#allocation222_spill] sm:$0xff]  ;;  %v33193_v11 = vpop.f32.mrb[160].mxu1 }
 0x97e   : > { %36359 = vst [vmem:[#allocation213_spill] sm:$0xff] %v33162_v26  ;;  %25206 = vmatmul.mubr.msk.bf16.gmra.mrb[188].mxu0 %vm2876_vm0, %v29429_v24  ;;  %v36370_v26 = vld [vmem:[#allocation224_spill] sm:$0xff]  ;;  %36374 = vst [vmem:[#allocation53_spill] sm:$0xff] %v33193_v11 }
 0x97f   : > { %36361 = vst [vmem:[#allocation218_spill] sm:$0xff] %v33165_v1  ;;  %25209 = vmatprep.mubr.msk.bf16.mxu0 %vm2876_vm0, %v29430_v48  ;;  %v36368_v1 = vld [vmem:[#allocation223_spill] sm:$0xff]  ;;  %v36372_v48 = vld [vmem:[#allocation225_spill] sm:$0xff] }
 0x981   : > { %v25101_v20 = vpop.f32.mrb[192].mxu0 }
 0x982   : > { %v10982_v47 = vpop.f32.mrb[193].mxu0  ;;  %v33180_v16 = vadd.f32 %v25101_v20, %v36366_v49  ;;  %v33197_v20 = vpop.f32.mrb[161].mxu1 }
 0x983   : > { %v25102_v13 = vpop.f32.mrb[194].mxu0  ;;  %v33183_v24 = vadd.f32 %v10982_v47, %v36368_v1  ;;  %36375 = vst [vmem:[#allocation221_spill] sm:$0xff] %v33197_v20  ;;  %v33199_v1 = vpop.f32.mrb[162].mxu1  ;;  %v29433_v20 = vld [vmem:[%s30044_s21 + $0x78] sm:$0xff]  }
 0x984   : > { %36367 = vst [vmem:[#allocation40_spill] sm:$0xff] %v33180_v16  ;;  %v10985_v38 = vpop.f32.mrb[195].mxu0  ;;  %v33186_v23 = vadd.f32 %v25102_v13, %v36370_v26  ;;  %36376 = vst [vmem:[#allocation226_spill] sm:$0xff] %v33199_v1  ;;  %v33201_v26 = vpop.f32.mrb[163].mxu1  ;;  %v29434_v1 = vld [vmem:[%s30044_s21 + $0x80] sm:$0xff]  }
 0x985   : > { %36369 = vst [vmem:[#allocation43_spill] sm:$0xff] %v33183_v24  ;;  %v33189_v4 = vadd.f32 %v10985_v38, %v36372_v48  ;;  %36377 = vst [vmem:[#allocation227_spill] sm:$0xff] %v33201_v26  ;;  %v36378_v38 = vld [vmem:[#allocation228_spill] sm:$0xff]  ;;  %v33217_v26 = vpop.f32.mrb[164].mxu1 }
 0x986   : > { %36371 = vst [vmem:[#allocation47_spill] sm:$0xff] %v33186_v23  ;;  %25210 = vmatmul.mubr.msk.bf16.gmra.mrb[192].mxu0 %vm2876_vm0, %v29431_v31  ;;  %v36382_v23 = vld [vmem:[#allocation230_spill] sm:$0xff]  ;;  %36386 = vst [vmem:[#allocation244_spill] sm:$0xff] %v33217_v26 }
 0x987   : > { %36373 = vst [vmem:[#allocation48_spill] sm:$0xff] %v33189_v4  ;;  %25213 = vmatprep.mubr.msk.bf16.mxu0 %vm2876_vm0, %v29432_v54  ;;  %v36380_v4 = vld [vmem:[#allocation229_spill] sm:$0xff]  ;;  %v36384_v54 = vld [vmem:[#allocation231_spill] sm:$0xff] }
 0x989   : > { %v25105_v47 = vpop.f32.mrb[196].mxu0 }
 0x98a   : > { %v10998_v49 = vpop.f32.mrb[197].mxu0  ;;  %v33204_v13 = vadd.f32 %v25105_v47, %v36378_v38  ;;  %v33221_v47 = vpop.f32.mrb[165].mxu1 }
 0x98b   : > { %v25106_v48 = vpop.f32.mrb[198].mxu0  ;;  %v33207_v31 = vadd.f32 %v10998_v49, %v36380_v4  ;;  %36387 = vst [vmem:[#allocation245_spill] sm:$0xff] %v33221_v47  ;;  %v33223_v4 = vpop.f32.mrb[166].mxu1  ;;  %v29435_v47 = vld [vmem:[%s30044_s21 + $0x88] sm:$0xff]  }
 0x98c   : > { %36379 = vst [vmem:[#allocation232_spill] sm:$0xff] %v33204_v13  ;;  %v11001_v11 = vpop.f32.mrb[199].mxu0  ;;  %v33210_v24 = vadd.f32 %v25106_v48, %v36382_v23  ;;  %36388 = vst [vmem:[#allocation250_spill] sm:$0xff] %v33223_v4  ;;  %v33225_v23 = vpop.f32.mrb[167].mxu1  ;;  %v29436_v4 = vld [vmem:[%s30044_s21 + $0x90] sm:$0xff]  }
 0x98d   : > { %36381 = vst [vmem:[#allocation233_spill] sm:$0xff] %v33207_v31  ;;  %v33213_v16 = vadd.f32 %v11001_v11, %v36384_v54  ;;  %36389 = vst [vmem:[#allocation251_spill] sm:$0xff] %v33225_v23  ;;  %v36390_v11 = vld [vmem:[#allocation234_spill] sm:$0xff]  ;;  %v33241_v23 = vpop.f32.mrb[168].mxu1 }
 0x98e   : > { %36383 = vst [vmem:[#allocation238_spill] sm:$0xff] %v33210_v24  ;;  %25214 = vmatmul.mubr.msk.bf16.gmra.mrb[196].mxu0 %vm2876_vm0, %v29433_v20  ;;  %v36394_v24 = vld [vmem:[#allocation236_spill] sm:$0xff]  ;;  %36398 = vst [vmem:[#allocation268_spill] sm:$0xff] %v33241_v23 }
 0x98f   : > { %36385 = vst [vmem:[#allocation239_spill] sm:$0xff] %v33213_v16  ;;  %25217 = vmatprep.mubr.msk.bf16.mxu0 %vm2876_vm0, %v29434_v1  ;;  %v36392_v16 = vld [vmem:[#allocation235_spill] sm:$0xff]  ;;  %v36396_v1 = vld [vmem:[#allocation237_spill] sm:$0xff] }
 0x991   : > { %v25109_v49 = vpop.f32.mrb[200].mxu0 }
 0x992   : > { %v11014_v38 = vpop.f32.mrb[201].mxu0  ;;  %v33228_v48 = vadd.f32 %v25109_v49, %v36390_v11  ;;  %v33245_v49 = vpop.f32.mrb[169].mxu1  ;;  %v36402_v11 = vld [vmem:[#allocation240_spill] sm:$0xff] }
 0x993   : > { %v25110_v54 = vpop.f32.mrb[202].mxu0  ;;  %v33231_v20 = vadd.f32 %v11014_v38, %v36392_v16  ;;  %36399 = vst [vmem:[#allocation269_spill] sm:$0xff] %v33245_v49  ;;  %v33247_v16 = vpop.f32.mrb[170].mxu1  ;;  %v36408_v49 = vld [vmem:[#allocation243_spill] sm:$0xff] }
 0x994   : > { %36391 = vst [vmem:[#allocation256_spill] sm:$0xff] %v33228_v48  ;;  %v11017_v26 = vpop.f32.mrb[203].mxu0  ;;  %v33234_v31 = vadd.f32 %v25110_v54, %v36394_v24  ;;  %36400 = vst [vmem:[#allocation274_spill] sm:$0xff] %v33247_v16  ;;  %v33249_v24 = vpop.f32.mrb[171].mxu1  ;;  %v29437_v16 = vld [vmem:[%s30044_s21 + $0x98] sm:$0xff]  }
 0x995   : > { %36393 = vst [vmem:[#allocation257_spill] sm:$0xff] %v33231_v20  ;;  %v33237_v13 = vadd.f32 %v11017_v26, %v36396_v1  ;;  %36401 = vst [vmem:[#allocation275_spill] sm:$0xff] %v33249_v24  ;;  %v33265_v24 = vpop.f32.mrb[172].mxu1 }
 0x996   : > { %36395 = vst [vmem:[#allocation262_spill] sm:$0xff] %v33234_v31  ;;  %25218 = vmatmul.mubr.msk.bf16.gmra.mrb[200].mxu0 %vm2876_vm0, %v29435_v47  ;;  %v36404_v47 = vld [vmem:[#allocation241_spill] sm:$0xff]  ;;  %v36406_v31 = vld [vmem:[#allocation242_spill] sm:$0xff]  ;;  %36410 = vst [vmem:[#allocation296_spill] sm:$0xff] %v33265_v24 }
 0x997   : > { %36397 = vst [vmem:[#allocation263_spill] sm:$0xff] %v33237_v13  ;;  %25221 = vmatprep.mubr.msk.bf16.mxu0 %vm2876_vm0, %v29436_v4 }
 0x999   : > { %v25113_v38 = vpop.f32.mrb[204].mxu0 }
 0x99a   : > { %v11030_v26 = vpop.f32.mrb[205].mxu0  ;;  %v33252_v54 = vadd.f32 %v25113_v38, %v36402_v11  ;;  %v29438_v38 = vld [vmem:[%s30044_s21 + $0xa0] sm:$0xff]  }
 0x99b   : > { %v25114_v1 = vpop.f32.mrb[206].mxu0  ;;  %v33255_v23 = vadd.f32 %v11030_v26, %v36404_v47  ;;  %v33269_v26 = vpop.f32.mrb[173].mxu1 }
 0x99c   : > { %36403 = vst [vmem:[#allocation280_spill] sm:$0xff] %v33252_v54  ;;  %v11033_v13 = vpop.f32.mrb[207].mxu0  ;;  %v33258_v4 = vadd.f32 %v25114_v1, %v36406_v31  ;;  %36411 = vst [vmem:[#allocation297_spill] sm:$0xff] %v33269_v26  ;;  %v33271_v11 = vpop.f32.mrb[174].mxu1  ;;  %v36421_v26 = vld [vmem:[#allocation55_spill] sm:$0xff]  ;;  %v36423_v54 = vld [vmem:[#allocation57_spill] sm:$0xff] }
 0x99d   : > { %36405 = vst [vmem:[#allocation293_spill] sm:$0xff] %v33255_v23  ;;  %v33261_v20 = vadd.f32 %v11033_v13, %v36408_v49  ;;  %36412 = vst [vmem:[#allocation298_spill] sm:$0xff] %v33271_v11  ;;  %v33273_v31 = vpop.f32.mrb[175].mxu1  ;;  %v29439_v13 = vld [vmem:[%s30044_s21 + $0xa8] sm:$0xff]   ;;  %v29441_v11 = vld [vmem:[%s30044_s21 + $0xb8] sm:$0xff]  }
 0x99e   : > { %36407 = vst [vmem:[#allocation294_spill] sm:$0xff] %v33258_v4  ;;  %25222 = vmatmul.mubr.msk.bf16.gmra.mrb[204].mxu0 %vm2876_vm0, %v29437_v16  ;;  %36413 = vst [vmem:[#allocation299_spill] sm:$0xff] %v33273_v31  ;;  %v33277_v49 = vpop.f32.mrb[176].mxu1  ;;  %v29440_v16 = vld [vmem:[%s30044_s21 + $0xb0] sm:$0xff]   ;;  %v29442_v31 = vld [vmem:[%s30044_s21 + $0xc0] sm:$0xff]  }
 0x99f   : > { %36409 = vst [vmem:[#allocation295_spill] sm:$0xff] %v33261_v20  ;;  %25225 = vmatprep.mubr.msk.bf16.mxu0 %vm2876_vm0, %v29438_v38  ;;  %36414 = vst [vmem:[#allocation300_spill] sm:$0xff] %v33277_v49  ;;  %v33281_v1 = vpop.f32.mrb[177].mxu1  ;;  %v29477_v49 = vld [vmem:[%s30044_s21 + $0x1d8] sm:$0xff]  }
 0x9a0   : > { %36415 = vst [vmem:[#allocation301_spill] sm:$0xff] %v33281_v1  ;;  %v33283_v47 = vpop.f32.mrb[178].mxu1  ;;  %v29449_v1 = vld [vmem:[%s30044_s21 + $0xf8] sm:$0xff]  }
 0x9a1   : > { %36416 = vst [vmem:[#allocation302_spill] sm:$0xff] %v33283_v47  ;;  %v33285_v38 = vpop.f32.mrb[179].mxu1  ;;  %v29445_v47 = vld [vmem:[%s30044_s21 + $0xd8] sm:$0xff]  }
 0x9a2   : > { %36417 = vst [vmem:[#allocation303_spill] sm:$0xff] %v33285_v38  ;;  %v29446_v38 = vld [vmem:[%s30044_s21 + $0xe0] sm:$0xff]  }
 0x9a6   : > { %25226 = vmatmul.mubr.msk.bf16.gmra.mrb[28].mxu0 %vm2876_vm0, %v29439_v13  ;;  %v29443_v13 = vld [vmem:[%s30044_s21 + $0xc8] sm:$0xff]  }
 0x9a7   : > { %25229 = vmatprep.mubr.msk.bf16.mxu0 %vm2876_vm0, %v29440_v16  ;;  %v29444_v16 = vld [vmem:[%s30044_s21 + $0xd0] sm:$0xff]  }
 0x9ae   : > { %25230 = vmatmul.mubr.msk.bf16.gmra.mrb[32].mxu0 %vm2876_vm0, %v29441_v11  ;;  %v29447_v11 = vld [vmem:[%s30044_s21 + $0xe8] sm:$0xff]  }
 0x9af   : > { %25233 = vmatprep.mubr.msk.bf16.mxu0 %vm2876_vm0, %v29442_v31  ;;  %v29448_v31 = vld [vmem:[%s30044_s21 + $0xf0] sm:$0xff]  }
 0x9b6   : > { %25234 = vmatmul.mubr.msk.bf16.gmra.mrb[36].mxu0 %vm2876_vm0, %v29443_v13  ;;  %v29450_v13 = vld [vmem:[%s30044_s21 + $0x100] sm:$0xff]  }
 0x9b7   : > { %25237 = vmatprep.mubr.msk.bf16.mxu0 %vm2876_vm0, %v29444_v16  ;;  %v29451_v16 = vld [vmem:[%s30044_s21 + $0x108] sm:$0xff]  }
 0x9be   : > { %25238 = vmatmul.mubr.msk.bf16.gmra.mrb[220].mxu0 %vm2876_vm0, %v29445_v47  ;;  %v29452_v47 = vld [vmem:[%s30044_s21 + $0x110] sm:$0xff]  }
 0x9bf   : > { %25241 = vmatprep.mubr.msk.bf16.mxu0 %vm2876_vm0, %v29446_v38  ;;  %v29067_v38 = vld [vmem:[%s36418_s3 + $0x20] sm:$0xff]  }
 0x9c0   : > { %25485 = vmatprep.subr.bf16.mxu1 %v29067_v38 }
 0x9c1   : > { %25486 = vmatpush3.bf16.msra.mxu1 %v29067_v38  ;;  %v29070_v38 = vld [vmem:[%s36418_s3 + $0x38] sm:$0xff]  }
 0x9c6   : > { %25242 = vmatmul.mubr.msk.bf16.gmra.mrb[224].mxu0 %vm2876_vm0, %v29447_v11  ;;  %v29453_v11 = vld [vmem:[%s30044_s21 + $0x118] sm:$0xff]  }
 0x9c7   : > { %25245 = vmatprep.mubr.msk.bf16.mxu0 %vm2876_vm0, %v29448_v31  ;;  %v29454_v31 = vld [vmem:[%s30044_s21 + $0x120] sm:$0xff]  }
 0x9ce   : > { %25246 = vmatmul.mubr.msk.bf16.gmra.mrb[228].mxu0 %vm2876_vm0, %v29449_v1  ;;  %v29068_v1 = vld [vmem:[%s36418_s3 + $0x28] sm:$0xff]  }
 0x9cf   : > { %25249 = vmatprep.mubr.msk.bf16.mxu0 %vm2876_vm0, %v29450_v13  ;;  %25487 = vmatprep.subr.bf16.mxu1 %v29068_v1  ;;  %v29069_v13 = vld [vmem:[%s36418_s3 + $0x30] sm:$0xff]  }
 0x9d0   : > { %25488 = vmatpush3.bf16.msra.mxu1 %v29068_v1  ;;  %v29459_v1 = vld [vmem:[%s30044_s21 + $0x148] sm:$0xff]  }
 0x9d1   : > { %25489 = vmatprep.subr.bf16.mxu1 %v29069_v13 }
 0x9d4   : > { %25490 = vmatpush3.bf16.msra.mxu1 %v29069_v13  ;;  %v29460_v13 = vld [vmem:[%s30044_s21 + $0x150] sm:$0xff]  }
 0x9d5   : > { %25491 = vmatprep.subr.bf16.mxu1 %v29070_v38 }
 0x9d6   : > { %25250 = vmatmul.mubr.msk.bf16.gmra.mrb[232].mxu0 %vm2876_vm0, %v29451_v16  ;;  %v29455_v16 = vld [vmem:[%s30044_s21 + $0x128] sm:$0xff]  }
 0x9d7   : > { %25253 = vmatprep.mubr.msk.bf16.mxu0 %vm2876_vm0, %v29452_v47  ;;  %v29456_v47 = vld [vmem:[%s30044_s21 + $0x130] sm:$0xff]  }
 0x9d8   : > { %25492 = vmatpush3.bf16.msra.mxu1 %v29070_v38  ;;  %v29463_v38 = vld [vmem:[%s30044_s21 + $0x168] sm:$0xff]  }
 0x9de   : > { %25254 = vmatmul.mubr.msk.bf16.gmra.mrb[236].mxu0 %vm2876_vm0, %v29453_v11  ;;  %v29457_v11 = vld [vmem:[%s30044_s21 + $0x138] sm:$0xff]  }
 0x9df   : > { %25257 = vmatprep.mubr.msk.bf16.mxu0 %vm2876_vm0, %v29454_v31  ;;  %v29458_v31 = vld [vmem:[%s30044_s21 + $0x140] sm:$0xff]  }
 0x9e6   : > { %25258 = vmatmul.mubr.msk.bf16.gmra.mrb[240].mxu0 %vm2876_vm0, %v29455_v16  ;;  %v29461_v16 = vld [vmem:[%s30044_s21 + $0x158] sm:$0xff]  }
 0x9e7   : > { %25261 = vmatprep.mubr.msk.bf16.mxu0 %vm2876_vm0, %v29456_v47  ;;  %v29462_v47 = vld [vmem:[%s30044_s21 + $0x160] sm:$0xff]  }
 0x9ee   : > { %25262 = vmatmul.mubr.msk.bf16.gmra.mrb[244].mxu0 %vm2876_vm0, %v29457_v11  ;;  %v29464_v11 = vld [vmem:[%s30044_s21 + $0x170] sm:$0xff]  }
 0x9ef   : > { %25265 = vmatprep.mubr.msk.bf16.mxu0 %vm2876_vm0, %v29458_v31  ;;  %v29465_v31 = vld [vmem:[%s30044_s21 + $0x178] sm:$0xff]  }
 0x9f6   : > { %25266 = vmatmul.mubr.msk.bf16.gmra.mrb[248].mxu0 %vm2876_vm0, %v29459_v1  ;;  %v29466_v1 = vld [vmem:[%s30044_s21 + $0x180] sm:$0xff]  }
 0x9f7   : > { %25269 = vmatprep.mubr.msk.bf16.mxu0 %vm2876_vm0, %v29460_v13  ;;  %v29467_v13 = vld [vmem:[%s30044_s21 + $0x188] sm:$0xff]  }
 0x9fe   : > { %25270 = vmatmul.mubr.msk.bf16.gmra.mrb[72].mxu0 %vm2876_vm0, %v29461_v16  ;;  %v29468_v16 = vld [vmem:[%s30044_s21 + $0x190] sm:$0xff]  }
 0x9ff   : > { %25273 = vmatprep.mubr.msk.bf16.mxu0 %vm2876_vm0, %v29462_v47  ;;  %v29469_v47 = vld [vmem:[%s30044_s21 + $0x198] sm:$0xff]  }
 0xa06   : > { %25274 = vmatmul.mubr.msk.bf16.gmra.mrb[76].mxu0 %vm2876_vm0, %v29463_v38  ;;  %v29470_v38 = vld [vmem:[%s30044_s21 + $0x1a0] sm:$0xff]  }
 0xa07   : > { %25277 = vmatprep.mubr.msk.bf16.mxu0 %vm2876_vm0, %v29464_v11  ;;  %v29471_v11 = vld [vmem:[%s30044_s21 + $0x1a8] sm:$0xff]  }
 0xa0e   : > { %25278 = vmatmul.mubr.msk.bf16.gmra.mrb[80].mxu0 %vm2876_vm0, %v29465_v31  ;;  %v29472_v31 = vld [vmem:[%s30044_s21 + $0x1b0] sm:$0xff]  }
 0xa0f   : > { %25281 = vmatprep.mubr.msk.bf16.mxu0 %vm2876_vm0, %v29466_v1  ;;  %v29473_v1 = vld [vmem:[%s30044_s21 + $0x1b8] sm:$0xff]  }
 0xa16   : > { %25282 = vmatmul.mubr.msk.bf16.gmra.mrb[84].mxu0 %vm2876_vm0, %v29467_v13  ;;  %v29474_v13 = vld [vmem:[%s30044_s21 + $0x1c0] sm:$0xff]  }
 0xa17   : > { %25285 = vmatprep.mubr.msk.bf16.mxu0 %vm2876_vm0, %v29468_v16  ;;  %v29475_v16 = vld [vmem:[%s30044_s21 + $0x1c8] sm:$0xff]  }
 0xa1e   : > { %25286 = vmatmul.mubr.msk.bf16.gmra.mrb[88].mxu0 %vm2876_vm0, %v29469_v47  ;;  %v29476_v47 = vld [vmem:[%s30044_s21 + $0x1d0] sm:$0xff]  }
 0xa1f   : > { %25289 = vmatprep.mubr.msk.bf16.mxu0 %vm2876_vm0, %v29470_v38  ;;  %v29478_v38 = vld [vmem:[%s30044_s21 + $0x1e0] sm:$0xff]  }
 0xa26   : > { %25290 = vmatmul.mubr.msk.bf16.gmra.mrb[92].mxu0 %vm2876_vm0, %v29471_v11  ;;  %v33378_v11 = vld [vmem:[%s36419_s26] ss:$0 sm:$0xff] }
 0xa27   : > { %25293 = vmatprep.mubr.msk.bf16.mxu0 %vm2876_vm0, %v29472_v31 }
 0xa2e   : > { %25294 = vmatmul.mubr.msk.bf16.gmra.mrb[96].mxu0 %vm2876_vm0, %v29473_v1  ;;  %v36420_v1 = vld [vmem:[#allocation54_spill] sm:$0xff] }
 0xa2f   : > { %25297 = vmatprep.mubr.msk.bf16.mxu0 %vm2876_vm0, %v29474_v13 }
 0xa36   : > { %25298 = vmatmul.mubr.msk.bf16.gmra.mrb[100].mxu0 %vm2876_vm0, %v29475_v16 }
 0xa37   : > { %25301 = vmatprep.mubr.msk.bf16.mxu0 %vm2876_vm0, %v29476_v47 }
 0xa3e   : > { %25302 = vmatmul.mubr.msk.bf16.gmra.mrb[104].mxu0 %vm2876_vm0, %v29477_v49  ;;  %v36422_v49 = vld [vmem:[#allocation56_spill] sm:$0xff] }
 0xa3f   : > { %25305 = vmatprep.mubr.msk.bf16.mxu0 %vm2876_vm0, %v29478_v38 }
 0xa41   : > { %v25199_v31 = vpop.f32.mrb[0].mxu0 }
 0xa42   : > { %v26507_v13 = vadd.f32 %v25199_v31, %v36420_v1  ;;  %v11704_v16 = vpop.f32.mrb[1].mxu0 }
 0xa43   : > { %v26508_v24 = vadd.f32 %v11704_v16, %v36421_v26  ;;  %v25200_v47 = vpop.f32.mrb[2].mxu0  ;;  %v29480_v26 = vld [vmem:[%s30044_s21 + $0x1f0] sm:$0xff]  }
 0xa44   : > { %v13151_v20 = vadd.f32 %v26507_v13, %v33378_v11  ;;  %v26509_v4 = vadd.f32 %v25200_v47, %v36422_v49  ;;  %v11707_v23 = vpop.f32.mrb[3].mxu0 }
 0xa45   : > { %v13149_v38 = vadd.f32 %v26508_v24, %v33378_v11  ;;  %v26510_v48 = vadd.f32 %v11707_v23, %v36423_v54 }
 0xa46   : > { %v13439_v50 = vmax.f32 %v13151_v20, 0.0  ;;  %v13152_v12 = vadd.f32 %v26509_v4, %v33378_v11  ;;  %25306 = vmatmul.mubr.msk.bf16.gmra.mrb[108].mxu0 %vm2876_vm0, %v29479_v6 }
 0xa47   : > { %v13437_v31 = vmax.f32 %v13149_v38, 0.0  ;;  %v13150_v1 = vadd.f32 %v26510_v48, %v33378_v11  ;;  %25309 = vmatprep.mubr.msk.bf16.mxu0 %vm2876_vm0, %v29480_v26  ;;  %v29481_v26 = vld [vmem:[%s30044_s21 + $0x1f8] sm:$0xff]  }
 0xa48   : > { %v13440_v13 = vmax.f32 %v13152_v12, 0.0 }
 0xa49   : > { %v13725_v16 = vmax.f32 %v13437_v31, %v13439_v50  ;;  %v13438_v47 = vmax.f32 %v13150_v1, 0.0  ;;  %v25203_v24 = vpop.f32.mrb[184].mxu0  ;;  %v29482_v31 = vld [vmem:[%s30044_s21 + $0x200] sm:$0xff]  }
 0xa4a   : > { %v26512_v23 = vadd.f32 %v32834_v21, %v25203_v24  ;;  %v11720_v20 = vpop.f32.mrb[185].mxu0 }
 0xa4b   : > { %v13726_v54 = vmax.f32 %v13438_v47, %v13440_v13  ;;  %v26514_v4 = vadd.f32 %v32837_v36, %v11720_v20  ;;  %v25204_v49 = vpop.f32.mrb[186].mxu0 }
 0xa4c   : > { %v26516_v6 = vadd.f32 %v32840_v33, %v25204_v49  ;;  %v11723_v38 = vpop.f32.mrb[187].mxu0  ;;  %v13155_v47 = vadd.f32 %v26512_v23, %v33378_v11 }
 0xa4d   : > { %v13153_v48 = vadd.f32 %v26514_v4, %v33378_v11  ;;  %v26518_v42 = vadd.f32 %v32843_v55, %v11723_v38 }
 0xa4e   : > { %25310 = vmatmul.mubr.msk.bf16.gmra.mrb[4].mxu0 %vm2876_vm0, %v29481_v26 }
 0xa4f   : > { %v13441_v12 = vmax.f32 %v13153_v48, 0.0  ;;  %v13154_v50 = vadd.f32 %v26518_v42, %v33378_v11  ;;  %25313 = vmatprep.mubr.msk.bf16.mxu0 %vm2876_vm0, %v29482_v31  ;;  %v13156_v42 = vadd.f32 %v26516_v6, %v33378_v11  ;;  %v13443_v48 = vmax.f32 %v13155_v47, 0.0 }
 0xa51   : > { %v33402_v21 = vmax.f32 %v13725_v16, %v13441_v12  ;;  %v13442_v36 = vmax.f32 %v13154_v50, 0.0  ;;  %v25207_v1 = vpop.f32.mrb[188].mxu0  ;;  %v13444_v12 = vmax.f32 %v13156_v42, 0.0 }
 0xa52   : > { %v26520_v33 = vadd.f32 %v32850_v29, %v25207_v1  ;;  %v11736_v13 = vpop.f32.mrb[189].mxu0 }
 0xa53   : > { %v33406_v55 = vmax.f32 %v13726_v54, %v13442_v36  ;;  %v26522_v24 = vadd.f32 %v32853_v57, %v11736_v13  ;;  %v25208_v20 = vpop.f32.mrb[190].mxu0  ;;  %v29483_v54 = vld [vmem:[%s30044_s21 + $0x208] sm:$0xff]  }
 0xa54   : > { %v26524_v4 = vadd.f32 %v32856_v58, %v25208_v20  ;;  %v11739_v16 = vpop.f32.mrb[191].mxu0  ;;  %v13159_v49 = vadd.f32 %v26520_v33, %v33378_v11  ;;  %v29484_v58 = vld [vmem:[%s30044_s21 + $0x210] sm:$0xff]  }
 0xa55   : > { %v13157_v38 = vadd.f32 %v26522_v24, %v33378_v11  ;;  %v26526_v29 = vadd.f32 %v32859_v62, %v11739_v16 }
 0xa56   : > { %25314 = vmatmul.mubr.msk.bf16.gmra.mrb[8].mxu0 %vm2876_vm0, %v29483_v54  ;;  %v13160_v26 = vadd.f32 %v26524_v4, %v33378_v11  ;;  %v13447_v50 = vmax.f32 %v13159_v49, 0.0 }
 0xa57   : > { %v13445_v57 = vmax.f32 %v13157_v38, 0.0  ;;  %v13158_v6 = vadd.f32 %v26526_v29, %v33378_v11  ;;  %25317 = vmatprep.mubr.msk.bf16.mxu0 %vm2876_vm0, %v29484_v58  ;;  %v29486_v58 = vld [vmem:[%s30044_s21 + $0x220] sm:$0xff]  }
 0xa58   : > { %v13448_v13 = vmax.f32 %v13160_v26, 0.0 }
 0xa59   : > { %v13727_v31 = vmax.f32 %v13443_v48, %v13445_v57  ;;  %v13446_v36 = vmax.f32 %v13158_v6, 0.0  ;;  %v25211_v62 = vpop.f32.mrb[192].mxu0  ;;  %v29485_v57 = vld [vmem:[%s30044_s21 + $0x218] sm:$0xff]  }
 0xa5a   : > { %v26528_v1 = vadd.f32 %v32866_v3, %v25211_v62  ;;  %v11752_v33 = vpop.f32.mrb[193].mxu0 }
 0xa5b   : > { %v13728_v24 = vmax.f32 %v13444_v12, %v13446_v36  ;;  %v26530_v47 = vadd.f32 %v32869_v19, %v11752_v33  ;;  %v25212_v20 = vpop.f32.mrb[194].mxu0  ;;  %v13823_v4 = vmax.f32 %v13727_v31, %v13447_v50 }
 0xa5c   : > { %v13163_v16 = vadd.f32 %v26528_v1, %v33378_v11  ;;  %v26532_v38 = vadd.f32 %v32872_v45, %v25212_v20  ;;  %v11755_v42 = vpop.f32.mrb[195].mxu0 }
 0xa5d   : > { %v13161_v49 = vadd.f32 %v26530_v47, %v33378_v11  ;;  %v26534_v29 = vadd.f32 %v32875_v18, %v11755_v42  ;;  %v13824_v54 = vmax.f32 %v13728_v24, %v13448_v13  ;;  %v29488_v42 = vld [vmem:[%s30044_s21 + $0x230] sm:$0xff]  }
 0xa5e   : > { %v13451_v48 = vmax.f32 %v13163_v16, 0.0  ;;  %v13164_v3 = vadd.f32 %v26532_v38, %v33378_v11  ;;  %25318 = vmatmul.mubr.msk.bf16.gmra.mrb[12].mxu0 %vm2876_vm0, %v29485_v57 }
 0xa5f   : > { %v13449_v19 = vmax.f32 %v13161_v49, 0.0  ;;  %v13162_v26 = vadd.f32 %v26534_v29, %v33378_v11  ;;  %v33432_v6 = vpack.c.bf16 %v13824_v54, %v13823_v4  ;;  %25321 = vmatprep.mubr.msk.bf16.mxu0 %vm2876_vm0, %v29486_v58  ;;  %v29487_v4 = vld [vmem:[%s30044_s21 + $0x228] sm:$0xff]  }
 0xa60   : > { %v13452_v45 = vmax.f32 %v13164_v3, 0.0 }
 0xa61   : > { %v13729_v12 = vmax.f32 %v13449_v19, %v13451_v48  ;;  %v13450_v18 = vmax.f32 %v13162_v26, 0.0  ;;  %v25215_v50 = vpop.f32.mrb[196].mxu0  ;;  %25493 = vmatprep.mubr.msk.bf16.mxu1 %vm14007_vm1, %v33432_v6 }
 0xa62   : > { %v26536_v31 = vadd.f32 %v32882_v61, %v25215_v50  ;;  %v11768_v36 = vpop.f32.mrb[197].mxu0 }
 0xa63   : > { %v13730_v62 = vmax.f32 %v13450_v18, %v13452_v45  ;;  %v26538_v1 = vadd.f32 %v32885_v41, %v11768_v36  ;;  %v25216_v33 = vpop.f32.mrb[198].mxu0  ;;  %v29489_v18 = vld [vmem:[%s30044_s21 + $0x238] sm:$0xff]  }
 0xa64   : > { %v26540_v13 = vadd.f32 %v32888_v0, %v25216_v33  ;;  %v11771_v24 = vpop.f32.mrb[199].mxu0  ;;  %v13167_v54 = vadd.f32 %v26536_v31, %v33378_v11 }
 0xa65   : > { %v13165_v47 = vadd.f32 %v26538_v1, %v33378_v11  ;;  %v26542_v20 = vadd.f32 %v32891_v9, %v11771_v24 }
 0xa66   : > { %25322 = vmatmul.mubr.msk.bf16.gmra.mrb[16].mxu0 %vm2876_vm0, %v29487_v4  ;;  %v13168_v57 = vadd.f32 %v26540_v13, %v33378_v11  ;;  %v13455_v50 = vmax.f32 %v13167_v54, 0.0 }
 0xa67   : > { %v13453_v16 = vmax.f32 %v13165_v47, 0.0  ;;  %v13166_v38 = vadd.f32 %v26542_v20, %v33378_v11  ;;  %25325 = vmatprep.mubr.msk.bf16.mxu0 %vm2876_vm0, %v29488_v42 }
 0xa69   : > { %v13825_v61 = vmax.f32 %v13729_v12, %v13453_v16  ;;  %v13454_v41 = vmax.f32 %v13166_v38, 0.0  ;;  %v25219_v49 = vpop.f32.mrb[200].mxu0 }
 0xa6a   : > { %v26544_v0 = vadd.f32 %v32898_v63, %v25219_v49  ;;  %v11784_v29 = vpop.f32.mrb[201].mxu0 }
 0xa6b   : > { %v13826_v48 = vmax.f32 %v13730_v62, %v13454_v41  ;;  %v26546_v9 = vadd.f32 %v32901_v28, %v11784_v29  ;;  %v25220_v3 = vpop.f32.mrb[202].mxu0  ;;  %v13456_v62 = vmax.f32 %v13168_v57, 0.0 }
 0xa6c   : > { %v26548_v19 = vadd.f32 %v32904_v22, %v25220_v3  ;;  %v11787_v26 = vpop.f32.mrb[203].mxu0  ;;  %v13171_v45 = vadd.f32 %v26544_v0, %v33378_v11  ;;  %v29490_v22 = vld [vmem:[%s30044_s21 + $0x240] sm:$0xff]  }
 0xa6d   : > { %v33453_v58 = vpack.c.bf16 %v13826_v48, %v13825_v61  ;;  %v13169_v12 = vadd.f32 %v26546_v9, %v33378_v11  ;;  %v26550_v63 = vadd.f32 %v32907_v35, %v11787_v26  ;;  %v29491_v9 = vld [vmem:[%s30044_s21 + $0x248] sm:$0xff]  }
 0xa6e   : > { %25326 = vmatmul.mubr.msk.bf16.gmra.mrb[20].mxu0 %vm2876_vm0, %v29489_v18  ;;  %v13172_v31 = vadd.f32 %v26548_v19, %v33378_v11  ;;  %v13459_v1 = vmax.f32 %v13171_v45, 0.0  ;;  %v29492_v19 = vld [vmem:[%s30044_s21 + $0x250] sm:$0xff]  }
 0xa6f   : > { %v13457_v28 = vmax.f32 %v13169_v12, 0.0  ;;  %v13170_v36 = vadd.f32 %v26550_v63, %v33378_v11  ;;  %25494 = vmatmul.mubr.msk.bf16.vlgmr.msra.gmra.mrb[0].mxu1 %vm14007_vm1, %v33453_v58  ;;  %25329 = vmatprep.mubr.msk.bf16.mxu0 %vm2876_vm0, %v29490_v22  ;;  %v36424_v12 = vld [vmem:[#allocation82_spill] sm:$0xff]  ;;  %v36426_v22 = vld [vmem:[#allocation84_spill] sm:$0xff] }
 0xa70   : > { %v13460_v20 = vmax.f32 %v13172_v31, 0.0 }
 0xa71   : > { %v13731_v33 = vmax.f32 %v13455_v50, %v13457_v28  ;;  %v13458_v13 = vmax.f32 %v13170_v36, 0.0  ;;  %v25223_v35 = vpop.f32.mrb[204].mxu0  ;;  %v36425_v28 = vld [vmem:[#allocation83_spill] sm:$0xff] }
 0xa72   : > { %v26552_v24 = vadd.f32 %v32914_v15, %v25223_v35  ;;  %v11800_v47 = vpop.f32.mrb[205].mxu0 }
 0xa73   : > { %v13732_v4 = vmax.f32 %v13456_v62, %v13458_v13  ;;  %v26554_v16 = vadd.f32 %v32917_v2, %v11800_v47  ;;  %v25224_v38 = vpop.f32.mrb[206].mxu0  ;;  %v13827_v42 = vmax.f32 %v13731_v33, %v13459_v1  ;;  %v36427_v13 = vld [vmem:[#allocation85_spill] sm:$0xff] }
 0xa74   : > { %v13175_v61 = vadd.f32 %v26552_v24, %v33378_v11  ;;  %v26556_v41 = vadd.f32 %v32920_v8, %v25224_v38  ;;  %v11803_v49 = vpop.f32.mrb[207].mxu0  ;;  %v29493_v24 = vld [vmem:[%s30044_s21 + $0x258] sm:$0xff]  }
 0xa75   : > { %v13173_v0 = vadd.f32 %v26554_v16, %v33378_v11  ;;  %v26558_v29 = vadd.f32 %v32923_v32, %v11803_v49  ;;  %v13828_v54 = vmax.f32 %v13732_v4, %v13460_v20  ;;  %v29494_v4 = vld [vmem:[%s30044_s21 + $0x260] sm:$0xff]  }
 0xa76   : > { %v13463_v48 = vmax.f32 %v13175_v61, 0.0  ;;  %v13176_v15 = vadd.f32 %v26556_v41, %v33378_v11  ;;  %25330 = vmatmul.mubr.msk.bf16.gmra.mrb[24].mxu0 %vm2876_vm0, %v29491_v9  ;;  %v36428_v61 = vld [vmem:[#allocation86_spill] sm:$0xff] }
 0xa77   : > { %v13461_v2 = vmax.f32 %v13173_v0, 0.0  ;;  %v13174_v3 = vadd.f32 %v26558_v29, %v33378_v11  ;;  %v33476_v57 = vpack.c.bf16 %v13828_v54, %v13827_v42  ;;  %25333 = vmatprep.mubr.msk.bf16.mxu0 %vm2876_vm0, %v29492_v19  ;;  %v36429_v54 = vld [vmem:[#allocation87_spill] sm:$0xff] }
 0xa78   : > { %v13464_v8 = vmax.f32 %v13176_v15, 0.0 }
 0xa79   : > { %v13733_v26 = vmax.f32 %v13461_v2, %v13463_v48  ;;  %v13462_v45 = vmax.f32 %v13174_v3, 0.0  ;;  %v25227_v32 = vpop.f32.mrb[28].mxu0  ;;  %25497 = vmatprep.mubr.msk.bf16.mxu1 %vm14007_vm1, %v33476_v57  ;;  %v36430_v2 = vld [vmem:[#allocation88_spill] sm:$0xff] }
 0xa7a   : > { %v26559_v63 = vadd.f32 %v25227_v32, %v36424_v12  ;;  %v11816_v18 = vpop.f32.mrb[29].mxu0  ;;  %v36431_v32 = vld [vmem:[#allocation89_spill] sm:$0xff] }
 0xa7b   : > { %v13734_v50 = vmax.f32 %v13462_v45, %v13464_v8  ;;  %v26560_v31 = vadd.f32 %v11816_v18, %v36425_v28  ;;  %v25228_v36 = vpop.f32.mrb[30].mxu0  ;;  %v29495_v18 = vld [vmem:[%s30044_s21 + $0x268] sm:$0xff]  }
 0xa7c   : > { %v26561_v62 = vadd.f32 %v25228_v36, %v36426_v22  ;;  %v11819_v1 = vpop.f32.mrb[31].mxu0  ;;  %v13179_v0 = vadd.f32 %v26559_v63, %v33378_v11  ;;  %v29496_v36 = vld [vmem:[%s30044_s21 + $0x270] sm:$0xff]  }
 0xa7d   : > { %v13177_v33 = vadd.f32 %v26560_v31, %v33378_v11  ;;  %v26562_v35 = vadd.f32 %v11819_v1, %v36427_v13 }
 0xa7e   : > { %25334 = vmatmul.mubr.msk.bf16.gmra.mrb[0].mxu0 %vm2876_vm0, %v29493_v24  ;;  %v13180_v9 = vadd.f32 %v26561_v62, %v33378_v11  ;;  %v13467_v63 = vmax.f32 %v13179_v0, 0.0 }
 0xa7f   : > { %v13465_v47 = vmax.f32 %v13177_v33, 0.0  ;;  %v13178_v20 = vadd.f32 %v26562_v35, %v33378_v11  ;;  %25337 = vmatprep.mubr.msk.bf16.mxu0 %vm2876_vm0, %v29494_v4  ;;  %v36432_v35 = vld [vmem:[#allocation90_spill] sm:$0xff] }
 0xa80   : > { %v13468_v22 = vmax.f32 %v13180_v9, 0.0 }
 0xa81   : > { %v13829_v16 = vmax.f32 %v13733_v26, %v13465_v47  ;;  %v13466_v38 = vmax.f32 %v13178_v20, 0.0  ;;  %v25231_v42 = vpop.f32.mrb[32].mxu0 }
 0xa82   : > { %v26563_v41 = vadd.f32 %v25231_v42, %v36428_v61  ;;  %v11832_v49 = vpop.f32.mrb[33].mxu0 }
 0xa83   : > { %v13830_v29 = vmax.f32 %v13734_v50, %v13466_v38  ;;  %v26564_v48 = vadd.f32 %v11832_v49, %v36429_v54  ;;  %v25232_v15 = vpop.f32.mrb[34].mxu0  ;;  %v36433_v38 = vld [vmem:[#allocation91_spill] sm:$0xff]  ;;  %v36434_v49 = vld [vmem:[#allocation92_spill] sm:$0xff] }
 0xa84   : > { %v26565_v3 = vadd.f32 %v25232_v15, %v36430_v2  ;;  %v11835_v19 = vpop.f32.mrb[35].mxu0  ;;  %v13183_v26 = vadd.f32 %v26563_v41, %v33378_v11  ;;  %v36435_v15 = vld [vmem:[#allocation93_spill] sm:$0xff] }
 0xa85   : > { %v33497_v8 = vpack.c.bf16 %v13830_v29, %v13829_v16  ;;  %v13181_v45 = vadd.f32 %v26564_v48, %v33378_v11  ;;  %v26566_v12 = vadd.f32 %v11835_v19, %v36431_v32  ;;  %v29497_v19 = vld [vmem:[%s30044_s21 + $0x278] sm:$0xff]  }
 0xa86   : > { %25338 = vmatmul.mubr.msk.bf16.gmra.mrb[184].mxu0 %vm2876_vm0, %v29495_v18  ;;  %v13184_v28 = vadd.f32 %v26565_v3, %v33378_v11  ;;  %v13471_v62 = vmax.f32 %v13183_v26, 0.0 }
 0xa87   : > { %v13469_v50 = vmax.f32 %v13181_v45, 0.0  ;;  %v13182_v31 = vadd.f32 %v26566_v12, %v33378_v11  ;;  %25498 = vmatmul.mubr.msk.bf16.gmra.mrb[4].mxu1 %vm14007_vm1, %v33497_v8  ;;  %25341 = vmatprep.mubr.msk.bf16.mxu0 %vm2876_vm0, %v29496_v36  ;;  %v29498_v12 = vld [vmem:[%s30044_s21 + $0x280] sm:$0xff]  }
 0xa88   : > { %v13472_v4 = vmax.f32 %v13184_v28, 0.0 }
 0xa89   : > { %v13735_v1 = vmax.f32 %v13467_v63, %v13469_v50  ;;  %v13470_v33 = vmax.f32 %v13182_v31, 0.0  ;;  %v25235_v13 = vpop.f32.mrb[36].mxu0  ;;  %v36436_v31 = vld [vmem:[#allocation94_spill] sm:$0xff] }
 0xa8a   : > { %v26567_v24 = vadd.f32 %v25235_v13, %v36432_v35  ;;  %v11848_v47 = vpop.f32.mrb[37].mxu0  ;;  %v36438_v35 = vld [vmem:[#allocation96_spill] sm:$0xff] }
 0xa8b   : > { %v13831_v20 = vmax.f32 %v13735_v1, %v13471_v62  ;;  %v13736_v16 = vmax.f32 %v13468_v22, %v13470_v33  ;;  %v26568_v42 = vadd.f32 %v11848_v47, %v36433_v38  ;;  %v25236_v61 = vpop.f32.mrb[38].mxu0  ;;  %v36437_v1 = vld [vmem:[#allocation95_spill] sm:$0xff]  ;;  %v29499_v38 = vld [vmem:[%s30044_s21 + $0x288] sm:$0xff]  }
 0xa8c   : > { %v13187_v41 = vadd.f32 %v26567_v24, %v33378_v11  ;;  %v26569_v0 = vadd.f32 %v25236_v61, %v36434_v49  ;;  %v11851_v29 = vpop.f32.mrb[39].mxu0 }
 0xa8d   : > { %v13832_v54 = vmax.f32 %v13736_v16, %v13472_v4  ;;  %v13185_v48 = vadd.f32 %v26568_v42, %v33378_v11  ;;  %v26570_v9 = vadd.f32 %v11851_v29, %v36435_v15  ;;  %v36439_v4 = vld [vmem:[#allocation97_spill] sm:$0xff] }
 0xa8e   : > { %v13475_v2 = vmax.f32 %v13187_v41, 0.0  ;;  %v13188_v3 = vadd.f32 %v26569_v0, %v33378_v11  ;;  %25342 = vmatmul.mubr.msk.bf16.gmra.mrb[144].mxu0 %vm2876_vm0, %v29497_v19  ;;  %v29500_v41 = vld [vmem:[%s30044_s21 + $0x290] sm:$0xff]  }
 0xa8f   : > { %v33519_v26 = vpack.c.bf16 %v13832_v54, %v13831_v20  ;;  %v13473_v45 = vmax.f32 %v13185_v48, 0.0  ;;  %v13186_v32 = vadd.f32 %v26570_v9, %v33378_v11  ;;  %25345 = vmatprep.mubr.msk.bf16.mxu0 %vm2876_vm0, %v29498_v12  ;;  %v36440_v54 = vld [vmem:[#allocation98_spill] sm:$0xff]  ;;  %v36442_v12 = vld [vmem:[#allocation100_spill] sm:$0xff] }
 0xa90   : > { %v13476_v18 = vmax.f32 %v13188_v3, 0.0  ;;  %v36441_v3 = vld [vmem:[#allocation99_spill] sm:$0xff] }
 0xa91   : > { %v13737_v63 = vmax.f32 %v13473_v45, %v13475_v2  ;;  %v13474_v50 = vmax.f32 %v13186_v32, 0.0  ;;  %v25239_v28 = vpop.f32.mrb[220].mxu0  ;;  %25501 = vmatprep.mubr.msk.bf16.mxu1 %vm14007_vm1, %v33519_v26 }
 0xa92   : > { %v26572_v36 = vadd.f32 %v36436_v31, %v25239_v28  ;;  %v11864_v22 = vpop.f32.mrb[221].mxu0 }
 0xa93   : > { %v13738_v62 = vmax.f32 %v13474_v50, %v13476_v18  ;;  %v26574_v33 = vadd.f32 %v36437_v1, %v11864_v22  ;;  %v25240_v13 = vpop.f32.mrb[222].mxu0  ;;  %v36443_v22 = vld [vmem:[#allocation101_spill] sm:$0xff] }
 0xa94   : > { %v26576_v24 = vadd.f32 %v36438_v35, %v25240_v13  ;;  %v11867_v47 = vpop.f32.mrb[223].mxu0  ;;  %v13191_v9 = vadd.f32 %v26572_v36, %v33378_v11 }
 0xa95   : > { %v13189_v20 = vadd.f32 %v26574_v33, %v33378_v11  ;;  %v26578_v16 = vadd.f32 %v36439_v4, %v11867_v47  ;;  %v29501_v33 = vld [vmem:[%s30044_s21 + $0x298] sm:$0xff]  }
 0xa96   : > { %25346 = vmatmul.mubr.msk.bf16.gmra.mrb[40].mxu0 %vm2876_vm0, %v29499_v38  ;;  %v13192_v32 = vadd.f32 %v26576_v24, %v33378_v11  ;;  %v13479_v36 = vmax.f32 %v13191_v9, 0.0  ;;  %v29502_v24 = vld [vmem:[%s30044_s21 + $0x2a0] sm:$0xff]  }
 0xa97   : > { %v13477_v42 = vmax.f32 %v13189_v20, 0.0  ;;  %v13190_v61 = vadd.f32 %v26578_v16, %v33378_v11  ;;  %25349 = vmatprep.mubr.msk.bf16.mxu0 %vm2876_vm0, %v29500_v41 }
 0xa98   : > { %v13480_v47 = vmax.f32 %v13192_v32, 0.0 }
 0xa99   : > { %v13833_v49 = vmax.f32 %v13737_v63, %v13477_v42  ;;  %v13478_v0 = vmax.f32 %v13190_v61, 0.0  ;;  %v25243_v29 = vpop.f32.mrb[224].mxu0  ;;  %v36444_v42 = vld [vmem:[#allocation102_spill] sm:$0xff] }
 0xa9a   : > { %v26580_v48 = vadd.f32 %v36440_v54, %v25243_v29  ;;  %v11880_v15 = vpop.f32.mrb[225].mxu0  ;;  %v36445_v54 = vld [vmem:[#allocation103_spill] sm:$0xff] }
 0xa9b   : > { %v13834_v2 = vmax.f32 %v13738_v62, %v13478_v0  ;;  %v26582_v19 = vadd.f32 %v36441_v3, %v11880_v15  ;;  %v25244_v45 = vpop.f32.mrb[226].mxu0 }
 0xa9c   : > { %v26584_v18 = vadd.f32 %v36442_v12, %v25244_v45  ;;  %v11883_v50 = vpop.f32.mrb[227].mxu0  ;;  %v13195_v63 = vadd.f32 %v26580_v48, %v33378_v11  ;;  %v36447_v12 = vld [vmem:[#allocation105_spill] sm:$0xff] }
 0xa9d   : > { %v33541_v28 = vpack.c.bf16 %v13834_v2, %v13833_v49  ;;  %v13193_v31 = vadd.f32 %v26582_v19, %v33378_v11  ;;  %v26586_v1 = vadd.f32 %v36443_v22, %v11883_v50  ;;  %v36446_v2 = vld [vmem:[#allocation104_spill] sm:$0xff] }
 0xa9e   : > { %25350 = vmatmul.mubr.msk.bf16.gmra.mrb[44].mxu0 %vm2876_vm0, %v29501_v33  ;;  %v13196_v13 = vadd.f32 %v26584_v18, %v33378_v11  ;;  %v13483_v20 = vmax.f32 %v13195_v63, 0.0 }
 0xa9f   : > { %v13481_v62 = vmax.f32 %v13193_v31, 0.0  ;;  %v13194_v35 = vadd.f32 %v26586_v1, %v33378_v11  ;;  %25502 = vmatmul.mubr.msk.bf16.gmra.mrb[8].mxu1 %vm14007_vm1, %v33541_v28  ;;  %25353 = vmatprep.mubr.msk.bf16.mxu0 %vm2876_vm0, %v29502_v24 }
 0xaa0   : > { %v13484_v0 = vmax.f32 %v13196_v13, 0.0 }
 0xaa1   : > { %v13739_v4 = vmax.f32 %v13479_v36, %v13481_v62  ;;  %v13482_v16 = vmax.f32 %v13194_v35, 0.0  ;;  %v25247_v38 = vpop.f32.mrb[228].mxu0  ;;  %v36448_v35 = vld [vmem:[#allocation106_spill] sm:$0xff] }
 0xaa2   : > { %v26588_v61 = vadd.f32 %v36444_v42, %v25247_v38  ;;  %v11896_v41 = vpop.f32.mrb[229].mxu0  ;;  %v36450_v38 = vld [vmem:[#allocation108_spill] sm:$0xff] }
 0xaa3   : > { %v13835_v49 = vmax.f32 %v13739_v4, %v13483_v20  ;;  %v13740_v29 = vmax.f32 %v13480_v47, %v13482_v16  ;;  %v26590_v48 = vadd.f32 %v36445_v54, %v11896_v41  ;;  %v25248_v15 = vpop.f32.mrb[230].mxu0  ;;  %v36449_v20 = vld [vmem:[#allocation107_spill] sm:$0xff]  ;;  %v36451_v41 = vld [vmem:[#allocation109_spill] sm:$0xff] }
 0xaa4   : > { %v13199_v9 = vadd.f32 %v26588_v61, %v33378_v11  ;;  %v26592_v3 = vadd.f32 %v36446_v2, %v25248_v15  ;;  %v11899_v19 = vpop.f32.mrb[231].mxu0 }
 0xaa5   : > { %v13836_v45 = vmax.f32 %v13740_v29, %v13484_v0  ;;  %v13197_v32 = vadd.f32 %v26590_v48, %v33378_v11  ;;  %v26594_v18 = vadd.f32 %v36447_v12, %v11899_v19  ;;  %v29503_v0 = vld [vmem:[%s30044_s21 + $0x2b8] sm:$0xff]   ;;  %v29504_v48 = vld [vmem:[%s30044_s21 + $0x2c0] sm:$0xff]  }
 0xaa6   : > { %v13487_v50 = vmax.f32 %v13199_v9, 0.0  ;;  %v13200_v63 = vadd.f32 %v26592_v3, %v33378_v11  ;;  %25354 = vmatmul.mubr.msk.bf16.gmra.mrb[48].mxu0 %vm2876_vm0, %v32952_v14  ;;  %v36452_v3 = vld [vmem:[#allocation110_spill] sm:$0xff] }
 0xaa7   : > { %v33563_v31 = vpack.c.bf16 %v13836_v45, %v13835_v49  ;;  %v13485_v22 = vmax.f32 %v13197_v32, 0.0  ;;  %v13198_v1 = vadd.f32 %v26594_v18, %v33378_v11  ;;  %25357 = vmatprep.mubr.msk.bf16.mxu0 %vm2876_vm0, %v32957_v17  ;;  %v36453_v18 = vld [vmem:[#allocation111_spill] sm:$0xff] }
 0xaa8   : > { %v13488_v33 = vmax.f32 %v13200_v63, 0.0 }
 0xaa9   : > { %v13741_v36 = vmax.f32 %v13485_v22, %v13487_v50  ;;  %v13486_v62 = vmax.f32 %v13198_v1, 0.0  ;;  %v25251_v13 = vpop.f32.mrb[232].mxu0  ;;  %25505 = vmatprep.mubr.msk.bf16.mxu1 %vm14007_vm1, %v33563_v31  ;;  %v36454_v1 = vld [vmem:[#allocation112_spill] sm:$0xff] }
 0xaaa   : > { %v26596_v24 = vadd.f32 %v36448_v35, %v25251_v13  ;;  %v11912_v14 = vpop.f32.mrb[233].mxu0 }
 0xaab   : > { %v13742_v47 = vmax.f32 %v13486_v62, %v13488_v33  ;;  %v26598_v4 = vadd.f32 %v36449_v20, %v11912_v14  ;;  %v25252_v16 = vpop.f32.mrb[234].mxu0  ;;  %v36455_v14 = vld [vmem:[#allocation113_spill] sm:$0xff] }
 0xaac   : > { %v26600_v42 = vadd.f32 %v36450_v38, %v25252_v16  ;;  %v11915_v61 = vpop.f32.mrb[235].mxu0  ;;  %v13203_v32 = vadd.f32 %v26596_v24, %v33378_v11 }
 0xaad   : > { %v13201_v17 = vadd.f32 %v26598_v4, %v33378_v11  ;;  %v26602_v49 = vadd.f32 %v36451_v41, %v11915_v61  ;;  %v29505_v4 = vld [vmem:[%s30044_s21 + $0x2c8] sm:$0xff]  }
 0xaae   : > { %25358 = vmatmul.mubr.msk.bf16.gmra.mrb[52].mxu0 %vm2876_vm0, %v29503_v0  ;;  %v13204_v22 = vadd.f32 %v26600_v42, %v33378_v11  ;;  %v13491_v24 = vmax.f32 %v13203_v32, 0.0  ;;  %v29506_v42 = vld [vmem:[%s30044_s21 + $0x2d0] sm:$0xff]  }
 0xaaf   : > { %v13489_v29 = vmax.f32 %v13201_v17, 0.0  ;;  %v13202_v54 = vadd.f32 %v26602_v49, %v33378_v11  ;;  %25361 = vmatprep.mubr.msk.bf16.mxu0 %vm2876_vm0, %v29504_v48 }
 0xab0   : > { %v13492_v61 = vmax.f32 %v13204_v22, 0.0 }
 0xab1   : > { %v13837_v15 = vmax.f32 %v13741_v36, %v13489_v29  ;;  %v13490_v9 = vmax.f32 %v13202_v54, 0.0  ;;  %v25255_v2 = vpop.f32.mrb[236].mxu0  ;;  %v36456_v29 = vld [vmem:[#allocation114_spill] sm:$0xff] }
 0xab2   : > { %v26604_v19 = vadd.f32 %v36452_v3, %v25255_v2  ;;  %v11928_v45 = vpop.f32.mrb[237].mxu0  ;;  %v36457_v3 = vld [vmem:[#allocation115_spill] sm:$0xff] }
 0xab3   : > { %v13838_v12 = vmax.f32 %v13742_v47, %v13490_v9  ;;  %v26606_v50 = vadd.f32 %v36453_v18, %v11928_v45  ;;  %v25256_v63 = vpop.f32.mrb[238].mxu0 }
 0xab4   : > { %v26608_v33 = vadd.f32 %v36454_v1, %v25256_v63  ;;  %v11931_v62 = vpop.f32.mrb[239].mxu0  ;;  %v13207_v36 = vadd.f32 %v26604_v19, %v33378_v11  ;;  %v36459_v1 = vld [vmem:[#allocation117_spill] sm:$0xff] }
 0xab5   : > { %v33585_v13 = vpack.c.bf16 %v13838_v12, %v13837_v15  ;;  %v13205_v35 = vadd.f32 %v26606_v50, %v33378_v11  ;;  %v26610_v20 = vadd.f32 %v36455_v14, %v11931_v62  ;;  %v36458_v12 = vld [vmem:[#allocation116_spill] sm:$0xff] }
 0xab6   : > { %25362 = vmatmul.mubr.msk.bf16.gmra.mrb[56].mxu0 %vm2876_vm0, %v29505_v4  ;;  %v13208_v16 = vadd.f32 %v26608_v33, %v33378_v11  ;;  %v13495_v17 = vmax.f32 %v13207_v36, 0.0 }
 0xab7   : > { %v13493_v47 = vmax.f32 %v13205_v35, 0.0  ;;  %v13206_v38 = vadd.f32 %v26610_v20, %v33378_v11  ;;  %25506 = vmatmul.mubr.msk.bf16.gmra.mrb[12].mxu1 %vm14007_vm1, %v33585_v13  ;;  %25365 = vmatprep.mubr.msk.bf16.mxu0 %vm2876_vm0, %v29506_v42  ;;  %v29507_v35 = vld [vmem:[%s30044_s21 + $0x2d8] sm:$0xff]  }
 0xab8   : > { %v13496_v9 = vmax.f32 %v13208_v16, 0.0 }
 0xab9   : > { %v13743_v41 = vmax.f32 %v13491_v24, %v13493_v47  ;;  %v13494_v49 = vmax.f32 %v13206_v38, 0.0  ;;  %v25259_v0 = vpop.f32.mrb[240].mxu0  ;;  %v29508_v24 = vld [vmem:[%s30044_s21 + $0x2e0] sm:$0xff]  }
 0xaba   : > { %v26612_v54 = vadd.f32 %v36456_v29, %v25259_v0  ;;  %v11944_v48 = vpop.f32.mrb[241].mxu0 }
 0xabb   : > { %v13839_v15 = vmax.f32 %v13743_v41, %v13495_v17  ;;  %v13744_v2 = vmax.f32 %v13492_v61, %v13494_v49  ;;  %v26614_v19 = vadd.f32 %v36457_v3, %v11944_v48  ;;  %v25260_v45 = vpop.f32.mrb[242].mxu0 }
 0xabc   : > { %v13211_v32 = vadd.f32 %v26612_v54, %v33378_v11  ;;  %v26616_v18 = vadd.f32 %v36458_v12, %v25260_v45  ;;  %v11947_v50 = vpop.f32.mrb[243].mxu0 }
 0xabd   : > { %v13840_v63 = vmax.f32 %v13744_v2, %v13496_v9  ;;  %v13209_v22 = vadd.f32 %v26614_v19, %v33378_v11  ;;  %v26618_v33 = vadd.f32 %v36459_v1, %v11947_v50  ;;  %v29509_v9 = vld [vmem:[%s30044_s21 + $0x2e8] sm:$0xff]   ;;  %v29510_v19 = vld [vmem:[%s30044_s21 + $0x2f0] sm:$0xff]  }
 0xabe   : > { %v13499_v62 = vmax.f32 %v13211_v32, 0.0  ;;  %v13212_v36 = vadd.f32 %v26616_v18, %v33378_v11  ;;  %25366 = vmatmul.mubr.msk.bf16.gmra.mrb[60].mxu0 %vm2876_vm0, %v29507_v35  ;;  %v29511_v35 = vld [vmem:[%s30044_s21 + $0x2f8] sm:$0xff]  }
 0xabf   : > { %v33607_v14 = vpack.c.bf16 %v13840_v63, %v13839_v15  ;;  %v13497_v20 = vmax.f32 %v13209_v22, 0.0  ;;  %v13210_v4 = vadd.f32 %v26618_v33, %v33378_v11  ;;  %25369 = vmatprep.mubr.msk.bf16.mxu0 %vm2876_vm0, %v29508_v24 }
 0xac0   : > { %v13500_v47 = vmax.f32 %v13212_v36, 0.0 }
 0xac1   : > { %v13745_v16 = vmax.f32 %v13497_v20, %v13499_v62  ;;  %v13498_v38 = vmax.f32 %v13210_v4, 0.0  ;;  %v25263_v42 = vpop.f32.mrb[244].mxu0  ;;  %25509 = vmatprep.mubr.msk.bf16.mxu1 %vm14007_vm1, %v33607_v14 }
 0xac2   : > { %v26620_v61 = vadd.f32 %v32475_v56, %v25263_v42  ;;  %v11960_v17 = vpop.f32.mrb[245].mxu0 }
 0xac3   : > { %v13746_v41 = vmax.f32 %v13498_v38, %v13500_v47  ;;  %v26622_v49 = vadd.f32 %v32478_v51, %v11960_v17  ;;  %v25264_v0 = vpop.f32.mrb[246].mxu0 }
 0xac4   : > { %v26624_v29 = vadd.f32 %v32481_v59, %v25264_v0  ;;  %v11963_v54 = vpop.f32.mrb[247].mxu0  ;;  %v13215_v12 = vadd.f32 %v26620_v61, %v33378_v11  ;;  %v36460_v61 = vld [vmem:[#allocation118_spill] sm:$0xff] }
 0xac5   : > { %v13213_v48 = vadd.f32 %v26622_v49, %v33378_v11  ;;  %v26626_v15 = vadd.f32 %v32484_v53, %v11963_v54  ;;  %v36461_v54 = vld [vmem:[#allocation119_spill] sm:$0xff] }
 0xac6   : > { %25370 = vmatmul.mubr.msk.bf16.gmra.mrb[64].mxu0 %vm2876_vm0, %v29509_v9  ;;  %v13216_v63 = vadd.f32 %v26624_v29, %v33378_v11  ;;  %v13503_v20 = vmax.f32 %v13215_v12, 0.0 }
 0xac7   : > { %v13501_v2 = vmax.f32 %v13213_v48, 0.0  ;;  %v13214_v3 = vadd.f32 %v26626_v15, %v33378_v11  ;;  %25373 = vmatprep.mubr.msk.bf16.mxu0 %vm2876_vm0, %v29510_v19 }
 0xac8   : > { %v13504_v47 = vmax.f32 %v13216_v63, 0.0 }
 0xac9   : > { %v13841_v56 = vmax.f32 %v13745_v16, %v13501_v2  ;;  %v13502_v51 = vmax.f32 %v13214_v3, 0.0  ;;  %v25267_v45 = vpop.f32.mrb[248].mxu0  ;;  %v36462_v2 = vld [vmem:[#allocation120_spill] sm:$0xff] }
 0xaca   : > { %v26628_v59 = vadd.f32 %v32491_v60, %v25267_v45  ;;  %v11976_v32 = vpop.f32.mrb[249].mxu0  ;;  %v36463_v45 = vld [vmem:[#allocation121_spill] sm:$0xff] }
 0xacb   : > { %v13842_v18 = vmax.f32 %v13746_v41, %v13502_v51  ;;  %v26630_v53 = vadd.f32 %v32494_v39, %v11976_v32  ;;  %v25268_v50 = vpop.f32.mrb[250].mxu0 }
 0xacc   : > { %v26632_v22 = vadd.f32 %v32497_v46, %v25268_v50  ;;  %v11979_v1 = vpop.f32.mrb[251].mxu0  ;;  %v13219_v62 = vadd.f32 %v26628_v59, %v33378_v11  ;;  %v29512_v46 = vld [vmem:[%s30044_s21 + $0x300] sm:$0xff]  }
 0xacd   : > { %v33629_v33 = vpack.c.bf16 %v13842_v18, %v13841_v56  ;;  %v13217_v36 = vadd.f32 %v26630_v53, %v33378_v11  ;;  %v26634_v60 = vadd.f32 %v32500_v30, %v11979_v1  ;;  %v29513_v18 = vld [vmem:[%s30044_s21 + $0x308] sm:$0xff]  }
 0xace   : > { %25374 = vmatmul.mubr.msk.bf16.gmra.mrb[68].mxu0 %vm2876_vm0, %v29511_v35  ;;  %v13220_v4 = vadd.f32 %v26632_v22, %v33378_v11  ;;  %v13507_v16 = vmax.f32 %v13219_v62, 0.0  ;;  %v29514_v22 = vld [vmem:[%s30044_s21 + $0x310] sm:$0xff]   ;;  %v36464_v35 = vld [vmem:[#allocation122_spill] sm:$0xff] }
 0xacf   : > { %v13505_v39 = vmax.f32 %v13217_v36, 0.0  ;;  %v13218_v24 = vadd.f32 %v26634_v60, %v33378_v11  ;;  %25510 = vmatmul.mubr.msk.bf16.gmra.mrb[16].mxu1 %vm14007_vm1, %v33629_v33  ;;  %25377 = vmatprep.mubr.msk.bf16.mxu0 %vm2876_vm0, %v29512_v46 }
 0xad0   : > { %v13508_v0 = vmax.f32 %v13220_v4, 0.0 }
 0xad1   : > { %v13747_v38 = vmax.f32 %v13503_v20, %v13505_v39  ;;  %v13506_v42 = vmax.f32 %v13218_v24, 0.0  ;;  %v25271_v30 = vpop.f32.mrb[72].mxu0  ;;  %v36465_v24 = vld [vmem:[#allocation123_spill] sm:$0xff] }
 0xad2   : > { %v26635_v17 = vadd.f32 %v25271_v30, %v36460_v61  ;;  %v11992_v41 = vpop.f32.mrb[73].mxu0  ;;  %v36467_v61 = vld [vmem:[#allocation125_spill] sm:$0xff] }
 0xad3   : > { %v13843_v49 = vmax.f32 %v13747_v38, %v13507_v16  ;;  %v13748_v29 = vmax.f32 %v13504_v47, %v13506_v42  ;;  %v26636_v48 = vadd.f32 %v11992_v41, %v36461_v54  ;;  %v25272_v15 = vpop.f32.mrb[74].mxu0  ;;  %v36466_v16 = vld [vmem:[#allocation124_spill] sm:$0xff] }
 0xad4   : > { %v13223_v9 = vadd.f32 %v26635_v17, %v33378_v11  ;;  %v26637_v3 = vadd.f32 %v25272_v15, %v36462_v2  ;;  %v11995_v19 = vpop.f32.mrb[75].mxu0  ;;  %v29515_v41 = vld [vmem:[%s30044_s21 + $0x318] sm:$0xff]  }
 0xad5   : > { %v13844_v56 = vmax.f32 %v13748_v29, %v13508_v0  ;;  %v13221_v51 = vadd.f32 %v26636_v48, %v33378_v11  ;;  %v26638_v59 = vadd.f32 %v11995_v19, %v36463_v45  ;;  %v29516_v29 = vld [vmem:[%s30044_s21 + $0x320] sm:$0xff]  }
 0xad6   : > { %v13511_v32 = vmax.f32 %v13223_v9, 0.0  ;;  %v13224_v12 = vadd.f32 %v26637_v3, %v33378_v11  ;;  %25378 = vmatmul.mubr.msk.bf16.gmra.mrb[180].mxu0 %vm2876_vm0, %v29513_v18  ;;  %v36468_v9 = vld [vmem:[#allocation126_spill] sm:$0xff] }
 0xad7   : > { %v33651_v53 = vpack.c.bf16 %v13844_v56, %v13843_v49  ;;  %v13509_v50 = vmax.f32 %v13221_v51, 0.0  ;;  %v13222_v63 = vadd.f32 %v26638_v59, %v33378_v11  ;;  %25381 = vmatprep.mubr.msk.bf16.mxu0 %vm2876_vm0, %v29514_v22  ;;  %v36469_v51 = vld [vmem:[#allocation127_spill] sm:$0xff] }
 0xad8   : > { %v13512_v1 = vmax.f32 %v13224_v12, 0.0  ;;  %v36470_v12 = vld [vmem:[#allocation128_spill] sm:$0xff] }
 0xad9   : > { %v13749_v62 = vmax.f32 %v13509_v50, %v13511_v32  ;;  %v13510_v36 = vmax.f32 %v13222_v63, 0.0  ;;  %v25275_v60 = vpop.f32.mrb[76].mxu0  ;;  %25513 = vmatprep.mubr.msk.bf16.mxu1 %vm14007_vm1, %v33651_v53 }
 0xada   : > { %v26639_v20 = vadd.f32 %v25275_v60, %v36464_v35  ;;  %v12008_v39 = vpop.f32.mrb[77].mxu0  ;;  %v29517_v60 = vld [vmem:[%s30044_s21 + $0x328] sm:$0xff]  }
 0xadb   : > { %v13750_v4 = vmax.f32 %v13510_v36, %v13512_v1  ;;  %v26640_v46 = vadd.f32 %v12008_v39, %v36465_v24  ;;  %v25276_v47 = vpop.f32.mrb[78].mxu0  ;;  %v29518_v24 = vld [vmem:[%s30044_s21 + $0x330] sm:$0xff]  }
 0xadc   : > { %v26641_v38 = vadd.f32 %v25276_v47, %v36466_v16  ;;  %v12011_v42 = vpop.f32.mrb[79].mxu0  ;;  %v13227_v19 = vadd.f32 %v26639_v20, %v33378_v11 }
 0xadd   : > { %v13225_v30 = vadd.f32 %v26640_v46, %v33378_v11  ;;  %v26642_v17 = vadd.f32 %v12011_v42, %v36467_v61 }
 0xade   : > { %25382 = vmatmul.mubr.msk.bf16.gmra.mrb[188].mxu0 %vm2876_vm0, %v29515_v41  ;;  %v13228_v32 = vadd.f32 %v26641_v38, %v33378_v11  ;;  %v13515_v35 = vmax.f32 %v13227_v19, 0.0 }
 0xadf   : > { %v13513_v49 = vmax.f32 %v13225_v30, 0.0  ;;  %v13226_v0 = vadd.f32 %v26642_v17, %v33378_v11  ;;  %25385 = vmatprep.mubr.msk.bf16.mxu0 %vm2876_vm0, %v29516_v29  ;;  %v36472_v30 = vld [vmem:[#allocation130_spill] sm:$0xff]  ;;  %v36473_v29 = vld [vmem:[#allocation131_spill] sm:$0xff] }
 0xae0   : > { %v13516_v46 = vmax.f32 %v13228_v32, 0.0 }
 0xae1   : > { %v13845_v54 = vmax.f32 %v13749_v62, %v13513_v49  ;;  %v13514_v48 = vmax.f32 %v13226_v0, 0.0  ;;  %v25279_v15 = vpop.f32.mrb[80].mxu0  ;;  %v36471_v62 = vld [vmem:[#allocation129_spill] sm:$0xff] }
 0xae2   : > { %v26643_v2 = vadd.f32 %v25279_v15, %v36468_v9  ;;  %v12024_v3 = vpop.f32.mrb[81].mxu0  ;;  %v36474_v9 = vld [vmem:[#allocation132_spill] sm:$0xff] }
 0xae3   : > { %v13846_v56 = vmax.f32 %v13750_v4, %v13514_v48  ;;  %v26644_v45 = vadd.f32 %v12024_v3, %v36469_v51  ;;  %v25280_v59 = vpop.f32.mrb[82].mxu0  ;;  %v36475_v51 = vld [vmem:[#allocation133_spill] sm:$0xff] }
 0xae4   : > { %v26645_v18 = vadd.f32 %v25280_v59, %v36470_v12  ;;  %v12027_v50 = vpop.f32.mrb[83].mxu0  ;;  %v13231_v22 = vadd.f32 %v26643_v2, %v33378_v11  ;;  %v29519_v12 = vld [vmem:[%s30044_s21 + $0x338] sm:$0xff]  }
 0xae5   : > { %v33673_v63 = vpack.c.bf16 %v13846_v56, %v13845_v54  ;;  %v13229_v1 = vadd.f32 %v26644_v45, %v33378_v11  ;;  %v26646_v36 = vadd.f32 %v12027_v50, %v36471_v62 }
 0xae6   : > { %25386 = vmatmul.mubr.msk.bf16.gmra.mrb[192].mxu0 %vm2876_vm0, %v29517_v60  ;;  %v13232_v39 = vadd.f32 %v26645_v18, %v33378_v11  ;;  %v13519_v47 = vmax.f32 %v13231_v22, 0.0 }
 0xae7   : > { %v13517_v20 = vmax.f32 %v13229_v1, 0.0  ;;  %v13230_v4 = vadd.f32 %v26646_v36, %v33378_v11  ;;  %25514 = vmatmul.mubr.msk.bf16.gmra.mrb[20].mxu1 %vm14007_vm1, %v33673_v63  ;;  %25389 = vmatprep.mubr.msk.bf16.mxu0 %vm2876_vm0, %v29518_v24  ;;  %v29520_v1 = vld [vmem:[%s30044_s21 + $0x340] sm:$0xff]  }
 0xae8   : > { %v13520_v49 = vmax.f32 %v13232_v39, 0.0 }
 0xae9   : > { %v13751_v16 = vmax.f32 %v13515_v35, %v13517_v20  ;;  %v13518_v38 = vmax.f32 %v13230_v4, 0.0  ;;  %v25283_v42 = vpop.f32.mrb[84].mxu0  ;;  %v36476_v20 = vld [vmem:[#allocation134_spill] sm:$0xff] }
 0xaea   : > { %v26647_v61 = vadd.f32 %v25283_v42, %v36472_v30  ;;  %v12040_v17 = vpop.f32.mrb[85].mxu0 }
 0xaeb   : > { %v13847_v41 = vmax.f32 %v13751_v16, %v13519_v47  ;;  %v13752_v0 = vmax.f32 %v13516_v46, %v13518_v38  ;;  %v26648_v54 = vadd.f32 %v12040_v17, %v36473_v29  ;;  %v25284_v48 = vpop.f32.mrb[86].mxu0  ;;  %v36477_v46 = vld [vmem:[#allocation135_spill] sm:$0xff]  ;;  %v36478_v38 = vld [vmem:[#allocation136_spill] sm:$0xff]  ;;  %v36479_v17 = vld [vmem:[#allocation137_spill] sm:$0xff] }
 0xaec   : > { %v13235_v15 = vadd.f32 %v26647_v61, %v33378_v11  ;;  %v26649_v2 = vadd.f32 %v25284_v48, %v36474_v9  ;;  %v12043_v3 = vpop.f32.mrb[87].mxu0 }
 0xaed   : > { %v13848_v19 = vmax.f32 %v13752_v0, %v13520_v49  ;;  %v13233_v56 = vadd.f32 %v26648_v54, %v33378_v11  ;;  %v26650_v45 = vadd.f32 %v12043_v3, %v36475_v51  ;;  %v29521_v49 = vld [vmem:[%s30044_s21 + $0x348] sm:$0xff]   ;;  %v29522_v54 = vld [vmem:[%s30044_s21 + $0x350] sm:$0xff]  }
 0xaee   : > { %v13523_v59 = vmax.f32 %v13235_v15, 0.0  ;;  %v13236_v32 = vadd.f32 %v26649_v2, %v33378_v11  ;;  %25390 = vmatmul.mubr.msk.bf16.gmra.mrb[196].mxu0 %vm2876_vm0, %v29519_v12  ;;  %v36480_v2 = vld [vmem:[#allocation138_spill] sm:$0xff] }
 0xaef   : > { %v33695_v18 = vpack.c.bf16 %v13848_v19, %v13847_v41  ;;  %v13521_v50 = vmax.f32 %v13233_v56, 0.0  ;;  %v13234_v22 = vadd.f32 %v26650_v45, %v33378_v11  ;;  %25393 = vmatprep.mubr.msk.bf16.mxu0 %vm2876_vm0, %v29520_v1  ;;  %v36481_v45 = vld [vmem:[#allocation139_spill] sm:$0xff] }
 0xaf0   : > { %v13524_v62 = vmax.f32 %v13236_v32, 0.0 }
 0xaf1   : > { %v13753_v36 = vmax.f32 %v13521_v50, %v13523_v59  ;;  %v13522_v60 = vmax.f32 %v13234_v22, 0.0  ;;  %v25287_v35 = vpop.f32.mrb[88].mxu0  ;;  %25517 = vmatprep.mubr.msk.bf16.mxu1 %vm14007_vm1, %v33695_v18  ;;  %v36482_v50 = vld [vmem:[#allocation140_spill] sm:$0xff] }
 0xaf2   : > { %v26651_v39 = vadd.f32 %v25287_v35, %v36476_v20  ;;  %v12056_v4 = vpop.f32.mrb[89].mxu0  ;;  %v36483_v35 = vld [vmem:[#allocation141_spill] sm:$0xff] }
 0xaf3   : > { %v13754_v24 = vmax.f32 %v13522_v60, %v13524_v62  ;;  %v26652_v47 = vadd.f32 %v12056_v4, %v36477_v46  ;;  %v25288_v16 = vpop.f32.mrb[90].mxu0  ;;  %v29523_v4 = vld [vmem:[%s30044_s21 + $0x358] sm:$0xff]   ;;  %v33727_v46 = vld [vmem:[%s36419_s26] ss:$0 sm:$0xff] }
 0xaf4   : > { %v26653_v42 = vadd.f32 %v25288_v16, %v36478_v38  ;;  %v12059_v30 = vpop.f32.mrb[91].mxu0  ;;  %v13239_v56 = vadd.f32 %v26651_v39, %v33378_v11 }
 0xaf5   : > { %v13237_v61 = vadd.f32 %v26652_v47, %v33378_v11  ;;  %v26654_v41 = vadd.f32 %v12059_v30, %v36479_v17 }
 0xaf6   : > { %25394 = vmatmul.mubr.msk.bf16.gmra.mrb[200].mxu0 %vm2876_vm0, %v29521_v49  ;;  %v13240_v12 = vadd.f32 %v26653_v42, %v33378_v11  ;;  %v13527_v39 = vmax.f32 %v13239_v56, 0.0 }
 0xaf7   : > { %v13525_v0 = vmax.f32 %v13237_v61, 0.0  ;;  %v13238_v29 = vadd.f32 %v26654_v41, %v33378_v11  ;;  %25397 = vmatprep.mubr.msk.bf16.mxu0 %vm2876_vm0, %v29522_v54  ;;  %v36484_v41 = vld [vmem:[#allocation142_spill] sm:$0xff] }
 0xaf8   : > { %v13528_v38 = vmax.f32 %v13240_v12, 0.0 }
 0xaf9   : > { %v13849_v48 = vmax.f32 %v13753_v36, %v13525_v0  ;;  %v13526_v15 = vmax.f32 %v13238_v29, 0.0  ;;  %v25291_v9 = vpop.f32.mrb[92].mxu0 }
 0xafa   : > { %v26655_v3 = vadd.f32 %v25291_v9, %v36480_v2  ;;  %v12072_v19 = vpop.f32.mrb[93].mxu0 }
 0xafb   : > { %v13850_v51 = vmax.f32 %v13754_v24, %v13526_v15  ;;  %v26656_v59 = vadd.f32 %v12072_v19, %v36481_v45  ;;  %v25292_v32 = vpop.f32.mrb[94].mxu0  ;;  %v36485_v15 = vld [vmem:[#allocation143_spill] sm:$0xff]  ;;  %v36486_v19 = vld [vmem:[#allocation144_spill] sm:$0xff] }
 0xafc   : > { %v26657_v22 = vadd.f32 %v25292_v32, %v36482_v50  ;;  %v12075_v1 = vpop.f32.mrb[95].mxu0  ;;  %v13243_v36 = vadd.f32 %v26655_v3, %v33378_v11  ;;  %v36487_v32 = vld [vmem:[#allocation145_spill] sm:$0xff] }
 0xafd   : > { %v33717_v62 = vpack.c.bf16 %v13850_v51, %v13849_v48  ;;  %v13241_v60 = vadd.f32 %v26656_v59, %v33378_v11  ;;  %v26658_v20 = vadd.f32 %v12075_v1, %v36483_v35  ;;  %v29525_v11 = vld [vmem:[%s30044_s21 + $0x360] sm:$0xff]   ;;  %v29526_v1 = vld [vmem:[%s30044_s21 + $0x368] sm:$0xff]  }
 0xafe   : > { %25398 = vmatmul.mubr.msk.bf16.gmra.mrb[204].mxu0 %vm2876_vm0, %v29523_v4  ;;  %v13244_v47 = vadd.f32 %v33727_v46, %v26657_v22  ;;  %v13531_v42 = vmax.f32 %v13243_v36, 0.0 }
 0xaff   : > { %v13529_v24 = vmax.f32 %v13241_v60, 0.0  ;;  %v13242_v16 = vadd.f32 %v33727_v46, %v26658_v20  ;;  %25518 = vmatmul.mubr.msk.bf16.gmra.mrb[24].mxu1 %vm14007_vm1, %v33717_v62  ;;  %25401 = vmatprep.mubr.msk.bf16.mxu0 %vm2876_vm0, %v29525_v11  ;;  %v29527_v20 = vld [vmem:[%s30044_s21 + $0x370] sm:$0xff]  }
 0xb00   : > { %v13532_v54 = vmax.f32 %v13244_v47, 0.0 }
 0xb01   : > { %v13755_v30 = vmax.f32 %v13527_v39, %v13529_v24  ;;  %v13530_v61 = vmax.f32 %v13242_v16, 0.0  ;;  %v25295_v17 = vpop.f32.mrb[96].mxu0  ;;  %v36488_v16 = vld [vmem:[#allocation148_spill] sm:$0xff] }
 0xb02   : > { %v26659_v49 = vadd.f32 %v25295_v17, %v36484_v41  ;;  %v12088_v0 = vpop.f32.mrb[97].mxu0  ;;  %v36490_v41 = vld [vmem:[#allocation150_spill] sm:$0xff] }
 0xb03   : > { %v13851_v29 = vmax.f32 %v13755_v30, %v13531_v42  ;;  %v13756_v48 = vmax.f32 %v13528_v38, %v13530_v61  ;;  %v26660_v9 = vadd.f32 %v12088_v0, %v36485_v15  ;;  %v25296_v2 = vpop.f32.mrb[98].mxu0  ;;  %v36489_v30 = vld [vmem:[#allocation149_spill] sm:$0xff]  ;;  %v29528_v15 = vld [vmem:[%s30044_s21 + $0x378] sm:$0xff]  }
 0xb04   : > { %v13247_v3 = vadd.f32 %v33727_v46, %v26659_v49  ;;  %v26661_v56 = vadd.f32 %v25296_v2, %v36486_v19  ;;  %v12091_v51 = vpop.f32.mrb[99].mxu0 }
 0xb05   : > { %v13852_v45 = vmax.f32 %v13756_v48, %v13532_v54  ;;  %v13245_v59 = vadd.f32 %v33727_v46, %v26660_v9  ;;  %v26662_v12 = vadd.f32 %v12091_v51, %v36487_v32  ;;  %v36491_v54 = vld [vmem:[#allocation151_spill] sm:$0xff] }
 0xb06   : > { %v13535_v50 = vmax.f32 %v13247_v3, 0.0  ;;  %v13248_v22 = vadd.f32 %v33727_v46, %v26661_v56  ;;  %25402 = vmatmul.mubr.msk.bf16.gmra.mrb[28].mxu0 %vm2876_vm0, %v29526_v1  ;;  %v29529_v3 = vld [vmem:[%s30044_s21 + $0x380] sm:$0xff]  }
 0xb07   : > { %v33744_v36 = vpack.c.bf16 %v13852_v45, %v13851_v29  ;;  %v13533_v60 = vmax.f32 %v13245_v59, 0.0  ;;  %v13246_v35 = vadd.f32 %v33727_v46, %v26662_v12  ;;  %25405 = vmatprep.mubr.msk.bf16.mxu0 %vm2876_vm0, %v29527_v20  ;;  %v36492_v45 = vld [vmem:[#allocation154_spill] sm:$0xff]  ;;  %v36494_v20 = vld [vmem:[#allocation156_spill] sm:$0xff] }
 0xb08   : > { %v13536_v4 = vmax.f32 %v13248_v22, 0.0  ;;  %v36493_v22 = vld [vmem:[#allocation155_spill] sm:$0xff] }
 0xb09   : > { %v13757_v39 = vmax.f32 %v13533_v60, %v13535_v50  ;;  %v13534_v24 = vmax.f32 %v13246_v35, 0.0  ;;  %v25299_v47 = vpop.f32.mrb[100].mxu0  ;;  %25521 = vmatprep.mubr.msk.bf16.mxu1 %vm14007_vm1, %v33744_v36 }
 0xb0a   : > { %v26663_v11 = vadd.f32 %v25299_v47, %v36488_v16  ;;  %v12104_v38 = vpop.f32.mrb[101].mxu0 }
 0xb0b   : > { %v13758_v42 = vmax.f32 %v13534_v24, %v13536_v4  ;;  %v26664_v61 = vadd.f32 %v12104_v38, %v36489_v30  ;;  %v25300_v17 = vpop.f32.mrb[102].mxu0  ;;  %v36495_v38 = vld [vmem:[#allocation157_spill] sm:$0xff] }
 0xb0c   : > { %v26665_v49 = vadd.f32 %v25300_v17, %v36490_v41  ;;  %v12107_v0 = vpop.f32.mrb[103].mxu0  ;;  %v13251_v12 = vadd.f32 %v33727_v46, %v26663_v11 }
 0xb0d   : > { %v13249_v29 = vadd.f32 %v33727_v46, %v26664_v61  ;;  %v26666_v48 = vadd.f32 %v12107_v0, %v36491_v54  ;;  %v29530_v61 = vld [vmem:[%s30044_s21 + $0x388] sm:$0xff]  }
 0xb0e   : > { %25406 = vmatmul.mubr.msk.bf16.gmra.mrb[208].mxu0 %vm2876_vm0, %v29528_v15  ;;  %v13252_v35 = vadd.f32 %v33727_v46, %v26665_v49  ;;  %v13539_v11 = vmax.f32 %v13251_v12, 0.0  ;;  %v29531_v49 = vld [vmem:[%s30044_s21 + $0x390] sm:$0xff]  }
 0xb0f   : > { %v13537_v9 = vmax.f32 %v13249_v29, 0.0  ;;  %v13250_v2 = vadd.f32 %v33727_v46, %v26666_v48  ;;  %25409 = vmatprep.mubr.msk.bf16.mxu0 %vm2876_vm0, %v29529_v3 }
 0xb10   : > { %v13540_v0 = vmax.f32 %v13252_v35, 0.0 }
 0xb11   : > { %v13853_v19 = vmax.f32 %v13757_v39, %v13537_v9  ;;  %v13538_v56 = vmax.f32 %v13250_v2, 0.0  ;;  %v25303_v51 = vpop.f32.mrb[104].mxu0  ;;  %v36496_v9 = vld [vmem:[#allocation160_spill] sm:$0xff] }
 0xb12   : > { %v26667_v59 = vadd.f32 %v25303_v51, %v36492_v45  ;;  %v12120_v32 = vpop.f32.mrb[105].mxu0  ;;  %v36497_v45 = vld [vmem:[#allocation161_spill] sm:$0xff] }
 0xb13   : > { %v13854_v50 = vmax.f32 %v13758_v42, %v13538_v56  ;;  %v26668_v1 = vadd.f32 %v12120_v32, %v36493_v22  ;;  %v25304_v60 = vpop.f32.mrb[106].mxu0 }
 0xb14   : > { %v26669_v4 = vadd.f32 %v25304_v60, %v36494_v20  ;;  %v12123_v24 = vpop.f32.mrb[107].mxu0  ;;  %v13255_v39 = vadd.f32 %v33727_v46, %v26667_v59  ;;  %v36499_v20 = vld [vmem:[#allocation163_spill] sm:$0xff] }
 0xb15   : > { %v33766_v47 = vpack.c.bf16 %v13854_v50, %v13853_v19  ;;  %v13253_v16 = vadd.f32 %v33727_v46, %v26668_v1  ;;  %v26670_v30 = vadd.f32 %v12123_v24, %v36495_v38  ;;  %v36498_v50 = vld [vmem:[#allocation162_spill] sm:$0xff] }
 0xb16   : > { %25410 = vmatmul.mubr.msk.bf16.gmra.mrb[212].mxu0 %vm2876_vm0, %v29530_v61  ;;  %v13256_v17 = vadd.f32 %v33727_v46, %v26669_v4  ;;  %v13543_v29 = vmax.f32 %v13255_v39, 0.0 }
 0xb17   : > { %v13541_v42 = vmax.f32 %v13253_v16, 0.0  ;;  %v13254_v41 = vadd.f32 %v33727_v46, %v26670_v30  ;;  %25522 = vmatmul.mubr.msk.bf16.gmra.mrb[28].mxu1 %vm14007_vm1, %v33766_v47  ;;  %25413 = vmatprep.mubr.msk.bf16.mxu0 %vm2876_vm0, %v29531_v49  ;;  %v29532_v16 = vld [vmem:[%s30044_s21 + $0x398] sm:$0xff]  }
 0xb18   : > { %v13544_v56 = vmax.f32 %v13256_v17, 0.0 }
 0xb19   : > { %v13759_v54 = vmax.f32 %v13539_v11, %v13541_v42  ;;  %v13542_v48 = vmax.f32 %v13254_v41, 0.0  ;;  %v25307_v15 = vpop.f32.mrb[108].mxu0  ;;  %v29533_v11 = vld [vmem:[%s30044_s21 + $0x3a0] sm:$0xff]  }
 0xb1a   : > { %v26671_v2 = vadd.f32 %v25307_v15, %v36496_v9  ;;  %v12136_v3 = vpop.f32.mrb[109].mxu0 }
 0xb1b   : > { %v13855_v19 = vmax.f32 %v13759_v54, %v13543_v29  ;;  %v13760_v51 = vmax.f32 %v13540_v0, %v13542_v48  ;;  %v26672_v59 = vadd.f32 %v12136_v3, %v36497_v45  ;;  %v25308_v32 = vpop.f32.mrb[110].mxu0 }
 0xb1c   : > { %v13259_v12 = vadd.f32 %v33727_v46, %v26671_v2  ;;  %v26673_v22 = vadd.f32 %v25308_v32, %v36498_v50  ;;  %v12139_v1 = vpop.f32.mrb[111].mxu0 }
 0xb1d   : > { %v13856_v60 = vmax.f32 %v13760_v51, %v13544_v56  ;;  %v13257_v35 = vadd.f32 %v33727_v46, %v26672_v59  ;;  %v26674_v4 = vadd.f32 %v12139_v1, %v36499_v20  ;;  %v29534_v56 = vld [vmem:[%s30044_s21 + $0x3a8] sm:$0xff]   ;;  %v29535_v59 = vld [vmem:[%s30044_s21 + $0x3b0] sm:$0xff]  }
 0xb1e   : > { %v13547_v24 = vmax.f32 %v13259_v12, 0.0  ;;  %v13260_v39 = vadd.f32 %v33727_v46, %v26673_v22  ;;  %25414 = vmatmul.mubr.msk.bf16.gmra.mrb[216].mxu0 %vm2876_vm0, %v29532_v16 }
 0xb1f   : > { %v33788_v38 = vpack.c.bf16 %v13856_v60, %v13855_v19  ;;  %v13545_v30 = vmax.f32 %v13257_v35, 0.0  ;;  %v13258_v61 = vadd.f32 %v33727_v46, %v26674_v4  ;;  %25417 = vmatprep.mubr.msk.bf16.mxu0 %vm2876_vm0, %v29533_v11 }
 0xb20   : > { %v13548_v42 = vmax.f32 %v13260_v39, 0.0 }
 0xb21   : > { %v13761_v17 = vmax.f32 %v13545_v30, %v13547_v24  ;;  %v13546_v41 = vmax.f32 %v13258_v61, 0.0  ;;  %v25311_v49 = vpop.f32.mrb[4].mxu0  ;;  %25525 = vmatprep.mubr.msk.bf16.mxu1 %vm14007_vm1, %v33788_v38  ;;  %v29536_v30 = vld [vmem:[%s30044_s21 + $0x3b8] sm:$0xff]  }
 0xb22   : > { %v26676_v0 = vadd.f32 %v32556_v25, %v25311_v49  ;;  %v12152_v29 = vpop.f32.mrb[5].mxu0 }
 0xb23   : > { %v13762_v54 = vmax.f32 %v13546_v41, %v13548_v42  ;;  %v26678_v48 = vadd.f32 %v32559_v37, %v12152_v29  ;;  %v25312_v15 = vpop.f32.mrb[6].mxu0 }
 0xb24   : > { %v26680_v9 = vadd.f32 %v32562_v43, %v25312_v15  ;;  %v12155_v2 = vpop.f32.mrb[7].mxu0  ;;  %v13263_v50 = vadd.f32 %v33727_v46, %v26676_v0 }
 0xb25   : > { %v13261_v3 = vadd.f32 %v33727_v46, %v26678_v48  ;;  %v26682_v19 = vadd.f32 %v32565_v44, %v12155_v2 }
 0xb26   : > { %25418 = vmatmul.mubr.msk.bf16.gmra.mrb[112].mxu0 %vm2876_vm0, %v29534_v56  ;;  %v13264_v60 = vadd.f32 %v33727_v46, %v26680_v9  ;;  %v13551_v61 = vmax.f32 %v13263_v50, 0.0  ;;  %v36504_v50 = vld [vmem:[#allocation158_spill] sm:$0xff] }
 0xb27   : > { %v13549_v51 = vmax.f32 %v13261_v3, 0.0  ;;  %v13262_v45 = vadd.f32 %v33727_v46, %v26682_v19  ;;  %25421 = vmatprep.mubr.msk.bf16.mxu0 %vm2876_vm0, %v29535_v59  ;;  %v36502_v19 = vld [vmem:[#allocation152_spill] sm:$0xff] }
 0xb29   : > { %v13857_v25 = vmax.f32 %v13761_v17, %v13549_v51  ;;  %v13550_v37 = vmax.f32 %v13262_v45, 0.0  ;;  %v25315_v32 = vpop.f32.mrb[8].mxu0  ;;  %v13552_v17 = vmax.f32 %v13264_v60, 0.0  ;;  %v29072_v45 = vld [vmem:[%s36418_s3] sm:$0xff]   ;;  %v29538_v60 = vld [vmem:[%s30044_s21 + $0x3c8] sm:$0xff]  }
 0xb2a   : > { %v26684_v43 = vadd.f32 %v32578_v7, %v25315_v32  ;;  %v12168_v12 = vpop.f32.mrb[9].mxu0  ;;  %v36500_v7 = vld [vmem:[#allocation146_spill] sm:$0xff]  ;;  %25577 = vmatprep.subr.bf16.mxu1 %v29072_v45 }
 0xb2b   : > { %v13858_v22 = vmax.f32 %v13762_v54, %v13550_v37  ;;  %v26686_v44 = vadd.f32 %v32581_v40, %v12168_v12  ;;  %v25316_v1 = vpop.f32.mrb[10].mxu0  ;;  %v36501_v54 = vld [vmem:[#allocation147_spill] sm:$0xff]  ;;  %25578 = vmatpush3.bf16.msra.mxu1 %v29072_v45 }
 0xb2c   : > { %v26688_v35 = vadd.f32 %v32584_v10, %v25316_v1  ;;  %v12171_v20 = vpop.f32.mrb[11].mxu0  ;;  %v13267_v24 = vadd.f32 %v33727_v46, %v26684_v43  ;;  %v29537_v10 = vld [vmem:[%s30044_s21 + $0x3c0] sm:$0xff]  }
 0xb2d   : > { %v33810_v4 = vpack.c.bf16 %v13858_v22, %v13857_v25  ;;  %v13265_v39 = vadd.f32 %v33727_v46, %v26686_v44  ;;  %v26690_v16 = vadd.f32 %v36500_v7, %v12171_v20  ;;  %v36503_v25 = vld [vmem:[#allocation153_spill] sm:$0xff] }
 0xb2e   : > { %25422 = vmatmul.mubr.msk.bf16.gmra.mrb[116].mxu0 %vm2876_vm0, %v29536_v30  ;;  %v13268_v11 = vadd.f32 %v33727_v46, %v26688_v35  ;;  %v13555_v41 = vmax.f32 %v13267_v24, 0.0 }
 0xb2f   : > { %v13553_v40 = vmax.f32 %v13265_v39, 0.0  ;;  %v13266_v42 = vadd.f32 %v33727_v46, %v26690_v16  ;;  %25526 = vmatmul.mubr.msk.bf16.gmra.mrb[32].mxu1 %vm14007_vm1, %v33810_v4  ;;  %25425 = vmatprep.mubr.msk.bf16.mxu0 %vm2876_vm0, %v29537_v10  ;;  %v29539_v39 = vld [vmem:[%s30044_s21 + $0x3d0] sm:$0xff]  }
 0xb30   : > { %v13556_v2 = vmax.f32 %v13268_v11, 0.0 }
 0xb31   : > { %v13763_v49 = vmax.f32 %v13551_v61, %v13553_v40  ;;  %v13554_v0 = vmax.f32 %v13266_v42, 0.0  ;;  %v25319_v29 = vpop.f32.mrb[12].mxu0  ;;  %v36505_v40 = vld [vmem:[#allocation166_spill] sm:$0xff] }
 0xb32   : > { %v26692_v48 = vadd.f32 %v36501_v54, %v25319_v29  ;;  %v12184_v15 = vpop.f32.mrb[13].mxu0 }
 0xb33   : > { %v13859_v9 = vmax.f32 %v13763_v49, %v13555_v41  ;;  %v13764_v3 = vmax.f32 %v13552_v17, %v13554_v0  ;;  %v26694_v56 = vadd.f32 %v36502_v19, %v12184_v15  ;;  %v25320_v51 = vpop.f32.mrb[14].mxu0  ;;  %v36506_v17 = vld [vmem:[#allocation167_spill] sm:$0xff]  ;;  %v36507_v0 = vld [vmem:[#allocation168_spill] sm:$0xff]  ;;  %v36508_v15 = vld [vmem:[#allocation169_spill] sm:$0xff] }
 0xb34   : > { %v13271_v59 = vadd.f32 %v33727_v46, %v26692_v48  ;;  %v26696_v37 = vadd.f32 %v36503_v25, %v25320_v51  ;;  %v12187_v32 = vpop.f32.mrb[15].mxu0  ;;  %v36509_v25 = vld [vmem:[#allocation159_spill] sm:$0xff] }
 0xb35   : > { %v13860_v43 = vmax.f32 %v13764_v3, %v13556_v2  ;;  %v13269_v12 = vadd.f32 %v33727_v46, %v26694_v56  ;;  %v26698_v22 = vadd.f32 %v36504_v50, %v12187_v32  ;;  %v29540_v2 = vld [vmem:[%s30044_s21 + $0x3d8] sm:$0xff]   ;;  %v29541_v56 = vld [vmem:[%s30044_s21 + $0x3e0] sm:$0xff]  }
 0xb36   : > { %v13559_v44 = vmax.f32 %v13271_v59, 0.0  ;;  %v13272_v1 = vadd.f32 %v33727_v46, %v26696_v37  ;;  %25426 = vmatmul.mubr.msk.bf16.gmra.mrb[120].mxu0 %vm2876_vm0, %v29538_v60  ;;  %v36510_v50 = vld [vmem:[#allocation164_spill] sm:$0xff] }
 0xb37   : > { %v33835_v35 = vpack.c.bf16 %v13860_v43, %v13859_v9  ;;  %v13557_v20 = vmax.f32 %v13269_v12, 0.0  ;;  %v13270_v24 = vadd.f32 %v33727_v46, %v26698_v22  ;;  %25429 = vmatprep.mubr.msk.bf16.mxu0 %vm2876_vm0, %v29539_v39  ;;  %v36511_v60 = vld [vmem:[#allocation172_spill] sm:$0xff] }
 0xb38   : > { %v13560_v7 = vmax.f32 %v13272_v1, 0.0 }
 0xb39   : > { %v13765_v16 = vmax.f32 %v13557_v20, %v13559_v44  ;;  %v13558_v30 = vmax.f32 %v13270_v24, 0.0  ;;  %v25323_v61 = vpop.f32.mrb[16].mxu0  ;;  %25529 = vmatprep.mubr.msk.bf16.mxu1 %vm14007_vm1, %v33835_v35 }
 0xb3a   : > { %v26700_v11 = vadd.f32 %v36505_v40, %v25323_v61  ;;  %v12200_v42 = vpop.f32.mrb[17].mxu0  ;;  %v29542_v40 = vld [vmem:[%s30044_s21 + $0x3e8] sm:$0xff]  }
 0xb3b   : > { %v13766_v10 = vmax.f32 %v13558_v30, %v13560_v7  ;;  %v26702_v41 = vadd.f32 %v36506_v17, %v12200_v42  ;;  %v25324_v49 = vpop.f32.mrb[18].mxu0  ;;  %v36512_v30 = vld [vmem:[#allocation173_spill] sm:$0xff] }
 0xb3c   : > { %v26704_v29 = vadd.f32 %v36507_v0, %v25324_v49  ;;  %v12203_v54 = vpop.f32.mrb[19].mxu0  ;;  %v13275_v43 = vadd.f32 %v33727_v46, %v26700_v11 }
 0xb3d   : > { %v13273_v48 = vadd.f32 %v33727_v46, %v26702_v41  ;;  %v26706_v9 = vadd.f32 %v36508_v15, %v12203_v54  ;;  %v29543_v41 = vld [vmem:[%s30044_s21 + $0x3f0] sm:$0xff]  }
 0xb3e   : > { %25430 = vmatmul.mubr.msk.bf16.gmra.mrb[124].mxu0 %vm2876_vm0, %v29540_v2  ;;  %v13276_v1 = vadd.f32 %v33727_v46, %v26704_v29  ;;  %v13563_v11 = vmax.f32 %v13275_v43, 0.0 }
 0xb3f   : > { %v13561_v3 = vmax.f32 %v13273_v48, 0.0  ;;  %v13274_v19 = vadd.f32 %v33727_v46, %v26706_v9  ;;  %25433 = vmatprep.mubr.msk.bf16.mxu0 %vm2876_vm0, %v29541_v56 }
 0xb40   : > { %v13564_v49 = vmax.f32 %v13276_v1, 0.0  ;;  %v29545_v1 = vld [vmem:[%s30044_s21 + $0x400] sm:$0xff]  }
 0xb41   : > { %v13861_v51 = vmax.f32 %v13765_v16, %v13561_v3  ;;  %v13562_v45 = vmax.f32 %v13274_v19, 0.0  ;;  %v25327_v59 = vpop.f32.mrb[20].mxu0 }
 0xb42   : > { %v26708_v37 = vadd.f32 %v36509_v25, %v25327_v59  ;;  %v12216_v32 = vpop.f32.mrb[21].mxu0 }
 0xb43   : > { %v13862_v12 = vmax.f32 %v13766_v10, %v13562_v45  ;;  %v26710_v22 = vadd.f32 %v36510_v50, %v12216_v32  ;;  %v25328_v44 = vpop.f32.mrb[22].mxu0  ;;  %v29544_v50 = vld [vmem:[%s30044_s21 + $0x3f8] sm:$0xff]  }
 0xb44   : > { %v26712_v20 = vadd.f32 %v36511_v60, %v25328_v44  ;;  %v12219_v24 = vpop.f32.mrb[23].mxu0  ;;  %v13279_v7 = vadd.f32 %v33727_v46, %v26708_v37 }
 0xb45   : > { %v33857_v39 = vpack.c.bf16 %v13862_v12, %v13861_v51  ;;  %v13277_v16 = vadd.f32 %v33727_v46, %v26710_v22  ;;  %v26714_v61 = vadd.f32 %v36512_v30, %v12219_v24  ;;  %v36513_v24 = vld [vmem:[#allocation171_spill] sm:$0xff] }
 0xb46   : > { %25434 = vmatmul.mubr.msk.bf16.gmra.mrb[128].mxu0 %vm2876_vm0, %v29542_v40  ;;  %v13280_v10 = vadd.f32 %v33727_v46, %v26712_v20  ;;  %v13567_v0 = vmax.f32 %v13279_v7, 0.0 }
 0xb47   : > { %v13565_v42 = vmax.f32 %v13277_v16, 0.0  ;;  %v13278_v17 = vadd.f32 %v33727_v46, %v26714_v61  ;;  %25530 = vmatmul.mubr.msk.bf16.gmra.mrb[36].mxu1 %vm14007_vm1, %v33857_v39  ;;  %25437 = vmatprep.mubr.msk.bf16.mxu0 %vm2876_vm0, %v29543_v41  ;;  %v36514_v61 = vld [vmem:[#allocation176_spill] sm:$0xff] }
 0xb48   : > { %v13568_v3 = vmax.f32 %v13280_v10, 0.0 }
 0xb49   : > { %v13767_v29 = vmax.f32 %v13563_v11, %v13565_v42  ;;  %v13566_v54 = vmax.f32 %v13278_v17, 0.0  ;;  %v25331_v48 = vpop.f32.mrb[24].mxu0  ;;  %v36515_v42 = vld [vmem:[#allocation184_spill] sm:$0xff] }
 0xb4a   : > { %v26716_v15 = vadd.f32 %v32642_v52, %v25331_v48  ;;  %v12232_v9 = vpop.f32.mrb[25].mxu0 }
 0xb4b   : > { %v13863_v2 = vmax.f32 %v13767_v29, %v13567_v0  ;;  %v13768_v19 = vmax.f32 %v13564_v49, %v13566_v54  ;;  %v26718_v56 = vadd.f32 %v32645_v5, %v12232_v9  ;;  %v25332_v51 = vpop.f32.mrb[26].mxu0  ;;  %v36516_v49 = vld [vmem:[#allocation185_spill] sm:$0xff]  ;;  %v29546_v29 = vld [vmem:[%s30044_s21 + $0x408] sm:$0xff]  }
 0xb4c   : > { %v13283_v45 = vadd.f32 %v33727_v46, %v26716_v15  ;;  %v26720_v59 = vadd.f32 %v32648_v34, %v25332_v51  ;;  %v12235_v25 = vpop.f32.mrb[27].mxu0  ;;  %v29547_v15 = vld [vmem:[%s30044_s21 + $0x410] sm:$0xff]  }
 0xb4d   : > { %v13864_v37 = vmax.f32 %v13768_v19, %v13568_v3  ;;  %v13281_v32 = vadd.f32 %v33727_v46, %v26718_v56  ;;  %v26722_v43 = vadd.f32 %v32651_v27, %v12235_v25  ;;  %v36517_v19 = vld [vmem:[#allocation186_spill] sm:$0xff]  ;;  %v36518_v25 = vld [vmem:[#allocation187_spill] sm:$0xff] }
 0xb4e   : > { %v13571_v12 = vmax.f32 %v13283_v45, 0.0  ;;  %v13284_v52 = vadd.f32 %v33727_v46, %v26720_v59  ;;  %25438 = vmatmul.mubr.msk.bf16.gmra.mrb[132].mxu0 %vm2876_vm0, %v29544_v50 }
 0xb4f   : > { %v33879_v22 = vpack.c.bf16 %v13864_v37, %v13863_v2  ;;  %v13569_v5 = vmax.f32 %v13281_v32, 0.0  ;;  %v13282_v44 = vadd.f32 %v33727_v46, %v26722_v43  ;;  %25441 = vmatprep.mubr.msk.bf16.mxu0 %vm2876_vm0, %v29545_v1 }
 0xb50   : > { %v13572_v34 = vmax.f32 %v13284_v52, 0.0 }
 0xb51   : > { %v13769_v60 = vmax.f32 %v13569_v5, %v13571_v12  ;;  %v13570_v20 = vmax.f32 %v13282_v44, 0.0  ;;  %v25335_v27 = vpop.f32.mrb[0].mxu0  ;;  %25533 = vmatprep.mubr.msk.bf16.mxu1 %vm14007_vm1, %v33879_v22  ;;  %v36519_v12 = vld [vmem:[#allocation177_spill] sm:$0xff] }
 0xb52   : > { %v26724_v7 = vadd.f32 %v36513_v24, %v25335_v27  ;;  %v12248_v16 = vpop.f32.mrb[1].mxu0 }
 0xb53   : > { %v13770_v30 = vmax.f32 %v13570_v20, %v13572_v34  ;;  %v26726_v40 = vadd.f32 %v36514_v61, %v12248_v16  ;;  %v25336_v11 = vpop.f32.mrb[2].mxu0  ;;  %v36520_v34 = vld [vmem:[#allocation182_spill] sm:$0xff]  ;;  %v29073_v61 = vld [vmem:[%s36418_s3 + $0x8] sm:$0xff]  }
 0xb54   : > { %v26728_v10 = vadd.f32 %v36515_v42, %v25336_v11  ;;  %v12251_v17 = vpop.f32.mrb[3].mxu0  ;;  %v13287_v45 = vadd.f32 %v33727_v46, %v26724_v7  ;;  %v29548_v20 = vld [vmem:[%s30044_s21 + $0x418] sm:$0xff]   ;;  %25579 = vmatprep.subr.bf16.mxu1 %v29073_v61 }
 0xb55   : > { %v13285_v41 = vadd.f32 %v33727_v46, %v26726_v40  ;;  %v26730_v0 = vadd.f32 %v36516_v49, %v12251_v17  ;;  %25580 = vmatpush3.bf16.msra.mxu1 %v29073_v61  ;;  %v36526_v61 = vld [vmem:[#allocation4_spill] sm:$0xff] }
 0xb56   : > { %25442 = vmatmul.mubr.msk.bf16.gmra.mrb[136].mxu0 %vm2876_vm0, %v29546_v29  ;;  %v13288_v43 = vadd.f32 %v33727_v46, %v26728_v10  ;;  %v13575_v27 = vmax.f32 %v13287_v45, 0.0 }
 0xb57   : > { %v13573_v54 = vmax.f32 %v13285_v41, 0.0  ;;  %v13286_v48 = vadd.f32 %v33727_v46, %v26730_v0  ;;  %25445 = vmatprep.mubr.msk.bf16.mxu0 %vm2876_vm0, %v29547_v15  ;;  %v36521_v41 = vld [vmem:[#allocation214_spill] sm:$0xff]  ;;  %v36522_v15 = vld [vmem:[#allocation215_spill] sm:$0xff] }
 0xb58   : > { %v13576_v40 = vmax.f32 %v13288_v43, 0.0 }
 0xb59   : > { %v13865_v9 = vmax.f32 %v13769_v60, %v13573_v54  ;;  %v13574_v2 = vmax.f32 %v13286_v48, 0.0  ;;  %v25339_v3 = vpop.f32.mrb[184].mxu0 }
 0xb5a   : > { %v26732_v56 = vadd.f32 %v36517_v19, %v25339_v3  ;;  %v12264_v51 = vpop.f32.mrb[185].mxu0  ;;  %v36523_v19 = vld [vmem:[#allocation216_spill] sm:$0xff] }
 0xb5b   : > { %v13866_v59 = vmax.f32 %v13770_v30, %v13574_v2  ;;  %v26734_v37 = vadd.f32 %v36518_v25, %v12264_v51  ;;  %v25340_v32 = vpop.f32.mrb[186].mxu0  ;;  %v29549_v30 = vld [vmem:[%s30044_s21 + $0x420] sm:$0xff]  }
 0xb5c   : > { %v26736_v52 = vadd.f32 %v36519_v12, %v25340_v32  ;;  %v12267_v50 = vpop.f32.mrb[187].mxu0  ;;  %v13291_v44 = vadd.f32 %v33727_v46, %v26732_v56  ;;  %v36524_v25 = vld [vmem:[#allocation217_spill] sm:$0xff]  ;;  %v29550_v12 = vld [vmem:[%s30044_s21 + $0x428] sm:$0xff]  }
 0xb5d   : > { %v33901_v5 = vpack.c.bf16 %v13866_v59, %v13865_v9  ;;  %v13289_v1 = vadd.f32 %v33727_v46, %v26734_v37  ;;  %v26738_v60 = vadd.f32 %v36520_v34, %v12267_v50 }
 0xb5e   : > { %25446 = vmatmul.mubr.msk.bf16.gmra.mrb[140].mxu0 %vm2876_vm0, %v29548_v20  ;;  %v13292_v7 = vadd.f32 %v33727_v46, %v26736_v52  ;;  %v13579_v11 = vmax.f32 %v13291_v44, 0.0 }
 0xb5f   : > { %v13577_v24 = vmax.f32 %v13289_v1, 0.0  ;;  %v13290_v16 = vadd.f32 %v33727_v46, %v26738_v60  ;;  %25534 = vmatmul.mubr.msk.bf16.gmra.mrb[72].mxu1 %vm14007_vm1, %v33901_v5  ;;  %25449 = vmatprep.mubr.msk.bf16.mxu0 %vm2876_vm0, %v29549_v30  ;;  %v29551_v1 = vld [vmem:[%s30044_s21 + $0x430] sm:$0xff]  }
 0xb60   : > { %v13580_v54 = vmax.f32 %v13292_v7, 0.0 }
 0xb61   : > { %v13771_v42 = vmax.f32 %v13575_v27, %v13577_v24  ;;  %v13578_v10 = vmax.f32 %v13290_v16, 0.0  ;;  %v25343_v17 = vpop.f32.mrb[144].mxu0  ;;  %v36525_v24 = vld [vmem:[#allocation220_spill] sm:$0xff] }
 0xb62   : > { %v26739_v49 = vadd.f32 %v25343_v17, %v36521_v41  ;;  %v12280_v0 = vpop.f32.mrb[145].mxu0 }
 0xb63   : > { %v13867_v29 = vmax.f32 %v13771_v42, %v13579_v11  ;;  %v13772_v48 = vmax.f32 %v13576_v40, %v13578_v10  ;;  %v26740_v9 = vadd.f32 %v12280_v0, %v36522_v15  ;;  %v25344_v2 = vpop.f32.mrb[146].mxu0  ;;  %v36527_v42 = vld [vmem:[#allocation3_spill] sm:$0xff] }
 0xb64   : > { %v13295_v3 = vadd.f32 %v33727_v46, %v26739_v49  ;;  %v26741_v56 = vadd.f32 %v25344_v2, %v36523_v19  ;;  %v12283_v51 = vpop.f32.mrb[147].mxu0  ;;  %v36528_v49 = vld [vmem:[#allocation5_spill] sm:$0xff]  ;;  %v36529_v19 = vld [vmem:[#allocation8_spill] sm:$0xff] }
 0xb65   : > { %v13868_v45 = vmax.f32 %v13772_v48, %v13580_v54  ;;  %v13293_v59 = vadd.f32 %v33727_v46, %v26740_v9  ;;  %v26742_v37 = vadd.f32 %v12283_v51, %v36524_v25  ;;  %v29553_v15 = vld [vmem:[%s30044_s21 + $0x440] sm:$0xff]   ;;  %v36530_v25 = vld [vmem:[#allocation10_spill] sm:$0xff] }
 0xb66   : > { %v13583_v32 = vmax.f32 %v13295_v3, 0.0  ;;  %v13296_v43 = vadd.f32 %v33727_v46, %v26741_v56  ;;  %25450 = vmatmul.mubr.msk.bf16.gmra.mrb[252].mxu0 %vm2876_vm0, %v29550_v12  ;;  %v36531_v12 = vld [vmem:[#allocation9_spill] sm:$0xff] }
 0xb67   : > { %v33926_v52 = vpack.c.bf16 %v13868_v45, %v13867_v29  ;;  %v13581_v50 = vmax.f32 %v13293_v59, 0.0  ;;  %v13294_v44 = vadd.f32 %v33727_v46, %v26742_v37  ;;  %25453 = vmatprep.mubr.msk.bf16.mxu0 %vm2876_vm0, %v29551_v1  ;;  %v29552_v29 = vld [vmem:[%s30044_s21 + $0x438] sm:$0xff]  }
 0xb68   : > { %v13584_v34 = vmax.f32 %v13296_v43, 0.0 }
 0xb69   : > { %v13773_v60 = vmax.f32 %v13581_v50, %v13583_v32  ;;  %v13582_v20 = vmax.f32 %v13294_v44, 0.0  ;;  %v25347_v27 = vpop.f32.mrb[40].mxu0  ;;  %25537 = vmatprep.mubr.msk.bf16.mxu1 %vm14007_vm1, %v33926_v52 }
 0xb6a   : > { %v26745_v7 = vadd.f32 %v25347_v27, %v36525_v24  ;;  %v12296_v16 = vpop.f32.mrb[41].mxu0  ;;  %v29554_v24 = vld [vmem:[%s30044_s21 + $0x448] sm:$0xff]  }
 0xb6b   : > { %v13774_v30 = vmax.f32 %v13582_v20, %v13584_v34  ;;  %v26748_v40 = vadd.f32 %v12296_v16, %v36526_v61  ;;  %v25348_v11 = vpop.f32.mrb[42].mxu0  ;;  %v36532_v20 = vld [vmem:[#allocation11_spill] sm:$0xff] }
 0xb6c   : > { %v26751_v10 = vadd.f32 %v25348_v11, %v36527_v42  ;;  %v12299_v17 = vpop.f32.mrb[43].mxu0  ;;  %v13299_v45 = vadd.f32 %v33727_v46, %v26745_v7 }
 0xb6d   : > { %v13297_v41 = vadd.f32 %v33727_v46, %v26748_v40  ;;  %v26754_v0 = vadd.f32 %v12299_v17, %v36528_v49  ;;  %v29555_v40 = vld [vmem:[%s30044_s21 + $0x450] sm:$0xff]   ;;  %v36533_v49 = vld [vmem:[#allocation14_spill] sm:$0xff] }
 0xb6e   : > { %25454 = vmatmul.mubr.msk.bf16.gmra.mrb[148].mxu0 %vm2876_vm0, %v29552_v29  ;;  %v13300_v43 = vadd.f32 %v33727_v46, %v26751_v10  ;;  %v13587_v7 = vmax.f32 %v13299_v45, 0.0 }
 0xb6f   : > { %v13585_v54 = vmax.f32 %v13297_v41, 0.0  ;;  %v13298_v48 = vadd.f32 %v33727_v46, %v26754_v0  ;;  %25457 = vmatprep.mubr.msk.bf16.mxu0 %vm2876_vm0, %v29553_v15 }
 0xb70   : > { %v13588_v11 = vmax.f32 %v13300_v43, 0.0 }
 0xb71   : > { %v13869_v9 = vmax.f32 %v13773_v60, %v13585_v54  ;;  %v13586_v2 = vmax.f32 %v13298_v48, 0.0  ;;  %v25351_v3 = vpop.f32.mrb[44].mxu0 }
 0xb72   : > { %v26757_v56 = vadd.f32 %v25351_v3, %v36529_v19  ;;  %v12312_v51 = vpop.f32.mrb[45].mxu0 }
 0xb73   : > { %v13870_v59 = vmax.f32 %v13774_v30, %v13586_v2  ;;  %v26760_v37 = vadd.f32 %v12312_v51, %v36530_v25  ;;  %v25352_v32 = vpop.f32.mrb[46].mxu0 }
 0xb74   : > { %v26763_v50 = vadd.f32 %v25352_v32, %v36531_v12  ;;  %v12315_v44 = vpop.f32.mrb[47].mxu0  ;;  %v13303_v34 = vadd.f32 %v33727_v46, %v26757_v56  ;;  %v36535_v56 = vld [vmem:[#allocation15_spill] sm:$0xff] }
 0xb75   : > { %v33948_v1 = vpack.c.bf16 %v13870_v59, %v13869_v9  ;;  %v13301_v60 = vadd.f32 %v33727_v46, %v26760_v37  ;;  %v26766_v27 = vadd.f32 %v12315_v44, %v36532_v20  ;;  %v36534_v9 = vld [vmem:[#allocation13_spill] sm:$0xff]  ;;  %v36536_v37 = vld [vmem:[#allocation16_spill] sm:$0xff] }
 0xb76   : > { %25458 = vmatmul.mubr.msk.bf16.gmra.mrb[152].mxu0 %vm2876_vm0, %v29554_v24  ;;  %v13304_v30 = vadd.f32 %v33727_v46, %v26763_v50  ;;  %v13591_v42 = vmax.f32 %v13303_v34, 0.0  ;;  %v29556_v50 = vld [vmem:[%s30044_s21 + $0x458] sm:$0xff]   ;;  %v29557_v20 = vld [vmem:[%s30044_s21 + $0x460] sm:$0xff]  }
 0xb77   : > { %v13589_v16 = vmax.f32 %v13301_v60, 0.0  ;;  %v13302_v61 = vadd.f32 %v33727_v46, %v26766_v27  ;;  %25538 = vmatmul.mubr.msk.bf16.gmra.mrb[76].mxu1 %vm14007_vm1, %v33948_v1  ;;  %25461 = vmatprep.mubr.msk.bf16.mxu0 %vm2876_vm0, %v29555_v40 }
 0xb78   : > { %v13592_v48 = vmax.f32 %v13304_v30, 0.0  ;;  %v36537_v30 = vld [vmem:[#allocation18_spill] sm:$0xff] }
 0xb79   : > { %v13775_v10 = vmax.f32 %v13587_v7, %v13589_v16  ;;  %v13590_v17 = vmax.f32 %v13302_v61, 0.0  ;;  %v25355_v41 = vpop.f32.mrb[48].mxu0 }
 0xb7a   : > { %v26769_v0 = vadd.f32 %v25355_v41, %v36533_v49  ;;  %v12328_v29 = vpop.f32.mrb[49].mxu0  ;;  %v36539_v41 = vld [vmem:[#allocation20_spill] sm:$0xff] }
 0xb7b   : > { %v13871_v54 = vmax.f32 %v13775_v10, %v13591_v42  ;;  %v13776_v15 = vmax.f32 %v13588_v11, %v13590_v17  ;;  %v26772_v2 = vadd.f32 %v12328_v29, %v36534_v9  ;;  %v25356_v3 = vpop.f32.mrb[50].mxu0  ;;  %v36538_v42 = vld [vmem:[#allocation17_spill] sm:$0xff] }
 0xb7c   : > { %v13307_v19 = vadd.f32 %v33727_v46, %v26769_v0  ;;  %v26775_v51 = vadd.f32 %v25356_v3, %v36535_v56  ;;  %v12331_v45 = vpop.f32.mrb[51].mxu0  ;;  %v29559_v3 = vld [vmem:[%s30044_s21 + $0x470] sm:$0xff]  }
 0xb7d   : > { %v13872_v59 = vmax.f32 %v13776_v15, %v13592_v48  ;;  %v13305_v25 = vadd.f32 %v33727_v46, %v26772_v2  ;;  %v26778_v32 = vadd.f32 %v12331_v45, %v36536_v37  ;;  %v29558_v15 = vld [vmem:[%s30044_s21 + $0x468] sm:$0xff]  }
 0xb7e   : > { %v13595_v43 = vmax.f32 %v13307_v19, 0.0  ;;  %v13308_v12 = vadd.f32 %v33727_v46, %v26775_v51  ;;  %25462 = vmatmul.mubr.msk.bf16.gmra.mrb[156].mxu0 %vm2876_vm0, %v29556_v50  ;;  %v36541_v45 = vld [vmem:[#allocation22_spill] sm:$0xff] }
 0xb7f   : > { %v33970_v44 = vpack.c.bf16 %v13872_v59, %v13871_v54  ;;  %v13593_v34 = vmax.f32 %v13305_v25, 0.0  ;;  %v13306_v60 = vadd.f32 %v33727_v46, %v26778_v32  ;;  %25465 = vmatprep.mubr.msk.bf16.mxu0 %vm2876_vm0, %v29557_v20  ;;  %v36540_v54 = vld [vmem:[#allocation19_spill] sm:$0xff] }
 0xb80   : > { %v13596_v27 = vmax.f32 %v13308_v12, 0.0  ;;  %v36543_v20 = vld [vmem:[#allocation23_spill] sm:$0xff] }
 0xb81   : > { %v13777_v24 = vmax.f32 %v13593_v34, %v13595_v43  ;;  %v13594_v7 = vmax.f32 %v13306_v60, 0.0  ;;  %v25359_v16 = vpop.f32.mrb[52].mxu0  ;;  %25541 = vmatprep.mubr.msk.bf16.mxu1 %vm14007_vm1, %v33970_v44  ;;  %v36542_v43 = vld [vmem:[#allocation21_spill] sm:$0xff] }
 0xb82   : > { %v26781_v61 = vadd.f32 %v25359_v16, %v36537_v30  ;;  %v12344_v40 = vpop.f32.mrb[53].mxu0  ;;  %v29074_v34 = vld [vmem:[%s36418_s3 + $0x10] sm:$0xff]  }
 0xb83   : > { %v13778_v11 = vmax.f32 %v13594_v7, %v13596_v27  ;;  %v26784_v10 = vadd.f32 %v12344_v40, %v36538_v42  ;;  %v25360_v17 = vpop.f32.mrb[54].mxu0  ;;  %25581 = vmatprep.subr.bf16.mxu1 %v29074_v34 }
 0xb84   : > { %v26787_v49 = vadd.f32 %v25360_v17, %v36539_v41  ;;  %v12347_v0 = vpop.f32.mrb[55].mxu0  ;;  %v13311_v37 = vadd.f32 %v33727_v46, %v26781_v61  ;;  %v36544_v61 = vld [vmem:[#allocation24_spill] sm:$0xff]  ;;  %25582 = vmatpush3.bf16.msra.mxu1 %v29074_v34 }
 0xb85   : > { %v13309_v29 = vadd.f32 %v33727_v46, %v26784_v10  ;;  %v26790_v48 = vadd.f32 %v12347_v0, %v36540_v54 }
 0xb86   : > { %25466 = vmatmul.mubr.msk.bf16.gmra.mrb[160].mxu0 %vm2876_vm0, %v29558_v15  ;;  %v13312_v60 = vadd.f32 %v33727_v46, %v26787_v49  ;;  %v13599_v42 = vmax.f32 %v13311_v37, 0.0  ;;  %v29561_v49 = vld [vmem:[%s30044_s21 + $0x480] sm:$0xff]  }
 0xb87   : > { %v13597_v9 = vmax.f32 %v13309_v29, 0.0  ;;  %v13310_v2 = vadd.f32 %v33727_v46, %v26790_v48  ;;  %25469 = vmatprep.mubr.msk.bf16.mxu0 %vm2876_vm0, %v29559_v3 }
 0xb88   : > { %v13600_v0 = vmax.f32 %v13312_v60, 0.0  ;;  %v36548_v60 = vld [vmem:[#allocation27_spill] sm:$0xff] }
 0xb89   : > { %v13873_v19 = vmax.f32 %v13777_v24, %v13597_v9  ;;  %v13598_v56 = vmax.f32 %v13310_v2, 0.0  ;;  %v25363_v51 = vpop.f32.mrb[56].mxu0  ;;  %v36545_v9 = vld [vmem:[#allocation26_spill] sm:$0xff] }
 0xb8a   : > { %v26793_v59 = vadd.f32 %v25363_v51, %v36541_v45  ;;  %v12360_v25 = vpop.f32.mrb[57].mxu0  ;;  %v36546_v45 = vld [vmem:[#allocation25_spill] sm:$0xff] }
 0xb8b   : > { %v13874_v32 = vmax.f32 %v13778_v11, %v13598_v56  ;;  %v26796_v12 = vadd.f32 %v12360_v25, %v36542_v43  ;;  %v25364_v50 = vpop.f32.mrb[58].mxu0  ;;  %v29560_v11 = vld [vmem:[%s30044_s21 + $0x478] sm:$0xff]  }
 0xb8c   : > { %v26799_v27 = vadd.f32 %v25364_v50, %v36543_v20  ;;  %v12363_v24 = vpop.f32.mrb[59].mxu0  ;;  %v13315_v16 = vadd.f32 %v33727_v46, %v26793_v59 }
 0xb8d   : > { %v33995_v7 = vpack.c.bf16 %v13874_v32, %v13873_v19  ;;  %v13313_v30 = vadd.f32 %v33727_v46, %v26796_v12  ;;  %v26802_v40 = vadd.f32 %v12363_v24, %v36544_v61  ;;  %v36547_v32 = vld [vmem:[#allocation28_spill] sm:$0xff] }
 0xb8e   : > { %25470 = vmatmul.mubr.msk.bf16.gmra.mrb[164].mxu0 %vm2876_vm0, %v29560_v11  ;;  %v13316_v17 = vadd.f32 %v33727_v46, %v26799_v27  ;;  %v13603_v29 = vmax.f32 %v13315_v16, 0.0  ;;  %v29562_v16 = vld [vmem:[%s30044_s21 + $0x488] sm:$0xff]   ;;  %v29563_v11 = vld [vmem:[%s30044_s21 + $0x490] sm:$0xff]  }
 0xb8f   : > { %v13601_v10 = vmax.f32 %v13313_v30, 0.0  ;;  %v13314_v41 = vadd.f32 %v33727_v46, %v26802_v40  ;;  %25542 = vmatmul.mubr.msk.bf16.gmra.mrb[80].mxu1 %vm14007_vm1, %v33995_v7  ;;  %25473 = vmatprep.mubr.msk.bf16.mxu0 %vm2876_vm0, %v29561_v49  ;;  %v36549_v49 = vld [vmem:[#allocation30_spill] sm:$0xff] }
 0xb90   : > { %v13604_v56 = vmax.f32 %v13316_v17, 0.0 }
 0xb91   : > { %v13779_v54 = vmax.f32 %v13599_v42, %v13601_v10  ;;  %v13602_v48 = vmax.f32 %v13314_v41, 0.0  ;;  %v25367_v15 = vpop.f32.mrb[60].mxu0 }
 0xb92   : > { %v26805_v2 = vadd.f32 %v25367_v15, %v36545_v9  ;;  %v12376_v3 = vpop.f32.mrb[61].mxu0 }
 0xb93   : > { %v13875_v19 = vmax.f32 %v13779_v54, %v13603_v29  ;;  %v13780_v51 = vmax.f32 %v13600_v0, %v13602_v48  ;;  %v26808_v59 = vadd.f32 %v12376_v3, %v36546_v45  ;;  %v25368_v25 = vpop.f32.mrb[62].mxu0  ;;  %v36550_v48 = vld [vmem:[#allocation29_spill] sm:$0xff] }
 0xb94   : > { %v13319_v37 = vadd.f32 %v33727_v46, %v26805_v2  ;;  %v26811_v43 = vadd.f32 %v25368_v25, %v36547_v32  ;;  %v12379_v12 = vpop.f32.mrb[63].mxu0  ;;  %v36551_v2 = vld [vmem:[#allocation31_spill] sm:$0xff] }
 0xb95   : > { %v13876_v50 = vmax.f32 %v13780_v51, %v13604_v56  ;;  %v13317_v34 = vadd.f32 %v33727_v46, %v26808_v59  ;;  %v26814_v20 = vadd.f32 %v12379_v12, %v36548_v60  ;;  %v36552_v51 = vld [vmem:[#allocation33_spill] sm:$0xff]  ;;  %v29564_v59 = vld [vmem:[%s30044_s21 + $0x498] sm:$0xff]  }
 0xb96   : > { %v13607_v27 = vmax.f32 %v13319_v37, 0.0  ;;  %v13320_v24 = vadd.f32 %v33727_v46, %v26811_v43  ;;  %25474 = vmatmul.mubr.msk.bf16.gmra.mrb[168].mxu0 %vm2876_vm0, %v29562_v16  ;;  %v29565_v32 = vld [vmem:[%s30044_s21 + $0x4a0] sm:$0xff]  }
 0xb97   : > { %v34017_v30 = vpack.c.bf16 %v13876_v50, %v13875_v19  ;;  %v13605_v61 = vmax.f32 %v13317_v34, 0.0  ;;  %v13318_v40 = vadd.f32 %v33727_v46, %v26814_v20  ;;  %25477 = vmatprep.mubr.msk.bf16.mxu0 %vm2876_vm0, %v29563_v11  ;;  %v36553_v34 = vld [vmem:[#allocation32_spill] sm:$0xff] }
 0xb98   : > { %v13608_v42 = vmax.f32 %v13320_v24, 0.0 }
 0xb99   : > { %v13781_v10 = vmax.f32 %v13605_v61, %v13607_v27  ;;  %v13606_v17 = vmax.f32 %v13318_v40, 0.0  ;;  %v25371_v41 = vpop.f32.mrb[64].mxu0  ;;  %25545 = vmatprep.mubr.msk.bf16.mxu1 %vm14007_vm1, %v34017_v30  ;;  %v29071_v27 = vld [vmem:[%s30044_s21 + $0x4a8] sm:$0xff]   ;;  %v36554_v61 = vld [vmem:[#allocation35_spill] sm:$0xff] }
 0xb9a   : > { %v26817_v0 = vadd.f32 %v36549_v49, %v25371_v41  ;;  %v12392_v29 = vpop.f32.mrb[65].mxu0 }
 0xb9b   : > { %v13782_v54 = vmax.f32 %v13606_v17, %v13608_v42  ;;  %v26820_v15 = vadd.f32 %v36550_v48, %v12392_v29  ;;  %v25372_v9 = vpop.f32.mrb[66].mxu0  ;;  %v36555_v17 = vld [vmem:[#allocation34_spill] sm:$0xff] }
 0xb9c   : > { %v26823_v3 = vadd.f32 %v36551_v2, %v25372_v9  ;;  %v12395_v19 = vpop.f32.mrb[67].mxu0  ;;  %v13323_v24 = vadd.f32 %v33727_v46, %v26817_v0 }
 0xb9d   : > { %v13321_v56 = vadd.f32 %v33727_v46, %v26820_v15  ;;  %v26826_v45 = vadd.f32 %v36552_v51, %v12395_v19  ;;  %v36556_v15 = vld [vmem:[#allocation37_spill] sm:$0xff] }
 0xb9e   : > { %25478 = vmatmul.mubr.msk.bf16.gmra.mrb[172].mxu0 %vm2876_vm0, %v29564_v59  ;;  %v13324_v42 = vadd.f32 %v33727_v46, %v26823_v3  ;;  %v13611_v0 = vmax.f32 %v13323_v24, 0.0  ;;  %v36559_v24 = vld [vmem:[#allocation39_spill] sm:$0xff] }
 0xb9f   : > { %v13609_v25 = vmax.f32 %v13321_v56, 0.0  ;;  %v13322_v37 = vadd.f32 %v33727_v46, %v26826_v45  ;;  %25481 = vmatprep.mubr.msk.bf16.mxu0 %vm2876_vm0, %v29565_v32 }
 0xba0   : > { %v13612_v3 = vmax.f32 %v13324_v42, 0.0  ;;  %v36560_v42 = vld [vmem:[#allocation41_spill] sm:$0xff] }
 0xba1   : > { %v13877_v43 = vmax.f32 %v13781_v10, %v13609_v25  ;;  %v13610_v12 = vmax.f32 %v13322_v37, 0.0  ;;  %v25375_v50 = vpop.f32.mrb[68].mxu0  ;;  %v36557_v25 = vld [vmem:[#allocation36_spill] sm:$0xff] }
 0xba2   : > { %v26829_v60 = vadd.f32 %v36553_v34, %v25375_v50  ;;  %v12408_v20 = vpop.f32.mrb[69].mxu0  ;;  %v36558_v34 = vld [vmem:[#allocation38_spill] sm:$0xff] }
 0xba3   : > { %v13878_v16 = vmax.f32 %v13782_v54, %v13610_v12  ;;  %v26832_v40 = vadd.f32 %v36554_v61, %v12408_v20  ;;  %v25376_v11 = vpop.f32.mrb[70].mxu0 }
 0xba4   : > { %v26835_v41 = vadd.f32 %v36555_v17, %v25376_v11  ;;  %v12411_v49 = vpop.f32.mrb[71].mxu0  ;;  %v13327_v10 = vadd.f32 %v33727_v46, %v26829_v60 }
 0xba5   : > { %v34040_v29 = vpack.c.bf16 %v13878_v16, %v13877_v43  ;;  %v13325_v48 = vadd.f32 %v33727_v46, %v26832_v40  ;;  %v26838_v9 = vadd.f32 %v36556_v15, %v12411_v49 }
 0xba6   : > { %25482 = vmatmul.mubr.msk.bf16.gmra.mrb[176].mxu0 %vm2876_vm0, %v29071_v27  ;;  %v13328_v2 = vadd.f32 %v33727_v46, %v26835_v41  ;;  %v13615_v56 = vmax.f32 %v13327_v10, 0.0 }
 0xba7   : > { %v13613_v54 = vmax.f32 %v13325_v48, 0.0  ;;  %v13326_v19 = vadd.f32 %v33727_v46, %v26838_v9  ;;  %25546 = vmatmul.mubr.msk.bf16.gmra.mrb[84].mxu1 %vm14007_vm1, %v34040_v29 }
 0xba8   : > { %v13616_v12 = vmax.f32 %v13328_v2, 0.0 }
 0xba9   : > { %v13783_v51 = vmax.f32 %v13611_v0, %v13613_v54  ;;  %v13614_v45 = vmax.f32 %v13326_v19, 0.0  ;;  %v25379_v59 = vpop.f32.mrb[180].mxu0  ;;  %v36561_v19 = vld [vmem:[#allocation198_spill] sm:$0xff] }
 0xbaa   : > { %v26839_v37 = vadd.f32 %v25379_v59, %v36557_v25  ;;  %v12424_v32 = vpop.f32.mrb[181].mxu0 }
 0xbab   : > { %v13879_v43 = vmax.f32 %v13783_v51, %v13615_v56  ;;  %v13784_v50 = vmax.f32 %v13612_v3, %v13614_v45  ;;  %v26840_v60 = vadd.f32 %v12424_v32, %v36558_v34  ;;  %v25380_v20 = vpop.f32.mrb[182].mxu0  ;;  %v36562_v45 = vld [vmem:[#allocation199_spill] sm:$0xff] }
 0xbac   : > { %v13331_v27 = vadd.f32 %v33727_v46, %v26839_v37  ;;  %v26841_v16 = vadd.f32 %v25380_v20, %v36559_v24  ;;  %v12427_v61 = vpop.f32.mrb[183].mxu0  ;;  %v36563_v37 = vld [vmem:[#allocation189_spill] sm:$0xff] }
 0xbad   : > { %v13880_v40 = vmax.f32 %v13784_v50, %v13616_v12  ;;  %v13329_v11 = vadd.f32 %v33727_v46, %v26840_v60  ;;  %v26842_v17 = vadd.f32 %v12427_v61, %v36560_v42  ;;  %v36564_v50 = vld [vmem:[#allocation194_spill] sm:$0xff] }
 0xbae   : > { %v13619_v41 = vmax.f32 %v13331_v27, 0.0  ;;  %v13332_v49 = vadd.f32 %v33727_v46, %v26841_v16  ;;  %v29075_v60 = vld [vmem:[%s36418_s3 + $0x18] sm:$0xff]   ;;  %v34073_v27 = vld [vmem:[%s36419_s26] ss:$0 sm:$0xff] }
 0xbaf   : > { %v34057_v10 = vpack.c.bf16 %v13880_v40, %v13879_v43  ;;  %v13617_v48 = vmax.f32 %v13329_v11, 0.0  ;;  %v13330_v15 = vadd.f32 %v33727_v46, %v26842_v17  ;;  %25583 = vmatprep.subr.bf16.mxu1 %v29075_v60 }
 0xbb0   : > { %v13620_v9 = vmax.f32 %v13332_v49, 0.0  ;;  %25584 = vmatpush3.bf16.msra.mxu1 %v29075_v60  ;;  %v36566_v49 = vld [vmem:[#allocation212_spill] sm:$0xff] }
 0xbb1   : > { %v13785_v0 = vmax.f32 %v13617_v48, %v13619_v41  ;;  %v13618_v54 = vmax.f32 %v13330_v15, 0.0  ;;  %v25383_v2 = vpop.f32.mrb[188].mxu0  ;;  %25549 = vmatprep.mubr.msk.bf16.mxu1 %vm14007_vm1, %v34057_v10 }
 0xbb2   : > { %v26844_v3 = vadd.f32 %v36561_v19, %v25383_v2  ;;  %v12440_v56 = vpop.f32.mrb[189].mxu0 }
 0xbb3   : > { %v13786_v51 = vmax.f32 %v13618_v54, %v13620_v9  ;;  %v26846_v59 = vadd.f32 %v36562_v45, %v12440_v56  ;;  %v25384_v25 = vpop.f32.mrb[190].mxu0  ;;  %v36567_v54 = vld [vmem:[#allocation213_spill] sm:$0xff] }
 0xbb4   : > { %v26848_v32 = vadd.f32 %v36563_v37, %v25384_v25  ;;  %v12443_v43 = vpop.f32.mrb[191].mxu0  ;;  %v13335_v17 = vadd.f32 %v34073_v27, %v26844_v3 }
 0xbb5   : > { %v13333_v12 = vadd.f32 %v33727_v46, %v26846_v59  ;;  %v26850_v34 = vadd.f32 %v36564_v50, %v12443_v43  ;;  %v36565_v46 = vld [vmem:[#allocation207_spill] sm:$0xff]  ;;  %v36568_v59 = vld [vmem:[#allocation218_spill] sm:$0xff] }
 0xbb6   : > { %v13336_v9 = vadd.f32 %v34073_v27, %v26848_v32  ;;  %v13623_v37 = vmax.f32 %v13335_v17, 0.0 }
 0xbb7   : > { %v13621_v20 = vmax.f32 %v13333_v12, 0.0  ;;  %v13334_v24 = vadd.f32 %v34073_v27, %v26850_v34 }
 0xbb8   : > { %v13624_v32 = vmax.f32 %v13336_v9, 0.0 }
 0xbb9   : > { %v13881_v16 = vmax.f32 %v13785_v0, %v13621_v20  ;;  %v13622_v61 = vmax.f32 %v13334_v24, 0.0  ;;  %v25387_v40 = vpop.f32.mrb[192].mxu0  ;;  %v36569_v20 = vld [vmem:[#allocation40_spill] sm:$0xff] }
 0xbba   : > { %v26852_v11 = vadd.f32 %v36565_v46, %v25387_v40  ;;  %v12456_v42 = vpop.f32.mrb[193].mxu0 }
 0xbbb   : > { %v13882_v41 = vmax.f32 %v13786_v51, %v13622_v61  ;;  %v26854_v48 = vadd.f32 %v36566_v49, %v12456_v42  ;;  %v25388_v15 = vpop.f32.mrb[194].mxu0  ;;  %v36571_v49 = vld [vmem:[#allocation47_spill] sm:$0xff] }
 0xbbc   : > { %v26856_v2 = vadd.f32 %v36567_v54, %v25388_v15  ;;  %v12459_v19 = vpop.f32.mrb[195].mxu0  ;;  %v13339_v0 = vadd.f32 %v34073_v27, %v26852_v11  ;;  %v36570_v11 = vld [vmem:[#allocation43_spill] sm:$0xff] }
 0xbbd   : > { %v34081_v56 = vpack.c.bf16 %v13882_v41, %v13881_v16  ;;  %v13337_v45 = vadd.f32 %v34073_v27, %v26854_v48  ;;  %v26858_v25 = vadd.f32 %v36568_v59, %v12459_v19 }
 0xbbe   : > { %v13340_v3 = vadd.f32 %v34073_v27, %v26856_v2  ;;  %v13627_v12 = vmax.f32 %v13339_v0, 0.0  ;;  %v36572_v2 = vld [vmem:[#allocation48_spill] sm:$0xff] }
 0xbbf   : > { %v13625_v43 = vmax.f32 %v13337_v45, 0.0  ;;  %v13338_v51 = vadd.f32 %v34073_v27, %v26858_v25  ;;  %25550 = vmatmul.mubr.msk.bf16.gmra.mrb[88].mxu1 %vm14007_vm1, %v34081_v56 }
 0xbc0   : > { %v13628_v40 = vmax.f32 %v13340_v3, 0.0 }
 0xbc1   : > { %v13787_v50 = vmax.f32 %v13623_v37, %v13625_v43  ;;  %v13626_v34 = vmax.f32 %v13338_v51, 0.0  ;;  %v25391_v60 = vpop.f32.mrb[196].mxu0 }
 0xbc2   : > { %v26860_v24 = vadd.f32 %v36569_v20, %v25391_v60  ;;  %v12472_v16 = vpop.f32.mrb[197].mxu0  ;;  %v36574_v20 = vld [vmem:[#allocation233_spill] sm:$0xff] }
 0xbc3   : > { %v13883_v61 = vmax.f32 %v13787_v50, %v13627_v12  ;;  %v13788_v46 = vmax.f32 %v13624_v32, %v13626_v34  ;;  %v26862_v42 = vadd.f32 %v36570_v11, %v12472_v16  ;;  %v25392_v17 = vpop.f32.mrb[198].mxu0  ;;  %v36573_v12 = vld [vmem:[#allocation232_spill] sm:$0xff] }
 0xbc4   : > { %v13343_v41 = vadd.f32 %v34073_v27, %v26860_v24  ;;  %v26864_v48 = vadd.f32 %v36571_v49, %v25392_v17  ;;  %v12475_v15 = vpop.f32.mrb[199].mxu0 }
 0xbc5   : > { %v13884_v54 = vmax.f32 %v13788_v46, %v13628_v40  ;;  %v13341_v9 = vadd.f32 %v34073_v27, %v26862_v42  ;;  %v26866_v19 = vadd.f32 %v36572_v2, %v12475_v15  ;;  %v36575_v40 = vld [vmem:[#allocation238_spill] sm:$0xff]  ;;  %v36576_v42 = vld [vmem:[#allocation239_spill] sm:$0xff] }
 0xbc6   : > { %v13631_v0 = vmax.f32 %v13343_v41, 0.0  ;;  %v13344_v45 = vadd.f32 %v34073_v27, %v26864_v48 }
 0xbc7   : > { %v34097_v59 = vpack.c.bf16 %v13884_v54, %v13883_v61  ;;  %v13629_v25 = vmax.f32 %v13341_v9, 0.0  ;;  %v13342_v37 = vadd.f32 %v34073_v27, %v26866_v19  ;;  %v36577_v9 = vld [vmem:[#allocation256_spill] sm:$0xff] }
 0xbc8   : > { %v13632_v43 = vmax.f32 %v13344_v45, 0.0 }
 0xbc9   : > { %v13789_v3 = vmax.f32 %v13629_v25, %v13631_v0  ;;  %v13630_v51 = vmax.f32 %v13342_v37, 0.0  ;;  %v25395_v32 = vpop.f32.mrb[200].mxu0  ;;  %25553 = vmatprep.mubr.msk.bf16.mxu1 %vm14007_vm1, %v34097_v59  ;;  %v36578_v25 = vld [vmem:[#allocation257_spill] sm:$0xff] }
 0xbca   : > { %v26868_v50 = vadd.f32 %v36573_v12, %v25395_v32  ;;  %v12488_v34 = vpop.f32.mrb[201].mxu0  ;;  %v36579_v32 = vld [vmem:[#allocation262_spill] sm:$0xff] }
 0xbcb   : > { %v13790_v60 = vmax.f32 %v13630_v51, %v13632_v43  ;;  %v26870_v24 = vadd.f32 %v36574_v20, %v12488_v34  ;;  %v25396_v16 = vpop.f32.mrb[202].mxu0 }
 0xbcc   : > { %v26872_v61 = vadd.f32 %v36575_v40, %v25396_v16  ;;  %v12491_v46 = vpop.f32.mrb[203].mxu0  ;;  %v13347_v0 = vadd.f32 %v34073_v27, %v26868_v50  ;;  %v36580_v16 = vld [vmem:[#allocation263_spill] sm:$0xff] }
 0xbcd   : > { %v13345_v11 = vadd.f32 %v34073_v27, %v26870_v24  ;;  %v26874_v17 = vadd.f32 %v36576_v42, %v12491_v46 }
 0xbce   : > { %v13348_v51 = vadd.f32 %v34073_v27, %v26872_v61  ;;  %v13635_v46 = vmax.f32 %v13347_v0, 0.0  ;;  %v36582_v0 = vld [vmem:[#allocation293_spill] sm:$0xff] }
 0xbcf   : > { %v13633_v41 = vmax.f32 %v13345_v11, 0.0  ;;  %v13346_v49 = vadd.f32 %v34073_v27, %v26874_v17 }
 0xbd0   : > { %v13636_v61 = vmax.f32 %v13348_v51, 0.0  ;;  %v36583_v51 = vld [vmem:[#allocation294_spill] sm:$0xff] }
 0xbd1   : > { %v13885_v48 = vmax.f32 %v13789_v3, %v13633_v41  ;;  %v13634_v15 = vmax.f32 %v13346_v49, 0.0  ;;  %v25399_v54 = vpop.f32.mrb[204].mxu0 }
 0xbd2   : > { %v26876_v2 = vadd.f32 %v36577_v9, %v25399_v54  ;;  %v12504_v19 = vpop.f32.mrb[205].mxu0 }
 0xbd3   : > { %v13886_v45 = vmax.f32 %v13790_v60, %v13634_v15  ;;  %v26878_v37 = vadd.f32 %v36578_v25, %v12504_v19  ;;  %v25400_v43 = vpop.f32.mrb[206].mxu0 }
 0xbd4   : > { %v26880_v12 = vadd.f32 %v36579_v32, %v25400_v43  ;;  %v12507_v34 = vpop.f32.mrb[207].mxu0  ;;  %v13351_v3 = vadd.f32 %v34073_v27, %v26876_v2 }
 0xbd5   : > { %v34113_v20 = vpack.c.bf16 %v13886_v45, %v13885_v48  ;;  %v13349_v24 = vadd.f32 %v34073_v27, %v26878_v37  ;;  %v26882_v40 = vadd.f32 %v36580_v16, %v12507_v34  ;;  %v36581_v48 = vld [vmem:[#allocation280_spill] sm:$0xff]  ;;  %v34127_v37 = vld [vmem:[%s36418_s3 + $0x40] sm:$0xff]  }
 0xbd6   : > { %v13352_v50 = vadd.f32 %v34073_v27, %v26880_v12  ;;  %v13639_v42 = vmax.f32 %v13351_v3, 0.0  ;;  %25669 = vmatprep.subr.bf16.mxu1 %v34127_v37 }
 0xbd7   : > { %v13637_v11 = vmax.f32 %v13349_v24, 0.0  ;;  %v13350_v60 = vadd.f32 %v34073_v27, %v26882_v40  ;;  %25554 = vmatmul.mubr.msk.bf16.gmra.mrb[92].mxu1 %vm14007_vm1, %v34113_v20  ;;  %v36584_v24 = vld [vmem:[#allocation295_spill] sm:$0xff] }
 0xbd8   : > { %v13640_v2 = vmax.f32 %v13352_v50, 0.0 }
 0xbd9   : > { %v13791_v17 = vmax.f32 %v13635_v46, %v13637_v11  ;;  %v13638_v41 = vmax.f32 %v13350_v60, 0.0  ;;  %v25403_v49 = vpop.f32.mrb[28].mxu0 }
 0xbda   : > { %v26884_v15 = vadd.f32 %v36581_v48, %v25403_v49  ;;  %v12520_v54 = vpop.f32.mrb[29].mxu0  ;;  %v36585_v49 = vld [vmem:[#allocation246_spill] sm:$0xff] }
 0xbdb   : > { %v13887_v9 = vmax.f32 %v13791_v17, %v13639_v42  ;;  %v13792_v19 = vmax.f32 %v13636_v61, %v13638_v41  ;;  %v26886_v45 = vadd.f32 %v36582_v0, %v12520_v54  ;;  %v25404_v25 = vpop.f32.mrb[30].mxu0 }
 0xbdc   : > { %v13355_v43 = vadd.f32 %v34073_v27, %v26884_v15  ;;  %v26888_v32 = vadd.f32 %v36583_v51, %v25404_v25  ;;  %v12523_v12 = vpop.f32.mrb[31].mxu0  ;;  %v36588_v51 = vld [vmem:[#allocation249_spill] sm:$0xff] }
 0xbdd   : > { %v13888_v34 = vmax.f32 %v13792_v19, %v13640_v2  ;;  %v13353_v3 = vadd.f32 %v34073_v27, %v26886_v45  ;;  %v26890_v16 = vadd.f32 %v36584_v24, %v12523_v12  ;;  %v36586_v2 = vld [vmem:[#allocation247_spill] sm:$0xff]  ;;  %v36587_v45 = vld [vmem:[#allocation248_spill] sm:$0xff] }
 0xbde   : > { %v13643_v40 = vmax.f32 %v13355_v43, 0.0  ;;  %v13356_v46 = vadd.f32 %v34073_v27, %v26888_v32 }
 0xbdf   : > { %v34135_v11 = vpack.c.bf16 %v13888_v34, %v13887_v9  ;;  %v13641_v50 = vmax.f32 %v13353_v3, 0.0  ;;  %v13354_v60 = vadd.f32 %v34073_v27, %v26890_v16 }
 0xbe0   : > { %v13644_v61 = vmax.f32 %v13356_v46, 0.0 }
 0xbe1   : > { %v13793_v42 = vmax.f32 %v13641_v50, %v13643_v40  ;;  %v13642_v17 = vmax.f32 %v13354_v60, 0.0  ;;  %v25407_v41 = vpop.f32.mrb[208].mxu0  ;;  %25557 = vmatprep.mubr.msk.bf16.mxu1 %vm14007_vm1, %v34135_v11  ;;  %v36589_v40 = vld [vmem:[#allocation252_spill] sm:$0xff] }
 0xbe2   : > { %v26891_v48 = vadd.f32 %v25407_v41, %v36585_v49  ;;  %v12536_v15 = vpop.f32.mrb[209].mxu0 }
 0xbe3   : > { %v13794_v54 = vmax.f32 %v13642_v17, %v13644_v61  ;;  %v26892_v19 = vadd.f32 %v12536_v15, %v36586_v2  ;;  %v25408_v0 = vpop.f32.mrb[210].mxu0  ;;  %v36590_v17 = vld [vmem:[#allocation253_spill] sm:$0xff]  ;;  %v36591_v2 = vld [vmem:[#allocation254_spill] sm:$0xff] }
 0xbe4   : > { %v26893_v9 = vadd.f32 %v25408_v0, %v36587_v45  ;;  %v12539_v25 = vpop.f32.mrb[211].mxu0  ;;  %v13359_v60 = vadd.f32 %v34073_v27, %v26891_v48 }
 0xbe5   : > { %v13357_v43 = vadd.f32 %v34073_v27, %v26892_v19  ;;  %v26894_v32 = vadd.f32 %v12539_v25, %v36588_v51 }
 0xbe6   : > { %v13360_v15 = vadd.f32 %v34073_v27, %v26893_v9 }
 0xbe7   : > { %v13645_v12 = vmax.f32 %v13357_v43, 0.0  ;;  %v13358_v34 = vadd.f32 %v34073_v27, %v26894_v32  ;;  %v36592_v43 = vld [vmem:[#allocation255_spill] sm:$0xff]  ;;  %v13647_v32 = vmax.f32 %v13359_v60, 0.0 }
 0xbe8   : > { %v13648_v9 = vmax.f32 %v13360_v15, 0.0  ;;  %v36594_v60 = vld [vmem:[#allocation259_spill] sm:$0xff] }
 0xbe9   : > { %v13889_v3 = vmax.f32 %v13793_v42, %v13645_v12  ;;  %v13646_v24 = vmax.f32 %v13358_v34, 0.0  ;;  %v25411_v16 = vpop.f32.mrb[212].mxu0 }
 0xbea   : > { %v26895_v46 = vadd.f32 %v25411_v16, %v36589_v40  ;;  %v12552_v50 = vpop.f32.mrb[213].mxu0  ;;  %v36593_v40 = vld [vmem:[#allocation258_spill] sm:$0xff] }
 0xbeb   : > { %v13890_v61 = vmax.f32 %v13794_v54, %v13646_v24  ;;  %v26896_v41 = vadd.f32 %v12552_v50, %v36590_v17  ;;  %v25412_v49 = vpop.f32.mrb[214].mxu0 }
 0xbec   : > { %v26897_v19 = vadd.f32 %v25412_v49, %v36591_v2  ;;  %v12555_v0 = vpop.f32.mrb[215].mxu0  ;;  %v13363_v42 = vadd.f32 %v34073_v27, %v26895_v46 }
 0xbed   : > { %v34151_v45 = vpack.c.bf16 %v13890_v61, %v13889_v3  ;;  %v13361_v25 = vadd.f32 %v34073_v27, %v26896_v41  ;;  %v26898_v51 = vadd.f32 %v12555_v0, %v36592_v43  ;;  %v36595_v0 = vld [vmem:[#allocation260_spill] sm:$0xff] }
 0xbee   : > { %v13364_v48 = vadd.f32 %v34073_v27, %v26897_v19  ;;  %v13651_v34 = vmax.f32 %v13363_v42, 0.0  ;;  %v36596_v42 = vld [vmem:[#allocation261_spill] sm:$0xff] }
 0xbef   : > { %v13649_v12 = vmax.f32 %v13361_v25, 0.0  ;;  %v13362_v54 = vadd.f32 %v34073_v27, %v26898_v51  ;;  %25558 = vmatmul.mubr.msk.bf16.gmra.mrb[96].mxu1 %vm14007_vm1, %v34151_v45 }
 0xbf0   : > { %v13652_v17 = vmax.f32 %v13364_v48, 0.0 }
 0xbf1   : > { %v13795_v24 = vmax.f32 %v13647_v32, %v13649_v12  ;;  %v13650_v3 = vmax.f32 %v13362_v54, 0.0  ;;  %v25415_v16 = vpop.f32.mrb[216].mxu0 }
 0xbf2   : > { %v26899_v46 = vadd.f32 %v25415_v16, %v36593_v40  ;;  %v12568_v50 = vpop.f32.mrb[217].mxu0 }
 0xbf3   : > { %v13891_v61 = vmax.f32 %v13795_v24, %v13651_v34  ;;  %v13796_v41 = vmax.f32 %v13648_v9, %v13650_v3  ;;  %v26900_v49 = vadd.f32 %v12568_v50, %v36594_v60  ;;  %v25416_v2 = vpop.f32.mrb[218].mxu0  ;;  %v36598_v60 = vld [vmem:[#allocation265_spill] sm:$0xff] }
 0xbf4   : > { %v13367_v19 = vadd.f32 %v34073_v27, %v26899_v46  ;;  %v26901_v25 = vadd.f32 %v25416_v2, %v36595_v0  ;;  %v12571_v43 = vpop.f32.mrb[219].mxu0  ;;  %v36597_v46 = vld [vmem:[#allocation264_spill] sm:$0xff] }
 0xbf5   : > { %v13892_v51 = vmax.f32 %v13796_v41, %v13652_v17  ;;  %v13365_v15 = vadd.f32 %v34073_v27, %v26900_v49  ;;  %v26902_v32 = vadd.f32 %v12571_v43, %v36596_v42  ;;  %v36600_v43 = vld [vmem:[#allocation267_spill] sm:$0xff] }
 0xbf6   : > { %v13655_v12 = vmax.f32 %v13367_v19, 0.0  ;;  %v13368_v54 = vadd.f32 %v34073_v27, %v26901_v25  ;;  %v36599_v19 = vld [vmem:[#allocation266_spill] sm:$0xff] }
 0xbf7   : > { %v34167_v16 = vpack.c.bf16 %v13892_v51, %v13891_v61  ;;  %v13653_v48 = vmax.f32 %v13365_v15, 0.0  ;;  %v13366_v9 = vadd.f32 %v34073_v27, %v26902_v32 }
 0xbf8   : > { %v13656_v34 = vmax.f32 %v13368_v54, 0.0 }
 0xbf9   : > { %v13797_v24 = vmax.f32 %v13653_v48, %v13655_v12  ;;  %v13654_v3 = vmax.f32 %v13366_v9, 0.0  ;;  %v25419_v40 = vpop.f32.mrb[112].mxu0  ;;  %25561 = vmatprep.mubr.msk.bf16.mxu1 %vm14007_vm1, %v34167_v16  ;;  %v36601_v48 = vld [vmem:[#allocation270_spill] sm:$0xff] }
 0xbfa   : > { %v26904_v50 = vadd.f32 %v36597_v46, %v25419_v40  ;;  %v12584_v17 = vpop.f32.mrb[113].mxu0  ;;  %v36602_v46 = vld [vmem:[#allocation271_spill] sm:$0xff] }
 0xbfb   : > { %v13798_v41 = vmax.f32 %v13654_v3, %v13656_v34  ;;  %v26906_v49 = vadd.f32 %v36598_v60, %v12584_v17  ;;  %v25420_v2 = vpop.f32.mrb[114].mxu0 }
 0xbfc   : > { %v26908_v61 = vadd.f32 %v36599_v19, %v25420_v2  ;;  %v12587_v0 = vpop.f32.mrb[115].mxu0  ;;  %v13371_v34 = vadd.f32 %v34073_v27, %v26904_v50 }
 0xbfd   : > { %v13369_v25 = vadd.f32 %v34073_v27, %v26906_v49  ;;  %v26910_v51 = vadd.f32 %v36600_v43, %v12587_v0  ;;  %v36603_v49 = vld [vmem:[#allocation272_spill] sm:$0xff] }
 0xbfe   : > { %v13372_v2 = vadd.f32 %v34073_v27, %v26908_v61 }
 0xbff   : > { %v13657_v15 = vmax.f32 %v13369_v25, 0.0  ;;  %v13370_v42 = vadd.f32 %v34073_v27, %v26910_v51  ;;  %v36605_v51 = vld [vmem:[#allocation273_spill] sm:$0xff] }
 0xc00   : > { %v13660_v61 = vmax.f32 %v13372_v2, 0.0 }
 0xc01   : > { %v13893_v32 = vmax.f32 %v13797_v24, %v13657_v15  ;;  %v13658_v12 = vmax.f32 %v13370_v42, 0.0  ;;  %v25423_v54 = vpop.f32.mrb[116].mxu0  ;;  %v13659_v42 = vmax.f32 %v13371_v34, 0.0  ;;  %v36607_v34 = vld [vmem:[#allocation277_spill] sm:$0xff] }
 0xc02   : > { %v26912_v9 = vadd.f32 %v36601_v48, %v25423_v54  ;;  %v12600_v40 = vpop.f32.mrb[117].mxu0 }
 0xc03   : > { %v13894_v3 = vmax.f32 %v13798_v41, %v13658_v12  ;;  %v26914_v17 = vadd.f32 %v36602_v46, %v12600_v40  ;;  %v25424_v60 = vpop.f32.mrb[118].mxu0 }
 0xc04   : > { %v26916_v19 = vadd.f32 %v36603_v49, %v25424_v60  ;;  %v12603_v0 = vpop.f32.mrb[119].mxu0  ;;  %v13375_v24 = vadd.f32 %v34073_v27, %v26912_v9 }
 0xc05   : > { %v34183_v25 = vpack.c.bf16 %v13894_v3, %v13893_v32  ;;  %v13373_v43 = vadd.f32 %v34073_v27, %v26914_v17  ;;  %v26918_v15 = vadd.f32 %v36605_v51, %v12603_v0  ;;  %v36606_v3 = vld [vmem:[#allocation276_spill] sm:$0xff]  ;;  %v36608_v51 = vld [vmem:[#allocation278_spill] sm:$0xff] }
 0xc06   : > { %v13376_v50 = vadd.f32 %v34073_v27, %v26916_v19  ;;  %v13663_v12 = vmax.f32 %v13375_v24, 0.0  ;;  %v36609_v24 = vld [vmem:[#allocation279_spill] sm:$0xff] }
 0xc07   : > { %36604 = vst [vmem:[#allocation58_spill] sm:$0xff] %v34183_v25  ;;  %v13661_v54 = vmax.f32 %v13373_v43, 0.0  ;;  %v13374_v41 = vadd.f32 %v34073_v27, %v26918_v15  ;;  %25562 = vmatmul.mubr.msk.bf16.gmra.mrb[100].mxu1 %vm14007_vm1, %v34183_v25 }
 0xc08   : > { %v13664_v60 = vmax.f32 %v13376_v50, 0.0 }
 0xc09   : > { %v13799_v48 = vmax.f32 %v13659_v42, %v13661_v54  ;;  %v13662_v32 = vmax.f32 %v13374_v41, 0.0  ;;  %v25427_v40 = vpop.f32.mrb[120].mxu0 }
 0xc0a   : > { %v26920_v9 = vadd.f32 %v36606_v3, %v25427_v40  ;;  %v12616_v46 = vpop.f32.mrb[121].mxu0 }
 0xc0b   : > { %v13895_v17 = vmax.f32 %v13799_v48, %v13663_v12  ;;  %v13800_v49 = vmax.f32 %v13660_v61, %v13662_v32  ;;  %v26922_v0 = vadd.f32 %v36607_v34, %v12616_v46  ;;  %v25428_v43 = vpop.f32.mrb[122].mxu0 }
 0xc0c   : > { %v13379_v19 = vadd.f32 %v34073_v27, %v26920_v9  ;;  %v26924_v15 = vadd.f32 %v36608_v51, %v25428_v43  ;;  %v12619_v23 = vpop.f32.mrb[123].mxu0  ;;  %v36611_v9 = vld [vmem:[#allocation281_spill] sm:$0xff]  ;;  %v36613_v43 = vld [vmem:[#allocation283_spill] sm:$0xff]  ;;  %v36614_v51 = vld [vmem:[#allocation284_spill] sm:$0xff] }
 0xc0d   : > { %v13896_v25 = vmax.f32 %v13800_v49, %v13664_v60  ;;  %v13377_v2 = vadd.f32 %v34073_v27, %v26922_v0  ;;  %v26926_v42 = vadd.f32 %v36609_v24, %v12619_v23  ;;  %v36612_v23 = vld [vmem:[#allocation282_spill] sm:$0xff] }
 0xc0e   : > { %v13667_v54 = vmax.f32 %v13379_v19, 0.0  ;;  %v13380_v41 = vadd.f32 %v34073_v27, %v26924_v15 }
 0xc0f   : > { %v34199_v40 = vpack.c.bf16 %v13896_v25, %v13895_v17  ;;  %v13665_v50 = vmax.f32 %v13377_v2, 0.0  ;;  %v13378_v61 = vadd.f32 %v34073_v27, %v26926_v42 }
 0xc10   : > { %v13668_v12 = vmax.f32 %v13380_v41, 0.0 }
 0xc11   : > { %36610 = vst [vmem:[#allocation59_spill] sm:$0xff] %v34199_v40  ;;  %v13801_v48 = vmax.f32 %v13665_v50, %v13667_v54  ;;  %v13666_v32 = vmax.f32 %v13378_v61, 0.0  ;;  %v25431_v3 = vpop.f32.mrb[124].mxu0  ;;  %25565 = vmatprep.mubr.msk.bf16.mxu1 %vm14007_vm1, %v34199_v40  ;;  %v36615_v50 = vld [vmem:[#allocation285_spill] sm:$0xff] }
 0xc12   : > { %v26928_v46 = vadd.f32 %v36611_v9, %v25431_v3  ;;  %v12632_v60 = vpop.f32.mrb[125].mxu0  ;;  %v36616_v9 = vld [vmem:[#allocation286_spill] sm:$0xff] }
 0xc13   : > { %v13802_v49 = vmax.f32 %v13666_v32, %v13668_v12  ;;  %v26930_v34 = vadd.f32 %v36612_v23, %v12632_v60  ;;  %v25432_v0 = vpop.f32.mrb[126].mxu0 }
 0xc14   : > { %v26932_v25 = vadd.f32 %v36613_v43, %v25432_v0  ;;  %v12635_v17 = vpop.f32.mrb[127].mxu0  ;;  %v13383_v12 = vadd.f32 %v34073_v27, %v26928_v46 }
 0xc15   : > { %v13381_v19 = vadd.f32 %v34073_v27, %v26930_v34  ;;  %v26934_v15 = vadd.f32 %v36614_v51, %v12635_v17  ;;  %v36617_v34 = vld [vmem:[#allocation287_spill] sm:$0xff] }
 0xc16   : > { %v13384_v0 = vadd.f32 %v34073_v27, %v26932_v25 }
 0xc17   : > { %v13669_v2 = vmax.f32 %v13381_v19, 0.0  ;;  %v13382_v24 = vadd.f32 %v34073_v27, %v26934_v15  ;;  %v36619_v15 = vld [vmem:[#allocation288_spill] sm:$0xff] }
 0xc18   : > { %v13672_v25 = vmax.f32 %v13384_v0, 0.0 }
 0xc19   : > { %v13897_v42 = vmax.f32 %v13801_v48, %v13669_v2  ;;  %v13670_v54 = vmax.f32 %v13382_v24, 0.0  ;;  %v25435_v41 = vpop.f32.mrb[128].mxu0  ;;  %v13671_v24 = vmax.f32 %v13383_v12, 0.0  ;;  %v36621_v12 = vld [vmem:[#allocation290_spill] sm:$0xff] }
 0xc1a   : > { %v26936_v61 = vadd.f32 %v36615_v50, %v25435_v41  ;;  %v12648_v3 = vpop.f32.mrb[129].mxu0 }
 0xc1b   : > { %v13898_v32 = vmax.f32 %v13802_v49, %v13670_v54  ;;  %v26938_v60 = vadd.f32 %v36616_v9, %v12648_v3  ;;  %v25436_v23 = vpop.f32.mrb[130].mxu0 }
 0xc1c   : > { %v26940_v43 = vadd.f32 %v36617_v34, %v25436_v23  ;;  %v12651_v17 = vpop.f32.mrb[131].mxu0  ;;  %v13387_v48 = vadd.f32 %v34073_v27, %v26936_v61 }
 0xc1d   : > { %v34215_v19 = vpack.c.bf16 %v13898_v32, %v13897_v42  ;;  %v13385_v51 = vadd.f32 %v34073_v27, %v26938_v60  ;;  %v26942_v2 = vadd.f32 %v36619_v15, %v12651_v17  ;;  %v36620_v32 = vld [vmem:[#allocation289_spill] sm:$0xff]  ;;  %v36622_v15 = vld [vmem:[#allocation291_spill] sm:$0xff] }
 0xc1e   : > { %v13388_v46 = vadd.f32 %v34073_v27, %v26940_v43  ;;  %v13675_v54 = vmax.f32 %v13387_v48, 0.0  ;;  %v36623_v48 = vld [vmem:[#allocation292_spill] sm:$0xff] }
 0xc1f   : > { %36618 = vst [vmem:[#allocation60_spill] sm:$0xff] %v34215_v19  ;;  %v13673_v41 = vmax.f32 %v13385_v51, 0.0  ;;  %v13386_v49 = vadd.f32 %v34073_v27, %v26942_v2  ;;  %25566 = vmatmul.mubr.msk.bf16.gmra.mrb[104].mxu1 %vm14007_vm1, %v34215_v19 }
 0xc20   : > { %v13676_v23 = vmax.f32 %v13388_v46, 0.0 }
 0xc21   : > { %v13803_v50 = vmax.f32 %v13671_v24, %v13673_v41  ;;  %v13674_v42 = vmax.f32 %v13386_v49, 0.0  ;;  %v25439_v3 = vpop.f32.mrb[132].mxu0 }
 0xc22   : > { %v26944_v61 = vadd.f32 %v36620_v32, %v25439_v3  ;;  %v12664_v9 = vpop.f32.mrb[133].mxu0 }
 0xc23   : > { %v13899_v60 = vmax.f32 %v13803_v50, %v13675_v54  ;;  %v13804_v34 = vmax.f32 %v13672_v25, %v13674_v42  ;;  %v26946_v17 = vadd.f32 %v36621_v12, %v12664_v9  ;;  %v25440_v51 = vpop.f32.mrb[134].mxu0 }
 0xc24   : > { %v13391_v43 = vadd.f32 %v34073_v27, %v26944_v61  ;;  %v26948_v2 = vadd.f32 %v36622_v15, %v25440_v51  ;;  %v12667_v40 = vpop.f32.mrb[135].mxu0  ;;  %v36625_v61 = vld [vmem:[#allocation174_spill] sm:$0xff]  ;;  %v36627_v51 = vld [vmem:[#allocation165_spill] sm:$0xff] }
 0xc25   : > { %v13900_v19 = vmax.f32 %v13804_v34, %v13676_v23  ;;  %v13389_v0 = vadd.f32 %v34073_v27, %v26946_v17  ;;  %v26950_v24 = vadd.f32 %v36623_v48, %v12667_v40  ;;  %v36626_v40 = vld [vmem:[#allocation175_spill] sm:$0xff]  ;;  %v36628_v15 = vld [vmem:[#allocation170_spill] sm:$0xff] }
 0xc26   : > { %v13679_v41 = vmax.f32 %v13391_v43, 0.0  ;;  %v13392_v49 = vadd.f32 %v34073_v27, %v26948_v2 }
 0xc27   : > { %v34231_v3 = vpack.c.bf16 %v13900_v19, %v13899_v60  ;;  %v13677_v46 = vmax.f32 %v13389_v0, 0.0  ;;  %v13390_v25 = vadd.f32 %v34073_v27, %v26950_v24 }
 0xc28   : > { %v13680_v54 = vmax.f32 %v13392_v49, 0.0 }
 0xc29   : > { %36624 = vst [vmem:[#allocation61_spill] sm:$0xff] %v34231_v3  ;;  %v13805_v50 = vmax.f32 %v13677_v46, %v13679_v41  ;;  %v13678_v42 = vmax.f32 %v13390_v25, 0.0  ;;  %v25443_v32 = vpop.f32.mrb[136].mxu0  ;;  %25569 = vmatprep.mubr.msk.bf16.mxu1 %vm14007_vm1, %v34231_v3  ;;  %v36629_v46 = vld [vmem:[#allocation178_spill] sm:$0xff] }
 0xc2a   : > { %v26952_v9 = vadd.f32 %v36625_v61, %v25443_v32  ;;  %v12680_v23 = vpop.f32.mrb[137].mxu0  ;;  %v36630_v61 = vld [vmem:[#allocation179_spill] sm:$0xff] }
 0xc2b   : > { %v13806_v34 = vmax.f32 %v13678_v42, %v13680_v54  ;;  %v26954_v12 = vadd.f32 %v36626_v40, %v12680_v23  ;;  %v25444_v17 = vpop.f32.mrb[138].mxu0 }
 0xc2c   : > { %v26956_v19 = vadd.f32 %v36627_v51, %v25444_v17  ;;  %v12683_v60 = vpop.f32.mrb[139].mxu0  ;;  %v13395_v54 = vadd.f32 %v34073_v27, %v26952_v9 }
 0xc2d   : > { %v13393_v43 = vadd.f32 %v34073_v27, %v26954_v12  ;;  %v26958_v2 = vadd.f32 %v36628_v15, %v12683_v60  ;;  %v36631_v12 = vld [vmem:[#allocation180_spill] sm:$0xff] }
 0xc2e   : > { %v13396_v17 = vadd.f32 %v34073_v27, %v26956_v19 }
 0xc2f   : > { %v13681_v0 = vmax.f32 %v13393_v43, 0.0  ;;  %v13394_v48 = vadd.f32 %v34073_v27, %v26958_v2  ;;  %v36633_v2 = vld [vmem:[#allocation181_spill] sm:$0xff] }
 0xc30   : > { %v13684_v19 = vmax.f32 %v13396_v17, 0.0 }
 0xc31   : > { %v13901_v24 = vmax.f32 %v13805_v50, %v13681_v0  ;;  %v13682_v41 = vmax.f32 %v13394_v48, 0.0  ;;  %v25447_v49 = vpop.f32.mrb[140].mxu0  ;;  %v13683_v48 = vmax.f32 %v13395_v54, 0.0  ;;  %v36635_v54 = vld [vmem:[#allocation191_spill] sm:$0xff] }
 0xc32   : > { %v26960_v25 = vadd.f32 %v36629_v46, %v25447_v49  ;;  %v12696_v32 = vpop.f32.mrb[141].mxu0 }
 0xc33   : > { %v13902_v42 = vmax.f32 %v13806_v34, %v13682_v41  ;;  %v26962_v23 = vadd.f32 %v36630_v61, %v12696_v32  ;;  %v25448_v40 = vpop.f32.mrb[142].mxu0 }
 0xc34   : > { %v26964_v51 = vadd.f32 %v36631_v12, %v25448_v40  ;;  %v12699_v60 = vpop.f32.mrb[143].mxu0  ;;  %v13399_v50 = vadd.f32 %v34073_v27, %v26960_v25 }
 0xc35   : > { %v34247_v43 = vpack.c.bf16 %v13902_v42, %v13901_v24  ;;  %v13397_v15 = vadd.f32 %v34073_v27, %v26962_v23  ;;  %v26966_v0 = vadd.f32 %v36633_v2, %v12699_v60  ;;  %v36634_v42 = vld [vmem:[#allocation190_spill] sm:$0xff]  ;;  %v36636_v2 = vld [vmem:[#allocation192_spill] sm:$0xff] }
 0xc36   : > { %v13400_v9 = vadd.f32 %v34073_v27, %v26964_v51  ;;  %v13687_v41 = vmax.f32 %v13399_v50, 0.0  ;;  %v36637_v50 = vld [vmem:[#allocation193_spill] sm:$0xff] }
 0xc37   : > { %36632 = vst [vmem:[#allocation304_spill] sm:$0xff] %v34247_v43  ;;  %v13685_v49 = vmax.f32 %v13397_v15, 0.0  ;;  %v13398_v34 = vadd.f32 %v34073_v27, %v26966_v0  ;;  %25570 = vmatmul.mubr.msk.bf16.gmra.mrb[108].mxu1 %vm14007_vm1, %v34247_v43 }
 0xc38   : > { %v13688_v40 = vmax.f32 %v13400_v9, 0.0 }
 0xc39   : > { %v13807_v46 = vmax.f32 %v13683_v48, %v13685_v49  ;;  %v13686_v24 = vmax.f32 %v13398_v34, 0.0  ;;  %v25451_v32 = vpop.f32.mrb[252].mxu0 }
 0xc3a   : > { %v26967_v25 = vadd.f32 %v25451_v32, %v36634_v42  ;;  %v12712_v61 = vpop.f32.mrb[253].mxu0 }
 0xc3b   : > { %v13903_v23 = vmax.f32 %v13807_v46, %v13687_v41  ;;  %v13808_v12 = vmax.f32 %v13684_v19, %v13686_v24  ;;  %v26968_v60 = vadd.f32 %v12712_v61, %v36635_v54  ;;  %v25452_v15 = vpop.f32.mrb[254].mxu0 }
 0xc3c   : > { %v13403_v51 = vadd.f32 %v34073_v27, %v26967_v25  ;;  %v26969_v0 = vadd.f32 %v25452_v15, %v36636_v2  ;;  %v12715_v3 = vpop.f32.mrb[255].mxu0  ;;  %v36638_v25 = vld [vmem:[#allocation183_spill] sm:$0xff]  ;;  %v36640_v15 = vld [vmem:[#allocation196_spill] sm:$0xff]  ;;  %v36641_v2 = vld [vmem:[#allocation197_spill] sm:$0xff] }
 0xc3d   : > { %v13904_v43 = vmax.f32 %v13808_v12, %v13688_v40  ;;  %v13401_v17 = vadd.f32 %v34073_v27, %v26968_v60  ;;  %v26970_v48 = vadd.f32 %v12715_v3, %v36637_v50  ;;  %v36639_v3 = vld [vmem:[#allocation188_spill] sm:$0xff] }
 0xc3e   : > { %v13691_v49 = vmax.f32 %v13403_v51, 0.0  ;;  %v13404_v34 = vadd.f32 %v34073_v27, %v26969_v0 }
 0xc3f   : > { %v34263_v32 = vpack.c.bf16 %v13904_v43, %v13903_v23  ;;  %v13689_v9 = vmax.f32 %v13401_v17, 0.0  ;;  %v13402_v19 = vadd.f32 %v34073_v27, %v26970_v48 }
 0xc40   : > { %v13692_v41 = vmax.f32 %v13404_v34, 0.0 }
 0xc41   : > { %v13809_v46 = vmax.f32 %v13689_v9, %v13691_v49  ;;  %v13690_v24 = vmax.f32 %v13402_v19, 0.0  ;;  %v25455_v42 = vpop.f32.mrb[148].mxu0  ;;  %25573 = vmatprep.mubr.msk.bf16.mxu1 %vm14007_vm1, %v34263_v32  ;;  %v36642_v9 = vld [vmem:[#allocation195_spill] sm:$0xff] }
 0xc42   : > { %v26971_v61 = vadd.f32 %v25455_v42, %v36638_v25  ;;  %v12728_v40 = vpop.f32.mrb[149].mxu0  ;;  %v36643_v25 = vld [vmem:[#allocation200_spill] sm:$0xff] }
 0xc43   : > { %v13810_v12 = vmax.f32 %v13690_v24, %v13692_v41  ;;  %v26972_v54 = vadd.f32 %v12728_v40, %v36639_v3  ;;  %v25456_v60 = vpop.f32.mrb[150].mxu0 }
 0xc44   : > { %v26973_v43 = vadd.f32 %v25456_v60, %v36640_v15  ;;  %v12731_v23 = vpop.f32.mrb[151].mxu0  ;;  %v13407_v41 = vadd.f32 %v34073_v27, %v26971_v61 }
 0xc45   : > { %v13405_v51 = vadd.f32 %v34073_v27, %v26972_v54  ;;  %v26974_v0 = vadd.f32 %v12731_v23, %v36641_v2  ;;  %v36644_v54 = vld [vmem:[#allocation201_spill] sm:$0xff] }
 0xc46   : > { %v13408_v60 = vadd.f32 %v34073_v27, %v26973_v43  ;;  %v36646_v43 = vpack.c.bf16 %v33406_v55, %v33402_v21 }
 0xc47   : > { %v13693_v17 = vmax.f32 %v13405_v51, 0.0  ;;  %v13406_v50 = vadd.f32 %v34073_v27, %v26974_v0  ;;  %v36645_v0 = vld [vmem:[#allocation206_spill] sm:$0xff] }
 0xc49   : > { %v13905_v48 = vmax.f32 %v13809_v46, %v13693_v17  ;;  %v13694_v49 = vmax.f32 %v13406_v50, 0.0  ;;  %v25459_v34 = vpop.f32.mrb[152].mxu0  ;;  %v13695_v50 = vmax.f32 %v13407_v41, 0.0 }
 0xc4a   : > { %v26975_v19 = vadd.f32 %v25459_v34, %v36642_v9  ;;  %v12744_v42 = vpop.f32.mrb[153].mxu0 }
 0xc4b   : > { %v13906_v24 = vmax.f32 %v13810_v12, %v13694_v49  ;;  %v26976_v40 = vadd.f32 %v12744_v42, %v36643_v25  ;;  %v25460_v3 = vpop.f32.mrb[154].mxu0 }
 0xc4c   : > { %v26977_v15 = vadd.f32 %v25460_v3, %v36644_v54  ;;  %v12747_v23 = vpop.f32.mrb[155].mxu0  ;;  %v13411_v46 = vadd.f32 %v34073_v27, %v26975_v19 }
 0xc4d   : > { %v34279_v51 = vpack.c.bf16 %v13906_v24, %v13905_v48  ;;  %v13409_v2 = vadd.f32 %v34073_v27, %v26976_v40  ;;  %v26978_v17 = vadd.f32 %v12747_v23, %v36645_v0  ;;  %v13696_v48 = vmax.f32 %v13408_v60, 0.0  ;;  %v36647_v24 = vld [vmem:[#allocation219_spill] sm:$0xff] }
 0xc4e   : > { %v13412_v61 = vadd.f32 %v34073_v27, %v26977_v15  ;;  %v13699_v49 = vmax.f32 %v13411_v46, 0.0  ;;  %v36648_v15 = vld [vmem:[#allocation6_spill] sm:$0xff]  ;;  %v36650_v46 = vld [vmem:[#allocation12_spill] sm:$0xff] }
 0xc4f   : > { %v13697_v34 = vmax.f32 %v13409_v2, 0.0  ;;  %v13410_v12 = vadd.f32 %v34073_v27, %v26978_v17  ;;  %25574 = vmatmul.mubr.msk.bf16.gmra.mrb[112].mxu1 %vm14007_vm1, %v34279_v51  ;;  %v36649_v17 = vld [vmem:[#allocation7_spill] sm:$0xff] }
 0xc50   : > { %25585 = vmatprep.mubr.msk.bf16.mxu1 %vm14007_vm1, %v36646_v43  ;;  %v13700_v3 = vmax.f32 %v13412_v61, 0.0 }
 0xc51   : > { %v13811_v9 = vmax.f32 %v13695_v50, %v13697_v34  ;;  %v13698_v19 = vmax.f32 %v13410_v12, 0.0  ;;  %v25463_v42 = vpop.f32.mrb[156].mxu0  ;;  %v29077_v34 = vld [vmem:[%s36418_s3 + $0x48] sm:$0xff]  }
 0xc52   : > { %v26979_v41 = vadd.f32 %v25463_v42, %v36647_v24  ;;  %v12760_v25 = vpop.f32.mrb[157].mxu0 }
 0xc53   : > { %v13907_v40 = vmax.f32 %v13811_v9, %v13699_v49  ;;  %v13812_v54 = vmax.f32 %v13696_v48, %v13698_v19  ;;  %v26980_v23 = vadd.f32 %v12760_v25, %v36648_v15  ;;  %v25464_v2 = vpop.f32.mrb[158].mxu0  ;;  %v29078_v25 = vld [vmem:[%s36418_s3 + $0x50] sm:$0xff]  }
 0xc54   : > { %v13415_v0 = vadd.f32 %v34073_v27, %v26979_v41  ;;  %v26981_v21 = vadd.f32 %v25464_v2, %v36649_v17  ;;  %v12763_v55 = vpop.f32.mrb[159].mxu0 }
 0xc55   : > { %v13908_v43 = vmax.f32 %v13812_v54, %v13700_v3  ;;  %v13413_v60 = vadd.f32 %v34073_v27, %v26980_v23  ;;  %v26982_v50 = vadd.f32 %v12763_v55, %v36650_v46  ;;  %v36652_v23 = vld [vmem:[#allocation221_spill] sm:$0xff]  ;;  %v36654_v55 = vld [vmem:[#allocation227_spill] sm:$0xff] }
 0xc56   : > { %v13703_v12 = vmax.f32 %v13415_v0, 0.0  ;;  %v13416_v61 = vadd.f32 %v34073_v27, %v26981_v21  ;;  %v36653_v0 = vld [vmem:[#allocation226_spill] sm:$0xff] }
 0xc57   : > { %v34302_v48 = vpack.c.bf16 %v13908_v43, %v13907_v40  ;;  %v13701_v49 = vmax.f32 %v13413_v60, 0.0  ;;  %v13414_v9 = vadd.f32 %v34073_v27, %v26982_v50  ;;  %25586 = vmatmul.mubr.msk.bf16.vlgmr.msra.gmra.mrb[0].mxu1 %vm14007_vm1, %v33432_v6  ;;  %v36651_v40 = vld [vmem:[#allocation53_spill] sm:$0xff]  ;;  %v29079_v60 = vld [vmem:[%s36418_s3 + $0x58] sm:$0xff]  }
 0xc58   : > { %v13704_v19 = vmax.f32 %v13416_v61, 0.0  ;;  %25670 = vmatpush3.bf16.msra.mxu1 %v34127_v37  ;;  %25589 = vmatprep.mubr.msk.bf16.mxu1 %vm14007_vm1, %v33453_v58 }
 0xc59   : > { %v13813_v42 = vmax.f32 %v13701_v49, %v13703_v12  ;;  %v13702_v24 = vmax.f32 %v13414_v9, 0.0  ;;  %v25467_v41 = vpop.f32.mrb[160].mxu0  ;;  %25671 = vmatprep.subr.bf16.mxu1 %v29077_v34  ;;  %v36655_v49 = vld [vmem:[#allocation244_spill] sm:$0xff] }
 0xc5a   : > { %v26983_v3 = vadd.f32 %v25467_v41, %v36651_v40  ;;  %v12776_v54 = vpop.f32.mrb[161].mxu0  ;;  %v36656_v40 = vld [vmem:[#allocation245_spill] sm:$0xff] }
 0xc5b   : > { %v13814_v15 = vmax.f32 %v13702_v24, %v13704_v19  ;;  %v26984_v6 = vadd.f32 %v12776_v54, %v36652_v23  ;;  %v25468_v2 = vpop.f32.mrb[162].mxu0 }
 0xc5c   : > { %v26985_v37 = vadd.f32 %v25468_v2, %v36653_v0  ;;  %v12779_v17 = vpop.f32.mrb[163].mxu0  ;;  %25672 = vmatpush3.bf16.msra.mxu1 %v29077_v34  ;;  %v13419_v24 = vadd.f32 %v34073_v27, %v26983_v3  ;;  %v36657_v2 = vld [vmem:[#allocation250_spill] sm:$0xff] }
 0xc5d   : > { %v13417_v21 = vadd.f32 %v34073_v27, %v26984_v6  ;;  %v26986_v43 = vadd.f32 %v12779_v17, %v36654_v55  ;;  %25673 = vmatprep.subr.bf16.mxu1 %v29078_v25  ;;  %v36658_v55 = vld [vmem:[#allocation251_spill] sm:$0xff] }
 0xc5e   : > { %v13420_v6 = vadd.f32 %v34073_v27, %v26985_v37 }
 0xc5f   : > { %v13705_v46 = vmax.f32 %v13417_v21, 0.0  ;;  %v13418_v50 = vadd.f32 %v34073_v27, %v26986_v43  ;;  %25590 = vmatmul.mubr.msk.bf16.gmra.mrb[4].mxu1 %vm14007_vm1, %v33476_v57 }
 0xc60   : > { %25593 = vmatprep.mubr.msk.bf16.mxu1 %vm14007_vm1, %v33497_v8  ;;  %25674 = vmatpush3.bf16.msra.mxu1 %v29078_v25  ;;  %v13708_v37 = vmax.f32 %v13420_v6, 0.0 }
 0xc61   : > { %v13909_v34 = vmax.f32 %v13813_v42, %v13705_v46  ;;  %v13706_v12 = vmax.f32 %v13418_v50, 0.0  ;;  %v25471_v61 = vpop.f32.mrb[164].mxu0  ;;  %25675 = vmatprep.subr.bf16.mxu1 %v29079_v60  ;;  %v13707_v46 = vmax.f32 %v13419_v24, 0.0 }
 0xc62   : > { %v26987_v9 = vadd.f32 %v25471_v61, %v36655_v49  ;;  %v12792_v19 = vpop.f32.mrb[165].mxu0  ;;  %v36659_v49 = vld [vmem:[#allocation268_spill] sm:$0xff] }
 0xc63   : > { %v13910_v41 = vmax.f32 %v13814_v15, %v13706_v12  ;;  %v26988_v54 = vadd.f32 %v12792_v19, %v36656_v40  ;;  %v25472_v23 = vpop.f32.mrb[166].mxu0 }
 0xc64   : > { %v26989_v0 = vadd.f32 %v25472_v23, %v36657_v2  ;;  %v12795_v17 = vpop.f32.mrb[167].mxu0  ;;  %25676 = vmatpush3.bf16.msra.mxu1 %v29079_v60  ;;  %v13423_v42 = vadd.f32 %v34073_v27, %v26987_v9 }
 0xc65   : > { %v34331_v25 = vpack.c.bf16 %v13910_v41, %v13909_v34  ;;  %v13421_v21 = vadd.f32 %v34073_v27, %v26988_v54  ;;  %v26990_v43 = vadd.f32 %v12795_v17, %v36658_v55  ;;  %v36660_v54 = vld [vmem:[#allocation269_spill] sm:$0xff]  ;;  %v36661_v17 = vld [vmem:[#allocation274_spill] sm:$0xff] }
 0xc66   : > { %v13424_v15 = vadd.f32 %v34073_v27, %v26989_v0  ;;  %v13711_v60 = vmax.f32 %v13423_v42, 0.0  ;;  %v36662_v42 = vld [vmem:[#allocation275_spill] sm:$0xff] }
 0xc67   : > { %v13709_v3 = vmax.f32 %v13421_v21, 0.0  ;;  %v13422_v50 = vadd.f32 %v34073_v27, %v26990_v43  ;;  %25594 = vmatmul.mubr.msk.bf16.gmra.mrb[8].mxu1 %vm14007_vm1, %v33519_v26 }
 0xc68   : > { %25597 = vmatprep.mubr.msk.bf16.mxu1 %vm14007_vm1, %v33541_v28  ;;  %v13712_v41 = vmax.f32 %v13424_v15, 0.0 }
 0xc69   : > { %v13815_v34 = vmax.f32 %v13707_v46, %v13709_v3  ;;  %v13710_v12 = vmax.f32 %v13422_v50, 0.0  ;;  %v25475_v61 = vpop.f32.mrb[168].mxu0 }
 0xc6a   : > { %v26991_v9 = vadd.f32 %v25475_v61, %v36659_v49  ;;  %v12808_v19 = vpop.f32.mrb[169].mxu0 }
 0xc6b   : > { %v13911_v24 = vmax.f32 %v13815_v34, %v13711_v60  ;;  %v13816_v40 = vmax.f32 %v13708_v37, %v13710_v12  ;;  %v26992_v23 = vadd.f32 %v12808_v19, %v36660_v54  ;;  %v25476_v2 = vpop.f32.mrb[170].mxu0  ;;  %v36664_v54 = vld [vmem:[#allocation297_spill] sm:$0xff] }
 0xc6c   : > { %v13427_v0 = vadd.f32 %v34073_v27, %v26991_v9  ;;  %v26993_v21 = vadd.f32 %v25476_v2, %v36661_v17  ;;  %v12811_v55 = vpop.f32.mrb[171].mxu0  ;;  %v36663_v9 = vld [vmem:[#allocation296_spill] sm:$0xff]  ;;  %v36665_v2 = vld [vmem:[#allocation298_spill] sm:$0xff] }
 0xc6d   : > { %v13912_v43 = vmax.f32 %v13816_v40, %v13712_v41  ;;  %v13425_v6 = vadd.f32 %v34073_v27, %v26992_v23  ;;  %v26994_v46 = vadd.f32 %v12811_v55, %v36662_v42  ;;  %v36666_v55 = vld [vmem:[#allocation299_spill] sm:$0xff] }
 0xc6e   : > { %v13715_v3 = vmax.f32 %v13427_v0, 0.0  ;;  %v13428_v50 = vadd.f32 %v34073_v27, %v26993_v21 }
 0xc6f   : > { %v34349_v61 = vpack.c.bf16 %v13912_v43, %v13911_v24  ;;  %v13713_v15 = vmax.f32 %v13425_v6, 0.0  ;;  %v13426_v37 = vadd.f32 %v34073_v27, %v26994_v46  ;;  %25598 = vmatmul.mubr.msk.bf16.gmra.mrb[12].mxu1 %vm14007_vm1, %v33563_v31  ;;  %v34369_v46 = vld [vmem:[%s36418_s3 + $0x60] sm:$0xff]  }
 0xc70   : > { %v13716_v60 = vmax.f32 %v13428_v50, 0.0  ;;  %25601 = vmatprep.mubr.msk.bf16.mxu1 %vm14007_vm1, %v33585_v13  ;;  %25761 = vmatprep.subr.bf16.mxu1 %v34369_v46 }
 0xc71   : > { %v13817_v34 = vmax.f32 %v13713_v15, %v13715_v3  ;;  %v13714_v12 = vmax.f32 %v13426_v37, 0.0  ;;  %v25479_v49 = vpop.f32.mrb[172].mxu0  ;;  %v36667_v37 = vld [vmem:[#allocation300_spill] sm:$0xff] }
 0xc72   : > { %v26995_v19 = vadd.f32 %v25479_v49, %v36663_v9  ;;  %v12824_v41 = vpop.f32.mrb[173].mxu0 }
 0xc73   : > { %v13818_v40 = vmax.f32 %v13714_v12, %v13716_v60  ;;  %v26996_v24 = vadd.f32 %v12824_v41, %v36664_v54  ;;  %v25480_v23 = vpop.f32.mrb[174].mxu0  ;;  %v36668_v41 = vld [vmem:[#allocation301_spill] sm:$0xff] }
 0xc74   : > { %v26997_v0 = vadd.f32 %v25480_v23, %v36665_v2  ;;  %v12827_v17 = vpop.f32.mrb[175].mxu0  ;;  %v13431_v49 = vadd.f32 %v34073_v27, %v26995_v19  ;;  %v29567_v23 = vld [vmem:[%s36419_s26] ss:$0 sm:$0xff] }
 0xc75   : > { %v13429_v21 = vadd.f32 %v34073_v27, %v26996_v24  ;;  %v26998_v43 = vadd.f32 %v12827_v17, %v36666_v55  ;;  %v36669_v17 = vld [vmem:[#allocation302_spill] sm:$0xff] }
 0xc76   : > { %v13432_v2 = vadd.f32 %v29567_v23, %v26997_v0 }
 0xc77   : > { %v13717_v6 = vmax.f32 %v13429_v21, 0.0  ;;  %v13430_v42 = vadd.f32 %v34073_v27, %v26998_v43  ;;  %25602 = vmatmul.mubr.msk.bf16.gmra.mrb[16].mxu1 %vm14007_vm1, %v33607_v14 }
 0xc78   : > { %25605 = vmatprep.mubr.msk.bf16.mxu1 %vm14007_vm1, %v33629_v33  ;;  %v13720_v0 = vmax.f32 %v13432_v2, 0.0  ;;  %v36673_v2 = vld [vmem:[#allocation60_spill] sm:$0xff] }
 0xc79   : > { %v13913_v3 = vmax.f32 %v13817_v34, %v13717_v6  ;;  %v13718_v50 = vmax.f32 %v13430_v42, 0.0  ;;  %v25483_v15 = vpop.f32.mrb[176].mxu0  ;;  %v36670_v42 = vld [vmem:[#allocation303_spill] sm:$0xff] }
 0xc7a   : > { %v26999_v60 = vadd.f32 %v25483_v15, %v36667_v37  ;;  %v12840_v12 = vpop.f32.mrb[177].mxu0  ;;  %v13719_v37 = vmax.f32 %v13431_v49, 0.0 }
 0xc7b   : > { %v13914_v9 = vmax.f32 %v13818_v40, %v13718_v50  ;;  %v27000_v54 = vadd.f32 %v12840_v12, %v36668_v41  ;;  %v25484_v24 = vpop.f32.mrb[178].mxu0 }
 0xc7c   : > { %v27001_v34 = vadd.f32 %v25484_v24, %v36669_v17  ;;  %v12843_v21 = vpop.f32.mrb[179].mxu0  ;;  %v13435_v43 = vadd.f32 %v29567_v23, %v26999_v60  ;;  %v36671_v24 = vld [vmem:[#allocation58_spill] sm:$0xff]  ;;  %v36674_v17 = vld [vmem:[#allocation61_spill] sm:$0xff] }
 0xc7d   : > { %v34379_v55 = vpack.c.bf16 %v13914_v9, %v13913_v3  ;;  %v13433_v6 = vadd.f32 %v29567_v23, %v27000_v54  ;;  %v27002_v15 = vadd.f32 %v12843_v21, %v36670_v42  ;;  %v29081_v21 = vld [vmem:[%s36418_s3 + $0x68] sm:$0xff]   ;;  %v29086_v42 = vld [vmem:[%s36418_s3 + $0x90] sm:$0xff]  }
 0xc7e   : > { %v13436_v19 = vadd.f32 %v29567_v23, %v27001_v34  ;;  %v13723_v50 = vmax.f32 %v13435_v43, 0.0  ;;  %v36675_v34 = vld [vmem:[#allocation304_spill] sm:$0xff]  ;;  %v29082_v43 = vld [vmem:[%s36418_s3 + $0x70] sm:$0xff]  }
 0xc7f   : > { %v13721_v27 = vmax.f32 %v13433_v6, 0.0  ;;  %v13434_v40 = vadd.f32 %v29567_v23, %v27002_v15  ;;  %25606 = vmatmul.mubr.msk.bf16.gmra.mrb[20].mxu1 %vm14007_vm1, %v33651_v53  ;;  %v36672_v23 = vld [vmem:[#allocation59_spill] sm:$0xff]  ;;  %v29085_v6 = vld [vmem:[%s36418_s3 + $0x88] sm:$0xff]  }
 0xc80   : > { %25609 = vmatprep.mubr.msk.bf16.mxu1 %vm14007_vm1, %v33673_v63  ;;  %v13724_v60 = vmax.f32 %v13436_v19, 0.0  ;;  %v29088_v15 = vld [vmem:[%s36418_s3 + $0xa0] sm:$0xff]  }
 0xc81   : > { %v13819_v12 = vmax.f32 %v13719_v37, %v13721_v27  ;;  %v13722_v41 = vmax.f32 %v13434_v40, 0.0  ;;  %v29089_v37 = vld [vmem:[%s36418_s3 + $0xa8] sm:$0xff]   ;;  %v29090_v27 = vld [vmem:[%s36418_s3 + $0xb0] sm:$0xff]   ;;  %v29092_v19 = vld [vmem:[%s36418_s3 + $0xc0] sm:$0xff]  }
 0xc82   : > { %v29093_v40 = vld [vmem:[%s36418_s3 + $0xc8] sm:$0xff]  }
 0xc83   : > { %v34386_v3 = vmax.f32 %v13819_v12, %v13723_v50  ;;  %v13820_v9 = vmax.f32 %v13720_v0, %v13722_v41  ;;  %v29094_v0 = vld [vmem:[%s36418_s3 + $0xd0] sm:$0xff]  }
 0xc85   : > { %v34388_v54 = vmax.f32 %v13820_v9, %v13724_v60 }
 0xc87   : > { %v13964_v49 = vpack.c.bf16 %v34388_v54, %v34386_v3  ;;  %25610 = vmatmul.mubr.msk.bf16.gmra.mrb[24].mxu1 %vm14007_vm1, %v33695_v18 }
 0xc88   : > { %25613 = vmatprep.mubr.msk.bf16.mxu1 %vm14007_vm1, %v33717_v62 }
 0xc8f   : > { %25614 = vmatmul.mubr.msk.bf16.gmra.mrb[28].mxu1 %vm14007_vm1, %v33744_v36 }
 0xc90   : > { %25617 = vmatprep.mubr.msk.bf16.mxu1 %vm14007_vm1, %v33766_v47 }
 0xc97   : > { %25618 = vmatmul.mubr.msk.bf16.gmra.mrb[32].mxu1 %vm14007_vm1, %v33788_v38 }
 0xc98   : > { %25621 = vmatprep.mubr.msk.bf16.mxu1 %vm14007_vm1, %v33810_v4 }
 0xc9f   : > { %25622 = vmatmul.mubr.msk.bf16.gmra.mrb[36].mxu1 %vm14007_vm1, %v33835_v35 }
 0xca0   : > { %25625 = vmatprep.mubr.msk.bf16.mxu1 %vm14007_vm1, %v33857_v39 }
 0xca7   : > { %25626 = vmatmul.mubr.msk.bf16.gmra.mrb[72].mxu1 %vm14007_vm1, %v33879_v22 }
 0xca8   : > { %25629 = vmatprep.mubr.msk.bf16.mxu1 %vm14007_vm1, %v33901_v5 }
 0xcaf   : > { %25630 = vmatmul.mubr.msk.bf16.gmra.mrb[76].mxu1 %vm14007_vm1, %v33926_v52 }
 0xcb0   : > { %25633 = vmatprep.mubr.msk.bf16.mxu1 %vm14007_vm1, %v33948_v1 }
 0xcb7   : > { %25634 = vmatmul.mubr.msk.bf16.gmra.mrb[80].mxu1 %vm14007_vm1, %v33970_v44 }
 0xcb8   : > { %25637 = vmatprep.mubr.msk.bf16.mxu1 %vm14007_vm1, %v33995_v7 }
 0xcbf   : > { %25638 = vmatmul.mubr.msk.bf16.gmra.mrb[84].mxu1 %vm14007_vm1, %v34017_v30 }
 0xcc0   : > { %25641 = vmatprep.mubr.msk.bf16.mxu1 %vm14007_vm1, %v34040_v29 }
 0xcc7   : > { %25642 = vmatmul.mubr.msk.bf16.gmra.mrb[88].mxu1 %vm14007_vm1, %v34057_v10 }
 0xcc8   : > { %25645 = vmatprep.mubr.msk.bf16.mxu1 %vm14007_vm1, %v34081_v56 }
 0xccf   : > { %25646 = vmatmul.mubr.msk.bf16.gmra.mrb[92].mxu1 %vm14007_vm1, %v34097_v59 }
 0xcd0   : > { %25649 = vmatprep.mubr.msk.bf16.mxu1 %vm14007_vm1, %v34113_v20 }
 0xcd7   : > { %25650 = vmatmul.mubr.msk.bf16.gmra.mrb[96].mxu1 %vm14007_vm1, %v34135_v11 }
 0xcd8   : > { %25653 = vmatprep.mubr.msk.bf16.mxu1 %vm14007_vm1, %v34151_v45 }
 0xcdf   : > { %25654 = vmatmul.mubr.msk.bf16.gmra.mrb[100].mxu1 %vm14007_vm1, %v34167_v16 }
 0xce0   : > { %25657 = vmatprep.mubr.msk.bf16.mxu1 %vm14007_vm1, %v36671_v24 }
 0xce7   : > { %25658 = vmatmul.mubr.msk.bf16.gmra.mrb[104].mxu1 %vm14007_vm1, %v36672_v23 }
 0xce8   : > { %25661 = vmatprep.mubr.msk.bf16.mxu1 %vm14007_vm1, %v36673_v2 }
 0xcef   : > { %25662 = vmatmul.mubr.msk.bf16.gmra.mrb[108].mxu1 %vm14007_vm1, %v36674_v17 }
 0xcf0   : > { %25665 = vmatprep.mubr.msk.bf16.mxu1 %vm14007_vm1, %v36675_v34 }
 0xcf7   : > { %25666 = vmatmul.mubr.msk.bf16.gmra.mrb[112].mxu1 %vm14007_vm1, %v34263_v32 }
 0xcf8   : > { %25677 = vmatprep.mubr.msk.bf16.mxu1 %vm14007_vm1, %v33453_v58  ;;  %v29083_v58 = vld [vmem:[%s36418_s3 + $0x78] sm:$0xff]  }
 0xcff   : > { %25678 = vmatmul.mubr.msk.bf16.vlgmr.msra.gmra.mrb[0].mxu1 %vm14007_vm1, %v33476_v57 }
 0xd00   : > { %25762 = vmatpush3.bf16.msra.mxu1 %v34369_v46  ;;  %25681 = vmatprep.mubr.msk.bf16.mxu1 %vm14007_vm1, %v33497_v8  ;;  %v29084_v46 = vld [vmem:[%s36418_s3 + $0x80] sm:$0xff]  }
 0xd01   : > { %25763 = vmatprep.subr.bf16.mxu1 %v29081_v21 }
 0xd04   : > { %25764 = vmatpush3.bf16.msra.mxu1 %v29081_v21 }
 0xd05   : > { %25765 = vmatprep.subr.bf16.mxu1 %v29082_v43 }
 0xd07   : > { %25682 = vmatmul.mubr.msk.bf16.gmra.mrb[4].mxu1 %vm14007_vm1, %v33519_v26 }
 0xd08   : > { %25685 = vmatprep.mubr.msk.bf16.mxu1 %vm14007_vm1, %v33541_v28  ;;  %25766 = vmatpush3.bf16.msra.mxu1 %v29082_v43 }
 0xd09   : > { %25767 = vmatprep.subr.bf16.mxu1 %v29083_v58 }
 0xd0c   : > { %25768 = vmatpush3.bf16.msra.mxu1 %v29083_v58 }
 0xd0d   : > { %25853 = vmatprep.subr.bf16.mxu1 %v29084_v46 }
 0xd0f   : > { %25686 = vmatmul.mubr.msk.bf16.gmra.mrb[8].mxu1 %vm14007_vm1, %v33563_v31 }
 0xd10   : > { %25689 = vmatprep.mubr.msk.bf16.mxu1 %vm14007_vm1, %v33585_v13 }
 0xd17   : > { %25690 = vmatmul.mubr.msk.bf16.gmra.mrb[12].mxu1 %vm14007_vm1, %v33607_v14 }
 0xd18   : > { %25693 = vmatprep.mubr.msk.bf16.mxu1 %vm14007_vm1, %v33629_v33 }
 0xd1f   : > { %25694 = vmatmul.mubr.msk.bf16.gmra.mrb[16].mxu1 %vm14007_vm1, %v33651_v53 }
 0xd20   : > { %25697 = vmatprep.mubr.msk.bf16.mxu1 %vm14007_vm1, %v33673_v63 }
 0xd27   : > { %25698 = vmatmul.mubr.msk.bf16.gmra.mrb[20].mxu1 %vm14007_vm1, %v33695_v18 }
 0xd28   : > { %25701 = vmatprep.mubr.msk.bf16.mxu1 %vm14007_vm1, %v33717_v62 }
 0xd2f   : > { %25702 = vmatmul.mubr.msk.bf16.gmra.mrb[24].mxu1 %vm14007_vm1, %v33744_v36 }
 0xd30   : > { %25705 = vmatprep.mubr.msk.bf16.mxu1 %vm14007_vm1, %v33766_v47 }
 0xd37   : > { %25706 = vmatmul.mubr.msk.bf16.gmra.mrb[28].mxu1 %vm14007_vm1, %v33788_v38 }
 0xd38   : > { %25709 = vmatprep.mubr.msk.bf16.mxu1 %vm14007_vm1, %v33810_v4 }
 0xd3f   : > { %25710 = vmatmul.mubr.msk.bf16.gmra.mrb[32].mxu1 %vm14007_vm1, %v33835_v35 }
 0xd40   : > { %25713 = vmatprep.mubr.msk.bf16.mxu1 %vm14007_vm1, %v33857_v39 }
 0xd47   : > { %25714 = vmatmul.mubr.msk.bf16.gmra.mrb[36].mxu1 %vm14007_vm1, %v33879_v22 }
 0xd48   : > { %25717 = vmatprep.mubr.msk.bf16.mxu1 %vm14007_vm1, %v33901_v5 }
 0xd4f   : > { %25718 = vmatmul.mubr.msk.bf16.gmra.mrb[72].mxu1 %vm14007_vm1, %v33926_v52 }
 0xd50   : > { %25721 = vmatprep.mubr.msk.bf16.mxu1 %vm14007_vm1, %v33948_v1 }
 0xd57   : > { %25722 = vmatmul.mubr.msk.bf16.gmra.mrb[76].mxu1 %vm14007_vm1, %v33970_v44 }
 0xd58   : > { %25725 = vmatprep.mubr.msk.bf16.mxu1 %vm14007_vm1, %v33995_v7 }
 0xd5f   : > { %25726 = vmatmul.mubr.msk.bf16.gmra.mrb[80].mxu1 %vm14007_vm1, %v34017_v30 }
 0xd60   : > { %25729 = vmatprep.mubr.msk.bf16.mxu1 %vm14007_vm1, %v34040_v29 }
 0xd67   : > { %25730 = vmatmul.mubr.msk.bf16.gmra.mrb[84].mxu1 %vm14007_vm1, %v34057_v10 }
 0xd68   : > { %25733 = vmatprep.mubr.msk.bf16.mxu1 %vm14007_vm1, %v34081_v56 }
 0xd6f   : > { %25734 = vmatmul.mubr.msk.bf16.gmra.mrb[88].mxu1 %vm14007_vm1, %v34097_v59 }
 0xd70   : > { %25737 = vmatprep.mubr.msk.bf16.mxu1 %vm14007_vm1, %v34113_v20 }
 0xd77   : > { %25738 = vmatmul.mubr.msk.bf16.gmra.mrb[92].mxu1 %vm14007_vm1, %v34135_v11 }
 0xd78   : > { %25741 = vmatprep.mubr.msk.bf16.mxu1 %vm14007_vm1, %v34151_v45 }
 0xd7f   : > { %25742 = vmatmul.mubr.msk.bf16.gmra.mrb[96].mxu1 %vm14007_vm1, %v34167_v16 }
 0xd80   : > { %25745 = vmatprep.mubr.msk.bf16.mxu1 %vm14007_vm1, %v36671_v24 }
 0xd87   : > { %25746 = vmatmul.mubr.msk.bf16.gmra.mrb[100].mxu1 %vm14007_vm1, %v36672_v23 }
 0xd88   : > { %25749 = vmatprep.mubr.msk.bf16.mxu1 %vm14007_vm1, %v36673_v2 }
 0xd8f   : > { %25750 = vmatmul.mubr.msk.bf16.gmra.mrb[104].mxu1 %vm14007_vm1, %v36674_v17 }
 0xd90   : > { %25753 = vmatprep.mubr.msk.bf16.mxu1 %vm14007_vm1, %v36675_v34 }
 0xd97   : > { %25754 = vmatmul.mubr.msk.bf16.gmra.mrb[108].mxu1 %vm14007_vm1, %v34263_v32 }
 0xd98   : > { %25757 = vmatprep.mubr.msk.bf16.mxu1 %vm14007_vm1, %v34279_v51 }
 0xd9f   : > { %25758 = vmatmul.mubr.msk.bf16.gmra.mrb[112].mxu1 %vm14007_vm1, %v34302_v48 }
 0xda0   : > { %25769 = vmatprep.mubr.msk.bf16.mxu1 %vm14007_vm1, %v33476_v57  ;;  %v29087_v57 = vld [vmem:[%s36418_s3 + $0x98] sm:$0xff]  }
 0xda7   : > { %25770 = vmatmul.mubr.msk.bf16.vlgmr.msra.gmra.mrb[0].mxu1 %vm14007_vm1, %v33497_v8 }
 0xda8   : > { %25854 = vmatpush3.bf16.msra.mxu1 %v29084_v46  ;;  %25773 = vmatprep.mubr.msk.bf16.mxu1 %vm14007_vm1, %v33519_v26 }
 0xda9   : > { %25855 = vmatprep.subr.bf16.mxu1 %v29085_v6 }
 0xdac   : > { %25856 = vmatpush3.bf16.msra.mxu1 %v29085_v6 }
 0xdad   : > { %25857 = vmatprep.subr.bf16.mxu1 %v29086_v42 }
 0xdaf   : > { %25774 = vmatmul.mubr.msk.bf16.gmra.mrb[4].mxu1 %vm14007_vm1, %v33541_v28 }
 0xdb0   : > { %25777 = vmatprep.mubr.msk.bf16.mxu1 %vm14007_vm1, %v33563_v31  ;;  %25858 = vmatpush3.bf16.msra.mxu1 %v29086_v42 }
 0xdb1   : > { %25859 = vmatprep.subr.bf16.mxu1 %v29087_v57 }
 0xdb4   : > { %25860 = vmatpush3.bf16.msra.mxu1 %v29087_v57 }
 0xdb5   : > { %25945 = vmatprep.subr.bf16.mxu1 %v29088_v15 }
 0xdb7   : > { %25778 = vmatmul.mubr.msk.bf16.gmra.mrb[8].mxu1 %vm14007_vm1, %v33585_v13 }
 0xdb8   : > { %25781 = vmatprep.mubr.msk.bf16.mxu1 %vm14007_vm1, %v33607_v14 }
 0xdbf   : > { %25782 = vmatmul.mubr.msk.bf16.gmra.mrb[12].mxu1 %vm14007_vm1, %v33629_v33 }
 0xdc0   : > { %25785 = vmatprep.mubr.msk.bf16.mxu1 %vm14007_vm1, %v33651_v53 }
 0xdc7   : > { %25786 = vmatmul.mubr.msk.bf16.gmra.mrb[16].mxu1 %vm14007_vm1, %v33673_v63 }
 0xdc8   : > { %25789 = vmatprep.mubr.msk.bf16.mxu1 %vm14007_vm1, %v33695_v18 }
 0xdcf   : > { %25790 = vmatmul.mubr.msk.bf16.gmra.mrb[20].mxu1 %vm14007_vm1, %v33717_v62 }
 0xdd0   : > { %25793 = vmatprep.mubr.msk.bf16.mxu1 %vm14007_vm1, %v33744_v36 }
 0xdd7   : > { %25794 = vmatmul.mubr.msk.bf16.gmra.mrb[24].mxu1 %vm14007_vm1, %v33766_v47 }
 0xdd8   : > { %25797 = vmatprep.mubr.msk.bf16.mxu1 %vm14007_vm1, %v33788_v38 }
 0xddf   : > { %25798 = vmatmul.mubr.msk.bf16.gmra.mrb[28].mxu1 %vm14007_vm1, %v33810_v4 }
 0xde0   : > { %25801 = vmatprep.mubr.msk.bf16.mxu1 %vm14007_vm1, %v33835_v35 }
 0xde7   : > { %25802 = vmatmul.mubr.msk.bf16.gmra.mrb[32].mxu1 %vm14007_vm1, %v33857_v39 }
 0xde8   : > { %25805 = vmatprep.mubr.msk.bf16.mxu1 %vm14007_vm1, %v33879_v22 }
 0xdef   : > { %25806 = vmatmul.mubr.msk.bf16.gmra.mrb[36].mxu1 %vm14007_vm1, %v33901_v5 }
 0xdf0   : > { %25809 = vmatprep.mubr.msk.bf16.mxu1 %vm14007_vm1, %v33926_v52 }
 0xdf7   : > { %25810 = vmatmul.mubr.msk.bf16.gmra.mrb[72].mxu1 %vm14007_vm1, %v33948_v1 }
 0xdf8   : > { %25813 = vmatprep.mubr.msk.bf16.mxu1 %vm14007_vm1, %v33970_v44 }
 0xdff   : > { %25814 = vmatmul.mubr.msk.bf16.gmra.mrb[76].mxu1 %vm14007_vm1, %v33995_v7 }
 0xe00   : > { %25817 = vmatprep.mubr.msk.bf16.mxu1 %vm14007_vm1, %v34017_v30 }
 0xe07   : > { %25818 = vmatmul.mubr.msk.bf16.gmra.mrb[80].mxu1 %vm14007_vm1, %v34040_v29 }
 0xe08   : > { %25821 = vmatprep.mubr.msk.bf16.mxu1 %vm14007_vm1, %v34057_v10 }
 0xe0f   : > { %25822 = vmatmul.mubr.msk.bf16.gmra.mrb[84].mxu1 %vm14007_vm1, %v34081_v56 }
 0xe10   : > { %25825 = vmatprep.mubr.msk.bf16.mxu1 %vm14007_vm1, %v34097_v59 }
 0xe17   : > { %25826 = vmatmul.mubr.msk.bf16.gmra.mrb[88].mxu1 %vm14007_vm1, %v34113_v20 }
 0xe18   : > { %25829 = vmatprep.mubr.msk.bf16.mxu1 %vm14007_vm1, %v34135_v11 }
 0xe1f   : > { %25830 = vmatmul.mubr.msk.bf16.gmra.mrb[92].mxu1 %vm14007_vm1, %v34151_v45 }
 0xe20   : > { %25833 = vmatprep.mubr.msk.bf16.mxu1 %vm14007_vm1, %v34167_v16 }
 0xe27   : > { %25834 = vmatmul.mubr.msk.bf16.gmra.mrb[96].mxu1 %vm14007_vm1, %v36671_v24 }
 0xe28   : > { %25837 = vmatprep.mubr.msk.bf16.mxu1 %vm14007_vm1, %v36672_v23 }
 0xe2f   : > { %25838 = vmatmul.mubr.msk.bf16.gmra.mrb[100].mxu1 %vm14007_vm1, %v36673_v2 }
 0xe30   : > { %25841 = vmatprep.mubr.msk.bf16.mxu1 %vm14007_vm1, %v36674_v17 }
 0xe37   : > { %25842 = vmatmul.mubr.msk.bf16.gmra.mrb[104].mxu1 %vm14007_vm1, %v36675_v34 }
 0xe38   : > { %25845 = vmatprep.mubr.msk.bf16.mxu1 %vm14007_vm1, %v34263_v32 }
 0xe3f   : > { %25846 = vmatmul.mubr.msk.bf16.gmra.mrb[108].mxu1 %vm14007_vm1, %v34279_v51 }
 0xe40   : > { %25849 = vmatprep.mubr.msk.bf16.mxu1 %vm14007_vm1, %v34302_v48 }
 0xe47   : > { %25850 = vmatmul.mubr.msk.bf16.gmra.mrb[112].mxu1 %vm14007_vm1, %v34331_v25 }
 0xe48   : > { %25861 = vmatprep.mubr.msk.bf16.mxu1 %vm14007_vm1, %v33497_v8  ;;  %v29091_v8 = vld [vmem:[%s36418_s3 + $0xb8] sm:$0xff]  }
 0xe4f   : > { %25862 = vmatmul.mubr.msk.bf16.vlgmr.msra.gmra.mrb[0].mxu1 %vm14007_vm1, %v33519_v26 }
 0xe50   : > { %25946 = vmatpush3.bf16.msra.mxu1 %v29088_v15  ;;  %25865 = vmatprep.mubr.msk.bf16.mxu1 %vm14007_vm1, %v33541_v28 }
 0xe51   : > { %25947 = vmatprep.subr.bf16.mxu1 %v29089_v37 }
 0xe54   : > { %25948 = vmatpush3.bf16.msra.mxu1 %v29089_v37 }
 0xe55   : > { %25949 = vmatprep.subr.bf16.mxu1 %v29090_v27 }
 0xe57   : > { %25866 = vmatmul.mubr.msk.bf16.gmra.mrb[4].mxu1 %vm14007_vm1, %v33563_v31 }
 0xe58   : > { %25869 = vmatprep.mubr.msk.bf16.mxu1 %vm14007_vm1, %v33585_v13  ;;  %25950 = vmatpush3.bf16.msra.mxu1 %v29090_v27 }
 0xe59   : > { %25951 = vmatprep.subr.bf16.mxu1 %v29091_v8 }
 0xe5c   : > { %25952 = vmatpush3.bf16.msra.mxu1 %v29091_v8 }
 0xe5d   : > { %26037 = vmatprep.subr.bf16.mxu1 %v29092_v19 }
 0xe5f   : > { %25870 = vmatmul.mubr.msk.bf16.gmra.mrb[8].mxu1 %vm14007_vm1, %v33607_v14 }
 0xe60   : > { %25873 = vmatprep.mubr.msk.bf16.mxu1 %vm14007_vm1, %v33629_v33 }
 0xe67   : > { %25874 = vmatmul.mubr.msk.bf16.gmra.mrb[12].mxu1 %vm14007_vm1, %v33651_v53 }
 0xe68   : > { %25877 = vmatprep.mubr.msk.bf16.mxu1 %vm14007_vm1, %v33673_v63 }
 0xe6f   : > { %25878 = vmatmul.mubr.msk.bf16.gmra.mrb[16].mxu1 %vm14007_vm1, %v33695_v18 }
 0xe70   : > { %25881 = vmatprep.mubr.msk.bf16.mxu1 %vm14007_vm1, %v33717_v62 }
 0xe77   : > { %25882 = vmatmul.mubr.msk.bf16.gmra.mrb[20].mxu1 %vm14007_vm1, %v33744_v36 }
 0xe78   : > { %25885 = vmatprep.mubr.msk.bf16.mxu1 %vm14007_vm1, %v33766_v47 }
 0xe7f   : > { %25886 = vmatmul.mubr.msk.bf16.gmra.mrb[24].mxu1 %vm14007_vm1, %v33788_v38 }
 0xe80   : > { %25889 = vmatprep.mubr.msk.bf16.mxu1 %vm14007_vm1, %v33810_v4 }
 0xe87   : > { %25890 = vmatmul.mubr.msk.bf16.gmra.mrb[28].mxu1 %vm14007_vm1, %v33835_v35 }
 0xe88   : > { %25893 = vmatprep.mubr.msk.bf16.mxu1 %vm14007_vm1, %v33857_v39 }
 0xe8f   : > { %25894 = vmatmul.mubr.msk.bf16.gmra.mrb[32].mxu1 %vm14007_vm1, %v33879_v22 }
 0xe90   : > { %25897 = vmatprep.mubr.msk.bf16.mxu1 %vm14007_vm1, %v33901_v5 }
 0xe97   : > { %25898 = vmatmul.mubr.msk.bf16.gmra.mrb[36].mxu1 %vm14007_vm1, %v33926_v52 }
 0xe98   : > { %25901 = vmatprep.mubr.msk.bf16.mxu1 %vm14007_vm1, %v33948_v1 }
 0xe9f   : > { %25902 = vmatmul.mubr.msk.bf16.gmra.mrb[72].mxu1 %vm14007_vm1, %v33970_v44 }
 0xea0   : > { %25905 = vmatprep.mubr.msk.bf16.mxu1 %vm14007_vm1, %v33995_v7 }
 0xea7   : > { %25906 = vmatmul.mubr.msk.bf16.gmra.mrb[76].mxu1 %vm14007_vm1, %v34017_v30 }
 0xea8   : > { %25909 = vmatprep.mubr.msk.bf16.mxu1 %vm14007_vm1, %v34040_v29 }
 0xeaf   : > { %25910 = vmatmul.mubr.msk.bf16.gmra.mrb[80].mxu1 %vm14007_vm1, %v34057_v10 }
 0xeb0   : > { %25913 = vmatprep.mubr.msk.bf16.mxu1 %vm14007_vm1, %v34081_v56 }
 0xeb7   : > { %25914 = vmatmul.mubr.msk.bf16.gmra.mrb[84].mxu1 %vm14007_vm1, %v34097_v59 }
 0xeb8   : > { %25917 = vmatprep.mubr.msk.bf16.mxu1 %vm14007_vm1, %v34113_v20 }
 0xebf   : > { %25918 = vmatmul.mubr.msk.bf16.gmra.mrb[88].mxu1 %vm14007_vm1, %v34135_v11 }
 0xec0   : > { %25921 = vmatprep.mubr.msk.bf16.mxu1 %vm14007_vm1, %v34151_v45 }
 0xec7   : > { %25922 = vmatmul.mubr.msk.bf16.gmra.mrb[92].mxu1 %vm14007_vm1, %v34167_v16 }
 0xec8   : > { %25925 = vmatprep.mubr.msk.bf16.mxu1 %vm14007_vm1, %v36671_v24 }
 0xecf   : > { %25926 = vmatmul.mubr.msk.bf16.gmra.mrb[96].mxu1 %vm14007_vm1, %v36672_v23 }
 0xed0   : > { %25929 = vmatprep.mubr.msk.bf16.mxu1 %vm14007_vm1, %v36673_v2 }
 0xed7   : > { %25930 = vmatmul.mubr.msk.bf16.gmra.mrb[100].mxu1 %vm14007_vm1, %v36674_v17 }
 0xed8   : > { %25933 = vmatprep.mubr.msk.bf16.mxu1 %vm14007_vm1, %v36675_v34 }
 0xedf   : > { %25934 = vmatmul.mubr.msk.bf16.gmra.mrb[104].mxu1 %vm14007_vm1, %v34263_v32 }
 0xee0   : > { %25937 = vmatprep.mubr.msk.bf16.mxu1 %vm14007_vm1, %v34279_v51 }
 0xee7   : > { %25938 = vmatmul.mubr.msk.bf16.gmra.mrb[108].mxu1 %vm14007_vm1, %v34302_v48 }
 0xee8   : > { %25941 = vmatprep.mubr.msk.bf16.mxu1 %vm14007_vm1, %v34331_v25 }
 0xeef   : > { %25942 = vmatmul.mubr.msk.bf16.gmra.mrb[112].mxu1 %vm14007_vm1, %v34349_v61 }
 0xef0   : > { %25953 = vmatprep.mubr.msk.bf16.mxu1 %vm14007_vm1, %v33519_v26  ;;  %v29095_v26 = vld [vmem:[%s36418_s3 + $0xd8] sm:$0xff]  }
 0xef7   : > { %25954 = vmatmul.mubr.msk.bf16.vlgmr.msra.gmra.mrb[0].mxu1 %vm14007_vm1, %v33541_v28 }
 0xef8   : > { %26038 = vmatpush3.bf16.msra.mxu1 %v29092_v19  ;;  %25957 = vmatprep.mubr.msk.bf16.mxu1 %vm14007_vm1, %v33563_v31 }
 0xef9   : > { %26039 = vmatprep.subr.bf16.mxu1 %v29093_v40 }
 0xefc   : > { %26040 = vmatpush3.bf16.msra.mxu1 %v29093_v40 }
 0xefd   : > { %26041 = vmatprep.subr.bf16.mxu1 %v29094_v0 }
 0xeff   : > { %25958 = vmatmul.mubr.msk.bf16.gmra.mrb[4].mxu1 %vm14007_vm1, %v33585_v13 }
 0xf00   : > { %25961 = vmatprep.mubr.msk.bf16.mxu1 %vm14007_vm1, %v33607_v14  ;;  %26042 = vmatpush3.bf16.msra.mxu1 %v29094_v0 }
 0xf01   : > { %26043 = vmatprep.subr.bf16.mxu1 %v29095_v26 }
 0xf04   : > { %26044 = vmatpush3.bf16.msra.mxu1 %v29095_v26 }
 0xf07   : > { %25962 = vmatmul.mubr.msk.bf16.gmra.mrb[8].mxu1 %vm14007_vm1, %v33629_v33 }
 0xf08   : > { %25965 = vmatprep.mubr.msk.bf16.mxu1 %vm14007_vm1, %v33651_v53 }
 0xf0f   : > { %25966 = vmatmul.mubr.msk.bf16.gmra.mrb[12].mxu1 %vm14007_vm1, %v33673_v63 }
 0xf10   : > { %25969 = vmatprep.mubr.msk.bf16.mxu1 %vm14007_vm1, %v33695_v18 }
 0xf17   : > { %25970 = vmatmul.mubr.msk.bf16.gmra.mrb[16].mxu1 %vm14007_vm1, %v33717_v62 }
 0xf18   : > { %25973 = vmatprep.mubr.msk.bf16.mxu1 %vm14007_vm1, %v33744_v36 }
 0xf1f   : > { %25974 = vmatmul.mubr.msk.bf16.gmra.mrb[20].mxu1 %vm14007_vm1, %v33766_v47 }
 0xf20   : > { %25977 = vmatprep.mubr.msk.bf16.mxu1 %vm14007_vm1, %v33788_v38 }
 0xf27   : > { %25978 = vmatmul.mubr.msk.bf16.gmra.mrb[24].mxu1 %vm14007_vm1, %v33810_v4 }
 0xf28   : > { %25981 = vmatprep.mubr.msk.bf16.mxu1 %vm14007_vm1, %v33835_v35 }
 0xf2f   : > { %25982 = vmatmul.mubr.msk.bf16.gmra.mrb[28].mxu1 %vm14007_vm1, %v33857_v39 }
 0xf30   : > { %25985 = vmatprep.mubr.msk.bf16.mxu1 %vm14007_vm1, %v33879_v22 }
 0xf37   : > { %25986 = vmatmul.mubr.msk.bf16.gmra.mrb[32].mxu1 %vm14007_vm1, %v33901_v5 }
 0xf38   : > { %25989 = vmatprep.mubr.msk.bf16.mxu1 %vm14007_vm1, %v33926_v52 }
 0xf3f   : > { %25990 = vmatmul.mubr.msk.bf16.gmra.mrb[36].mxu1 %vm14007_vm1, %v33948_v1 }
 0xf40   : > { %25993 = vmatprep.mubr.msk.bf16.mxu1 %vm14007_vm1, %v33970_v44 }
 0xf47   : > { %25994 = vmatmul.mubr.msk.bf16.gmra.mrb[72].mxu1 %vm14007_vm1, %v33995_v7 }
 0xf48   : > { %25997 = vmatprep.mubr.msk.bf16.mxu1 %vm14007_vm1, %v34017_v30 }
 0xf4f   : > { %25998 = vmatmul.mubr.msk.bf16.gmra.mrb[76].mxu1 %vm14007_vm1, %v34040_v29 }
 0xf50   : > { %26001 = vmatprep.mubr.msk.bf16.mxu1 %vm14007_vm1, %v34057_v10 }
 0xf57   : > { %26002 = vmatmul.mubr.msk.bf16.gmra.mrb[80].mxu1 %vm14007_vm1, %v34081_v56 }
 0xf58   : > { %26005 = vmatprep.mubr.msk.bf16.mxu1 %vm14007_vm1, %v34097_v59 }
 0xf5f   : > { %26006 = vmatmul.mubr.msk.bf16.gmra.mrb[84].mxu1 %vm14007_vm1, %v34113_v20 }
 0xf60   : > { %26009 = vmatprep.mubr.msk.bf16.mxu1 %vm14007_vm1, %v34135_v11 }
 0xf67   : > { %26010 = vmatmul.mubr.msk.bf16.gmra.mrb[88].mxu1 %vm14007_vm1, %v34151_v45 }
 0xf68   : > { %26013 = vmatprep.mubr.msk.bf16.mxu1 %vm14007_vm1, %v34167_v16 }
 0xf6f   : > { %26014 = vmatmul.mubr.msk.bf16.gmra.mrb[92].mxu1 %vm14007_vm1, %v36671_v24 }
 0xf70   : > { %26017 = vmatprep.mubr.msk.bf16.mxu1 %vm14007_vm1, %v36672_v23 }
 0xf77   : > { %26018 = vmatmul.mubr.msk.bf16.gmra.mrb[96].mxu1 %vm14007_vm1, %v36673_v2 }
 0xf78   : > { %26021 = vmatprep.mubr.msk.bf16.mxu1 %vm14007_vm1, %v36674_v17 }
 0xf7f   : > { %26022 = vmatmul.mubr.msk.bf16.gmra.mrb[100].mxu1 %vm14007_vm1, %v36675_v34 }
 0xf80   : > { %26025 = vmatprep.mubr.msk.bf16.mxu1 %vm14007_vm1, %v34263_v32 }
 0xf87   : > { %26026 = vmatmul.mubr.msk.bf16.gmra.mrb[104].mxu1 %vm14007_vm1, %v34279_v51 }
 0xf88   : > { %26029 = vmatprep.mubr.msk.bf16.mxu1 %vm14007_vm1, %v34302_v48 }
 0xf8f   : > { %26030 = vmatmul.mubr.msk.bf16.gmra.mrb[108].mxu1 %vm14007_vm1, %v34331_v25 }
 0xf90   : > { %26033 = vmatprep.mubr.msk.bf16.mxu1 %vm14007_vm1, %v34349_v61 }
 0xf97   : > { %26034 = vmatmul.mubr.msk.bf16.gmra.mrb[112].mxu1 %vm14007_vm1, %v34379_v55 }
 0xf98   : > { %26045 = vmatprep.mubr.msk.bf16.mxu1 %vm14007_vm1, %v33541_v28  ;;  %v29096_v28 = vld [vmem:[%s35616_s5 + $0x20] sm:$0xff]  }
 0xf99   : > { %26129 = vmatprep.subr.bf16.mxu1 %v29096_v28 }
 0xf9f   : > { %26046 = vmatmul.mubr.msk.bf16.vlgmr.msra.gmra.mrb[0].mxu1 %vm14007_vm1, %v33563_v31  ;;  %v29097_v31 = vld [vmem:[%s35616_s5 + $0x28] sm:$0xff]  }
 0xfa0   : > { %26049 = vmatprep.mubr.msk.bf16.mxu1 %vm14007_vm1, %v33585_v13  ;;  %26130 = vmatpush3.bf16.msra.mxu1 %v29096_v28  ;;  %v29098_v13 = vld [vmem:[%s35616_s5 + $0x30] sm:$0xff]  }
 0xfa1   : > { %26131 = vmatprep.subr.bf16.mxu1 %v29097_v31 }
 0xfa4   : > { %26132 = vmatpush3.bf16.msra.mxu1 %v29097_v31 }
 0xfa5   : > { %26133 = vmatprep.subr.bf16.mxu1 %v29098_v13 }
 0xfa7   : > { %26050 = vmatmul.mubr.msk.bf16.gmra.mrb[4].mxu1 %vm14007_vm1, %v33607_v14  ;;  %v29099_v14 = vld [vmem:[%s35616_s5 + $0x38] sm:$0xff]  }
 0xfa8   : > { %26053 = vmatprep.mubr.msk.bf16.mxu1 %vm14007_vm1, %v33629_v33  ;;  %26134 = vmatpush3.bf16.msra.mxu1 %v29098_v13  ;;  %v34933_v33 = vld [vmem:[%s35615_s4] ss:$0 sm:$0xff] }
 0xfa9   : > { %26135 = vmatprep.subr.bf16.mxu1 %v29099_v14 }
 0xfac   : > { %26136 = vmatpush3.bf16.msra.mxu1 %v29099_v14 }
 0xfaf   : > { %26054 = vmatmul.mubr.msk.bf16.gmra.mrb[8].mxu1 %vm14007_vm1, %v33651_v53 }
 0xfb0   : > { %26057 = vmatprep.mubr.msk.bf16.mxu1 %vm14007_vm1, %v33673_v63  ;;  %v34938_v63 = vld [vmem:[%s35616_s5] sm:$0xff]  }
 0xfb1   : > { %26161 = vmatprep.subr.bf16.mxu1 %v34938_v63 }
 0xfb7   : > { %26058 = vmatmul.mubr.msk.bf16.gmra.mrb[12].mxu1 %vm14007_vm1, %v33695_v18 }
 0xfb8   : > { %26061 = vmatprep.mubr.msk.bf16.mxu1 %vm14007_vm1, %v33717_v62 }
 0xfbf   : > { %26062 = vmatmul.mubr.msk.bf16.gmra.mrb[16].mxu1 %vm14007_vm1, %v33744_v36 }
 0xfc0   : > { %26065 = vmatprep.mubr.msk.bf16.mxu1 %vm14007_vm1, %v33766_v47 }
 0xfc7   : > { %26066 = vmatmul.mubr.msk.bf16.gmra.mrb[20].mxu1 %vm14007_vm1, %v33788_v38 }
 0xfc8   : > { %26069 = vmatprep.mubr.msk.bf16.mxu1 %vm14007_vm1, %v33810_v4 }
 0xfcf   : > { %26070 = vmatmul.mubr.msk.bf16.gmra.mrb[24].mxu1 %vm14007_vm1, %v33835_v35 }
 0xfd0   : > { %26073 = vmatprep.mubr.msk.bf16.mxu1 %vm14007_vm1, %v33857_v39 }
 0xfd7   : > { %26074 = vmatmul.mubr.msk.bf16.gmra.mrb[28].mxu1 %vm14007_vm1, %v33879_v22 }
 0xfd8   : > { %26077 = vmatprep.mubr.msk.bf16.mxu1 %vm14007_vm1, %v33901_v5 }
 0xfdf   : > { %26078 = vmatmul.mubr.msk.bf16.gmra.mrb[32].mxu1 %vm14007_vm1, %v33926_v52 }
 0xfe0   : > { %26081 = vmatprep.mubr.msk.bf16.mxu1 %vm14007_vm1, %v33948_v1 }
 0xfe7   : > { %26082 = vmatmul.mubr.msk.bf16.gmra.mrb[36].mxu1 %vm14007_vm1, %v33970_v44 }
 0xfe8   : > { %26085 = vmatprep.mubr.msk.bf16.mxu1 %vm14007_vm1, %v33995_v7 }
 0xfef   : > { %26086 = vmatmul.mubr.msk.bf16.gmra.mrb[72].mxu1 %vm14007_vm1, %v34017_v30 }
 0xff0   : > { %26089 = vmatprep.mubr.msk.bf16.mxu1 %vm14007_vm1, %v34040_v29 }
 0xff7   : > { %26090 = vmatmul.mubr.msk.bf16.gmra.mrb[76].mxu1 %vm14007_vm1, %v34057_v10 }
 0xff8   : > { %26093 = vmatprep.mubr.msk.bf16.mxu1 %vm14007_vm1, %v34081_v56 }
 0xfff   : > { %26094 = vmatmul.mubr.msk.bf16.gmra.mrb[80].mxu1 %vm14007_vm1, %v34097_v59 }
0x1000   : > { %26097 = vmatprep.mubr.msk.bf16.mxu1 %vm14007_vm1, %v34113_v20 }
0x1007   : > { %26098 = vmatmul.mubr.msk.bf16.gmra.mrb[84].mxu1 %vm14007_vm1, %v34135_v11 }
0x1008   : > { %26101 = vmatprep.mubr.msk.bf16.mxu1 %vm14007_vm1, %v34151_v45 }
0x100f   : > { %26102 = vmatmul.mubr.msk.bf16.gmra.mrb[88].mxu1 %vm14007_vm1, %v34167_v16 }
0x1010   : > { %26105 = vmatprep.mubr.msk.bf16.mxu1 %vm14007_vm1, %v36671_v24 }
0x1017   : > { %26106 = vmatmul.mubr.msk.bf16.gmra.mrb[92].mxu1 %vm14007_vm1, %v36672_v23 }
0x1018   : > { %26109 = vmatprep.mubr.msk.bf16.mxu1 %vm14007_vm1, %v36673_v2 }
0x101f   : > { %26110 = vmatmul.mubr.msk.bf16.gmra.mrb[96].mxu1 %vm14007_vm1, %v36674_v17 }
0x1020   : > { %26113 = vmatprep.mubr.msk.bf16.mxu1 %vm14007_vm1, %v36675_v34 }
0x1027   : > { %26114 = vmatmul.mubr.msk.bf16.gmra.mrb[100].mxu1 %vm14007_vm1, %v34263_v32 }
0x1028   : > { %26117 = vmatprep.mubr.msk.bf16.mxu1 %vm14007_vm1, %v34279_v51 }
0x102f   : > { %26118 = vmatmul.mubr.msk.bf16.gmra.mrb[104].mxu1 %vm14007_vm1, %v34302_v48 }
0x1030   : > { %26121 = vmatprep.mubr.msk.bf16.mxu1 %vm14007_vm1, %v34331_v25 }
0x1037   : > { %26122 = vmatmul.mubr.msk.bf16.gmra.mrb[108].mxu1 %vm14007_vm1, %v34349_v61 }
0x1038   : > { %26125 = vmatprep.mubr.msk.bf16.mxu1 %vm14007_vm1, %v34379_v55 }
0x103f   : > { %26126 = vmatmul.mubr.msk.bf16.gmra.mrb[112].mxu1 %vm14007_vm1, %v13964_v49 }
0x1072   : > { %v26047_v53 = vpop.f32.mrb[0].mxu1 }
0x1073   : > { %v17352_v18 = vadd.f32 %v26047_v53, %v34933_v33  ;;  %v16925_v62 = vpop.f32.mrb[1].mxu1 }
0x1074   : > { %v17350_v36 = vadd.f32 %v34933_v33, %v16925_v62  ;;  %v26048_v47 = vpop.f32.mrb[2].mxu1 }
0x1075   : > { %v17436_v38 = vmax.f32 %v17352_v18, 0.0  ;;  %v17353_v4 = vadd.f32 %v26048_v47, %v34933_v33  ;;  %v16928_v35 = vpop.f32.mrb[3].mxu1 }
0x1076   : > { %v17434_v39 = vmax.f32 %v17350_v36, 0.0  ;;  %v17351_v22 = vadd.f32 %v34933_v33, %v16928_v35 }
0x1077   : > { %v17437_v5 = vmax.f32 %v17353_v4, 0.0 }
0x1078   : > { %v17518_v52 = vmax.f32 %v17434_v39, %v17436_v38  ;;  %v17435_v1 = vmax.f32 %v17351_v22, 0.0 }
0x107a   : > { %v17519_v44 = vmax.f32 %v17435_v1, %v17437_v5  ;;  %v26051_v7 = vpop.f32.mrb[4].mxu1 }
0x107b   : > { %v16941_v30 = vpop.f32.mrb[5].mxu1  ;;  %v17356_v16 = vadd.f32 %v26051_v7, %v34933_v33 }
0x107c   : > { %v17354_v29 = vadd.f32 %v34933_v33, %v16941_v30  ;;  %v26052_v10 = vpop.f32.mrb[6].mxu1 }
0x107d   : > { %v16944_v56 = vpop.f32.mrb[7].mxu1  ;;  %v17357_v25 = vadd.f32 %v26052_v10, %v34933_v33  ;;  %v17440_v3 = vmax.f32 %v17356_v16, 0.0 }
0x107e   : > { %v17438_v59 = vmax.f32 %v17354_v29, 0.0  ;;  %v17355_v20 = vadd.f32 %v34933_v33, %v16944_v56  ;;  %v29101_v29 = vld [vmem:[%s35616_s5 + $0x8] sm:$0xff]  }
0x107f   : > { %v17441_v49 = vmax.f32 %v17357_v25, 0.0 }
0x1080   : > { %v34947_v11 = vmax.f32 %v17518_v52, %v17438_v59  ;;  %v17439_v45 = vmax.f32 %v17355_v20, 0.0 }
0x1082   : > { %v34950_v32 = vmax.f32 %v17519_v44, %v17439_v45  ;;  %v26055_v51 = vpop.f32.mrb[8].mxu1 }
0x1083   : > { %v16957_v48 = vpop.f32.mrb[9].mxu1  ;;  %v17360_v55 = vadd.f32 %v26055_v51, %v34933_v33 }
0x1084   : > { %v17574_v61 = vpack.c.bf16 %v34950_v32, %v34947_v11  ;;  %v17358_v50 = vadd.f32 %v34933_v33, %v16957_v48  ;;  %v26056_v12 = vpop.f32.mrb[10].mxu1  ;;  %v29106_v11 = vld [vmem:[%s35616_s5 + $0x50] sm:$0xff]   ;;  %v29107_v32 = vld [vmem:[%s35616_s5 + $0x58] sm:$0xff]  }
0x1085   : > { %v16960_v41 = vpop.f32.mrb[11].mxu1  ;;  %v17361_v9 = vadd.f32 %v26056_v12, %v34933_v33  ;;  %v17444_v24 = vmax.f32 %v17360_v55, 0.0  ;;  %v29102_v55 = vld [vmem:[%s35616_s5 + $0x10] sm:$0xff]  }
0x1086   : > { %v17442_v60 = vmax.f32 %v17358_v50, 0.0  ;;  %v17359_v54 = vadd.f32 %v34933_v33, %v16960_v41 }
0x1087   : > { %v17445_v34 = vmax.f32 %v17361_v9, 0.0 }
0x1088   : > { %v17520_v23 = vmax.f32 %v17440_v3, %v17442_v60  ;;  %v17443_v2 = vmax.f32 %v17359_v54, 0.0 }
0x108a   : > { %v17548_v17 = vmax.f32 %v17520_v23, %v17444_v24  ;;  %v17521_v21 = vmax.f32 %v17441_v49, %v17443_v2  ;;  %v26059_v43 = vpop.f32.mrb[12].mxu1  ;;  %v29103_v24 = vld [vmem:[%s35616_s5 + $0x18] sm:$0xff]  }
0x108b   : > { %v17364_v58 = vadd.f32 %v26059_v43, %v34933_v33  ;;  %v16973_v46 = vpop.f32.mrb[13].mxu1 }
0x108c   : > { %v17549_v6 = vmax.f32 %v17521_v21, %v17445_v34  ;;  %v17362_v42 = vadd.f32 %v34933_v33, %v16973_v46  ;;  %v26060_v57 = vpop.f32.mrb[14].mxu1 }
0x108d   : > { %v17448_v15 = vmax.f32 %v17364_v58, 0.0  ;;  %v17365_v37 = vadd.f32 %v26060_v57, %v34933_v33  ;;  %v16976_v27 = vpop.f32.mrb[15].mxu1 }
0x108e   : > { %v34962_v8 = vpack.c.bf16 %v17549_v6, %v17548_v17  ;;  %v17446_v19 = vmax.f32 %v17362_v42, 0.0  ;;  %v17363_v40 = vadd.f32 %v34933_v33, %v16976_v27  ;;  %v35000_v42 = vld [vmem:[%s35616_s5 + $0x40] sm:$0xff]  }
0x108f   : > { %v17449_v0 = vmax.f32 %v17365_v37, 0.0 }
0x1090   : > { %v17522_v26 = vmax.f32 %v17446_v19, %v17448_v15  ;;  %v17447_v28 = vmax.f32 %v17363_v40, 0.0  ;;  %26137 = vmatprep.mubr.msk.bf16.mxu1 %vm14007_vm1, %v34962_v8 }
0x1092   : > { %v17523_v31 = vmax.f32 %v17447_v28, %v17449_v0  ;;  %v26063_v13 = vpop.f32.mrb[16].mxu1 }
0x1093   : > { %v16989_v14 = vpop.f32.mrb[17].mxu1  ;;  %v17368_v35 = vadd.f32 %v26063_v13, %v34933_v33 }
0x1094   : > { %v17366_v53 = vadd.f32 %v34933_v33, %v16989_v14  ;;  %v26064_v18 = vpop.f32.mrb[18].mxu1 }
0x1095   : > { %v16992_v62 = vpop.f32.mrb[19].mxu1  ;;  %v17369_v52 = vadd.f32 %v26064_v18, %v34933_v33  ;;  %v17452_v56 = vmax.f32 %v17368_v35, 0.0 }
0x1096   : > { %v17450_v36 = vmax.f32 %v17366_v53, 0.0  ;;  %v17367_v47 = vadd.f32 %v34933_v33, %v16992_v62 }
0x1097   : > { %v17453_v16 = vmax.f32 %v17369_v52, 0.0 }
0x1098   : > { %v17550_v38 = vmax.f32 %v17522_v26, %v17450_v36  ;;  %v17451_v4 = vmax.f32 %v17367_v47, 0.0 }
0x109a   : > { %v17551_v39 = vmax.f32 %v17523_v31, %v17451_v4  ;;  %v26067_v22 = vpop.f32.mrb[20].mxu1 }
0x109b   : > { %v17005_v5 = vpop.f32.mrb[21].mxu1  ;;  %v17372_v44 = vadd.f32 %v26067_v22, %v34933_v33 }
0x109c   : > { %v34971_v1 = vpack.c.bf16 %v17551_v39, %v17550_v38  ;;  %v17370_v7 = vadd.f32 %v34933_v33, %v17005_v5  ;;  %v26068_v30 = vpop.f32.mrb[22].mxu1 }
0x109d   : > { %v17008_v10 = vpop.f32.mrb[23].mxu1  ;;  %v17373_v20 = vadd.f32 %v26068_v30, %v34933_v33  ;;  %v17456_v51 = vmax.f32 %v17372_v44, 0.0 }
0x109e   : > { %v17454_v59 = vmax.f32 %v17370_v7, 0.0  ;;  %v17371_v45 = vadd.f32 %v34933_v33, %v17008_v10  ;;  %26138 = vmatmul.mubr.msk.bf16.vlgmr.msra.gmra.mrb[116].mxu1 %vm14007_vm1, %v34971_v1 }
0x109f   : > { %26162 = vmatpush3.bf16.msra.mxu1 %v34938_v63  ;;  %v17457_v12 = vmax.f32 %v17373_v20, 0.0 }
0x10a0   : > { %v17524_v48 = vmax.f32 %v17452_v56, %v17454_v59  ;;  %v17455_v25 = vmax.f32 %v17371_v45, 0.0  ;;  %26163 = vmatprep.subr.bf16.mxu1 %v29101_v29 }
0x10a2   : > { %v17552_v50 = vmax.f32 %v17524_v48, %v17456_v51  ;;  %v17525_v41 = vmax.f32 %v17453_v16, %v17455_v25  ;;  %v26071_v3 = vpop.f32.mrb[24].mxu1 }
0x10a3   : > { %v17376_v60 = vadd.f32 %v26071_v3, %v34933_v33  ;;  %v17021_v9 = vpop.f32.mrb[25].mxu1  ;;  %26164 = vmatpush3.bf16.msra.mxu1 %v29101_v29 }
0x10a4   : > { %v17553_v54 = vmax.f32 %v17525_v41, %v17457_v12  ;;  %v17374_v63 = vadd.f32 %v34933_v33, %v17021_v9  ;;  %v26072_v49 = vpop.f32.mrb[26].mxu1  ;;  %26165 = vmatprep.subr.bf16.mxu1 %v29102_v55 }
0x10a5   : > { %v17460_v23 = vmax.f32 %v17376_v60, 0.0  ;;  %v17377_v2 = vadd.f32 %v26072_v49, %v34933_v33  ;;  %v17024_v17 = vpop.f32.mrb[27].mxu1 }
0x10a6   : > { %v34992_v34 = vpack.c.bf16 %v17553_v54, %v17552_v50  ;;  %v17458_v21 = vmax.f32 %v17374_v63, 0.0  ;;  %v17375_v43 = vadd.f32 %v34933_v33, %v17024_v17 }
0x10a7   : > { %v17461_v58 = vmax.f32 %v17377_v2, 0.0  ;;  %26166 = vmatpush3.bf16.msra.mxu1 %v29102_v55 }
0x10a8   : > { %v17526_v46 = vmax.f32 %v17458_v21, %v17460_v23  ;;  %v17459_v6 = vmax.f32 %v17375_v43, 0.0  ;;  %26141 = vmatprep.mubr.msk.bf16.mxu1 %vm14007_vm1, %v34992_v34  ;;  %26167 = vmatprep.subr.bf16.mxu1 %v29103_v24 }
0x10aa   : > { %v17527_v57 = vmax.f32 %v17459_v6, %v17461_v58  ;;  %v26075_v15 = vpop.f32.mrb[28].mxu1 }
0x10ab   : > { %v17037_v37 = vpop.f32.mrb[29].mxu1  ;;  %26168 = vmatpush3.bf16.msra.mxu1 %v29103_v24  ;;  %v17380_v13 = vadd.f32 %v26075_v15, %v34933_v33 }
0x10ac   : > { %v17378_v27 = vadd.f32 %v34933_v33, %v17037_v37  ;;  %v26076_v19 = vpop.f32.mrb[30].mxu1  ;;  %26193 = vmatprep.subr.bf16.mxu1 %v35000_v42 }
0x10ad   : > { %v17040_v40 = vpop.f32.mrb[31].mxu1  ;;  %v17381_v62 = vadd.f32 %v26076_v19, %v34933_v33  ;;  %v17464_v39 = vmax.f32 %v17380_v13, 0.0 }
0x10ae   : > { %v17462_v0 = vmax.f32 %v17378_v27, 0.0  ;;  %v17379_v26 = vadd.f32 %v34933_v33, %v17040_v40 }
0x10af   : > { %v17465_v44 = vmax.f32 %v17381_v62, 0.0 }
0x10b0   : > { %v17554_v28 = vmax.f32 %v17526_v46, %v17462_v0  ;;  %v17463_v31 = vmax.f32 %v17379_v26, 0.0 }
0x10b2   : > { %v17555_v14 = vmax.f32 %v17527_v57, %v17463_v31  ;;  %v26079_v53 = vpop.f32.mrb[32].mxu1 }
0x10b3   : > { %v17053_v18 = vpop.f32.mrb[33].mxu1  ;;  %v17384_v47 = vadd.f32 %v26079_v53, %v34933_v33 }
0x10b4   : > { %v35007_v36 = vpack.c.bf16 %v17555_v14, %v17554_v28  ;;  %v17382_v38 = vadd.f32 %v34933_v33, %v17053_v18  ;;  %v26080_v4 = vpop.f32.mrb[34].mxu1 }
0x10b5   : > { %v17056_v35 = vpop.f32.mrb[35].mxu1  ;;  %v17385_v5 = vadd.f32 %v26080_v4, %v34933_v33  ;;  %v17468_v7 = vmax.f32 %v17384_v47, 0.0 }
0x10b6   : > { %v17466_v22 = vmax.f32 %v17382_v38, 0.0  ;;  %v17383_v52 = vadd.f32 %v34933_v33, %v17056_v35  ;;  %26142 = vmatmul.mubr.msk.bf16.gmra.mrb[120].mxu1 %vm14007_vm1, %v35007_v36 }
0x10b7   : > { %v17469_v56 = vmax.f32 %v17385_v5, 0.0 }
0x10b8   : > { %v17528_v30 = vmax.f32 %v17464_v39, %v17466_v22  ;;  %v17467_v29 = vmax.f32 %v17383_v52, 0.0 }
0x10ba   : > { %v17556_v10 = vmax.f32 %v17528_v30, %v17468_v7  ;;  %v17529_v59 = vmax.f32 %v17465_v44, %v17467_v29  ;;  %v26083_v20 = vpop.f32.mrb[36].mxu1 }
0x10bb   : > { %v17388_v45 = vadd.f32 %v26083_v20, %v34933_v33  ;;  %v17069_v16 = vpop.f32.mrb[37].mxu1 }
0x10bc   : > { %v17557_v51 = vmax.f32 %v17529_v59, %v17469_v56  ;;  %v17386_v48 = vadd.f32 %v34933_v33, %v17069_v16  ;;  %v26084_v25 = vpop.f32.mrb[38].mxu1 }
0x10bd   : > { %v17472_v55 = vmax.f32 %v17388_v45, 0.0  ;;  %v17389_v50 = vadd.f32 %v26084_v25, %v34933_v33  ;;  %v17072_v12 = vpop.f32.mrb[39].mxu1 }
0x10be   : > { %v35018_v41 = vpack.c.bf16 %v17557_v51, %v17556_v10  ;;  %v17470_v3 = vmax.f32 %v17386_v48, 0.0  ;;  %v17387_v60 = vadd.f32 %v34933_v33, %v17072_v12 }
0x10bf   : > { %v17473_v9 = vmax.f32 %v17389_v50, 0.0 }
0x10c0   : > { %v17530_v54 = vmax.f32 %v17470_v3, %v17472_v55  ;;  %v17471_v63 = vmax.f32 %v17387_v60, 0.0  ;;  %26145 = vmatprep.mubr.msk.bf16.mxu1 %vm14007_vm1, %v35018_v41 }
0x10c2   : > { %v17531_v49 = vmax.f32 %v17471_v63, %v17473_v9  ;;  %v26087_v24 = vpop.f32.mrb[72].mxu1 }
0x10c3   : > { %v17085_v23 = vpop.f32.mrb[73].mxu1  ;;  %v17392_v57 = vadd.f32 %v26087_v24, %v34933_v33 }
0x10c4   : > { %v17390_v2 = vadd.f32 %v34933_v33, %v17085_v23  ;;  %v26088_v17 = vpop.f32.mrb[74].mxu1 }
0x10c5   : > { %v17088_v21 = vpop.f32.mrb[75].mxu1  ;;  %v17393_v19 = vadd.f32 %v26088_v17, %v34933_v33  ;;  %v17476_v13 = vmax.f32 %v17392_v57, 0.0 }
0x10c6   : > { %v17474_v43 = vmax.f32 %v17390_v2, 0.0  ;;  %v17391_v58 = vadd.f32 %v34933_v33, %v17088_v21 }
0x10c7   : > { %v17477_v62 = vmax.f32 %v17393_v19, 0.0 }
0x10c8   : > { %v17558_v46 = vmax.f32 %v17530_v54, %v17474_v43  ;;  %v17475_v6 = vmax.f32 %v17391_v58, 0.0 }
0x10ca   : > { %v17559_v15 = vmax.f32 %v17531_v49, %v17475_v6  ;;  %v26091_v37 = vpop.f32.mrb[76].mxu1 }
0x10cb   : > { %v17101_v27 = vpop.f32.mrb[77].mxu1  ;;  %v17396_v0 = vadd.f32 %v26091_v37, %v34933_v33 }
0x10cc   : > { %v35027_v40 = vpack.c.bf16 %v17559_v15, %v17558_v46  ;;  %v17394_v26 = vadd.f32 %v34933_v33, %v17101_v27  ;;  %v26092_v28 = vpop.f32.mrb[78].mxu1 }
0x10cd   : > { %v17104_v31 = vpop.f32.mrb[79].mxu1  ;;  %v17397_v53 = vadd.f32 %v26092_v28, %v34933_v33  ;;  %v17480_v47 = vmax.f32 %v17396_v0, 0.0 }
0x10ce   : > { %v17478_v14 = vmax.f32 %v17394_v26, 0.0  ;;  %v17395_v18 = vadd.f32 %v34933_v33, %v17104_v31  ;;  %26146 = vmatmul.mubr.msk.bf16.gmra.mrb[124].mxu1 %vm14007_vm1, %v35027_v40 }
0x10cf   : > { %v17481_v39 = vmax.f32 %v17397_v53, 0.0 }
0x10d0   : > { %v17532_v38 = vmax.f32 %v17476_v13, %v17478_v14  ;;  %v17479_v4 = vmax.f32 %v17395_v18, 0.0 }
0x10d2   : > { %v17560_v35 = vmax.f32 %v17532_v38, %v17480_v47  ;;  %v17533_v22 = vmax.f32 %v17477_v62, %v17479_v4  ;;  %v26095_v5 = vpop.f32.mrb[80].mxu1 }
0x10d3   : > { %v17400_v52 = vadd.f32 %v26095_v5, %v34933_v33  ;;  %v17117_v44 = vpop.f32.mrb[81].mxu1 }
0x10d4   : > { %v17561_v7 = vmax.f32 %v17533_v22, %v17481_v39  ;;  %v17398_v30 = vadd.f32 %v34933_v33, %v17117_v44  ;;  %v26096_v29 = vpop.f32.mrb[82].mxu1 }
0x10d5   : > { %v17484_v10 = vmax.f32 %v17400_v52, 0.0  ;;  %v17401_v56 = vadd.f32 %v26096_v29, %v34933_v33  ;;  %v17120_v59 = vpop.f32.mrb[83].mxu1 }
0x10d6   : > { %v35038_v20 = vpack.c.bf16 %v17561_v7, %v17560_v35  ;;  %v17482_v45 = vmax.f32 %v17398_v30, 0.0  ;;  %v17399_v16 = vadd.f32 %v34933_v33, %v17120_v59 }
0x10d7   : > { %v17485_v51 = vmax.f32 %v17401_v56, 0.0 }
0x10d8   : > { %v17534_v48 = vmax.f32 %v17482_v45, %v17484_v10  ;;  %v17483_v25 = vmax.f32 %v17399_v16, 0.0  ;;  %26149 = vmatprep.mubr.msk.bf16.mxu1 %vm14007_vm1, %v35038_v20 }
0x10da   : > { %v17535_v55 = vmax.f32 %v17483_v25, %v17485_v51  ;;  %v26099_v50 = vpop.f32.mrb[84].mxu1 }
0x10db   : > { %v17133_v12 = vpop.f32.mrb[85].mxu1  ;;  %v17404_v23 = vadd.f32 %v26099_v50, %v34933_v33 }
0x10dc   : > { %v17402_v3 = vadd.f32 %v34933_v33, %v17133_v12  ;;  %v26100_v60 = vpop.f32.mrb[86].mxu1 }
0x10dd   : > { %v17136_v9 = vpop.f32.mrb[87].mxu1  ;;  %v17405_v43 = vadd.f32 %v26100_v60, %v34933_v33  ;;  %v17488_v37 = vmax.f32 %v17404_v23, 0.0 }
0x10de   : > { %v17486_v54 = vmax.f32 %v17402_v3, 0.0  ;;  %v17403_v63 = vadd.f32 %v34933_v33, %v17136_v9 }
0x10df   : > { %v17489_v26 = vmax.f32 %v17405_v43, 0.0 }
0x10e0   : > { %v17562_v49 = vmax.f32 %v17534_v48, %v17486_v54  ;;  %v17487_v24 = vmax.f32 %v17403_v63, 0.0 }
0x10e2   : > { %v17563_v2 = vmax.f32 %v17535_v55, %v17487_v24  ;;  %v26103_v17 = vpop.f32.mrb[88].mxu1 }
0x10e3   : > { %v17149_v21 = vpop.f32.mrb[89].mxu1  ;;  %v17408_v46 = vadd.f32 %v26103_v17, %v34933_v33 }
0x10e4   : > { %v35047_v58 = vpack.c.bf16 %v17563_v2, %v17562_v49  ;;  %v17406_v6 = vadd.f32 %v34933_v33, %v17149_v21  ;;  %v26104_v57 = vpop.f32.mrb[90].mxu1 }
0x10e5   : > { %v17152_v15 = vpop.f32.mrb[91].mxu1  ;;  %v17409_v19 = vadd.f32 %v26104_v57, %v34933_v33  ;;  %v17492_v28 = vmax.f32 %v17408_v46, 0.0 }
0x10e6   : > { %v17490_v27 = vmax.f32 %v17406_v6, 0.0  ;;  %v17407_v0 = vadd.f32 %v34933_v33, %v17152_v15  ;;  %26150 = vmatmul.mubr.msk.bf16.gmra.mrb[128].mxu1 %vm14007_vm1, %v35047_v58 }
0x10e7   : > { %v17493_v53 = vmax.f32 %v17409_v19, 0.0 }
0x10e8   : > { %v17536_v31 = vmax.f32 %v17488_v37, %v17490_v27  ;;  %v17491_v13 = vmax.f32 %v17407_v0, 0.0 }
0x10ea   : > { %v17564_v14 = vmax.f32 %v17536_v31, %v17492_v28  ;;  %v17537_v18 = vmax.f32 %v17489_v26, %v17491_v13  ;;  %v26107_v62 = vpop.f32.mrb[92].mxu1 }
0x10eb   : > { %v17412_v47 = vadd.f32 %v26107_v62, %v34933_v33  ;;  %v17165_v38 = vpop.f32.mrb[93].mxu1 }
0x10ec   : > { %v17565_v4 = vmax.f32 %v17537_v18, %v17493_v53  ;;  %v17410_v35 = vadd.f32 %v34933_v33, %v17165_v38  ;;  %v26108_v39 = vpop.f32.mrb[94].mxu1 }
0x10ed   : > { %v17496_v22 = vmax.f32 %v17412_v47, 0.0  ;;  %v17413_v5 = vadd.f32 %v26108_v39, %v34933_v33  ;;  %v17168_v52 = vpop.f32.mrb[95].mxu1 }
0x10ee   : > { %v35058_v44 = vpack.c.bf16 %v17565_v4, %v17564_v14  ;;  %v17494_v7 = vmax.f32 %v17410_v35, 0.0  ;;  %v17411_v30 = vadd.f32 %v34933_v33, %v17168_v52 }
0x10ef   : > { %v17497_v29 = vmax.f32 %v17413_v5, 0.0 }
0x10f0   : > { %v17538_v10 = vmax.f32 %v17494_v7, %v17496_v22  ;;  %v17495_v56 = vmax.f32 %v17411_v30, 0.0  ;;  %26153 = vmatprep.mubr.msk.bf16.mxu1 %vm14007_vm1, %v35058_v44 }
0x10f2   : > { %v17539_v59 = vmax.f32 %v17495_v56, %v17497_v29  ;;  %v26111_v45 = vpop.f32.mrb[96].mxu1 }
0x10f3   : > { %v17181_v16 = vpop.f32.mrb[97].mxu1  ;;  %v17416_v60 = vadd.f32 %v26111_v45, %v34933_v33 }
0x10f4   : > { %v17414_v51 = vadd.f32 %v34933_v33, %v17181_v16  ;;  %v26112_v48 = vpop.f32.mrb[98].mxu1 }
0x10f5   : > { %v17184_v25 = vpop.f32.mrb[99].mxu1  ;;  %v17417_v49 = vadd.f32 %v26112_v48, %v34933_v33  ;;  %v17500_v43 = vmax.f32 %v17416_v60, 0.0 }
0x10f6   : > { %v17498_v55 = vmax.f32 %v17414_v51, 0.0  ;;  %v17415_v50 = vadd.f32 %v34933_v33, %v17184_v25 }
0x10f7   : > { %v17501_v15 = vmax.f32 %v17417_v49, 0.0 }
0x10f8   : > { %v17566_v12 = vmax.f32 %v17538_v10, %v17498_v55  ;;  %v17499_v3 = vmax.f32 %v17415_v50, 0.0 }
0x10fa   : > { %v17567_v9 = vmax.f32 %v17539_v59, %v17499_v3  ;;  %v26115_v54 = vpop.f32.mrb[100].mxu1 }
0x10fb   : > { %v17197_v63 = vpop.f32.mrb[101].mxu1  ;;  %v17420_v23 = vadd.f32 %v26115_v54, %v34933_v33 }
0x10fc   : > { %v35067_v24 = vpack.c.bf16 %v17567_v9, %v17566_v12  ;;  %v17418_v2 = vadd.f32 %v34933_v33, %v17197_v63  ;;  %v26116_v17 = vpop.f32.mrb[102].mxu1 }
0x10fd   : > { %v17200_v21 = vpop.f32.mrb[103].mxu1  ;;  %v17421_v6 = vadd.f32 %v26116_v17, %v34933_v33  ;;  %v17504_v37 = vmax.f32 %v17420_v23, 0.0 }
0x10fe   : > { %v17502_v46 = vmax.f32 %v17418_v2, 0.0  ;;  %v17419_v57 = vadd.f32 %v34933_v33, %v17200_v21  ;;  %26154 = vmatmul.mubr.msk.bf16.gmra.mrb[132].mxu1 %vm14007_vm1, %v35067_v24 }
0x10ff   : > { %v17505_v26 = vmax.f32 %v17421_v6, 0.0 }
0x1100   : > { %v17540_v27 = vmax.f32 %v17500_v43, %v17502_v46  ;;  %v17503_v19 = vmax.f32 %v17419_v57, 0.0 }
0x1102   : > { %v17568_v0 = vmax.f32 %v17540_v27, %v17504_v37  ;;  %v17541_v28 = vmax.f32 %v17501_v15, %v17503_v19  ;;  %v26119_v31 = vpop.f32.mrb[104].mxu1 }
0x1103   : > { %v17424_v13 = vadd.f32 %v26119_v31, %v34933_v33  ;;  %v17213_v14 = vpop.f32.mrb[105].mxu1 }
0x1104   : > { %v17569_v53 = vmax.f32 %v17541_v28, %v17505_v26  ;;  %v17422_v18 = vadd.f32 %v34933_v33, %v17213_v14  ;;  %v26120_v62 = vpop.f32.mrb[106].mxu1  ;;  %v29105_v26 = vld [vmem:[%s35616_s5 + $0x48] sm:$0xff]  }
0x1105   : > { %v17508_v47 = vmax.f32 %v17424_v13, 0.0  ;;  %v17425_v38 = vadd.f32 %v26120_v62, %v34933_v33  ;;  %v17216_v4 = vpop.f32.mrb[107].mxu1 }
0x1106   : > { %v35078_v35 = vpack.c.bf16 %v17569_v53, %v17568_v0  ;;  %v17506_v39 = vmax.f32 %v17422_v18, 0.0  ;;  %v17423_v22 = vadd.f32 %v34933_v33, %v17216_v4 }
0x1107   : > { %v17509_v5 = vmax.f32 %v17425_v38, 0.0 }
0x1108   : > { %v17542_v52 = vmax.f32 %v17506_v39, %v17508_v47  ;;  %v17507_v7 = vmax.f32 %v17423_v22, 0.0  ;;  %26157 = vmatprep.mubr.msk.bf16.mxu1 %vm14007_vm1, %v35078_v35 }
0x110a   : > { %v17543_v30 = vmax.f32 %v17507_v7, %v17509_v5  ;;  %v26123_v29 = vpop.f32.mrb[108].mxu1 }
0x110b   : > { %v17229_v10 = vpop.f32.mrb[109].mxu1  ;;  %v17428_v55 = vadd.f32 %v26123_v29, %v34933_v33 }
0x110c   : > { %v17426_v56 = vadd.f32 %v34933_v33, %v17229_v10  ;;  %v26124_v59 = vpop.f32.mrb[110].mxu1 }
0x110d   : > { %v17232_v45 = vpop.f32.mrb[111].mxu1  ;;  %v17429_v60 = vadd.f32 %v26124_v59, %v34933_v33  ;;  %v17512_v2 = vmax.f32 %v17428_v55, 0.0 }
0x110e   : > { %v17510_v16 = vmax.f32 %v17426_v56, 0.0  ;;  %v17427_v51 = vadd.f32 %v34933_v33, %v17232_v45 }
0x110f   : > { %v17513_v46 = vmax.f32 %v17429_v60, 0.0 }
0x1110   : > { %v17570_v48 = vmax.f32 %v17542_v52, %v17510_v16  ;;  %v17511_v25 = vmax.f32 %v17427_v51, 0.0  ;;  %v29113_v51 = vld [vmem:[%s35618_s7 + $0x8] sm:$0xff]  }
0x1112   : > { %v17571_v50 = vmax.f32 %v17543_v30, %v17511_v25  ;;  %v26127_v12 = vpop.f32.mrb[112].mxu1 }
0x1113   : > { %v17245_v3 = vpop.f32.mrb[113].mxu1  ;;  %v17432_v54 = vadd.f32 %v26127_v12, %v34933_v33 }
0x1114   : > { %v17586_v9 = vpack.c.bf16 %v17571_v50, %v17570_v48  ;;  %v17430_v63 = vadd.f32 %v34933_v33, %v17245_v3  ;;  %v26128_v49 = vpop.f32.mrb[114].mxu1 }
0x1115   : > { %v17248_v23 = vpop.f32.mrb[115].mxu1  ;;  %v17433_v21 = vadd.f32 %v26128_v49, %v34933_v33  ;;  %v17516_v6 = vmax.f32 %v17432_v54, 0.0 }
0x1116   : > { %v17514_v17 = vmax.f32 %v17430_v63, 0.0  ;;  %v17431_v43 = vadd.f32 %v34933_v33, %v17248_v23  ;;  %26158 = vmatmul.mubr.msk.bf16.gmra.mrb[136].mxu1 %vm14007_vm1, %v17586_v9 }
0x1117   : > { %26169 = vmatprep.mubr.msk.bf16.mxu1 %vm14007_vm1, %v17574_v61  ;;  %v17517_v27 = vmax.f32 %v17433_v21, 0.0  ;;  %v29108_v61 = vld [vmem:[%s35618_s7 + $0x20] sm:$0xff]  }
0x1118   : > { %v17544_v57 = vmax.f32 %v17512_v2, %v17514_v17  ;;  %v17515_v15 = vmax.f32 %v17431_v43, 0.0  ;;  %v29115_v43 = vld [vmem:[%s35618_s7 + $0x18] sm:$0xff]  }
0x111a   : > { %v17572_v37 = vmax.f32 %v17544_v57, %v17516_v6  ;;  %v17545_v19 = vmax.f32 %v17513_v46, %v17515_v15 }
0x111c   : > { %v17573_v0 = vmax.f32 %v17545_v19, %v17517_v27 }
0x111e   : > { %v17587_v33 = vpack.c.bf16 %v17573_v0, %v17572_v37  ;;  %26170 = vmatmul.mubr.msk.bf16.vlgmr.msra.gmra.mrb[116].mxu1 %vm14007_vm1, %v34962_v8  ;;  %v29109_v8 = vld [vmem:[%s35618_s7 + $0x28] sm:$0xff]   ;;  %v29116_v0 = vld [vmem:[%s35618_s7 + $0x40] sm:$0xff]  }
0x111f   : > { %26194 = vmatpush3.bf16.msra.mxu1 %v35000_v42  ;;  %26173 = vmatprep.mubr.msk.bf16.mxu1 %vm14007_vm1, %v34971_v1  ;;  %v29110_v42 = vld [vmem:[%s35618_s7 + $0x30] sm:$0xff]  }
0x1120   : > { %26195 = vmatprep.subr.bf16.mxu1 %v29105_v26 }
0x1123   : > { %26196 = vmatpush3.bf16.msra.mxu1 %v29105_v26 }
0x1124   : > { %26197 = vmatprep.subr.bf16.mxu1 %v29106_v11 }
0x1126   : > { %26174 = vmatmul.mubr.msk.bf16.gmra.mrb[120].mxu1 %vm14007_vm1, %v34992_v34 }
0x1127   : > { %26177 = vmatprep.mubr.msk.bf16.mxu1 %vm14007_vm1, %v35007_v36  ;;  %26198 = vmatpush3.bf16.msra.mxu1 %v29106_v11 }
0x1128   : > { %26199 = vmatprep.subr.bf16.mxu1 %v29107_v32 }
0x112b   : > { %26200 = vmatpush3.bf16.msra.mxu1 %v29107_v32 }
0x112c   : > { %26225 = vmatprep.subr.bf16.mxu1 %v29108_v61 }
0x112e   : > { %26178 = vmatmul.mubr.msk.bf16.gmra.mrb[124].mxu1 %vm14007_vm1, %v35018_v41 }
0x112f   : > { %26181 = vmatprep.mubr.msk.bf16.mxu1 %vm14007_vm1, %v35027_v40 }
0x1136   : > { %26182 = vmatmul.mubr.msk.bf16.gmra.mrb[128].mxu1 %vm14007_vm1, %v35038_v20 }
0x1137   : > { %26185 = vmatprep.mubr.msk.bf16.mxu1 %vm14007_vm1, %v35047_v58 }
0x113e   : > { %26186 = vmatmul.mubr.msk.bf16.gmra.mrb[132].mxu1 %vm14007_vm1, %v35058_v44 }
0x113f   : > { %26189 = vmatprep.mubr.msk.bf16.mxu1 %vm14007_vm1, %v35067_v24 }
0x1146   : > { %26190 = vmatmul.mubr.msk.bf16.gmra.mrb[136].mxu1 %vm14007_vm1, %v35078_v35 }
0x1147   : > { %26201 = vmatprep.mubr.msk.bf16.mxu1 %vm14007_vm1, %v34971_v1  ;;  %v29111_v1 = vld [vmem:[%s35618_s7 + $0x38] sm:$0xff]  }
0x114e   : > { %26202 = vmatmul.mubr.msk.bf16.vlgmr.msra.gmra.mrb[116].mxu1 %vm14007_vm1, %v34992_v34  ;;  %v29112_v34 = vld [vmem:[%s35618_s7] sm:$0xff]  }
0x114f   : > { %26205 = vmatprep.mubr.msk.bf16.mxu1 %vm14007_vm1, %v35007_v36  ;;  %26226 = vmatpush3.bf16.msra.mxu1 %v29108_v61  ;;  %v35168_v36 = vld [vmem:[%s35617_s6] ss:$0 sm:$0xff] }
0x1150   : > { %26227 = vmatprep.subr.bf16.mxu1 %v29109_v8 }
0x1153   : > { %26228 = vmatpush3.bf16.msra.mxu1 %v29109_v8 }
0x1154   : > { %26229 = vmatprep.subr.bf16.mxu1 %v29110_v42 }
0x1156   : > { %26206 = vmatmul.mubr.msk.bf16.gmra.mrb[120].mxu1 %vm14007_vm1, %v35018_v41 }
0x1157   : > { %26209 = vmatprep.mubr.msk.bf16.mxu1 %vm14007_vm1, %v35027_v40  ;;  %26230 = vmatpush3.bf16.msra.mxu1 %v29110_v42 }
0x1158   : > { %26231 = vmatprep.subr.bf16.mxu1 %v29111_v1 }
0x115b   : > { %26232 = vmatpush3.bf16.msra.mxu1 %v29111_v1 }
0x115c   : > { %26253 = vmatprep.subr.bf16.mxu1 %v29112_v34 }
0x115e   : > { %26210 = vmatmul.mubr.msk.bf16.gmra.mrb[124].mxu1 %vm14007_vm1, %v35038_v20 }
0x115f   : > { %26213 = vmatprep.mubr.msk.bf16.mxu1 %vm14007_vm1, %v35047_v58 }
0x1166   : > { %26214 = vmatmul.mubr.msk.bf16.gmra.mrb[128].mxu1 %vm14007_vm1, %v35058_v44 }
0x1167   : > { %26217 = vmatprep.mubr.msk.bf16.mxu1 %vm14007_vm1, %v35067_v24 }
0x116e   : > { %26218 = vmatmul.mubr.msk.bf16.gmra.mrb[132].mxu1 %vm14007_vm1, %v35078_v35 }
0x116f   : > { %26221 = vmatprep.mubr.msk.bf16.mxu1 %vm14007_vm1, %v17586_v9  ;;  %v29114_v9 = vld [vmem:[%s35618_s7 + $0x10] sm:$0xff]  }
0x1176   : > { %26222 = vmatmul.mubr.msk.bf16.gmra.mrb[136].mxu1 %vm14007_vm1, %v17587_v33 }
0x1221   : > { %v26203_v41 = vpop.f32.mrb[116].mxu1 }
0x1222   : > { %v18148_v40 = vadd.f32 %v26203_v41, %v35168_v36  ;;  %v18021_v20 = vpop.f32.mrb[117].mxu1 }
0x1223   : > { %v18146_v58 = vadd.f32 %v35168_v36, %v18021_v20  ;;  %v26204_v44 = vpop.f32.mrb[118].mxu1 }
0x1224   : > { %v18149_v24 = vadd.f32 %v26204_v44, %v35168_v36  ;;  %v18024_v28 = vpop.f32.mrb[119].mxu1  ;;  %v18172_v13 = vmax.f32 %v18148_v40, 0.0 }
0x1225   : > { %v18147_v31 = vadd.f32 %v35168_v36, %v18024_v28  ;;  %v18170_v53 = vmax.f32 %v18146_v58, 0.0 }
0x1226   : > { %v18173_v14 = vmax.f32 %v18149_v24, 0.0 }
0x1227   : > { %v18171_v18 = vmax.f32 %v18147_v31, 0.0 }
0x1228   : > { %v35174_v62 = vpack.c.bf16 %v18173_v14, %v18172_v13 }
0x1229   : > { %v35176_v47 = vpack.c.bf16 %v18171_v18, %v18170_v53  ;;  %v26207_v38 = vpop.f32.mrb[120].mxu1 }
0x122a   : > { %v18152_v4 = vadd.f32 %v26207_v38, %v35168_v36  ;;  %v18037_v35 = vpop.f32.mrb[121].mxu1  ;;  %26233 = vmatprep.mubr.msk.bf16.mxu1 %vm14007_vm1, %v35174_v62 }
0x122b   : > { %v18150_v39 = vadd.f32 %v35168_v36, %v18037_v35  ;;  %v26208_v22 = vpop.f32.mrb[122].mxu1 }
0x122c   : > { %v18153_v5 = vadd.f32 %v26208_v22, %v35168_v36  ;;  %v18040_v52 = vpop.f32.mrb[123].mxu1  ;;  %v18176_v30 = vmax.f32 %v18152_v4, 0.0 }
0x122d   : > { %v18151_v7 = vadd.f32 %v35168_v36, %v18040_v52  ;;  %v18174_v10 = vmax.f32 %v18150_v39, 0.0 }
0x122e   : > { %v18177_v29 = vmax.f32 %v18153_v5, 0.0 }
0x122f   : > { %v18175_v56 = vmax.f32 %v18151_v7, 0.0 }
0x1230   : > { %v35184_v59 = vpack.c.bf16 %v18177_v29, %v18176_v30 }
0x1231   : > { %v35186_v45 = vpack.c.bf16 %v18175_v56, %v18174_v10  ;;  %v26211_v16 = vpop.f32.mrb[124].mxu1 }
0x1232   : > { %v18156_v48 = vadd.f32 %v26211_v16, %v35168_v36  ;;  %v18053_v25 = vpop.f32.mrb[125].mxu1 }
0x1233   : > { %v18154_v55 = vadd.f32 %v35168_v36, %v18053_v25  ;;  %v26212_v50 = vpop.f32.mrb[126].mxu1  ;;  %26234 = vmatmul.mubr.msk.bf16.vlgmr.msra.gmra.mrb[140].mxu1 %vm14007_vm1, %v35186_v45  ;;  %v29122_v25 = vld [vmem:[%s35620_s9 + $0x30] sm:$0xff]  }
0x1234   : > { %v18157_v12 = vadd.f32 %v26212_v50, %v35168_v36  ;;  %26254 = vmatpush3.bf16.msra.mxu1 %v29112_v34  ;;  %v18056_v3 = vpop.f32.mrb[127].mxu1  ;;  %26237 = vmatprep.mubr.msk.bf16.mxu1 %vm14007_vm1, %v35184_v59  ;;  %v18180_v54 = vmax.f32 %v18156_v48, 0.0  ;;  %v29121_v48 = vld [vmem:[%s35620_s9 + $0x28] sm:$0xff]  }
0x1235   : > { %v18155_v60 = vadd.f32 %v35168_v36, %v18056_v3  ;;  %26255 = vmatprep.subr.bf16.mxu1 %v29113_v51  ;;  %v18178_v49 = vmax.f32 %v18154_v55, 0.0  ;;  %v35300_v55 = vld [vmem:[%s35619_s8] ss:$0 sm:$0xff] }
0x1236   : > { %v18181_v63 = vmax.f32 %v18157_v12, 0.0 }
0x1237   : > { %v18179_v23 = vmax.f32 %v18155_v60, 0.0 }
0x1238   : > { %v35202_v2 = vpack.c.bf16 %v18181_v63, %v18180_v54  ;;  %26256 = vmatpush3.bf16.msra.mxu1 %v29113_v51  ;;  %v29117_v51 = vld [vmem:[%s35618_s7 + $0x48] sm:$0xff]  }
0x1239   : > { %v35204_v17 = vpack.c.bf16 %v18179_v23, %v18178_v49  ;;  %v26215_v21 = vpop.f32.mrb[128].mxu1  ;;  %26257 = vmatprep.subr.bf16.mxu1 %v29114_v9 }
0x123a   : > { %v18160_v46 = vadd.f32 %v26215_v21, %v35168_v36  ;;  %v18069_v6 = vpop.f32.mrb[129].mxu1 }
0x123b   : > { %v18158_v57 = vadd.f32 %v35168_v36, %v18069_v6  ;;  %v26216_v15 = vpop.f32.mrb[130].mxu1  ;;  %26238 = vmatmul.mubr.msk.bf16.gmra.mrb[144].mxu1 %vm14007_vm1, %v35204_v17 }
0x123c   : > { %v18161_v37 = vadd.f32 %v26216_v15, %v35168_v36  ;;  %v18072_v27 = vpop.f32.mrb[131].mxu1  ;;  %26241 = vmatprep.mubr.msk.bf16.mxu1 %vm14007_vm1, %v35202_v2  ;;  %26258 = vmatpush3.bf16.msra.mxu1 %v29114_v9  ;;  %v18184_v26 = vmax.f32 %v18160_v46, 0.0 }
0x123d   : > { %v18159_v19 = vadd.f32 %v35168_v36, %v18072_v27  ;;  %26259 = vmatprep.subr.bf16.mxu1 %v29115_v43  ;;  %v18182_v11 = vmax.f32 %v18158_v57, 0.0 }
0x123e   : > { %v18185_v33 = vmax.f32 %v18161_v37, 0.0 }
0x123f   : > { %v18183_v32 = vmax.f32 %v18159_v19, 0.0 }
0x1240   : > { %v35220_v61 = vpack.c.bf16 %v18185_v33, %v18184_v26  ;;  %26260 = vmatpush3.bf16.msra.mxu1 %v29115_v43 }
0x1241   : > { %v35222_v8 = vpack.c.bf16 %v18183_v32, %v18182_v11  ;;  %v26219_v42 = vpop.f32.mrb[132].mxu1  ;;  %26281 = vmatprep.subr.bf16.mxu1 %v29116_v0 }
0x1242   : > { %v18164_v1 = vadd.f32 %v26219_v42, %v35168_v36  ;;  %v18085_v34 = vpop.f32.mrb[133].mxu1 }
0x1243   : > { %v18162_v41 = vadd.f32 %v35168_v36, %v18085_v34  ;;  %v26220_v40 = vpop.f32.mrb[134].mxu1  ;;  %26242 = vmatmul.mubr.msk.bf16.gmra.mrb[40].mxu1 %vm14007_vm1, %v35222_v8  ;;  %v29125_v34 = vld [vmem:[%s35620_s9 + $0x8] sm:$0xff]  }
0x1244   : > { %v18165_v20 = vadd.f32 %v26220_v40, %v35168_v36  ;;  %v18088_v58 = vpop.f32.mrb[135].mxu1  ;;  %26245 = vmatprep.mubr.msk.bf16.mxu1 %vm14007_vm1, %v35220_v61  ;;  %v18188_v24 = vmax.f32 %v18164_v1, 0.0 }
0x1245   : > { %v18163_v44 = vadd.f32 %v35168_v36, %v18088_v58  ;;  %v18186_v31 = vmax.f32 %v18162_v41, 0.0 }
0x1246   : > { %v18189_v28 = vmax.f32 %v18165_v20, 0.0 }
0x1247   : > { %v18187_v13 = vmax.f32 %v18163_v44, 0.0 }
0x1248   : > { %v18203_v14 = vpack.c.bf16 %v18189_v28, %v18188_v24 }
0x1249   : > { %v18202_v53 = vpack.c.bf16 %v18187_v13, %v18186_v31  ;;  %v26223_v18 = vpop.f32.mrb[136].mxu1  ;;  %v29126_v31 = vld [vmem:[%s35620_s9 + $0x10] sm:$0xff]  }
0x124a   : > { %v18168_v38 = vadd.f32 %v26223_v18, %v35168_v36  ;;  %v18101_v4 = vpop.f32.mrb[137].mxu1 }
0x124b   : > { %v18166_v35 = vadd.f32 %v35168_v36, %v18101_v4  ;;  %v26224_v39 = vpop.f32.mrb[138].mxu1  ;;  %26246 = vmatmul.mubr.msk.bf16.gmra.mrb[44].mxu1 %vm14007_vm1, %v18202_v53 }
0x124c   : > { %v18169_v22 = vadd.f32 %v26224_v39, %v35168_v36  ;;  %v18104_v5 = vpop.f32.mrb[139].mxu1  ;;  %26249 = vmatprep.mubr.msk.bf16.mxu1 %vm14007_vm1, %v18203_v14  ;;  %v18192_v7 = vmax.f32 %v18168_v38, 0.0  ;;  %v29127_v39 = vld [vmem:[%s35620_s9 + $0x18] sm:$0xff]  }
0x124d   : > { %v18167_v52 = vadd.f32 %v35168_v36, %v18104_v5  ;;  %v18190_v29 = vmax.f32 %v18166_v35, 0.0  ;;  %v29118_v36 = vld [vmem:[%s35618_s7 + $0x50] sm:$0xff]  }
0x124e   : > { %v18193_v30 = vmax.f32 %v18169_v22, 0.0 }
0x124f   : > { %v18191_v10 = vmax.f32 %v18167_v52, 0.0 }
0x1250   : > { %v18205_v56 = vpack.c.bf16 %v18193_v30, %v18192_v7 }
0x1251   : > { %v18204_v16 = vpack.c.bf16 %v18191_v10, %v18190_v29 }
0x1253   : > { %26250 = vmatmul.mubr.msk.bf16.gmra.mrb[48].mxu1 %vm14007_vm1, %v18204_v16 }
0x1254   : > { %26261 = vmatprep.mubr.msk.bf16.mxu1 %vm14007_vm1, %v35176_v47  ;;  %v29119_v47 = vld [vmem:[%s35618_s7 + $0x58] sm:$0xff]  }
0x125b   : > { %26262 = vmatmul.mubr.msk.bf16.vlgmr.msra.gmra.mrb[140].mxu1 %vm14007_vm1, %v35174_v62  ;;  %v29120_v62 = vld [vmem:[%s35620_s9 + $0x20] sm:$0xff]  }
0x125c   : > { %26282 = vmatpush3.bf16.msra.mxu1 %v29116_v0  ;;  %26265 = vmatprep.mubr.msk.bf16.mxu1 %vm14007_vm1, %v35186_v45 }
0x125d   : > { %26283 = vmatprep.subr.bf16.mxu1 %v29117_v51 }
0x1260   : > { %26284 = vmatpush3.bf16.msra.mxu1 %v29117_v51 }
0x1261   : > { %26285 = vmatprep.subr.bf16.mxu1 %v29118_v36 }
0x1263   : > { %26266 = vmatmul.mubr.msk.bf16.gmra.mrb[144].mxu1 %vm14007_vm1, %v35184_v59 }
0x1264   : > { %26269 = vmatprep.mubr.msk.bf16.mxu1 %vm14007_vm1, %v35204_v17  ;;  %26286 = vmatpush3.bf16.msra.mxu1 %v29118_v36 }
0x1265   : > { %26287 = vmatprep.subr.bf16.mxu1 %v29119_v47 }
0x1268   : > { %26288 = vmatpush3.bf16.msra.mxu1 %v29119_v47 }
0x1269   : > { %26309 = vmatprep.subr.bf16.mxu1 %v29120_v62 }
0x126b   : > { %26270 = vmatmul.mubr.msk.bf16.gmra.mrb[40].mxu1 %vm14007_vm1, %v35202_v2 }
0x126c   : > { %26273 = vmatprep.mubr.msk.bf16.mxu1 %vm14007_vm1, %v35222_v8 }
0x1273   : > { %26274 = vmatmul.mubr.msk.bf16.gmra.mrb[44].mxu1 %vm14007_vm1, %v35220_v61 }
0x1274   : > { %26277 = vmatprep.mubr.msk.bf16.mxu1 %vm14007_vm1, %v18202_v53 }
0x127b   : > { %26278 = vmatmul.mubr.msk.bf16.gmra.mrb[48].mxu1 %vm14007_vm1, %v18203_v14 }
0x127c   : > { %26289 = vmatprep.mubr.msk.bf16.mxu1 %vm14007_vm1, %v35186_v45  ;;  %v29124_v45 = vld [vmem:[%s35620_s9] sm:$0xff]  }
0x1283   : > { %26290 = vmatmul.mubr.msk.bf16.vlgmr.msra.gmra.mrb[140].mxu1 %vm14007_vm1, %v35184_v59  ;;  %v29123_v59 = vld [vmem:[%s35620_s9 + $0x38] sm:$0xff]  }
0x1284   : > { %26293 = vmatprep.mubr.msk.bf16.mxu1 %vm14007_vm1, %v35204_v17  ;;  %26310 = vmatpush3.bf16.msra.mxu1 %v29120_v62 }
0x1285   : > { %26311 = vmatprep.subr.bf16.mxu1 %v29121_v48 }
0x1288   : > { %26312 = vmatpush3.bf16.msra.mxu1 %v29121_v48 }
0x1289   : > { %26313 = vmatprep.subr.bf16.mxu1 %v29122_v25 }
0x128b   : > { %26294 = vmatmul.mubr.msk.bf16.gmra.mrb[144].mxu1 %vm14007_vm1, %v35202_v2 }
0x128c   : > { %26297 = vmatprep.mubr.msk.bf16.mxu1 %vm14007_vm1, %v35222_v8  ;;  %26314 = vmatpush3.bf16.msra.mxu1 %v29122_v25 }
0x128d   : > { %26315 = vmatprep.subr.bf16.mxu1 %v29123_v59 }
0x1290   : > { %26316 = vmatpush3.bf16.msra.mxu1 %v29123_v59 }
0x1291   : > { %26333 = vmatprep.subr.bf16.mxu1 %v29124_v45 }
0x1293   : > { %26298 = vmatmul.mubr.msk.bf16.gmra.mrb[40].mxu1 %vm14007_vm1, %v35220_v61 }
0x1294   : > { %26301 = vmatprep.mubr.msk.bf16.mxu1 %vm14007_vm1, %v18202_v53 }
0x129b   : > { %26302 = vmatmul.mubr.msk.bf16.gmra.mrb[44].mxu1 %vm14007_vm1, %v18203_v14 }
0x129c   : > { %26305 = vmatprep.mubr.msk.bf16.mxu1 %vm14007_vm1, %v18204_v16 }
0x12a3   : > { %26306 = vmatmul.mubr.msk.bf16.gmra.mrb[48].mxu1 %vm14007_vm1, %v18205_v56  ;;  %v29128_v56 = vld [vmem:[%s35620_s9 + $0x40] sm:$0xff]  }
0x1356   : > { %v26291_v50 = vpop.f32.mrb[140].mxu1 }
0x1357   : > { %v18708_v12 = vadd.f32 %v26291_v50, %v35300_v55  ;;  %v18601_v3 = vpop.f32.mrb[141].mxu1 }
0x1358   : > { %v18706_v60 = vadd.f32 %v35300_v55, %v18601_v3  ;;  %v26292_v9 = vpop.f32.mrb[142].mxu1 }
0x1359   : > { %v18709_v54 = vadd.f32 %v26292_v9, %v35300_v55  ;;  %v18604_v63 = vpop.f32.mrb[143].mxu1  ;;  %v18728_v23 = vmax.f32 %v18708_v12, 0.0 }
0x135a   : > { %v18707_v49 = vadd.f32 %v35300_v55, %v18604_v63  ;;  %v18726_v17 = vmax.f32 %v18706_v60, 0.0 }
0x135b   : > { %v18729_v2 = vmax.f32 %v18709_v54, 0.0 }
0x135c   : > { %v18727_v21 = vmax.f32 %v18707_v49, 0.0 }
0x135d   : > { %v35306_v43 = vpack.c.bf16 %v18729_v2, %v18728_v23 }
0x135e   : > { %v35308_v46 = vpack.c.bf16 %v18727_v21, %v18726_v17  ;;  %v26295_v6 = vpop.f32.mrb[144].mxu1  ;;  %v29129_v21 = vld [vmem:[%s35620_s9 + $0x48] sm:$0xff]  }
0x135f   : > { %v18712_v57 = vadd.f32 %v26295_v6, %v35300_v55  ;;  %v18617_v15 = vpop.f32.mrb[145].mxu1  ;;  %26317 = vmatprep.mubr.msk.bf16.mxu1 %vm14007_vm1, %v35306_v43  ;;  %v29133_v6 = vld [vmem:[%s35622_s11 + $0x28] sm:$0xff]  }
0x1360   : > { %v18710_v37 = vadd.f32 %v35300_v55, %v18617_v15  ;;  %v26296_v27 = vpop.f32.mrb[146].mxu1  ;;  %v29135_v15 = vld [vmem:[%s35622_s11 + $0x38] sm:$0xff]  }
0x1361   : > { %v18713_v19 = vadd.f32 %v26296_v27, %v35300_v55  ;;  %v18620_v0 = vpop.f32.mrb[147].mxu1  ;;  %v18732_v33 = vmax.f32 %v18712_v57, 0.0  ;;  %v29134_v57 = vld [vmem:[%s35622_s11 + $0x30] sm:$0xff]   ;;  %v35412_v27 = vld [vmem:[%s35621_s10] ss:$0 sm:$0xff] }
0x1362   : > { %v18711_v26 = vadd.f32 %v35300_v55, %v18620_v0  ;;  %v18730_v32 = vmax.f32 %v18710_v37, 0.0  ;;  %v29136_v37 = vld [vmem:[%s35622_s11] sm:$0xff]  }
0x1363   : > { %v18733_v11 = vmax.f32 %v18713_v19, 0.0 }
0x1364   : > { %v18731_v61 = vmax.f32 %v18711_v26, 0.0 }
0x1365   : > { %v35316_v8 = vpack.c.bf16 %v18733_v11, %v18732_v33 }
0x1366   : > { %v35318_v42 = vpack.c.bf16 %v18731_v61, %v18730_v32  ;;  %v26299_v1 = vpop.f32.mrb[40].mxu1 }
0x1367   : > { %v18716_v41 = vadd.f32 %v26299_v1, %v35300_v55  ;;  %v18633_v40 = vpop.f32.mrb[41].mxu1 }
0x1368   : > { %v18714_v20 = vadd.f32 %v35300_v55, %v18633_v40  ;;  %v26300_v58 = vpop.f32.mrb[42].mxu1  ;;  %26318 = vmatmul.mubr.msk.bf16.vlgmr.msra.gmra.mrb[52].mxu1 %vm14007_vm1, %v35318_v42 }
0x1369   : > { %v18717_v44 = vadd.f32 %v26300_v58, %v35300_v55  ;;  %26334 = vmatpush3.bf16.msra.mxu1 %v29124_v45  ;;  %v18636_v24 = vpop.f32.mrb[43].mxu1  ;;  %26321 = vmatprep.mubr.msk.bf16.mxu1 %vm14007_vm1, %v35316_v8  ;;  %v18736_v13 = vmax.f32 %v18716_v41, 0.0 }
0x136a   : > { %v18715_v28 = vadd.f32 %v35300_v55, %v18636_v24  ;;  %26335 = vmatprep.subr.bf16.mxu1 %v29125_v34  ;;  %v18734_v53 = vmax.f32 %v18714_v20, 0.0 }
0x136b   : > { %v18737_v14 = vmax.f32 %v18717_v44, 0.0 }
0x136c   : > { %v18735_v18 = vmax.f32 %v18715_v28, 0.0 }
0x136d   : > { %v35334_v38 = vpack.c.bf16 %v18737_v14, %v18736_v13  ;;  %26336 = vmatpush3.bf16.msra.mxu1 %v29125_v34 }
0x136e   : > { %v35336_v4 = vpack.c.bf16 %v18735_v18, %v18734_v53  ;;  %v26303_v35 = vpop.f32.mrb[44].mxu1  ;;  %26337 = vmatprep.subr.bf16.mxu1 %v29126_v31 }
0x136f   : > { %v18720_v22 = vadd.f32 %v26303_v35, %v35300_v55  ;;  %v18649_v5 = vpop.f32.mrb[45].mxu1 }
0x1370   : > { %v18718_v52 = vadd.f32 %v35300_v55, %v18649_v5  ;;  %v26304_v7 = vpop.f32.mrb[46].mxu1  ;;  %26322 = vmatmul.mubr.msk.bf16.gmra.mrb[56].mxu1 %vm14007_vm1, %v35336_v4 }
0x1371   : > { %v18721_v30 = vadd.f32 %v26304_v7, %v35300_v55  ;;  %v18652_v29 = vpop.f32.mrb[47].mxu1  ;;  %26325 = vmatprep.mubr.msk.bf16.mxu1 %vm14007_vm1, %v35334_v38  ;;  %26338 = vmatpush3.bf16.msra.mxu1 %v29126_v31  ;;  %v18740_v16 = vmax.f32 %v18720_v22, 0.0 }
0x1372   : > { %v18719_v10 = vadd.f32 %v35300_v55, %v18652_v29  ;;  %26339 = vmatprep.subr.bf16.mxu1 %v29127_v39  ;;  %v18738_v36 = vmax.f32 %v18718_v52, 0.0  ;;  %v29137_v52 = vld [vmem:[%s35622_s11 + $0x8] sm:$0xff]  }
0x1373   : > { %v18741_v51 = vmax.f32 %v18721_v30, 0.0 }
0x1374   : > { %v18739_v47 = vmax.f32 %v18719_v10, 0.0 }
0x1375   : > { %v18753_v62 = vpack.c.bf16 %v18741_v51, %v18740_v16  ;;  %26340 = vmatpush3.bf16.msra.mxu1 %v29127_v39 }
0x1376   : > { %v18752_v48 = vpack.c.bf16 %v18739_v47, %v18738_v36  ;;  %v26307_v25 = vpop.f32.mrb[48].mxu1  ;;  %26357 = vmatprep.subr.bf16.mxu1 %v29128_v56  ;;  %v29138_v36 = vld [vmem:[%s35622_s11 + $0x10] sm:$0xff]  }
0x1377   : > { %v18724_v59 = vadd.f32 %v26307_v25, %v35300_v55  ;;  %v18665_v45 = vpop.f32.mrb[49].mxu1 }
0x1378   : > { %v18722_v50 = vadd.f32 %v35300_v55, %v18665_v45  ;;  %v26308_v12 = vpop.f32.mrb[50].mxu1  ;;  %26326 = vmatmul.mubr.msk.bf16.gmra.mrb[60].mxu1 %vm14007_vm1, %v18752_v48 }
0x1379   : > { %v18725_v3 = vadd.f32 %v26308_v12, %v35300_v55  ;;  %v18668_v60 = vpop.f32.mrb[51].mxu1  ;;  %26329 = vmatprep.mubr.msk.bf16.mxu1 %vm14007_vm1, %v18753_v62  ;;  %v18744_v54 = vmax.f32 %v18724_v59, 0.0  ;;  %v29139_v12 = vld [vmem:[%s35622_s11 + $0x18] sm:$0xff]  }
0x137a   : > { %v18723_v9 = vadd.f32 %v35300_v55, %v18668_v60  ;;  %v18742_v49 = vmax.f32 %v18722_v50, 0.0  ;;  %v29130_v55 = vld [vmem:[%s35620_s9 + $0x50] sm:$0xff]  }
0x137b   : > { %v18745_v63 = vmax.f32 %v18725_v3, 0.0 }
0x137c   : > { %v18743_v23 = vmax.f32 %v18723_v9, 0.0 }
0x137d   : > { %v18755_v2 = vpack.c.bf16 %v18745_v63, %v18744_v54 }
0x137e   : > { %v18754_v17 = vpack.c.bf16 %v18743_v23, %v18742_v49 }
0x1380   : > { %26330 = vmatmul.mubr.msk.bf16.gmra.mrb[64].mxu1 %vm14007_vm1, %v18754_v17 }
0x1381   : > { %26341 = vmatprep.mubr.msk.bf16.mxu1 %vm14007_vm1, %v35308_v46  ;;  %v29131_v46 = vld [vmem:[%s35620_s9 + $0x58] sm:$0xff]  }
0x1388   : > { %26342 = vmatmul.mubr.msk.bf16.vlgmr.msra.gmra.mrb[52].mxu1 %vm14007_vm1, %v35306_v43  ;;  %v29132_v43 = vld [vmem:[%s35622_s11 + $0x20] sm:$0xff]  }
0x1389   : > { %26358 = vmatpush3.bf16.msra.mxu1 %v29128_v56  ;;  %26345 = vmatprep.mubr.msk.bf16.mxu1 %vm14007_vm1, %v35318_v42 }
0x138a   : > { %26359 = vmatprep.subr.bf16.mxu1 %v29129_v21 }
0x138d   : > { %26360 = vmatpush3.bf16.msra.mxu1 %v29129_v21 }
0x138e   : > { %26361 = vmatprep.subr.bf16.mxu1 %v29130_v55 }
0x1390   : > { %26346 = vmatmul.mubr.msk.bf16.gmra.mrb[56].mxu1 %vm14007_vm1, %v35316_v8 }
0x1391   : > { %26349 = vmatprep.mubr.msk.bf16.mxu1 %vm14007_vm1, %v35336_v4  ;;  %26362 = vmatpush3.bf16.msra.mxu1 %v29130_v55 }
0x1392   : > { %26363 = vmatprep.subr.bf16.mxu1 %v29131_v46 }
0x1395   : > { %26364 = vmatpush3.bf16.msra.mxu1 %v29131_v46 }
0x1396   : > { %26381 = vmatprep.subr.bf16.mxu1 %v29132_v43 }
0x1398   : > { %26350 = vmatmul.mubr.msk.bf16.gmra.mrb[60].mxu1 %vm14007_vm1, %v35334_v38 }
0x1399   : > { %26353 = vmatprep.mubr.msk.bf16.mxu1 %vm14007_vm1, %v18752_v48 }
0x13a0   : > { %26354 = vmatmul.mubr.msk.bf16.gmra.mrb[64].mxu1 %vm14007_vm1, %v18753_v62 }
0x13a1   : > { %26365 = vmatprep.mubr.msk.bf16.mxu1 %vm14007_vm1, %v35318_v42 }
0x13a8   : > { %26366 = vmatmul.mubr.msk.bf16.vlgmr.msra.gmra.mrb[52].mxu1 %vm14007_vm1, %v35316_v8 }
0x13a9   : > { %26369 = vmatprep.mubr.msk.bf16.mxu1 %vm14007_vm1, %v35336_v4  ;;  %26382 = vmatpush3.bf16.msra.mxu1 %v29132_v43 }
0x13aa   : > { %26383 = vmatprep.subr.bf16.mxu1 %v29133_v6 }
0x13ad   : > { %26384 = vmatpush3.bf16.msra.mxu1 %v29133_v6 }
0x13ae   : > { %26385 = vmatprep.subr.bf16.mxu1 %v29134_v57 }
0x13b0   : > { %26370 = vmatmul.mubr.msk.bf16.gmra.mrb[56].mxu1 %vm14007_vm1, %v35334_v38 }
0x13b1   : > { %26373 = vmatprep.mubr.msk.bf16.mxu1 %vm14007_vm1, %v18752_v48  ;;  %26386 = vmatpush3.bf16.msra.mxu1 %v29134_v57  ;;  %v29141_v57 = vld [vmem:[%s35622_s11 + $0x48] sm:$0xff]  }
0x13b2   : > { %26387 = vmatprep.subr.bf16.mxu1 %v29135_v15 }
0x13b5   : > { %26388 = vmatpush3.bf16.msra.mxu1 %v29135_v15  ;;  %v29142_v15 = vld [vmem:[%s35622_s11 + $0x50] sm:$0xff]  }
0x13b6   : > { %26401 = vmatprep.subr.bf16.mxu1 %v29136_v37 }
0x13b8   : > { %26374 = vmatmul.mubr.msk.bf16.gmra.mrb[60].mxu1 %vm14007_vm1, %v18753_v62 }
0x13b9   : > { %26377 = vmatprep.mubr.msk.bf16.mxu1 %vm14007_vm1, %v18754_v17 }
0x13c0   : > { %26378 = vmatmul.mubr.msk.bf16.gmra.mrb[64].mxu1 %vm14007_vm1, %v18755_v2  ;;  %v29140_v2 = vld [vmem:[%s35622_s11 + $0x40] sm:$0xff]  }
0x147b   : > { %v26367_v19 = vpop.f32.mrb[52].mxu1 }
0x147c   : > { %v19200_v0 = vadd.f32 %v26367_v19, %v35412_v27  ;;  %v19113_v26 = vpop.f32.mrb[53].mxu1  ;;  %v29592_v19 = vmov 0.0  }
0x147d   : > { %v19198_v33 = vadd.f32 %v35412_v27, %v19113_v26  ;;  %v26368_v11 = vpop.f32.mrb[54].mxu1  ;;  %v29146_v26 = vld [vmem:[%s35624_s13 + $0x30] sm:$0xff]  }
0x147e   : > { %v19201_v32 = vadd.f32 %v26368_v11, %v35412_v27  ;;  %v19116_v61 = vpop.f32.mrb[55].mxu1  ;;  %v19216_v42 = vmax.f32 %v19200_v0, 0.0  ;;  %v29145_v0 = vld [vmem:[%s35624_s13 + $0x28] sm:$0xff]   ;;  %v21893_v11 = vld [vmem:[%s35623_s12] ss:$0 sm:$0xff] }
0x147f   : > { %v19199_v8 = vadd.f32 %v35412_v27, %v19116_v61  ;;  %v19214_v34 = vmax.f32 %v19198_v33, 0.0  ;;  %v29147_v33 = vld [vmem:[%s35624_s13 + $0x38] sm:$0xff]  }
0x1480   : > { %v19217_v1 = vmax.f32 %v19201_v32, 0.0 }
0x1481   : > { %v19215_v41 = vmax.f32 %v19199_v8, 0.0 }
0x1482   : > { %v35418_v40 = vpack.c.bf16 %v19217_v1, %v19216_v42 }
0x1483   : > { %v19230_v20 = vpack.c.bf16 %v19215_v41, %v19214_v34  ;;  %v26371_v58 = vpop.f32.mrb[56].mxu1 }
0x1484   : > { %v19204_v44 = vadd.f32 %v26371_v58, %v35412_v27  ;;  %v19129_v24 = vpop.f32.mrb[57].mxu1  ;;  %26389 = vmatprep.mubr.msk.bf16.mxu1 %vm14007_vm1, %v35418_v40 }
0x1485   : > { %v19202_v28 = vadd.f32 %v35412_v27, %v19129_v24  ;;  %v26372_v31 = vpop.f32.mrb[58].mxu1 }
0x1486   : > { %v19205_v13 = vadd.f32 %v26372_v31, %v35412_v27  ;;  %v19132_v14 = vpop.f32.mrb[59].mxu1  ;;  %v19220_v18 = vmax.f32 %v19204_v44, 0.0 }
0x1487   : > { %v19203_v53 = vadd.f32 %v35412_v27, %v19132_v14  ;;  %v19218_v4 = vmax.f32 %v19202_v28, 0.0 }
0x1488   : > { %v19221_v38 = vmax.f32 %v19205_v13, 0.0 }
0x1489   : > { %v19219_v35 = vmax.f32 %v19203_v53, 0.0 }
0x148a   : > { %v35426_v39 = vpack.c.bf16 %v19221_v38, %v19220_v18 }
0x148b   : > { %v19232_v22 = vpack.c.bf16 %v19219_v35, %v19218_v4  ;;  %v26375_v5 = vpop.f32.mrb[60].mxu1 }
0x148c   : > { %v19208_v7 = vadd.f32 %v26375_v5, %v35412_v27  ;;  %v19145_v30 = vpop.f32.mrb[61].mxu1 }
0x148d   : > { %v19206_v29 = vadd.f32 %v35412_v27, %v19145_v30  ;;  %v26376_v10 = vpop.f32.mrb[62].mxu1  ;;  %26390 = vmatmul.mubr.msk.bf16.vlgmr.msra.gmra.mrb[68].mxu1 %vm14007_vm1, %v19232_v22 }
0x148e   : > { %v19209_v56 = vadd.f32 %v26376_v10, %v35412_v27  ;;  %26402 = vmatpush3.bf16.msra.mxu1 %v29136_v37  ;;  %v19148_v16 = vpop.f32.mrb[63].mxu1  ;;  %26393 = vmatprep.mubr.msk.bf16.mxu1 %vm14007_vm1, %v35426_v39  ;;  %v19224_v47 = vmax.f32 %v19208_v7, 0.0  ;;  %v29143_v37 = vld [vmem:[%s35622_s11 + $0x58] sm:$0xff]  }
0x148f   : > { %v19207_v51 = vadd.f32 %v35412_v27, %v19148_v16  ;;  %26403 = vmatprep.subr.bf16.mxu1 %v29137_v52  ;;  %v19222_v48 = vmax.f32 %v19206_v29, 0.0 }
0x1490   : > { %v19225_v62 = vmax.f32 %v19209_v56, 0.0 }
0x1491   : > { %v19223_v25 = vmax.f32 %v19207_v51, 0.0 }
0x1492   : > { %v19235_v59 = vpack.c.bf16 %v19225_v62, %v19224_v47  ;;  %26404 = vmatpush3.bf16.msra.mxu1 %v29137_v52 }
0x1493   : > { %v19234_v45 = vpack.c.bf16 %v19223_v25, %v19222_v48  ;;  %v26379_v50 = vpop.f32.mrb[64].mxu1  ;;  %26405 = vmatprep.subr.bf16.mxu1 %v29138_v36 }
0x1494   : > { %v19212_v3 = vadd.f32 %v26379_v50, %v35412_v27  ;;  %v19161_v60 = vpop.f32.mrb[65].mxu1 }
0x1495   : > { %v19210_v9 = vadd.f32 %v35412_v27, %v19161_v60  ;;  %v26380_v54 = vpop.f32.mrb[66].mxu1  ;;  %26394 = vmatmul.mubr.msk.bf16.gmra.mrb[180].mxu1 %vm14007_vm1, %v19234_v45 }
0x1496   : > { %v19213_v63 = vadd.f32 %v26380_v54, %v35412_v27  ;;  %v19164_v49 = vpop.f32.mrb[67].mxu1  ;;  %26397 = vmatprep.mubr.msk.bf16.mxu1 %vm14007_vm1, %v19235_v59  ;;  %26406 = vmatpush3.bf16.msra.mxu1 %v29138_v36  ;;  %v19228_v17 = vmax.f32 %v19212_v3, 0.0 }
0x1497   : > { %v19211_v23 = vadd.f32 %v35412_v27, %v19164_v49  ;;  %26407 = vmatprep.subr.bf16.mxu1 %v29139_v12  ;;  %v19226_v55 = vmax.f32 %v19210_v9, 0.0  ;;  %v29144_v27 = vld [vmem:[%s35624_s13 + $0x20] sm:$0xff]  }
0x1498   : > { %v19229_v21 = vmax.f32 %v19213_v63, 0.0  ;;  %v29148_v63 = vld [vmem:[%s35624_s13] sm:$0xff]  }
0x1499   : > { %v19227_v46 = vmax.f32 %v19211_v23, 0.0  ;;  %v29149_v23 = vld [vmem:[%s35624_s13 + $0x8] sm:$0xff]  }
0x149a   : > { %v19237_v43 = vpack.c.bf16 %v19229_v21, %v19228_v17  ;;  %26408 = vmatpush3.bf16.msra.mxu1 %v29139_v12  ;;  %v29151_v17 = vld [vmem:[%s35624_s13 + $0x18] sm:$0xff]   ;;  %v29152_v21 = vld [vmem:[%s35626_s15] sm:$0xff]  }
0x149b   : > { %v19236_v6 = vpack.c.bf16 %v19227_v46, %v19226_v55  ;;  %26421 = vmatprep.subr.bf16.mxu1 %v29140_v2  ;;  %v29153_v55 = vld [vmem:[%s35626_s15 + $0x8] sm:$0xff]   ;;  %v29154_v46 = vld [vmem:[%s35626_s15 + $0x10] sm:$0xff]  }
0x149d   : > { %26398 = vmatmul.mubr.msk.bf16.gmra.mrb[184].mxu1 %vm14007_vm1, %v19236_v6 }
0x149e   : > { %26409 = vmatprep.mubr.msk.bf16.mxu1 %vm14007_vm1, %v19230_v20 }
0x14a5   : > { %26410 = vmatmul.mubr.msk.bf16.vlgmr.msra.gmra.mrb[68].mxu1 %vm14007_vm1, %v35418_v40 }
0x14a6   : > { %26422 = vmatpush3.bf16.msra.mxu1 %v29140_v2  ;;  %26413 = vmatprep.mubr.msk.bf16.mxu1 %vm14007_vm1, %v19232_v22  ;;  %v29150_v2 = vld [vmem:[%s35624_s13 + $0x10] sm:$0xff]  }
0x14a7   : > { %26423 = vmatprep.subr.bf16.mxu1 %v29141_v57 }
0x14aa   : > { %26424 = vmatpush3.bf16.msra.mxu1 %v29141_v57  ;;  %v29157_v57 = vld [vmem:[%s35626_s15 + $0x28] sm:$0xff]  }
0x14ab   : > { %26425 = vmatprep.subr.bf16.mxu1 %v29142_v15 }
0x14ad   : > { %26414 = vmatmul.mubr.msk.bf16.gmra.mrb[180].mxu1 %vm14007_vm1, %v35426_v39 }
0x14ae   : > { %26417 = vmatprep.mubr.msk.bf16.mxu1 %vm14007_vm1, %v19234_v45  ;;  %26426 = vmatpush3.bf16.msra.mxu1 %v29142_v15  ;;  %v29158_v15 = vld [vmem:[%s35626_s15 + $0x30] sm:$0xff]  }
0x14af   : > { %26427 = vmatprep.subr.bf16.mxu1 %v29143_v37 }
0x14b2   : > { %26428 = vmatpush3.bf16.msra.mxu1 %v29143_v37  ;;  %v29159_v37 = vld [vmem:[%s35626_s15 + $0x38] sm:$0xff]  }
0x14b3   : > { %26441 = vmatprep.subr.bf16.mxu1 %v29592_v19 }
0x14b5   : > { %26418 = vmatmul.mubr.msk.bf16.gmra.mrb[184].mxu1 %vm14007_vm1, %v19235_v59 }
0x14b6   : > { %26429 = vmatprep.mubr.msk.bf16.mxu1 %vm14007_vm1, %v19232_v22 }
0x14bd   : > { %26430 = vmatmul.mubr.msk.bf16.vlgmr.msra.gmra.mrb[68].mxu1 %vm14007_vm1, %v35426_v39 }
0x14be   : > { %26433 = vmatprep.mubr.msk.bf16.mxu1 %vm14007_vm1, %v19234_v45  ;;  %26442 = vmatpush3.bf16.msra.mxu1 %v29144_v27 }
0x14bf   : > { %26443 = vmatprep.subr.bf16.mxu1 %v29592_v19 }
0x14c2   : > { %26444 = vmatpush3.bf16.msra.mxu1 %v29145_v0 }
0x14c3   : > { %26445 = vmatprep.subr.bf16.mxu1 %v29592_v19 }
0x14c5   : > { %26434 = vmatmul.mubr.msk.bf16.gmra.mrb[180].mxu1 %vm14007_vm1, %v19235_v59 }
0x14c6   : > { %26437 = vmatprep.mubr.msk.bf16.mxu1 %vm14007_vm1, %v19236_v6  ;;  %26446 = vmatpush3.bf16.msra.mxu1 %v29146_v26  ;;  %v29156_v6 = vld [vmem:[%s35626_s15 + $0x20] sm:$0xff]  }
0x14c7   : > { %26447 = vmatprep.subr.bf16.mxu1 %v29592_v19 }
0x14ca   : > { %26448 = vmatpush3.bf16.msra.mxu1 %v29147_v33 }
0x14cb   : > { %26453 = vmatprep.subr.bf16.mxu1 %v29592_v19 }
0x14cd   : > { %26438 = vmatmul.mubr.msk.bf16.gmra.mrb[184].mxu1 %vm14007_vm1, %v19237_v43  ;;  %v29155_v43 = vld [vmem:[%s35626_s15 + $0x18] sm:$0xff]  }
0x14ce   : > { %26449 = vmatprep.mubr.msk.bf16.mxu1 %vm29593_vm2, %v29592_v19 }
0x1590   : > { %v26431_v32 = vpop.f32.mrb[68].mxu1 }
0x1591   : > { %v19624_v61 = vadd.f32 %v26431_v32, %v21893_v11  ;;  %v19557_v8 = vpop.f32.mrb[69].mxu1  ;;  %v21912_v32 = vld [vmem:[%s35625_s14] ss:$0 sm:$0xff] }
0x1592   : > { %v19622_v42 = vadd.f32 %v21893_v11, %v19557_v8  ;;  %v26432_v1 = vpop.f32.mrb[70].mxu1 }
0x1593   : > { %v19636_v34 = vmax.f32 %v19624_v61, 0.0  ;;  %v19625_v41 = vadd.f32 %v26432_v1, %v21893_v11  ;;  %v19560_v40 = vpop.f32.mrb[71].mxu1 }
0x1594   : > { %v19634_v20 = vmax.f32 %v19622_v42, 0.0  ;;  %v19623_v58 = vadd.f32 %v21893_v11, %v19560_v40 }
0x1595   : > { %v19637_v44 = vmax.f32 %v19625_v41, 0.0 }
0x1596   : > { %v19646_v24 = vmax.f32 %v19634_v20, %v19636_v34  ;;  %v19635_v28 = vmax.f32 %v19623_v58, 0.0 }
0x1598   : > { %v19647_v31 = vmax.f32 %v19635_v28, %v19637_v44  ;;  %v26435_v13 = vpop.f32.mrb[180].mxu1  ;;  %v29160_v44 = vld [vmem:[%s35628_s17] sm:$0xff]   ;;  %v29161_v28 = vld [vmem:[%s35628_s17 + $0x8] sm:$0xff]  }
0x1599   : > { %v19573_v14 = vpop.f32.mrb[181].mxu1  ;;  %v19628_v5 = vadd.f32 %v26435_v13, %v21893_v11  ;;  %v29163_v13 = vld [vmem:[%s35628_s17 + $0x18] sm:$0xff]  }
0x159a   : > { %v19626_v53 = vadd.f32 %v21893_v11, %v19573_v14  ;;  %v26436_v18 = vpop.f32.mrb[182].mxu1  ;;  %v29164_v14 = vld [vmem:[%s35628_s17 + $0x20] sm:$0xff]  }
0x159b   : > { %v19576_v38 = vpop.f32.mrb[183].mxu1  ;;  %v19629_v29 = vadd.f32 %v26436_v18, %v21893_v11  ;;  %v19640_v47 = vmax.f32 %v19628_v5, 0.0  ;;  %v29166_v18 = vld [vmem:[%s35628_s17 + $0x30] sm:$0xff]  }
0x159c   : > { %v19638_v4 = vmax.f32 %v19626_v53, 0.0  ;;  %v19627_v35 = vadd.f32 %v21893_v11, %v19576_v38  ;;  %v29165_v53 = vld [vmem:[%s35628_s17 + $0x28] sm:$0xff]   ;;  %v29167_v38 = vld [vmem:[%s35628_s17 + $0x38] sm:$0xff]  }
0x159d   : > { %v19641_v59 = vmax.f32 %v19629_v29, 0.0 }
0x159e   : > { %v19650_v39 = vmax.f32 %v19646_v24, %v19638_v4  ;;  %v19639_v22 = vmax.f32 %v19627_v35, 0.0  ;;  %v21913_v4 = vld [vmem:[%s35627_s16] ss:$0 sm:$0xff] }
0x15a0   : > { %v19651_v52 = vmax.f32 %v19647_v31, %v19639_v22  ;;  %v26439_v7 = vpop.f32.mrb[184].mxu1  ;;  %v29162_v31 = vld [vmem:[%s35628_s17 + $0x10] sm:$0xff]  }
0x15a1   : > { %v19589_v30 = vpop.f32.mrb[185].mxu1  ;;  %v19632_v56 = vadd.f32 %v26439_v7, %v21893_v11 }
0x15a2   : > { %v19654_v10 = vpack.c.bf16 %v19651_v52, %v19650_v39  ;;  %v19630_v16 = vadd.f32 %v21893_v11, %v19589_v30  ;;  %v26440_v51 = vpop.f32.mrb[186].mxu1 }
0x15a3   : > { %v19592_v36 = vpop.f32.mrb[187].mxu1  ;;  %v19633_v48 = vadd.f32 %v26440_v51, %v21893_v11  ;;  %v19644_v45 = vmax.f32 %v19632_v56, 0.0 }
0x15a4   : > { %v19642_v62 = vmax.f32 %v19630_v16, 0.0  ;;  %v19631_v25 = vadd.f32 %v21893_v11, %v19592_v36 }
0x15a5   : > { %v19645_v60 = vmax.f32 %v19633_v48, 0.0 }
0x15a6   : > { %v19648_v50 = vmax.f32 %v19640_v47, %v19642_v62  ;;  %v19643_v12 = vmax.f32 %v19631_v25, 0.0 }
0x15a8   : > { %v19652_v3 = vmax.f32 %v19648_v50, %v19644_v45  ;;  %v19649_v9 = vmax.f32 %v19641_v59, %v19643_v12 }
0x15aa   : > { %v19653_v54 = vmax.f32 %v19649_v9, %v19645_v60 }
0x15ac   : > { %v19655_v49 = vpack.c.bf16 %v19653_v54, %v19652_v3 }
0x15ae   : > { %26450 = vmatmul.mubr.msk.bf16.vlgmr.msra.gmra.mrb[188].mxu1 %vm14007_vm1, %v19655_v49 }
0x15af   : > { %26454 = vmatpush3.bf16.msra.mxu1 %v29148_v63  ;;  %26461 = vmatprep.mubr.msk.bf16.mxu1 %vm29593_vm2, %v29592_v19 }
0x15b0   : > { %26455 = vmatprep.subr.bf16.mxu1 %v29592_v19 }
0x15b3   : > { %26456 = vmatpush3.bf16.msra.mxu1 %v29149_v23 }
0x15b4   : > { %26457 = vmatprep.subr.bf16.mxu1 %v29592_v19 }
0x15b7   : > { %26458 = vmatpush3.bf16.msra.mxu1 %v29150_v2 }
0x15b8   : > { %26459 = vmatprep.subr.bf16.mxu1 %v29592_v19 }
0x15bb   : > { %26460 = vmatpush3.bf16.msra.mxu1 %v29151_v17 }
0x15bc   : > { %26465 = vmatprep.subr.bf16.mxu1 %v29592_v19 }
0x15be   : > { %26462 = vmatmul.mubr.msk.bf16.vlgmr.msra.gmra.mrb[192].mxu1 %vm14007_vm1, %v19654_v10 }
0x15bf   : > { %26466 = vmatpush3.bf16.msra.mxu1 %v29152_v21  ;;  %26481 = vmatprep.mubr.msk.bf16.mxu1 %vm29593_vm2, %v29592_v19 }
0x15c0   : > { %26467 = vmatprep.subr.bf16.mxu1 %v29592_v19 }
0x15c3   : > { %26468 = vmatpush3.bf16.msra.mxu1 %v29153_v55 }
0x15c4   : > { %26469 = vmatprep.subr.bf16.mxu1 %v29592_v19 }
0x15c7   : > { %26470 = vmatpush3.bf16.msra.mxu1 %v29154_v46 }
0x15c8   : > { %26471 = vmatprep.subr.bf16.mxu1 %v29592_v19 }
0x15cb   : > { %26472 = vmatpush3.bf16.msra.mxu1 %v29155_v43 }
0x15cc   : > { %26473 = vmatprep.subr.bf16.mxu1 %v29592_v19 }
0x15cf   : > { %26474 = vmatpush3.bf16.msra.mxu1 %v29156_v6 }
0x15d0   : > { %26475 = vmatprep.subr.bf16.mxu1 %v29592_v19 }
0x15d3   : > { %26476 = vmatpush3.bf16.msra.mxu1 %v29157_v57 }
0x15d4   : > { %26477 = vmatprep.subr.bf16.mxu1 %v29592_v19 }
0x15d7   : > { %26478 = vmatpush3.bf16.msra.mxu1 %v29158_v15 }
0x15d8   : > { %26479 = vmatprep.subr.bf16.mxu1 %v29592_v19 }
0x15db   : > { %26480 = vmatpush3.bf16.msra.mxu1 %v29159_v37 }
0x15dc   : > { %26485 = vmatprep.subr.bf16.mxu1 %v29592_v19 }
0x1681   : > { %v19734_v27 = vpop.f32.mrb[188].mxu1 }
0x1682   : > { %v26451_v0 = vpop.f32.mrb[189].mxu1 }
0x1683   : > { %v19737_v26 = vpop.f32.mrb[190].mxu1 }
0x1684   : > { %v26452_v33 = vpop.f32.mrb[191].mxu1 }
0x1691   : > { %v19802_v11 = vpop.f32.mrb[192].mxu1 }
0x1692   : > { %v19803_v61 = vadd.f32 %v19802_v11, %v19734_v27  ;;  %v26463_v8 = vpop.f32.mrb[193].mxu1 }
0x1693   : > { %v19805_v42 = vpop.f32.mrb[194].mxu1 }
0x1694   : > { %v19816_v1 = vadd.f32 %v21912_v32, %v19803_v61  ;;  %v19806_v34 = vadd.f32 %v19805_v42, %v19737_v26  ;;  %v26464_v41 = vpop.f32.mrb[195].mxu1 }
0x1696   : > { %v19817_v40 = vadd.f32 %v21912_v32, %v19806_v34  ;;  %v19818_v20 = vmax.f32 %v19816_v1, 0.0 }
0x1698   : > { %v19819_v58 = vmax.f32 %v19817_v40, 0.0 }
0x169a   : > { %v19820_v24 = vpack.c.bf16 %v19819_v58, %v19818_v20 }
0x169c   : > { %26482 = vmatmul.mubr.bf16.vlgmr.msra.gmra.mrb[196].mxu1 %v19820_v24 }
0x169d   : > { %26486 = vmatpush3.bf16.msra.mxu1 %v29160_v44  ;;  %26501 = vmatprep.mubr.msk.bf16.mxu1 %vm29593_vm2, %v29592_v19 }
0x169e   : > { %26487 = vmatprep.subr.bf16.mxu1 %v29592_v19 }
0x16a1   : > { %26488 = vmatpush3.bf16.msra.mxu1 %v29161_v28 }
0x16a2   : > { %26489 = vmatprep.subr.bf16.mxu1 %v29592_v19 }
0x16a5   : > { %26490 = vmatpush3.bf16.msra.mxu1 %v29162_v31 }
0x16a6   : > { %26491 = vmatprep.subr.bf16.mxu1 %v29592_v19 }
0x16a9   : > { %26492 = vmatpush3.bf16.msra.mxu1 %v29163_v13 }
0x16aa   : > { %26493 = vmatprep.subr.bf16.mxu1 %v29592_v19 }
0x16ad   : > { %26494 = vmatpush3.bf16.msra.mxu1 %v29164_v14 }
0x16ae   : > { %26495 = vmatprep.subr.bf16.mxu1 %v29592_v19 }
0x16b1   : > { %26496 = vmatpush3.bf16.msra.mxu1 %v29165_v53 }
0x16b2   : > { %26497 = vmatprep.subr.bf16.mxu1 %v29592_v19 }
0x16b5   : > { %26498 = vmatpush3.bf16.msra.mxu1 %v29166_v18 }
0x16b6   : > { %26499 = vmatprep.subr.bf16.mxu1 %v29592_v19  ;;  %v21922_v19 = vld [vmem:[%s35629_s18] ss:$0 sm:$0xff] }
0x16b9   : > { %26500 = vmatpush3.bf16.msra.mxu1 %v29167_v38 }
0x176f   : > { %v19926_v35 = vpop.f32.mrb[196].mxu1 }
0x1770   : > { %v19927_v39 = vadd.f32 %v21913_v4, %v19926_v35  ;;  %v26483_v22 = vpop.f32.mrb[197].mxu1 }
0x1771   : > { %v19929_v5 = vpop.f32.mrb[198].mxu1 }
0x1772   : > { %v19930_v52 = vadd.f32 %v21913_v4, %v19929_v5  ;;  %v26484_v7 = vpop.f32.mrb[199].mxu1  ;;  %v19933_v30 = vmax.f32 %v19927_v39, 0.0 }
0x1774   : > { %v19934_v29 = vmax.f32 %v19930_v52, 0.0 }
0x1776   : > { %v19935_v10 = vpack.c.bf16 %v19934_v29, %v19933_v30 }
0x1778   : > { %26502 = vmatmul.mubr.bf16.vlgmr.msra.gmra.mrb[200].mxu1 %v19935_v10 }
0x184b   : > { %v20041_v56 = vpop.f32.mrb[200].mxu1 }
0x184c   : > { %v20042_v16 = vadd.f32 %v21922_v19, %v20041_v56  ;;  %v26503_v51 = vpop.f32.mrb[201].mxu1 }
0x184d   : > { %v20044_v36 = vpop.f32.mrb[202].mxu1 }
0x184e   : > { %20048 = vst [vmem:[%s1841_s22] sm:$0xff] %v20042_v16  ;;  %v20045_v47 = vadd.f32 %v21922_v19, %v20044_v36  ;;  %v26504_v62 = vpop.f32.mrb[203].mxu1 }
0x1850   : > { %20049 = vst [vmem:[%s1841_s22 + $0x8] sm:$0xff] %v20045_v47 }
0x1851 PF: > { %p26_p9 = scmp.ge.s32.totalorder %s29711_s1, 4   ;;  %s36677_s0 = smov %s29586_s30 }
0x1852   : > { %s36678_s30 = smov %s29720_s23  ;;  %s36679_s20 = smov %s29711_s1 }
0x1853   :  { %28 = sbr.rel (!%p26_p9) target bundleno = 7 (0x7), region = 193 }

</bundles_post_ra>
